<compile_context>
chip_gen: v5e
topology: v5e:2x2
jax: 0.10.0
libtpu: 0.0.40
codegen_flags: <defaults>
</compile_context>

<pallas_src>
import functools
import math

import jax
import jax.numpy as jnp
from jax import lax
from jax.experimental import pallas as pl
from jax.experimental.pallas import tpu as pltpu


_SQRT_2_OVER_PI = math.sqrt(2.0 / math.pi)
_VMEM_LIMIT = 64 * 1024 * 1024


def _gelu(x):
    # TODO(synk): nn.GELU() is exact-erf; a tanh approximation is used inside the TPU kernels
    # (erf lowering is not guaranteed on Mosaic). Deviation is ~1e-3 relative.
    return 0.5 * x * (1.0 + jnp.tanh(_SQRT_2_OVER_PI * (x + 0.044715 * x * x * x)))


# ============================================================================ Pallas kernels

# ---- 1) fused channel mixer + dual pooling accumulation ----------------------------------

def _channel_mixer_pool_kernel(x_ref, sc_ref, sh_ref, w1_ref, b1_ref, w2_ref, b2_ref,
                               v_ref, plat_ref, plon_ref, *, n_lon, cv):
    xn = x_ref[0].astype(jnp.float32) * sc_ref[0] + sh_ref[0]       # GroupNorm apply (stats in JAX)
    h = jnp.dot(xn.astype(jnp.bfloat16), w1_ref[...],
                preferred_element_type=jnp.float32) + b1_ref[...]
    h = _gelu(h)                                                    # f32 elementwise
    # single wide matmul for the concatenated (v | u) output weight
    y = jnp.dot(h.astype(jnp.bfloat16), w2_ref[...],
                preferred_element_type=jnp.float32) + b2_ref[...]
    v_ref[0] = y[:, :cv].astype(v_ref.dtype)
    u = y[:, cv:]                                                   # (tm, dim) f32, stays on-chip
    tm, c = u.shape
    u3 = u.reshape(tm // n_lon, n_lon, c)                           # (tlat, nlon, dim)
    plat_ref[0] = jnp.sum(u3, axis=1)                               # sum over lon (complete per tile)

    @pl.when(pl.program_id(1) == 0)
    def _():
        plon_ref[...] = jnp.zeros_like(plon_ref)

    plon_ref[0] += jnp.sum(u3, axis=0)                              # accumulate over lat tiles


def _pick_lat_tile(n_lat, n_lon, target_rows):
    best = 1
    for t in range(1, n_lat + 1):
        if n_lat % t == 0 and t * n_lon <= max(target_rows, n_lon):
            best = t
    return best


def channel_mixer_pool(x, scale, shift, w1, b1, w2, b2, *, n_lat, n_lon, cv, tile_rows=2048):
    """x: (B, S, dim) bf16 -> (v (B,S,H*Dh) bf16, lat_sum (B,nlat,dim) f32, lon_sum (B,nlon,dim) f32)."""
    B, S, C = x.shape
    Ch = w1.shape[1]
    Cvu = w2.shape[1]
    tlat = _pick_lat_tile(n_lat, n_lon, tile_rows)
    tm = tlat * n_lon
    kernel = functools.partial(_channel_mixer_pool_kernel, n_lon=n_lon, cv=cv)
    return pl.pallas_call(
        kernel,
        out_shape=(jax.ShapeDtypeStruct((B, S, cv), jnp.bfloat16),
                   jax.ShapeDtypeStruct((B, n_lat, C), jnp.float32),
                   jax.ShapeDtypeStruct((B, n_lon, C), jnp.float32)),
        grid=(B, n_lat // tlat),
        in_specs=[
            pl.BlockSpec((1, tm, C), lambda b, t: (b, t, 0)),
            pl.BlockSpec((1, 1, C), lambda b, t: (b, 0, 0)),
            pl.BlockSpec((1, 1, C), lambda b, t: (b, 0, 0)),
            pl.BlockSpec((C, Ch), lambda b, t: (0, 0)),
            pl.BlockSpec((1, Ch), lambda b, t: (0, 0)),
            pl.BlockSpec((Ch, Cvu), lambda b, t: (0, 0)),
            pl.BlockSpec((1, Cvu), lambda b, t: (0, 0)),
        ],
        out_specs=(pl.BlockSpec((1, tm, cv), lambda b, t: (b, t, 0)),
                   pl.BlockSpec((1, tlat, C), lambda b, t: (b, t, 0)),
                   pl.BlockSpec((1, n_lon, C), lambda b, t: (b, 0, 0))),
        compiler_params=pltpu.CompilerParams(
            dimension_semantics=("parallel", "arbitrary"),
            vmem_limit_bytes=_VMEM_LIMIT),
    )(x, scale, shift,
      w1.astype(jnp.bfloat16), b1.reshape(1, -1).astype(jnp.float32),
      w2.astype(jnp.bfloat16), b2.reshape(1, -1).astype(jnp.float32))


# ---- 2) pooled activations -> LowRankKernel.to_k ------------------------------------------

def _pool_branch(p, win_ref, lnw_ref, lnb_ref, w1_ref, b1_ref, w2_ref, b2_ref, wk_ref):
    # to_in (bias=False) -> PreNorm(LayerNorm) -> Linear -> GeAct -> Linear -> to_k (bias=False)
    h = jnp.dot(p.astype(jnp.bfloat16), win_ref[...], preferred_element_type=jnp.float32)
    mu = jnp.mean(h, axis=-1, keepdims=True)
    var = jnp.mean(jnp.square(h - mu), axis=-1, keepdims=True)
    z = (h - mu) * lax.rsqrt(var + 1e-5) * lnw_ref[...] + lnb_ref[...]
    z = jnp.dot(z.astype(jnp.bfloat16), w1_ref[...], preferred_element_type=jnp.float32) + b1_ref[...]
    half = z.shape[-1] // 2
    z = _gelu(z[:, :half]) * z[:, half:]                            # GeAct(GELU)
    z = jnp.dot(z.astype(jnp.bfloat16), w2_ref[...], preferred_element_type=jnp.float32) + b2_ref[...]
    return jnp.dot(z.astype(jnp.bfloat16), wk_ref[...], preferred_element_type=jnp.float32)


def _pool_to_k_kernel(plat_ref, plon_ref, wlat_ref,
                      a_win, a_lnw, a_lnb, a_w1, a_b1, a_w2, a_b2, a_wk,
                      o_win, o_lnw, o_lnb, o_w1, o_b1, o_w2, o_b2, o_wk,
                      klat_ref, klon_ref, *, inv_n_lon, inv_n_lat):
    # mean-pool (sums come from channel_mixer_pool) ; latitude mesh weights on the kept lat axis.
    p_lat = plat_ref[0] * inv_n_lon * wlat_ref[...]                 # (nlat, dim)
    p_lon = plon_ref[0] * inv_n_lat                                 # (nlon, dim)
    klat_ref[0] = _pool_branch(p_lat, a_win, a_lnw, a_lnb, a_w1, a_b1,
                               a_w2, a_b2, a_wk).astype(klat_ref.dtype)
    klon_ref[0] = _pool_branch(p_lon, o_win, o_lnw, o_lnb, o_w1, o_b1,
                               o_w2, o_b2, o_wk).astype(klon_ref.dtype)


def pool_to_k(lat_sum, lon_sum, weights_lat, p_lat, p_lon, *, n_lat, n_lon):
    """(B,nlat,dim),(B,nlon,dim) f32 -> (k_lat_src (B,nlat,H*dk), k_lon_src (B,nlon,H*dk)) bf16."""
    B, _, C = lat_sum.shape
    Hdk = p_lat["wk"].shape[1]

    def branch_inputs(p):
        return [p["in_w"].astype(jnp.bfloat16),
                p["ln_w"].reshape(1, -1), p["ln_b"].reshape(1, -1),
                p["w1"].astype(jnp.bfloat16), p["b1"].reshape(1, -1),
                p["w2"].astype(jnp.bfloat16), p["b2"].reshape(1, -1),
                p["wk"].astype(jnp.bfloat16)]

    inputs = [lat_sum, lon_sum, weights_lat.reshape(n_lat, 1).astype(jnp.float32)]
    inputs += branch_inputs(p_lat) + branch_inputs(p_lon)

    in_specs = [pl.BlockSpec((1, n_lat, C), lambda b: (b, 0, 0)),
                pl.BlockSpec((1, n_lon, C), lambda b: (b, 0, 0)),
                pl.BlockSpec((n_lat, 1), lambda b: (0, 0))]
    for a in inputs[3:]:
        in_specs.append(pl.BlockSpec(a.shape, lambda b, nd=a.ndim: (0,) * nd))

    kernel = functools.partial(_pool_to_k_kernel, inv_n_lon=1.0 / n_lon, inv_n_lat=1.0 / n_lat)
    return pl.pallas_call(
        kernel,
        out_shape=(jax.ShapeDtypeStruct((B, n_lat, Hdk), jnp.bfloat16),
                   jax.ShapeDtypeStruct((B, n_lon, Hdk), jnp.bfloat16)),
        grid=(B,),
        in_specs=in_specs,
        out_specs=(pl.BlockSpec((1, n_lat, Hdk), lambda b: (b, 0, 0)),
                   pl.BlockSpec((1, n_lon, Hdk), lambda b: (b, 0, 0))),
        compiler_params=pltpu.CompilerParams(
            dimension_semantics=("parallel",),
            vmem_limit_bytes=_VMEM_LIMIT),
    )(*inputs)


# ---- 3) fused low-rank kernels + factorized application ----------------------------------

def _fca_apply_kernel(qlat_ref, klat_ref, dlat_ref, qlon_ref, klon_ref, dlon_ref,
                      wlat_ref, v_ref, o_ref, *, heads, dim_head, out_scale, neg_slope):
    # TODO(synk): LowRankKernel modulation assumed multiplicative (distance "decay"),
    #             leaky_relu applied after scale*modulation, as in the forward's F.leaky_relu_.
    nlat_s = klat_ref.shape[2]
    nlon_q = qlon_ref.shape[2]
    outs = []
    for h in range(heads):
        # low-rank scores (scaling is pre-folded into the decay tensors in the wrapper)
        s_lat = lax.dot_general(qlat_ref[0, h], klat_ref[0, h], (((1,), (1,)), ((), ())),
                                preferred_element_type=jnp.float32)          # (nlat_q, nlat_s)
        s_lat = s_lat * dlat_ref[h]
        s_lat = jnp.where(s_lat >= 0, s_lat, neg_slope * s_lat)
        s_lat = s_lat * wlat_ref[...]                                        # quadrature weights

        s_lon = lax.dot_general(qlon_ref[0, h], klon_ref[0, h], (((1,), (1,)), ((), ())),
                                preferred_element_type=jnp.float32)          # (nlon_q, nlon_s)
        s_lon = s_lon * dlon_ref[h]
        s_lon = jnp.where(s_lon >= 0, s_lon, neg_slope * s_lon)
        s_lon = s_lon * out_scale                                            # (pi/nlat)*(2pi/nlon)

        # both factorized contractions as plain 2-D MXU matmuls (no Dh broadcast of scores)
        v_h = v_ref[0, h]                                                    # (nlat_s*Dh, nlon_s) bf16
        # tB[(j,c), l] = sum_m v[(j,c), m] * s_lon[l, m]
        t = lax.dot_general(v_h, s_lon.astype(jnp.bfloat16), (((1,), (1,)), ((), ())),
                            preferred_element_type=jnp.float32)              # (nlat_s*Dh, nlon_q)
        t = t.reshape(nlat_s, dim_head, nlon_q)
        t = jnp.swapaxes(t, 1, 2)                                            # (nlat_s, nlon_q, Dh)
        t = t.reshape(nlat_s, nlon_q * dim_head).astype(jnp.bfloat16)
        # out_h[i, (l,c)] = sum_j s_lat[i, j] * tB[j, (l,c)]
        o_h = jnp.dot(s_lat.astype(jnp.bfloat16), t,
                      preferred_element_type=jnp.float32)                    # (nlat_q, nlon_q*Dh)
        outs.append(o_h.reshape(o_h.shape[0], nlon_q, dim_head))
    # channels-last, lane-dense single store; heads concatenated on the channel axis
    o_ref[0] = jnp.concatenate(outs, axis=-1).astype(o_ref.dtype)


def fca_apply(q_lat, k_lat, lat_decay, q_lon, k_lon, lon_decay, weights_lat, v_heads,
              *, heads, dim_head, out_scale, neg_slope=0.2):
    """Outputs channels-last (B, nlat_q, nlon_q, H*Dh) bf16 (no wrapper transpose needed)."""
    B, H, nlat_q, dk = q_lat.shape
    nlat_s = k_lat.shape[2]
    nlon_q = q_lon.shape[2]
    nlon_s = k_lon.shape[2]
    kernel = functools.partial(_fca_apply_kernel, heads=heads, dim_head=dim_head,
                               out_scale=out_scale, neg_slope=neg_slope)
    return pl.pallas_call(
        kernel,
        out_shape=jax.ShapeDtypeStruct((B, nlat_q, nlon_q, heads * dim_head), jnp.bfloat16),
        grid=(B,),
        in_specs=[
            pl.BlockSpec((1, H, nlat_q, dk), lambda b: (b, 0, 0, 0)),
            pl.BlockSpec((1, H, nlat_s, dk), lambda b: (b, 0, 0, 0)),
            pl.BlockSpec((H, nlat_q, nlat_s), lambda b: (0, 0, 0)),
            pl.BlockSpec((1, H, nlon_q, dk), lambda b: (b, 0, 0, 0)),
            pl.BlockSpec((1, H, nlon_s, dk), lambda b: (b, 0, 0, 0)),
            pl.BlockSpec((H, nlon_q, nlon_s), lambda b: (0, 0, 0)),
            pl.BlockSpec((1, nlat_s), lambda b: (0, 0)),
            pl.BlockSpec((1, H, nlat_s * dim_head, nlon_s), lambda b: (b, 0, 0, 0)),
        ],
        out_specs=pl.BlockSpec((1, nlat_q, nlon_q, heads * dim_head), lambda b: (b, 0, 0, 0)),
        compiler_params=pltpu.CompilerParams(
            dimension_semantics=("parallel",),
            vmem_limit_bytes=_VMEM_LIMIT),
    )(q_lat, k_lat, lat_decay, q_lon, k_lon, lon_decay, weights_lat, v_heads)


# ---- 4) fused merge head: GN-apply + Linear(bias=False) -----------------------------------

def _merge_head_kernel(x_ref, sc_ref, sh_ref, w_ref, o_ref):
    xn = x_ref[0].astype(jnp.float32) * sc_ref[0] + sh_ref[0]
    o_ref[0] = jnp.dot(xn.astype(jnp.bfloat16), w_ref[...],
                       preferred_element_type=jnp.float32).astype(o_ref.dtype)


def merge_head(x, scale, shift, w, *, tile_m=2048):
    B, S, C = x.shape
    Co = w.shape[1]
    tm = min(tile_m, S)
    return pl.pallas_call(
        _merge_head_kernel,
        out_shape=jax.ShapeDtypeStruct((B, S, Co), jnp.float32),
        grid=(B, pl.cdiv(S, tm)),
        in_specs=[pl.BlockSpec((1, tm, C), lambda b, t: (b, t, 0)),
                  pl.BlockSpec((1, 1, C), lambda b, t: (b, 0, 0)),
                  pl.BlockSpec((1, 1, C), lambda b, t: (b, 0, 0)),
                  pl.BlockSpec((C, Co), lambda b, t: (0, 0))],
        out_specs=pl.BlockSpec((1, tm, Co), lambda b, t: (b, t, 0)),
        compiler_params=pltpu.CompilerParams(
            dimension_semantics=("parallel", "parallel"),
            vmem_limit_bytes=_VMEM_LIMIT),
    )(x, scale, shift, w.astype(jnp.bfloat16))


# ============================================================================ JAX glue

def group_norm_scale_shift(x_flat, gamma, beta, num_groups, eps=1e-5):
    """Per-(batch, channel) scale/shift for GroupNorm, torch.nn.GroupNorm semantics
    (stats per sample & group over all positions + channels-in-group). Accepts bf16 input."""
    # TODO(synk): the repo's custom channels-last GroupNorm source was not provided;
    # torch.nn.GroupNorm semantics assumed.
    B, N, C = x_flat.shape
    gs = C // num_groups
    xg = x_flat.astype(jnp.float32).reshape(B, N, num_groups, gs)
    mean = xg.mean(axis=(1, 3))                                     # (B, G)
    var = xg.var(axis=(1, 3))                                       # (B, G)
    rstd = lax.rsqrt(var + eps)
    mean_c = jnp.repeat(mean, gs, axis=-1)                          # (B, C)
    rstd_c = jnp.repeat(rstd, gs, axis=-1)
    scale = rstd_c * gamma[None, :]
    shift = beta[None, :] - mean_c * scale
    return scale[:, None, :].astype(jnp.float32), shift[:, None, :].astype(jnp.float32)


def get_latitude_weights(lat, polar_eps):
    w = jnp.cos(lat)
    dlat = lat[1] - lat[0]
    polar_w = jnp.sin(dlat / 4.0) ** 2 / jnp.sin(dlat / 2.0)
    w = w.at[0].set(jnp.where(w[0] < 0.001, polar_eps * polar_w, w[0]))
    w = w.at[-1].set(jnp.where(w[-1] < 0.001, polar_eps * polar_w, w[-1]))
    return w


def radial_bessel_basis(dist, head_w, periodic, cutoff=math.pi, eps=1e-6):
    # TODO(synk): RadialBesselBasis source not provided; standard Bessel radial basis
    # sqrt(2/c)*sin(n*pi*d/c)/d (distance folded if periodic) + per-head linear mix.
    K = head_w.shape[0]
    if periodic:
        dist = jnp.minimum(dist, 2.0 * math.pi - dist)
    d = dist[..., None] + eps                                       # (i, j, 1)
    n = jnp.arange(1, K + 1, dtype=jnp.float32)
    basis = math.sqrt(2.0 / cutoff) * jnp.sin(n * math.pi * d / cutoff) / d
    decay = basis @ head_w                                          # (i, j, H)
    return jnp.transpose(decay, (2, 0, 1)).astype(jnp.float32)      # (H, i, j)


# ============================================================================ forward

def fca_block_s2_forward(params, cfg, u_src, query_basis_lst, query_pos_lst, src_pos_lst):
    dim, H, Dh = cfg["dim"], cfg["heads"], cfg["dim_head"]
    KM = cfg["kernel_multiplier"]
    dk = Dh * KM
    dim_out = cfg["dim_out"]
    scaling = (1.0 / math.sqrt(dk)) if (KM > 4 or cfg["use_softmax"]) else cfg["scaling_factor"]

    B, nlat_s, nlon_s, _ = u_src.shape
    src_lat, src_long = src_pos_lst
    qry_lat, qry_long = query_pos_lst
    u_lat_qry, u_long_qry = query_basis_lst
    nlat_q, nlon_q = qry_lat.shape[-1], qry_long.shape[-1]
    S = nlat_s * nlon_s

    # ---- channel_mixer: GroupNorm(32, dim) + MLP([dim, 4*dim, H*Dh+dim], GELU), fused with
    #      both PoolingReducer reductions (u never written to HBM).  Input fed in bf16. ----
    x = u_src.reshape(B, S, dim).astype(jnp.bfloat16)
    sc, sh = group_norm_scale_shift(x, params["cm_gn_w"], params["cm_gn_b"], 32)
    v_flat, lat_sum, lon_sum = channel_mixer_pool(
        x, sc, sh, params["cm_w1"], params["cm_b1"], params["cm_w2"], params["cm_b2"],
        n_lat=nlat_s, n_lon=nlon_s, cv=H * Dh)

    weights_lat = get_latitude_weights(src_lat, cfg["polar_eps"])

    # ---- pooled activations -> PreNorm MLPs -> LowRankKernel.to_k (tiny, grid (B,)) ----
    k_lat_src, k_lon_src = pool_to_k(lat_sum, lon_sum, weights_lat,
                                     params["to_lat"], params["to_long"],
                                     n_lat=nlat_s, n_lon=nlon_s)

    # ---- positional decay (use_pe=True); scaling folded into the decay tensors ----
    long_dist = jnp.abs(src_long[None, :] - qry_long[:, None])
    lat_dist = jnp.abs(src_lat[None, :] - qry_lat[:, None])
    long_decay = radial_bessel_basis(long_dist, params["pe_long_w"], periodic=True) * scaling
    lat_decay = radial_bessel_basis(lat_dist, params["pe_lat_w"], periodic=False) * scaling

    # ---- per-head bf16 layouts of the small low-rank factors (cheap JAX glue) ----
    def per_head(a, n):
        return a.reshape(B, n, H, dk).transpose(0, 2, 1, 3).astype(jnp.bfloat16)

    q_lat = per_head(u_lat_qry, nlat_q)                             # (B, H, nlat_q, dk)
    q_lon = per_head(u_long_qry, nlon_q)
    k_lat = per_head(k_lat_src, nlat_s)
    k_lon = per_head(k_lon_src, nlon_s)

    # v per-head layout ((j, c), m): (B, H, nlat_s*Dh, nlon_s), bf16 (one wrapper re-layout).
    # TODO(synk): fold this re-layout into channel_mixer_pool's out_spec to remove the last
    #             full HBM round trip of v.
    v_heads = (v_flat.reshape(B, nlat_s, nlon_s, H, Dh)
               .transpose(0, 3, 1, 4, 2)
               .reshape(B, H, nlat_s * Dh, nlon_s))

    out_scale = float(math.pi / nlat_s) * float(2.0 * math.pi / nlon_s)
    o = fca_apply(q_lat, k_lat, lat_decay, q_lon, k_lon, long_decay,
                  weights_lat.reshape(1, nlat_s).astype(jnp.float32), v_heads,
                  heads=H, dim_head=Dh, out_scale=out_scale)        # (B, nlat_q, nlon_q, H*Dh) bf16

    # ---- merge_head: GroupNorm(heads, H*Dh) + Linear(H*Dh, dim_out, bias=False), fused ----
    u_out = o.reshape(B, nlat_q * nlon_q, H * Dh)                   # free reshape (no transpose)
    sc2, sh2 = group_norm_scale_shift(u_out, params["mh_gn_w"], params["mh_gn_b"], H)
    out = merge_head(u_out, sc2, sh2, params["mh_w"])
    return out.reshape(B, nlat_q, nlon_q, dim_out)


# ============================================================================ params

def init_params(key, cfg):
    dim, H, Dh = cfg["dim"], cfg["heads"], cfg["dim_head"]
    LAT, KM, dim_out = cfg["latent_dim"], cfg["kernel_multiplier"], cfg["dim_out"]
    dk = Dh * KM
    keys = iter(jax.random.split(key, 40))

    def w(shape, std=0.02):
        return std * jax.random.normal(next(keys), shape, jnp.float32)

    def pooling_params(in_dim, hidden, out_dim):
        return dict(
            in_w=w((in_dim, hidden)),                               # to_in, bias=False
            ln_w=jnp.ones((hidden,), jnp.float32), ln_b=jnp.zeros((hidden,), jnp.float32),
            w1=w((hidden, 2 * hidden)), b1=jnp.zeros((2 * hidden,), jnp.float32),
            w2=w((hidden, out_dim)), b2=jnp.zeros((out_dim,), jnp.float32),
            wk=w((out_dim, H * dk)),                                # LowRankKernel.to_k (fused)
        )

    return dict(
        cm_gn_w=jnp.ones((dim,), jnp.float32), cm_gn_b=jnp.zeros((dim,), jnp.float32),
        cm_w1=w((dim, 4 * dim)), cm_b1=jnp.zeros((4 * dim,), jnp.float32),
        # second MLP Linear kept as ONE concatenated (v | u) weight (== torch.split of outputs)
        cm_w2=w((4 * dim, H * Dh + dim)), cm_b2=jnp.zeros((H * Dh + dim,), jnp.float32),
        to_long=pooling_params(dim, dim, LAT),
        to_lat=pooling_params(dim, dim, LAT),
        pe_long_w=w((64, H), std=0.1),   # RadialBesselBasis(num_kernels=64)
        pe_lat_w=w((32, H), std=0.1),    # RadialBesselBasis(num_kernels=32)
        mh_gn_w=jnp.ones((H * Dh,), jnp.float32), mh_gn_b=jnp.zeros((H * Dh,), jnp.float32),
        mh_w=w((H * Dh, dim_out)),
    )


# ============================================================================ main

if __name__ == "__main__":
    cfg = dict(dim=64, dim_head=8, latent_dim=32, heads=4, dim_out=64,
               kernel_multiplier=3, scaling_factor=1.0, use_softmax=False, polar_eps=1.0)

    B = 2
    NLAT_S, NLON_S = 8, 16
    NLAT_Q, NLON_Q = 8, 16
    basis_dim = cfg["heads"] * cfg["dim_head"] * cfg["kernel_multiplier"]  # 96

    key = jax.random.PRNGKey(0)
    k1, k2, k3, kp = jax.random.split(key, 4)

    u_src = jax.random.normal(k1, (B, NLAT_S, NLON_S, cfg["dim"]), jnp.float32)
    u_lat_qry = jax.random.normal(k2, (B, NLAT_Q, basis_dim), jnp.float32)
    u_long_qry = jax.random.normal(k3, (B, NLON_Q, basis_dim), jnp.float32)

    src_lat = jnp.linspace(-math.pi / 2, math.pi / 2, NLAT_S).astype(jnp.float32)
    src_long = jnp.linspace(0.0, 2 * math.pi, NLON_S, endpoint=False).astype(jnp.float32)
    qry_lat = jnp.linspace(-math.pi / 2, math.pi / 2, NLAT_Q).astype(jnp.float32)
    qry_long = jnp.linspace(0.0, 2 * math.pi, NLON_Q, endpoint=False).astype(jnp.float32)

    params = init_params(kp, cfg)

    fwd = jax.jit(lambda p, u, qb, qp, sp: fca_block_s2_forward(p, cfg, u, qb, qp, sp))
    out = fwd(params, u_src,
              (u_lat_qry, u_long_qry), (qry_lat, qry_long), (src_lat, src_long))
    out = jax.block_until_ready(out)
    assert out.shape == (B, NLAT_Q, NLON_Q, cfg["dim_out"]), out.shape
    assert bool(jnp.all(jnp.isfinite(out)))
    print("KERNEL_OK")
</pallas_src>

<mosaic_0001>
module attributes {stable_mosaic.version = 11 : i64} {
  func.func @_channel_mixer_pool_kernel(%arg0: i32, %arg1: i32, %arg2: memref<1x128x64xbf16, #tpu.memory_space<vmem>>, %arg3: memref<1x1x64xf32, #tpu.memory_space<vmem>>, %arg4: memref<1x1x64xf32, #tpu.memory_space<vmem>>, %arg5: memref<64x256xbf16, #tpu.memory_space<vmem>>, %arg6: memref<1x256xf32, #tpu.memory_space<vmem>>, %arg7: memref<256x96xbf16, #tpu.memory_space<vmem>>, %arg8: memref<1x96xf32, #tpu.memory_space<vmem>>, %arg9: memref<1x128x32xbf16, #tpu.memory_space<vmem>>, %arg10: memref<1x8x64xf32, #tpu.memory_space<vmem>>, %arg11: memref<1x16x64xf32, #tpu.memory_space<vmem>>) attributes {dimension_semantics = [#tpu.dimension_semantics<parallel>, #tpu.dimension_semantics<arbitrary>], iteration_bounds = array<i64: 2, 1>, scalar_prefetch = 0 : i64, scratch_operands = 0 : i64, tpu.core_type = #tpu.core_type<tc>, window_params = [{transform_indices = @transform_0, window_bounds = array<i64: 1, 128, 64>}, {transform_indices = @transform_1, window_bounds = array<i64: 1, 1, 64>}, {transform_indices = @transform_2, window_bounds = array<i64: 1, 1, 64>}, {pipeline_mode = #tpu.pipeline_mode<synchronous>, transform_indices = @transform_3, window_bounds = array<i64: 64, 256>}, {pipeline_mode = #tpu.pipeline_mode<synchronous>, transform_indices = @transform_4, window_bounds = array<i64: 1, 256>}, {pipeline_mode = #tpu.pipeline_mode<synchronous>, transform_indices = @transform_5, window_bounds = array<i64: 256, 96>}, {pipeline_mode = #tpu.pipeline_mode<synchronous>, transform_indices = @transform_6, window_bounds = array<i64: 1, 96>}, {transform_indices = @transform_7, window_bounds = array<i64: 1, 128, 32>}, {transform_indices = @transform_8, window_bounds = array<i64: 1, 8, 64>}, {transform_indices = @transform_9, window_bounds = array<i64: 1, 16, 64>}]} {
    %c0 = arith.constant 0 : index
    %c0_0 = arith.constant 0 : index
    %c0_1 = arith.constant 0 : index
    %0 = vector.load %arg2[%c0, %c0_0, %c0_1] : memref<1x128x64xbf16, #tpu.memory_space<vmem>>, vector<1x128x64xbf16>
    %1 = vector.shape_cast %0 : vector<1x128x64xbf16> to vector<128x64xbf16>
    %2 = arith.extf %1 : vector<128x64xbf16> to vector<128x64xf32>
    %c0_2 = arith.constant 0 : index
    %c0_3 = arith.constant 0 : index
    %c0_4 = arith.constant 0 : index
    %3 = vector.load %arg3[%c0_2, %c0_3, %c0_4] : memref<1x1x64xf32, #tpu.memory_space<vmem>>, vector<1x1x64xf32>
    %4 = vector.shape_cast %3 : vector<1x1x64xf32> to vector<1x64xf32>
    %5 = vector.broadcast %4 : vector<1x64xf32> to vector<128x64xf32>
    %6 = arith.mulf %2, %5 : vector<128x64xf32>
    %c0_5 = arith.constant 0 : index
    %c0_6 = arith.constant 0 : index
    %c0_7 = arith.constant 0 : index
    %7 = vector.load %arg4[%c0_5, %c0_6, %c0_7] : memref<1x1x64xf32, #tpu.memory_space<vmem>>, vector<1x1x64xf32>
    %8 = vector.shape_cast %7 : vector<1x1x64xf32> to vector<1x64xf32>
    %9 = vector.broadcast %8 : vector<1x64xf32> to vector<128x64xf32>
    %10 = arith.addf %6, %9 : vector<128x64xf32>
    %11 = arith.truncf %10 : vector<128x64xf32> to vector<128x64xbf16>
    %c0_8 = arith.constant 0 : index
    %c0_9 = arith.constant 0 : index
    %12 = vector.load %arg5[%c0_8, %c0_9] : memref<64x256xbf16, #tpu.memory_space<vmem>>, vector<64x256xbf16>
    %cst = arith.constant dense<0.000000e+00> : vector<128x256xf32>
    %13 = tpu.matmul %11, %12, %cst {dimension_numbers = #tpu.dot_dimension_numbers<[1], [0], [0], [1], [0, 0, 1, 1], [], []>} : vector<128x64xbf16>, vector<64x256xbf16>, vector<128x256xf32> -> vector<128x256xf32>
    %c0_10 = arith.constant 0 : index
    %c0_11 = arith.constant 0 : index
    %14 = vector.load %arg6[%c0_10, %c0_11] : memref<1x256xf32, #tpu.memory_space<vmem>>, vector<1x256xf32>
    %15 = vector.broadcast %14 : vector<1x256xf32> to vector<128x256xf32>
    %16 = arith.addf %13, %15 : vector<128x256xf32>
    %cst_12 = arith.constant 5.000000e-01 : f32
    %17 = vector.broadcast %cst_12 : f32 to vector<128x256xf32>
    %18 = arith.mulf %17, %16 : vector<128x256xf32>
    %cst_13 = arith.constant 4.471500e-02 : f32
    %19 = vector.broadcast %cst_13 : f32 to vector<128x256xf32>
    %20 = arith.mulf %19, %16 : vector<128x256xf32>
    %21 = arith.mulf %20, %16 : vector<128x256xf32>
    %22 = arith.mulf %21, %16 : vector<128x256xf32>
    %23 = arith.addf %16, %22 : vector<128x256xf32>
    %cst_14 = arith.constant 0.797884583 : f32
    %24 = vector.broadcast %cst_14 : f32 to vector<128x256xf32>
    %25 = arith.mulf %24, %23 : vector<128x256xf32>
    %26 = math.tanh %25 : vector<128x256xf32>
    %cst_15 = arith.constant 1.000000e+00 : f32
    %27 = vector.broadcast %cst_15 : f32 to vector<128x256xf32>
    %28 = arith.addf %27, %26 : vector<128x256xf32>
    %29 = arith.mulf %18, %28 : vector<128x256xf32>
    %30 = arith.truncf %29 : vector<128x256xf32> to vector<128x256xbf16>
    %c0_16 = arith.constant 0 : index
    %c0_17 = arith.constant 0 : index
    %31 = vector.load %arg7[%c0_16, %c0_17] : memref<256x96xbf16, #tpu.memory_space<vmem>>, vector<256x96xbf16>
    %cst_18 = arith.constant dense<0.000000e+00> : vector<128x96xf32>
    %32 = tpu.matmul %30, %31, %cst_18 {dimension_numbers = #tpu.dot_dimension_numbers<[1], [0], [0], [1], [0, 0, 1, 1], [], []>} : vector<128x256xbf16>, vector<256x96xbf16>, vector<128x96xf32> -> vector<128x96xf32>
    %c0_19 = arith.constant 0 : index
    %c0_20 = arith.constant 0 : index
    %33 = vector.load %arg8[%c0_19, %c0_20] : memref<1x96xf32, #tpu.memory_space<vmem>>, vector<1x96xf32>
    %34 = vector.broadcast %33 : vector<1x96xf32> to vector<128x96xf32>
    %35 = arith.addf %32, %34 : vector<128x96xf32>
    %36 = vector.extract_strided_slice %35 {offsets = [0, 0], sizes = [128, 32], strides = [1, 1]} : vector<128x96xf32> to vector<128x32xf32>
    %37 = arith.truncf %36 : vector<128x32xf32> to vector<128x32xbf16>
    %c0_21 = arith.constant 0 : index
    %c0_22 = arith.constant 0 : index
    %c0_23 = arith.constant 0 : index
    %38 = vector.load %arg9[%c0_21, %c0_22, %c0_23] : memref<1x128x32xbf16, #tpu.memory_space<vmem>>, vector<1x128x32xbf16>
    %39 = vector.shape_cast %38 : vector<1x128x32xbf16> to vector<128x32xbf16>
    %40 = vector.shape_cast %37 : vector<128x32xbf16> to vector<1x128x32xbf16>
    tpu.vector_store %arg9[%c0_21, %c0_22, %c0_23], %40 {strides = array<i32>} : memref<1x128x32xbf16, #tpu.memory_space<vmem>>, vector<1x128x32xbf16>,
    %41 = vector.extract_strided_slice %35 {offsets = [0, 32], sizes = [128, 64], strides = [1, 1]} : vector<128x96xf32> to vector<128x64xf32>
    %42 = vector.shape_cast %41 : vector<128x64xf32> to vector<8x16x64xf32>
    %cst_24 = arith.constant dense<0.000000e+00> : vector<8x64xf32>
    %43 = vector.multi_reduction <add>, %42, %cst_24 [1] : vector<8x16x64xf32> to vector<8x64xf32>
    %c0_25 = arith.constant 0 : index
    %c0_26 = arith.constant 0 : index
    %c0_27 = arith.constant 0 : index
    %44 = vector.load %arg10[%c0_25, %c0_26, %c0_27] : memref<1x8x64xf32, #tpu.memory_space<vmem>>, vector<1x8x64xf32>
    %45 = vector.shape_cast %44 : vector<1x8x64xf32> to vector<8x64xf32>
    %46 = vector.shape_cast %43 : vector<8x64xf32> to vector<1x8x64xf32>
    tpu.vector_store %arg10[%c0_25, %c0_26, %c0_27], %46 {strides = array<i32>} : memref<1x8x64xf32, #tpu.memory_space<vmem>>, vector<1x8x64xf32>,
    %c0_i32 = arith.constant 0 : i32
    %47 = arith.cmpi eq, %arg1, %c0_i32 : i32
    %48 = arith.extui %47 : i1 to i32
    %c0_i32_28 = arith.constant 0 : i32
    %49 = arith.cmpi ne, %48, %c0_i32_28 : i32
    scf.if %49 {
      %cst_36 = arith.constant 0.000000e+00 : f32
      %57 = vector.broadcast %cst_36 : f32 to vector<1x16x64xf32>
      %c0_37 = arith.constant 0 : index
      %c0_38 = arith.constant 0 : index
      %c0_39 = arith.constant 0 : index
      %58 = vector.load %arg11[%c0_37, %c0_38, %c0_39] : memref<1x16x64xf32, #tpu.memory_space<vmem>>, vector<1x16x64xf32>
      tpu.vector_store %arg11[%c0_37, %c0_38, %c0_39], %57 {strides = array<i32>} : memref<1x16x64xf32, #tpu.memory_space<vmem>>, vector<1x16x64xf32>,
    } else {
    }
    %c0_29 = arith.constant 0 : index
    %c0_30 = arith.constant 0 : index
    %c0_31 = arith.constant 0 : index
    %50 = vector.load %arg11[%c0_29, %c0_30, %c0_31] : memref<1x16x64xf32, #tpu.memory_space<vmem>>, vector<1x16x64xf32>
    %51 = vector.shape_cast %50 : vector<1x16x64xf32> to vector<16x64xf32>
    %cst_32 = arith.constant dense<0.000000e+00> : vector<16x64xf32>
    %52 = vector.multi_reduction <add>, %42, %cst_32 [0] : vector<8x16x64xf32> to vector<16x64xf32>
    %53 = arith.addf %51, %52 : vector<16x64xf32>
    %c0_33 = arith.constant 0 : index
    %c0_34 = arith.constant 0 : index
    %c0_35 = arith.constant 0 : index
    %54 = vector.load %arg11[%c0_33, %c0_34, %c0_35] : memref<1x16x64xf32, #tpu.memory_space<vmem>>, vector<1x16x64xf32>
    %55 = vector.shape_cast %54 : vector<1x16x64xf32> to vector<16x64xf32>
    %56 = vector.shape_cast %53 : vector<16x64xf32> to vector<1x16x64xf32>
    tpu.vector_store %arg11[%c0_33, %c0_34, %c0_35], %56 {strides = array<i32>} : memref<1x16x64xf32, #tpu.memory_space<vmem>>, vector<1x16x64xf32>,
    return
  }
  func.func @transform_0(%arg0: i32, %arg1: i32) -> (i32, i32, i32) {
    %c0_i32 = arith.constant 0 : i32
    %c0_i32_0 = arith.constant 0 : i32
    return %arg0, %arg1, %c0_i32 : i32, i32, i32
  }
  func.func @transform_1(%arg0: i32, %arg1: i32) -> (i32, i32, i32) {
    %c0_i32 = arith.constant 0 : i32
    %c0_i32_0 = arith.constant 0 : i32
    %c0_i32_1 = arith.constant 0 : i32
    return %arg0, %c0_i32, %c0_i32_0 : i32, i32, i32
  }
  func.func @transform_2(%arg0: i32, %arg1: i32) -> (i32, i32, i32) {
    %c0_i32 = arith.constant 0 : i32
    %c0_i32_0 = arith.constant 0 : i32
    %c0_i32_1 = arith.constant 0 : i32
    return %arg0, %c0_i32, %c0_i32_0 : i32, i32, i32
  }
  func.func @transform_3(%arg0: i32, %arg1: i32) -> (i32, i32) {
    %c0_i32 = arith.constant 0 : i32
    %c0_i32_0 = arith.constant 0 : i32
    %c0_i32_1 = arith.constant 0 : i32
    return %c0_i32, %c0_i32_0 : i32, i32
  }
  func.func @transform_4(%arg0: i32, %arg1: i32) -> (i32, i32) {
    %c0_i32 = arith.constant 0 : i32
    %c0_i32_0 = arith.constant 0 : i32
    %c0_i32_1 = arith.constant 0 : i32
    return %c0_i32, %c0_i32_0 : i32, i32
  }
  func.func @transform_5(%arg0: i32, %arg1: i32) -> (i32, i32) {
    %c0_i32 = arith.constant 0 : i32
    %c0_i32_0 = arith.constant 0 : i32
    %c0_i32_1 = arith.constant 0 : i32
    return %c0_i32, %c0_i32_0 : i32, i32
  }
  func.func @transform_6(%arg0: i32, %arg1: i32) -> (i32, i32) {
    %c0_i32 = arith.constant 0 : i32
    %c0_i32_0 = arith.constant 0 : i32
    %c0_i32_1 = arith.constant 0 : i32
    return %c0_i32, %c0_i32_0 : i32, i32
  }
  func.func @transform_7(%arg0: i32, %arg1: i32) -> (i32, i32, i32) {
    %c0_i32 = arith.constant 0 : i32
    %c0_i32_0 = arith.constant 0 : i32
    return %arg0, %arg1, %c0_i32 : i32, i32, i32
  }
  func.func @transform_8(%arg0: i32, %arg1: i32) -> (i32, i32, i32) {
    %c0_i32 = arith.constant 0 : i32
    %c0_i32_0 = arith.constant 0 : i32
    return %arg0, %arg1, %c0_i32 : i32, i32, i32
  }
  func.func @transform_9(%arg0: i32, %arg1: i32) -> (i32, i32, i32) {
    %c0_i32 = arith.constant 0 : i32
    %c0_i32_0 = arith.constant 0 : i32
    %c0_i32_1 = arith.constant 0 : i32
    return %arg0, %c0_i32, %c0_i32_0 : i32, i32, i32
  }
}

module attributes {stable_mosaic.version = 11 : i64} {
  func.func @_pool_to_k_kernel(%arg0: i32, %arg1: memref<1x8x64xf32, #tpu.memory_space<vmem>>, %arg2: memref<1x16x64xf32, #tpu.memory_space<vmem>>, %arg3: memref<8x1xf32, #tpu.memory_space<vmem>>, %arg4: memref<64x64xbf16, #tpu.memory_space<vmem>>, %arg5: memref<1x64xf32, #tpu.memory_space<vmem>>, %arg6: memref<1x64xf32, #tpu.memory_space<vmem>>, %arg7: memref<64x128xbf16, #tpu.memory_space<vmem>>, %arg8: memref<1x128xf32, #tpu.memory_space<vmem>>, %arg9: memref<64x32xbf16, #tpu.memory_space<vmem>>, %arg10: memref<1x32xf32, #tpu.memory_space<vmem>>, %arg11: memref<32x96xbf16, #tpu.memory_space<vmem>>, %arg12: memref<64x64xbf16, #tpu.memory_space<vmem>>, %arg13: memref<1x64xf32, #tpu.memory_space<vmem>>, %arg14: memref<1x64xf32, #tpu.memory_space<vmem>>, %arg15: memref<64x128xbf16, #tpu.memory_space<vmem>>, %arg16: memref<1x128xf32, #tpu.memory_space<vmem>>, %arg17: memref<64x32xbf16, #tpu.memory_space<vmem>>, %arg18: memref<1x32xf32, #tpu.memory_space<vmem>>, %arg19: memref<32x96xbf16, #tpu.memory_space<vmem>>, %arg20: memref<1x8x96xbf16, #tpu.memory_space<vmem>>, %arg21: memref<1x16x96xbf16, #tpu.memory_space<vmem>>) attributes {dimension_semantics = [#tpu.dimension_semantics<parallel>], iteration_bounds = array<i64: 2>, scalar_prefetch = 0 : i64, scratch_operands = 0 : i64, tpu.core_type = #tpu.core_type<tc>, window_params = [{transform_indices = @transform_0, window_bounds = array<i64: 1, 8, 64>}, {transform_indices = @transform_1, window_bounds = array<i64: 1, 16, 64>}, {pipeline_mode = #tpu.pipeline_mode<synchronous>, transform_indices = @transform_2, window_bounds = array<i64: 8, 1>}, {pipeline_mode = #tpu.pipeline_mode<synchronous>, transform_indices = @transform_3, window_bounds = array<i64: 64, 64>}, {pipeline_mode = #tpu.pipeline_mode<synchronous>, transform_indices = @transform_4, window_bounds = array<i64: 1, 64>}, {pipeline_mode = #tpu.pipeline_mode<synchronous>, transform_indices = @transform_5, window_bounds = array<i64: 1, 64>}, {pipeline_mode = #tpu.pipeline_mode<synchronous>, transform_indices = @transform_6, window_bounds = array<i64: 64, 128>}, {pipeline_mode = #tpu.pipeline_mode<synchronous>, transform_indices = @transform_7, window_bounds = array<i64: 1, 128>}, {pipeline_mode = #tpu.pipeline_mode<synchronous>, transform_indices = @transform_8, window_bounds = array<i64: 64, 32>}, {pipeline_mode = #tpu.pipeline_mode<synchronous>, transform_indices = @transform_9, window_bounds = array<i64: 1, 32>}, {pipeline_mode = #tpu.pipeline_mode<synchronous>, transform_indices = @transform_10, window_bounds = array<i64: 32, 96>}, {pipeline_mode = #tpu.pipeline_mode<synchronous>, transform_indices = @transform_11, window_bounds = array<i64: 64, 64>}, {pipeline_mode = #tpu.pipeline_mode<synchronous>, transform_indices = @transform_12, window_bounds = array<i64: 1, 64>}, {pipeline_mode = #tpu.pipeline_mode<synchronous>, transform_indices = @transform_13, window_bounds = array<i64: 1, 64>}, {pipeline_mode = #tpu.pipeline_mode<synchronous>, transform_indices = @transform_14, window_bounds = array<i64: 64, 128>}, {pipeline_mode = #tpu.pipeline_mode<synchronous>, transform_indices = @transform_15, window_bounds = array<i64: 1, 128>}, {pipeline_mode = #tpu.pipeline_mode<synchronous>, transform_indices = @transform_16, window_bounds = array<i64: 64, 32>}, {pipeline_mode = #tpu.pipeline_mode<synchronous>, transform_indices = @transform_17, window_bounds = array<i64: 1, 32>}, {pipeline_mode = #tpu.pipeline_mode<synchronous>, transform_indices = @transform_18, window_bounds = array<i64: 32, 96>}, {transform_indices = @transform_19, window_bounds = array<i64: 1, 8, 96>}, {transform_indices = @transform_20, window_bounds = array<i64: 1, 16, 96>}]} {
    %c0 = arith.constant 0 : index
    %c0_0 = arith.constant 0 : index
    %c0_1 = arith.constant 0 : index
    %0 = vector.load %arg1[%c0, %c0_0, %c0_1] : memref<1x8x64xf32, #tpu.memory_space<vmem>>, vector<1x8x64xf32>
    %1 = vector.shape_cast %0 : vector<1x8x64xf32> to vector<8x64xf32>
    %cst = arith.constant 6.250000e-02 : f32
    %2 = vector.broadcast %cst : f32 to vector<8x64xf32>
    %3 = arith.mulf %1, %2 : vector<8x64xf32>
    %c0_2 = arith.constant 0 : index
    %c0_3 = arith.constant 0 : index
    %4 = vector.load %arg3[%c0_2, %c0_3] : memref<8x1xf32, #tpu.memory_space<vmem>>, vector<8x1xf32>
    %5 = vector.broadcast %4 : vector<8x1xf32> to vector<8x64xf32>
    %6 = arith.mulf %3, %5 : vector<8x64xf32>
    %c0_4 = arith.constant 0 : index
    %c0_5 = arith.constant 0 : index
    %c0_6 = arith.constant 0 : index
    %7 = vector.load %arg2[%c0_4, %c0_5, %c0_6] : memref<1x16x64xf32, #tpu.memory_space<vmem>>, vector<1x16x64xf32>
    %8 = vector.shape_cast %7 : vector<1x16x64xf32> to vector<16x64xf32>
    %cst_7 = arith.constant 1.250000e-01 : f32
    %9 = vector.broadcast %cst_7 : f32 to vector<16x64xf32>
    %10 = arith.mulf %8, %9 : vector<16x64xf32>
    %11 = arith.truncf %6 : vector<8x64xf32> to vector<8x64xbf16>
    %c0_8 = arith.constant 0 : index
    %c0_9 = arith.constant 0 : index
    %12 = vector.load %arg4[%c0_8, %c0_9] : memref<64x64xbf16, #tpu.memory_space<vmem>>, vector<64x64xbf16>
    %cst_10 = arith.constant dense<0.000000e+00> : vector<8x64xf32>
    %13 = tpu.matmul %11, %12, %cst_10 {dimension_numbers = #tpu.dot_dimension_numbers<[1], [0], [0], [1], [0, 0, 1, 1], [], []>} : vector<8x64xbf16>, vector<64x64xbf16>, vector<8x64xf32> -> vector<8x64xf32>
    %cst_11 = arith.constant dense<0.000000e+00> : vector<8xf32>
    %14 = vector.multi_reduction <add>, %13, %cst_11 [1] : vector<8x64xf32> to vector<8xf32>
    %15 = vector.shape_cast %14 : vector<8xf32> to vector<8x1xf32>
    %cst_12 = arith.constant 6.400000e+01 : f32
    %16 = vector.broadcast %cst_12 : f32 to vector<8x1xf32>
    %17 = arith.divf %15, %16 : vector<8x1xf32>
    %18 = vector.broadcast %17 : vector<8x1xf32> to vector<8x64xf32>
    %19 = arith.subf %13, %18 : vector<8x64xf32>
    %20 = arith.mulf %19, %19 : vector<8x64xf32>
    %cst_13 = arith.constant dense<0.000000e+00> : vector<8xf32>
    %21 = vector.multi_reduction <add>, %20, %cst_13 [1] : vector<8x64xf32> to vector<8xf32>
    %22 = vector.shape_cast %21 : vector<8xf32> to vector<8x1xf32>
    %cst_14 = arith.constant 6.400000e+01 : f32
    %23 = vector.broadcast %cst_14 : f32 to vector<8x1xf32>
    %24 = arith.divf %22, %23 : vector<8x1xf32>
    %25 = vector.broadcast %17 : vector<8x1xf32> to vector<8x64xf32>
    %26 = arith.subf %13, %25 : vector<8x64xf32>
    %cst_15 = arith.constant 9.99999974E-6 : f32
    %27 = vector.broadcast %cst_15 : f32 to vector<8x1xf32>
    %28 = arith.addf %24, %27 : vector<8x1xf32>
    %29 = math.rsqrt %28 : vector<8x1xf32>
    %30 = vector.broadcast %29 : vector<8x1xf32> to vector<8x64xf32>
    %31 = arith.mulf %26, %30 : vector<8x64xf32>
    %c0_16 = arith.constant 0 : index
    %c0_17 = arith.constant 0 : index
    %32 = vector.load %arg5[%c0_16, %c0_17] : memref<1x64xf32, #tpu.memory_space<vmem>>, vector<1x64xf32>
    %33 = vector.broadcast %32 : vector<1x64xf32> to vector<8x64xf32>
    %34 = arith.mulf %31, %33 : vector<8x64xf32>
    %c0_18 = arith.constant 0 : index
    %c0_19 = arith.constant 0 : index
    %35 = vector.load %arg6[%c0_18, %c0_19] : memref<1x64xf32, #tpu.memory_space<vmem>>, vector<1x64xf32>
    %36 = vector.broadcast %35 : vector<1x64xf32> to vector<8x64xf32>
    %37 = arith.addf %34, %36 : vector<8x64xf32>
    %38 = arith.truncf %37 : vector<8x64xf32> to vector<8x64xbf16>
    %c0_20 = arith.constant 0 : index
    %c0_21 = arith.constant 0 : index
    %39 = vector.load %arg7[%c0_20, %c0_21] : memref<64x128xbf16, #tpu.memory_space<vmem>>, vector<64x128xbf16>
    %cst_22 = arith.constant dense<0.000000e+00> : vector<8x128xf32>
    %40 = tpu.matmul %38, %39, %cst_22 {dimension_numbers = #tpu.dot_dimension_numbers<[1], [0], [0], [1], [0, 0, 1, 1], [], []>} : vector<8x64xbf16>, vector<64x128xbf16>, vector<8x128xf32> -> vector<8x128xf32>
    %c0_23 = arith.constant 0 : index
    %c0_24 = arith.constant 0 : index
    %41 = vector.load %arg8[%c0_23, %c0_24] : memref<1x128xf32, #tpu.memory_space<vmem>>, vector<1x128xf32>
    %42 = vector.broadcast %41 : vector<1x128xf32> to vector<8x128xf32>
    %43 = arith.addf %40, %42 : vector<8x128xf32>
    %44 = vector.extract_strided_slice %43 {offsets = [0, 0], sizes = [8, 64], strides = [1, 1]} : vector<8x128xf32> to vector<8x64xf32>
    %cst_25 = arith.constant 5.000000e-01 : f32
    %45 = vector.broadcast %cst_25 : f32 to vector<8x64xf32>
    %46 = arith.mulf %45, %44 : vector<8x64xf32>
    %cst_26 = arith.constant 4.471500e-02 : f32
    %47 = vector.broadcast %cst_26 : f32 to vector<8x64xf32>
    %48 = arith.mulf %47, %44 : vector<8x64xf32>
    %49 = arith.mulf %48, %44 : vector<8x64xf32>
    %50 = arith.mulf %49, %44 : vector<8x64xf32>
    %51 = arith.addf %44, %50 : vector<8x64xf32>
    %cst_27 = arith.constant 0.797884583 : f32
    %52 = vector.broadcast %cst_27 : f32 to vector<8x64xf32>
    %53 = arith.mulf %52, %51 : vector<8x64xf32>
    %54 = math.tanh %53 : vector<8x64xf32>
    %cst_28 = arith.constant 1.000000e+00 : f32
    %55 = vector.broadcast %cst_28 : f32 to vector<8x64xf32>
    %56 = arith.addf %55, %54 : vector<8x64xf32>
    %57 = arith.mulf %46, %56 : vector<8x64xf32>
    %58 = vector.extract_strided_slice %43 {offsets = [0, 64], sizes = [8, 64], strides = [1, 1]} : vector<8x128xf32> to vector<8x64xf32>
    %59 = arith.mulf %57, %58 : vector<8x64xf32>
    %60 = arith.truncf %59 : vector<8x64xf32> to vector<8x64xbf16>
    %c0_29 = arith.constant 0 : index
    %c0_30 = arith.constant 0 : index
    %61 = vector.load %arg9[%c0_29, %c0_30] : memref<64x32xbf16, #tpu.memory_space<vmem>>, vector<64x32xbf16>
    %cst_31 = arith.constant dense<0.000000e+00> : vector<8x32xf32>
    %62 = tpu.matmul %60, %61, %cst_31 {dimension_numbers = #tpu.dot_dimension_numbers<[1], [0], [0], [1], [0, 0, 1, 1], [], []>} : vector<8x64xbf16>, vector<64x32xbf16>, vector<8x32xf32> -> vector<8x32xf32>
    %c0_32 = arith.constant 0 : index
    %c0_33 = arith.constant 0 : index
    %63 = vector.load %arg10[%c0_32, %c0_33] : memref<1x32xf32, #tpu.memory_space<vmem>>, vector<1x32xf32>
    %64 = vector.broadcast %63 : vector<1x32xf32> to vector<8x32xf32>
    %65 = arith.addf %62, %64 : vector<8x32xf32>
    %66 = arith.truncf %65 : vector<8x32xf32> to vector<8x32xbf16>
    %c0_34 = arith.constant 0 : index
    %c0_35 = arith.constant 0 : index
    %67 = vector.load %arg11[%c0_34, %c0_35] : memref<32x96xbf16, #tpu.memory_space<vmem>>, vector<32x96xbf16>
    %cst_36 = arith.constant dense<0.000000e+00> : vector<8x96xf32>
    %68 = tpu.matmul %66, %67, %cst_36 {dimension_numbers = #tpu.dot_dimension_numbers<[1], [0], [0], [1], [0, 0, 1, 1], [], []>} : vector<8x32xbf16>, vector<32x96xbf16>, vector<8x96xf32> -> vector<8x96xf32>
    %69 = arith.truncf %68 : vector<8x96xf32> to vector<8x96xbf16>
    %c0_37 = arith.constant 0 : index
    %c0_38 = arith.constant 0 : index
    %c0_39 = arith.constant 0 : index
    %70 = vector.load %arg20[%c0_37, %c0_38, %c0_39] : memref<1x8x96xbf16, #tpu.memory_space<vmem>>, vector<1x8x96xbf16>
    %71 = vector.shape_cast %70 : vector<1x8x96xbf16> to vector<8x96xbf16>
    %72 = vector.shape_cast %69 : vector<8x96xbf16> to vector<1x8x96xbf16>
    tpu.vector_store %arg20[%c0_37, %c0_38, %c0_39], %72 {strides = array<i32>} : memref<1x8x96xbf16, #tpu.memory_space<vmem>>, vector<1x8x96xbf16>,
    %73 = arith.truncf %10 : vector<16x64xf32> to vector<16x64xbf16>
    %c0_40 = arith.constant 0 : index
    %c0_41 = arith.constant 0 : index
    %74 = vector.load %arg12[%c0_40, %c0_41] : memref<64x64xbf16, #tpu.memory_space<vmem>>, vector<64x64xbf16>
    %cst_42 = arith.constant dense<0.000000e+00> : vector<16x64xf32>
    %75 = tpu.matmul %73, %74, %cst_42 {dimension_numbers = #tpu.dot_dimension_numbers<[1], [0], [0], [1], [0, 0, 1, 1], [], []>} : vector<16x64xbf16>, vector<64x64xbf16>, vector<16x64xf32> -> vector<16x64xf32>
    %cst_43 = arith.constant dense<0.000000e+00> : vector<16xf32>
    %76 = vector.multi_reduction <add>, %75, %cst_43 [1] : vector<16x64xf32> to vector<16xf32>
    %77 = vector.shape_cast %76 : vector<16xf32> to vector<16x1xf32>
    %cst_44 = arith.constant 6.400000e+01 : f32
    %78 = vector.broadcast %cst_44 : f32 to vector<16x1xf32>
    %79 = arith.divf %77, %78 : vector<16x1xf32>
    %80 = vector.broadcast %79 : vector<16x1xf32> to vector<16x64xf32>
    %81 = arith.subf %75, %80 : vector<16x64xf32>
    %82 = arith.mulf %81, %81 : vector<16x64xf32>
    %cst_45 = arith.constant dense<0.000000e+00> : vector<16xf32>
    %83 = vector.multi_reduction <add>, %82, %cst_45 [1] : vector<16x64xf32> to vector<16xf32>
    %84 = vector.shape_cast %83 : vector<16xf32> to vector<16x1xf32>
    %cst_46 = arith.constant 6.400000e+01 : f32
    %85 = vector.broadcast %cst_46 : f32 to vector<16x1xf32>
    %86 = arith.divf %84, %85 : vector<16x1xf32>
    %87 = vector.broadcast %79 : vector<16x1xf32> to vector<16x64xf32>
    %88 = arith.subf %75, %87 : vector<16x64xf32>
    %cst_47 = arith.constant 9.99999974E-6 : f32
    %89 = vector.broadcast %cst_47 : f32 to vector<16x1xf32>
    %90 = arith.addf %86, %89 : vector<16x1xf32>
    %91 = math.rsqrt %90 : vector<16x1xf32>
    %92 = vector.broadcast %91 : vector<16x1xf32> to vector<16x64xf32>
    %93 = arith.mulf %88, %92 : vector<16x64xf32>
    %c0_48 = arith.constant 0 : index
    %c0_49 = arith.constant 0 : index
    %94 = vector.load %arg13[%c0_48, %c0_49] : memref<1x64xf32, #tpu.memory_space<vmem>>, vector<1x64xf32>
    %95 = vector.broadcast %94 : vector<1x64xf32> to vector<16x64xf32>
    %96 = arith.mulf %93, %95 : vector<16x64xf32>
    %c0_50 = arith.constant 0 : index
    %c0_51 = arith.constant 0 : index
    %97 = vector.load %arg14[%c0_50, %c0_51] : memref<1x64xf32, #tpu.memory_space<vmem>>, vector<1x64xf32>
    %98 = vector.broadcast %97 : vector<1x64xf32> to vector<16x64xf32>
    %99 = arith.addf %96, %98 : vector<16x64xf32>
    %100 = arith.truncf %99 : vector<16x64xf32> to vector<16x64xbf16>
    %c0_52 = arith.constant 0 : index
    %c0_53 = arith.constant 0 : index
    %101 = vector.load %arg15[%c0_52, %c0_53] : memref<64x128xbf16, #tpu.memory_space<vmem>>, vector<64x128xbf16>
    %cst_54 = arith.constant dense<0.000000e+00> : vector<16x128xf32>
    %102 = tpu.matmul %100, %101, %cst_54 {dimension_numbers = #tpu.dot_dimension_numbers<[1], [0], [0], [1], [0, 0, 1, 1], [], []>} : vector<16x64xbf16>, vector<64x128xbf16>, vector<16x128xf32> -> vector<16x128xf32>
    %c0_55 = arith.constant 0 : index
    %c0_56 = arith.constant 0 : index
    %103 = vector.load %arg16[%c0_55, %c0_56] : memref<1x128xf32, #tpu.memory_space<vmem>>, vector<1x128xf32>
    %104 = vector.broadcast %103 : vector<1x128xf32> to vector<16x128xf32>
    %105 = arith.addf %102, %104 : vector<16x128xf32>
    %106 = vector.extract_strided_slice %105 {offsets = [0, 0], sizes = [16, 64], strides = [1, 1]} : vector<16x128xf32> to vector<16x64xf32>
    %cst_57 = arith.constant 5.000000e-01 : f32
    %107 = vector.broadcast %cst_57 : f32 to vector<16x64xf32>
    %108 = arith.mulf %107, %106 : vector<16x64xf32>
    %cst_58 = arith.constant 4.471500e-02 : f32
    %109 = vector.broadcast %cst_58 : f32 to vector<16x64xf32>
    %110 = arith.mulf %109, %106 : vector<16x64xf32>
    %111 = arith.mulf %110, %106 : vector<16x64xf32>
    %112 = arith.mulf %111, %106 : vector<16x64xf32>
    %113 = arith.addf %106, %112 : vector<16x64xf32>
    %cst_59 = arith.constant 0.797884583 : f32
    %114 = vector.broadcast %cst_59 : f32 to vector<16x64xf32>
    %115 = arith.mulf %114, %113 : vector<16x64xf32>
    %116 = math.tanh %115 : vector<16x64xf32>
    %cst_60 = arith.constant 1.000000e+00 : f32
    %117 = vector.broadcast %cst_60 : f32 to vector<16x64xf32>
    %118 = arith.addf %117, %116 : vector<16x64xf32>
    %119 = arith.mulf %108, %118 : vector<16x64xf32>
    %120 = vector.extract_strided_slice %105 {offsets = [0, 64], sizes = [16, 64], strides = [1, 1]} : vector<16x128xf32> to vector<16x64xf32>
    %121 = arith.mulf %119, %120 : vector<16x64xf32>
    %122 = arith.truncf %121 : vector<16x64xf32> to vector<16x64xbf16>
    %c0_61 = arith.constant 0 : index
    %c0_62 = arith.constant 0 : index
    %123 = vector.load %arg17[%c0_61, %c0_62] : memref<64x32xbf16, #tpu.memory_space<vmem>>, vector<64x32xbf16>
    %cst_63 = arith.constant dense<0.000000e+00> : vector<16x32xf32>
    %124 = tpu.matmul %122, %123, %cst_63 {dimension_numbers = #tpu.dot_dimension_numbers<[1], [0], [0], [1], [0, 0, 1, 1], [], []>} : vector<16x64xbf16>, vector<64x32xbf16>, vector<16x32xf32> -> vector<16x32xf32>
    %c0_64 = arith.constant 0 : index
    %c0_65 = arith.constant 0 : index
    %125 = vector.load %arg18[%c0_64, %c0_65] : memref<1x32xf32, #tpu.memory_space<vmem>>, vector<1x32xf32>
    %126 = vector.broadcast %125 : vector<1x32xf32> to vector<16x32xf32>
    %127 = arith.addf %124, %126 : vector<16x32xf32>
    %128 = arith.truncf %127 : vector<16x32xf32> to vector<16x32xbf16>
    %c0_66 = arith.constant 0 : index
    %c0_67 = arith.constant 0 : index
    %129 = vector.load %arg19[%c0_66, %c0_67] : memref<32x96xbf16, #tpu.memory_space<vmem>>, vector<32x96xbf16>
    %cst_68 = arith.constant dense<0.000000e+00> : vector<16x96xf32>
    %130 = tpu.matmul %128, %129, %cst_68 {dimension_numbers = #tpu.dot_dimension_numbers<[1], [0], [0], [1], [0, 0, 1, 1], [], []>} : vector<16x32xbf16>, vector<32x96xbf16>, vector<16x96xf32> -> vector<16x96xf32>
    %131 = arith.truncf %130 : vector<16x96xf32> to vector<16x96xbf16>
    %c0_69 = arith.constant 0 : index
    %c0_70 = arith.constant 0 : index
    %c0_71 = arith.constant 0 : index
    %132 = vector.load %arg21[%c0_69, %c0_70, %c0_71] : memref<1x16x96xbf16, #tpu.memory_space<vmem>>, vector<1x16x96xbf16>
    %133 = vector.shape_cast %132 : vector<1x16x96xbf16> to vector<16x96xbf16>
    %134 = vector.shape_cast %131 : vector<16x96xbf16> to vector<1x16x96xbf16>
    tpu.vector_store %arg21[%c0_69, %c0_70, %c0_71], %134 {strides = array<i32>} : memref<1x16x96xbf16, #tpu.memory_space<vmem>>, vector<1x16x96xbf16>,
    return
  }
  func.func @transform_0(%arg0: i32) -> (i32, i32, i32) {
    %c0_i32 = arith.constant 0 : i32
    %c0_i32_0 = arith.constant 0 : i32
    %c0_i32_1 = arith.constant 0 : i32
    return %arg0, %c0_i32, %c0_i32_0 : i32, i32, i32
  }
  func.func @transform_1(%arg0: i32) -> (i32, i32, i32) {
    %c0_i32 = arith.constant 0 : i32
    %c0_i32_0 = arith.constant 0 : i32
    %c0_i32_1 = arith.constant 0 : i32
    return %arg0, %c0_i32, %c0_i32_0 : i32, i32, i32
  }
  func.func @transform_2(%arg0: i32) -> (i32, i32) {
    %c0_i32 = arith.constant 0 : i32
    %c0_i32_0 = arith.constant 0 : i32
    %c0_i32_1 = arith.constant 0 : i32
    return %c0_i32, %c0_i32_0 : i32, i32
  }
  func.func @transform_3(%arg0: i32) -> (i32, i32) {
    %c0_i32 = arith.constant 0 : i32
    %c0_i32_0 = arith.constant 0 : i32
    %c0_i32_1 = arith.constant 0 : i32
    return %c0_i32, %c0_i32_0 : i32, i32
  }
  func.func @transform_4(%arg0: i32) -> (i32, i32) {
    %c0_i32 = arith.constant 0 : i32
    %c0_i32_0 = arith.constant 0 : i32
    %c0_i32_1 = arith.constant 0 : i32
    return %c0_i32, %c0_i32_0 : i32, i32
  }
  func.func @transform_5(%arg0: i32) -> (i32, i32) {
    %c0_i32 = arith.constant 0 : i32
    %c0_i32_0 = arith.constant 0 : i32
    %c0_i32_1 = arith.constant 0 : i32
    return %c0_i32, %c0_i32_0 : i32, i32
  }
  func.func @transform_6(%arg0: i32) -> (i32, i32) {
    %c0_i32 = arith.constant 0 : i32
    %c0_i32_0 = arith.constant 0 : i32
    %c0_i32_1 = arith.constant 0 : i32
    return %c0_i32, %c0_i32_0 : i32, i32
  }
  func.func @transform_7(%arg0: i32) -> (i32, i32) {
    %c0_i32 = arith.constant 0 : i32
    %c0_i32_0 = arith.constant 0 : i32
    %c0_i32_1 = arith.constant 0 : i32
    return %c0_i32, %c0_i32_0 : i32, i32
  }
  func.func @transform_8(%arg0: i32) -> (i32, i32) {
    %c0_i32 = arith.constant 0 : i32
    %c0_i32_0 = arith.constant 0 : i32
    %c0_i32_1 = arith.constant 0 : i32
    return %c0_i32, %c0_i32_0 : i32, i32
  }
  func.func @transform_9(%arg0: i32) -> (i32, i32) {
    %c0_i32 = arith.constant 0 : i32
    %c0_i32_0 = arith.constant 0 : i32
    %c0_i32_1 = arith.constant 0 : i32
    return %c0_i32, %c0_i32_0 : i32, i32
  }
  func.func @transform_10(%arg0: i32) -> (i32, i32) {
    %c0_i32 = arith.constant 0 : i32
    %c0_i32_0 = arith.constant 0 : i32
    %c0_i32_1 = arith.constant 0 : i32
    return %c0_i32, %c0_i32_0 : i32, i32
  }
  func.func @transform_11(%arg0: i32) -> (i32, i32) {
    %c0_i32 = arith.constant 0 : i32
    %c0_i32_0 = arith.constant 0 : i32
    %c0_i32_1 = arith.constant 0 : i32
    return %c0_i32, %c0_i32_0 : i32, i32
  }
  func.func @transform_12(%arg0: i32) -> (i32, i32) {
    %c0_i32 = arith.constant 0 : i32
    %c0_i32_0 = arith.constant 0 : i32
    %c0_i32_1 = arith.constant 0 : i32
    return %c0_i32, %c0_i32_0 : i32, i32
  }
  func.func @transform_13(%arg0: i32) -> (i32, i32) {
    %c0_i32 = arith.constant 0 : i32
    %c0_i32_0 = arith.constant 0 : i32
    %c0_i32_1 = arith.constant 0 : i32
    return %c0_i32, %c0_i32_0 : i32, i32
  }
  func.func @transform_14(%arg0: i32) -> (i32, i32) {
    %c0_i32 = arith.constant 0 : i32
    %c0_i32_0 = arith.constant 0 : i32
    %c0_i32_1 = arith.constant 0 : i32
    return %c0_i32, %c0_i32_0 : i32, i32
  }
  func.func @transform_15(%arg0: i32) -> (i32, i32) {
    %c0_i32 = arith.constant 0 : i32
    %c0_i32_0 = arith.constant 0 : i32
    %c0_i32_1 = arith.constant 0 : i32
    return %c0_i32, %c0_i32_0 : i32, i32
  }
  func.func @transform_16(%arg0: i32) -> (i32, i32) {
    %c0_i32 = arith.constant 0 : i32
    %c0_i32_0 = arith.constant 0 : i32
    %c0_i32_1 = arith.constant 0 : i32
    return %c0_i32, %c0_i32_0 : i32, i32
  }
  func.func @transform_17(%arg0: i32) -> (i32, i32) {
    %c0_i32 = arith.constant 0 : i32
    %c0_i32_0 = arith.constant 0 : i32
    %c0_i32_1 = arith.constant 0 : i32
    return %c0_i32, %c0_i32_0 : i32, i32
  }
  func.func @transform_18(%arg0: i32) -> (i32, i32) {
    %c0_i32 = arith.constant 0 : i32
    %c0_i32_0 = arith.constant 0 : i32
    %c0_i32_1 = arith.constant 0 : i32
    return %c0_i32, %c0_i32_0 : i32, i32
  }
  func.func @transform_19(%arg0: i32) -> (i32, i32, i32) {
    %c0_i32 = arith.constant 0 : i32
    %c0_i32_0 = arith.constant 0 : i32
    %c0_i32_1 = arith.constant 0 : i32
    return %arg0, %c0_i32, %c0_i32_0 : i32, i32, i32
  }
  func.func @transform_20(%arg0: i32) -> (i32, i32, i32) {
    %c0_i32 = arith.constant 0 : i32
    %c0_i32_0 = arith.constant 0 : i32
    %c0_i32_1 = arith.constant 0 : i32
    return %arg0, %c0_i32, %c0_i32_0 : i32, i32, i32
  }
}

module attributes {stable_mosaic.version = 11 : i64} {
  func.func @_fca_apply_kernel(%arg0: i32, %arg1: memref<1x4x8x24xbf16, #tpu.memory_space<vmem>>, %arg2: memref<1x4x8x24xbf16, #tpu.memory_space<vmem>>, %arg3: memref<4x8x8xf32, #tpu.memory_space<vmem>>, %arg4: memref<1x4x16x24xbf16, #tpu.memory_space<vmem>>, %arg5: memref<1x4x16x24xbf16, #tpu.memory_space<vmem>>, %arg6: memref<4x16x16xf32, #tpu.memory_space<vmem>>, %arg7: memref<1x8xf32, #tpu.memory_space<vmem>>, %arg8: memref<1x4x64x16xbf16, #tpu.memory_space<vmem>>, %arg9: memref<1x8x16x32xbf16, #tpu.memory_space<vmem>>) attributes {dimension_semantics = [#tpu.dimension_semantics<parallel>], iteration_bounds = array<i64: 2>, scalar_prefetch = 0 : i64, scratch_operands = 0 : i64, tpu.core_type = #tpu.core_type<tc>, window_params = [{transform_indices = @transform_0, window_bounds = array<i64: 1, 4, 8, 24>}, {transform_indices = @transform_1, window_bounds = array<i64: 1, 4, 8, 24>}, {pipeline_mode = #tpu.pipeline_mode<synchronous>, transform_indices = @transform_2, window_bounds = array<i64: 4, 8, 8>}, {transform_indices = @transform_3, window_bounds = array<i64: 1, 4, 16, 24>}, {transform_indices = @transform_4, window_bounds = array<i64: 1, 4, 16, 24>}, {pipeline_mode = #tpu.pipeline_mode<synchronous>, transform_indices = @transform_5, window_bounds = array<i64: 4, 16, 16>}, {pipeline_mode = #tpu.pipeline_mode<synchronous>, transform_indices = @transform_6, window_bounds = array<i64: 1, 8>}, {transform_indices = @transform_7, window_bounds = array<i64: 1, 4, 64, 16>}, {transform_indices = @transform_8, window_bounds = array<i64: 1, 8, 16, 32>}]} {
    %c0 = arith.constant 0 : index
    %c0_0 = arith.constant 0 : index
    %c0_1 = arith.constant 0 : index
    %c0_2 = arith.constant 0 : index
    %0 = vector.load %arg1[%c0, %c0_0, %c0_1, %c0_2] : memref<1x4x8x24xbf16, #tpu.memory_space<vmem>>, vector<1x1x8x24xbf16>
    %1 = vector.shape_cast %0 : vector<1x1x8x24xbf16> to vector<8x24xbf16>
    %c0_3 = arith.constant 0 : index
    %c0_4 = arith.constant 0 : index
    %c0_5 = arith.constant 0 : index
    %c0_6 = arith.constant 0 : index
    %2 = vector.load %arg2[%c0_3, %c0_4, %c0_5, %c0_6] : memref<1x4x8x24xbf16, #tpu.memory_space<vmem>>, vector<1x1x8x24xbf16>
    %3 = vector.shape_cast %2 : vector<1x1x8x24xbf16> to vector<8x24xbf16>
    %cst = arith.constant dense<0.000000e+00> : vector<8x8xf32>
    %4 = tpu.matmul %1, %3, %cst {dimension_numbers = #tpu.dot_dimension_numbers<[1], [1], [0], [0], [0, 0, 1, 0], [], []>} : vector<8x24xbf16>, vector<8x24xbf16>, vector<8x8xf32> -> vector<8x8xf32>
    %c0_7 = arith.constant 0 : index
    %c0_8 = arith.constant 0 : index
    %c0_9 = arith.constant 0 : index
    %5 = vector.load %arg3[%c0_7, %c0_8, %c0_9] : memref<4x8x8xf32, #tpu.memory_space<vmem>>, vector<1x8x8xf32>
    %6 = vector.shape_cast %5 : vector<1x8x8xf32> to vector<8x8xf32>
    %7 = arith.mulf %4, %6 : vector<8x8xf32>
    %cst_10 = arith.constant 0.000000e+00 : f32
    %8 = vector.broadcast %cst_10 : f32 to vector<8x8xf32>
    %9 = arith.cmpf oge, %7, %8 : vector<8x8xf32>
    %cst_11 = arith.constant 2.000000e-01 : f32
    %10 = vector.broadcast %cst_11 : f32 to vector<8x8xf32>
    %11 = arith.mulf %10, %7 : vector<8x8xf32>
    %12 = arith.select %9, %7, %11 : vector<8x8xi1>, vector<8x8xf32>
    %c0_12 = arith.constant 0 : index
    %c0_13 = arith.constant 0 : index
    %13 = vector.load %arg7[%c0_12, %c0_13] : memref<1x8xf32, #tpu.memory_space<vmem>>, vector<1x8xf32>
    %14 = vector.broadcast %13 : vector<1x8xf32> to vector<8x8xf32>
    %15 = arith.mulf %12, %14 : vector<8x8xf32>
    %c0_14 = arith.constant 0 : index
    %c0_15 = arith.constant 0 : index
    %c0_16 = arith.constant 0 : index
    %c0_17 = arith.constant 0 : index
    %16 = vector.load %arg4[%c0_14, %c0_15, %c0_16, %c0_17] : memref<1x4x16x24xbf16, #tpu.memory_space<vmem>>, vector<1x1x16x24xbf16>
    %17 = vector.shape_cast %16 : vector<1x1x16x24xbf16> to vector<16x24xbf16>
    %c0_18 = arith.constant 0 : index
    %c0_19 = arith.constant 0 : index
    %c0_20 = arith.constant 0 : index
    %c0_21 = arith.constant 0 : index
    %18 = vector.load %arg5[%c0_18, %c0_19, %c0_20, %c0_21] : memref<1x4x16x24xbf16, #tpu.memory_space<vmem>>, vector<1x1x16x24xbf16>
    %19 = vector.shape_cast %18 : vector<1x1x16x24xbf16> to vector<16x24xbf16>
    %cst_22 = arith.constant dense<0.000000e+00> : vector<16x16xf32>
    %20 = tpu.matmul %17, %19, %cst_22 {dimension_numbers = #tpu.dot_dimension_numbers<[1], [1], [0], [0], [0, 0, 1, 0], [], []>} : vector<16x24xbf16>, vector<16x24xbf16>, vector<16x16xf32> -> vector<16x16xf32>
    %c0_23 = arith.constant 0 : index
    %c0_24 = arith.constant 0 : index
    %c0_25 = arith.constant 0 : index
    %21 = vector.load %arg6[%c0_23, %c0_24, %c0_25] : memref<4x16x16xf32, #tpu.memory_space<vmem>>, vector<1x16x16xf32>
    %22 = vector.shape_cast %21 : vector<1x16x16xf32> to vector<16x16xf32>
    %23 = arith.mulf %20, %22 : vector<16x16xf32>
    %cst_26 = arith.constant 0.000000e+00 : f32
    %24 = vector.broadcast %cst_26 : f32 to vector<16x16xf32>
    %25 = arith.cmpf oge, %23, %24 : vector<16x16xf32>
    %cst_27 = arith.constant 2.000000e-01 : f32
    %26 = vector.broadcast %cst_27 : f32 to vector<16x16xf32>
    %27 = arith.mulf %26, %23 : vector<16x16xf32>
    %28 = arith.select %25, %23, %27 : vector<16x16xi1>, vector<16x16xf32>
    %cst_28 = arith.constant 0.154212564 : f32
    %29 = vector.broadcast %cst_28 : f32 to vector<16x16xf32>
    %30 = arith.mulf %28, %29 : vector<16x16xf32>
    %c0_29 = arith.constant 0 : index
    %c0_30 = arith.constant 0 : index
    %c0_31 = arith.constant 0 : index
    %c0_32 = arith.constant 0 : index
    %31 = vector.load %arg8[%c0_29, %c0_30, %c0_31, %c0_32] : memref<1x4x64x16xbf16, #tpu.memory_space<vmem>>, vector<1x1x64x16xbf16>
    %32 = vector.shape_cast %31 : vector<1x1x64x16xbf16> to vector<64x16xbf16>
    %33 = arith.truncf %30 : vector<16x16xf32> to vector<16x16xbf16>
    %cst_33 = arith.constant dense<0.000000e+00> : vector<64x16xf32>
    %34 = tpu.matmul %32, %33, %cst_33 {dimension_numbers = #tpu.dot_dimension_numbers<[1], [1], [0], [0], [0, 0, 1, 0], [], []>} : vector<64x16xbf16>, vector<16x16xbf16>, vector<64x16xf32> -> vector<64x16xf32>
    %35 = vector.shape_cast %34 : vector<64x16xf32> to vector<8x8x16xf32>
    %36 = tpu.transpose %35, [0, 2, 1] : vector<8x8x16xf32> -> vector<8x16x8xf32>
    %37 = vector.shape_cast %36 : vector<8x16x8xf32> to vector<8x128xf32>
    %38 = arith.truncf %37 : vector<8x128xf32> to vector<8x128xbf16>
    %39 = arith.truncf %15 : vector<8x8xf32> to vector<8x8xbf16>
    %cst_34 = arith.constant dense<0.000000e+00> : vector<8x128xf32>
    %40 = tpu.matmul %39, %38, %cst_34 {dimension_numbers = #tpu.dot_dimension_numbers<[1], [0], [0], [1], [0, 0, 1, 1], [], []>} : vector<8x8xbf16>, vector<8x128xbf16>, vector<8x128xf32> -> vector<8x128xf32>
    %41 = vector.shape_cast %40 : vector<8x128xf32> to vector<8x16x8xf32>
    %c0_35 = arith.constant 0 : index
    %c1 = arith.constant 1 : index
    %c0_36 = arith.constant 0 : index
    %c0_37 = arith.constant 0 : index
    %42 = vector.load %arg1[%c0_35, %c1, %c0_36, %c0_37] : memref<1x4x8x24xbf16, #tpu.memory_space<vmem>>, vector<1x1x8x24xbf16>
    %43 = vector.shape_cast %42 : vector<1x1x8x24xbf16> to vector<8x24xbf16>
    %c0_38 = arith.constant 0 : index
    %c1_39 = arith.constant 1 : index
    %c0_40 = arith.constant 0 : index
    %c0_41 = arith.constant 0 : index
    %44 = vector.load %arg2[%c0_38, %c1_39, %c0_40, %c0_41] : memref<1x4x8x24xbf16, #tpu.memory_space<vmem>>, vector<1x1x8x24xbf16>
    %45 = vector.shape_cast %44 : vector<1x1x8x24xbf16> to vector<8x24xbf16>
    %cst_42 = arith.constant dense<0.000000e+00> : vector<8x8xf32>
    %46 = tpu.matmul %43, %45, %cst_42 {dimension_numbers = #tpu.dot_dimension_numbers<[1], [1], [0], [0], [0, 0, 1, 0], [], []>} : vector<8x24xbf16>, vector<8x24xbf16>, vector<8x8xf32> -> vector<8x8xf32>
    %c1_43 = arith.constant 1 : index
    %c0_44 = arith.constant 0 : index
    %c0_45 = arith.constant 0 : index
    %47 = vector.load %arg3[%c1_43, %c0_44, %c0_45] : memref<4x8x8xf32, #tpu.memory_space<vmem>>, vector<1x8x8xf32>
    %48 = vector.shape_cast %47 : vector<1x8x8xf32> to vector<8x8xf32>
    %49 = arith.mulf %46, %48 : vector<8x8xf32>
    %cst_46 = arith.constant 0.000000e+00 : f32
    %50 = vector.broadcast %cst_46 : f32 to vector<8x8xf32>
    %51 = arith.cmpf oge, %49, %50 : vector<8x8xf32>
    %cst_47 = arith.constant 2.000000e-01 : f32
    %52 = vector.broadcast %cst_47 : f32 to vector<8x8xf32>
    %53 = arith.mulf %52, %49 : vector<8x8xf32>
    %54 = arith.select %51, %49, %53 : vector<8x8xi1>, vector<8x8xf32>
    %c0_48 = arith.constant 0 : index
    %c0_49 = arith.constant 0 : index
    %55 = vector.load %arg7[%c0_48, %c0_49] : memref<1x8xf32, #tpu.memory_space<vmem>>, vector<1x8xf32>
    %56 = vector.broadcast %55 : vector<1x8xf32> to vector<8x8xf32>
    %57 = arith.mulf %54, %56 : vector<8x8xf32>
    %c0_50 = arith.constant 0 : index
    %c1_51 = arith.constant 1 : index
    %c0_52 = arith.constant 0 : index
    %c0_53 = arith.constant 0 : index
    %58 = vector.load %arg4[%c0_50, %c1_51, %c0_52, %c0_53] : memref<1x4x16x24xbf16, #tpu.memory_space<vmem>>, vector<1x1x16x24xbf16>
    %59 = vector.shape_cast %58 : vector<1x1x16x24xbf16> to vector<16x24xbf16>
    %c0_54 = arith.constant 0 : index
    %c1_55 = arith.constant 1 : index
    %c0_56 = arith.constant 0 : index
    %c0_57 = arith.constant 0 : index
    %60 = vector.load %arg5[%c0_54, %c1_55, %c0_56, %c0_57] : memref<1x4x16x24xbf16, #tpu.memory_space<vmem>>, vector<1x1x16x24xbf16>
    %61 = vector.shape_cast %60 : vector<1x1x16x24xbf16> to vector<16x24xbf16>
    %cst_58 = arith.constant dense<0.000000e+00> : vector<16x16xf32>
    %62 = tpu.matmul %59, %61, %cst_58 {dimension_numbers = #tpu.dot_dimension_numbers<[1], [1], [0], [0], [0, 0, 1, 0], [], []>} : vector<16x24xbf16>, vector<16x24xbf16>, vector<16x16xf32> -> vector<16x16xf32>
    %c1_59 = arith.constant 1 : index
    %c0_60 = arith.constant 0 : index
    %c0_61 = arith.constant 0 : index
    %63 = vector.load %arg6[%c1_59, %c0_60, %c0_61] : memref<4x16x16xf32, #tpu.memory_space<vmem>>, vector<1x16x16xf32>
    %64 = vector.shape_cast %63 : vector<1x16x16xf32> to vector<16x16xf32>
    %65 = arith.mulf %62, %64 : vector<16x16xf32>
    %cst_62 = arith.constant 0.000000e+00 : f32
    %66 = vector.broadcast %cst_62 : f32 to vector<16x16xf32>
    %67 = arith.cmpf oge, %65, %66 : vector<16x16xf32>
    %cst_63 = arith.constant 2.000000e-01 : f32
    %68 = vector.broadcast %cst_63 : f32 to vector<16x16xf32>
    %69 = arith.mulf %68, %65 : vector<16x16xf32>
    %70 = arith.select %67, %65, %69 : vector<16x16xi1>, vector<16x16xf32>
    %cst_64 = arith.constant 0.154212564 : f32
    %71 = vector.broadcast %cst_64 : f32 to vector<16x16xf32>
    %72 = arith.mulf %70, %71 : vector<16x16xf32>
    %c0_65 = arith.constant 0 : index
    %c1_66 = arith.constant 1 : index
    %c0_67 = arith.constant 0 : index
    %c0_68 = arith.constant 0 : index
    %73 = vector.load %arg8[%c0_65, %c1_66, %c0_67, %c0_68] : memref<1x4x64x16xbf16, #tpu.memory_space<vmem>>, vector<1x1x64x16xbf16>
    %74 = vector.shape_cast %73 : vector<1x1x64x16xbf16> to vector<64x16xbf16>
    %75 = arith.truncf %72 : vector<16x16xf32> to vector<16x16xbf16>
    %cst_69 = arith.constant dense<0.000000e+00> : vector<64x16xf32>
    %76 = tpu.matmul %74, %75, %cst_69 {dimension_numbers = #tpu.dot_dimension_numbers<[1], [1], [0], [0], [0, 0, 1, 0], [], []>} : vector<64x16xbf16>, vector<16x16xbf16>, vector<64x16xf32> -> vector<64x16xf32>
    %77 = vector.shape_cast %76 : vector<64x16xf32> to vector<8x8x16xf32>
    %78 = tpu.transpose %77, [0, 2, 1] : vector<8x8x16xf32> -> vector<8x16x8xf32>
    %79 = vector.shape_cast %78 : vector<8x16x8xf32> to vector<8x128xf32>
    %80 = arith.truncf %79 : vector<8x128xf32> to vector<8x128xbf16>
    %81 = arith.truncf %57 : vector<8x8xf32> to vector<8x8xbf16>
    %cst_70 = arith.constant dense<0.000000e+00> : vector<8x128xf32>
    %82 = tpu.matmul %81, %80, %cst_70 {dimension_numbers = #tpu.dot_dimension_numbers<[1], [0], [0], [1], [0, 0, 1, 1], [], []>} : vector<8x8xbf16>, vector<8x128xbf16>, vector<8x128xf32> -> vector<8x128xf32>
    %83 = vector.shape_cast %82 : vector<8x128xf32> to vector<8x16x8xf32>
    %c0_71 = arith.constant 0 : index
    %c2 = arith.constant 2 : index
    %c0_72 = arith.constant 0 : index
    %c0_73 = arith.constant 0 : index
    %84 = vector.load %arg1[%c0_71, %c2, %c0_72, %c0_73] : memref<1x4x8x24xbf16, #tpu.memory_space<vmem>>, vector<1x1x8x24xbf16>
    %85 = vector.shape_cast %84 : vector<1x1x8x24xbf16> to vector<8x24xbf16>
    %c0_74 = arith.constant 0 : index
    %c2_75 = arith.constant 2 : index
    %c0_76 = arith.constant 0 : index
    %c0_77 = arith.constant 0 : index
    %86 = vector.load %arg2[%c0_74, %c2_75, %c0_76, %c0_77] : memref<1x4x8x24xbf16, #tpu.memory_space<vmem>>, vector<1x1x8x24xbf16>
    %87 = vector.shape_cast %86 : vector<1x1x8x24xbf16> to vector<8x24xbf16>
    %cst_78 = arith.constant dense<0.000000e+00> : vector<8x8xf32>
    %88 = tpu.matmul %85, %87, %cst_78 {dimension_numbers = #tpu.dot_dimension_numbers<[1], [1], [0], [0], [0, 0, 1, 0], [], []>} : vector<8x24xbf16>, vector<8x24xbf16>, vector<8x8xf32> -> vector<8x8xf32>
    %c2_79 = arith.constant 2 : index
    %c0_80 = arith.constant 0 : index
    %c0_81 = arith.constant 0 : index
    %89 = vector.load %arg3[%c2_79, %c0_80, %c0_81] : memref<4x8x8xf32, #tpu.memory_space<vmem>>, vector<1x8x8xf32>
    %90 = vector.shape_cast %89 : vector<1x8x8xf32> to vector<8x8xf32>
    %91 = arith.mulf %88, %90 : vector<8x8xf32>
    %cst_82 = arith.constant 0.000000e+00 : f32
    %92 = vector.broadcast %cst_82 : f32 to vector<8x8xf32>
    %93 = arith.cmpf oge, %91, %92 : vector<8x8xf32>
    %cst_83 = arith.constant 2.000000e-01 : f32
    %94 = vector.broadcast %cst_83 : f32 to vector<8x8xf32>
    %95 = arith.mulf %94, %91 : vector<8x8xf32>
    %96 = arith.select %93, %91, %95 : vector<8x8xi1>, vector<8x8xf32>
    %c0_84 = arith.constant 0 : index
    %c0_85 = arith.constant 0 : index
    %97 = vector.load %arg7[%c0_84, %c0_85] : memref<1x8xf32, #tpu.memory_space<vmem>>, vector<1x8xf32>
    %98 = vector.broadcast %97 : vector<1x8xf32> to vector<8x8xf32>
    %99 = arith.mulf %96, %98 : vector<8x8xf32>
    %c0_86 = arith.constant 0 : index
    %c2_87 = arith.constant 2 : index
    %c0_88 = arith.constant 0 : index
    %c0_89 = arith.constant 0 : index
    %100 = vector.load %arg4[%c0_86, %c2_87, %c0_88, %c0_89] : memref<1x4x16x24xbf16, #tpu.memory_space<vmem>>, vector<1x1x16x24xbf16>
    %101 = vector.shape_cast %100 : vector<1x1x16x24xbf16> to vector<16x24xbf16>
    %c0_90 = arith.constant 0 : index
    %c2_91 = arith.constant 2 : index
    %c0_92 = arith.constant 0 : index
    %c0_93 = arith.constant 0 : index
    %102 = vector.load %arg5[%c0_90, %c2_91, %c0_92, %c0_93] : memref<1x4x16x24xbf16, #tpu.memory_space<vmem>>, vector<1x1x16x24xbf16>
    %103 = vector.shape_cast %102 : vector<1x1x16x24xbf16> to vector<16x24xbf16>
    %cst_94 = arith.constant dense<0.000000e+00> : vector<16x16xf32>
    %104 = tpu.matmul %101, %103, %cst_94 {dimension_numbers = #tpu.dot_dimension_numbers<[1], [1], [0], [0], [0, 0, 1, 0], [], []>} : vector<16x24xbf16>, vector<16x24xbf16>, vector<16x16xf32> -> vector<16x16xf32>
    %c2_95 = arith.constant 2 : index
    %c0_96 = arith.constant 0 : index
    %c0_97 = arith.constant 0 : index
    %105 = vector.load %arg6[%c2_95, %c0_96, %c0_97] : memref<4x16x16xf32, #tpu.memory_space<vmem>>, vector<1x16x16xf32>
    %106 = vector.shape_cast %105 : vector<1x16x16xf32> to vector<16x16xf32>
    %107 = arith.mulf %104, %106 : vector<16x16xf32>
    %cst_98 = arith.constant 0.000000e+00 : f32
    %108 = vector.broadcast %cst_98 : f32 to vector<16x16xf32>
    %109 = arith.cmpf oge, %107, %108 : vector<16x16xf32>
    %cst_99 = arith.constant 2.000000e-01 : f32
    %110 = vector.broadcast %cst_99 : f32 to vector<16x16xf32>
    %111 = arith.mulf %110, %107 : vector<16x16xf32>
    %112 = arith.select %109, %107, %111 : vector<16x16xi1>, vector<16x16xf32>
    %cst_100 = arith.constant 0.154212564 : f32
    %113 = vector.broadcast %cst_100 : f32 to vector<16x16xf32>
    %114 = arith.mulf %112, %113 : vector<16x16xf32>
    %c0_101 = arith.constant 0 : index
    %c2_102 = arith.constant 2 : index
    %c0_103 = arith.constant 0 : index
    %c0_104 = arith.constant 0 : index
    %115 = vector.load %arg8[%c0_101, %c2_102, %c0_103, %c0_104] : memref<1x4x64x16xbf16, #tpu.memory_space<vmem>>, vector<1x1x64x16xbf16>
    %116 = vector.shape_cast %115 : vector<1x1x64x16xbf16> to vector<64x16xbf16>
    %117 = arith.truncf %114 : vector<16x16xf32> to vector<16x16xbf16>
    %cst_105 = arith.constant dense<0.000000e+00> : vector<64x16xf32>
    %118 = tpu.matmul %116, %117, %cst_105 {dimension_numbers = #tpu.dot_dimension_numbers<[1], [1], [0], [0], [0, 0, 1, 0], [], []>} : vector<64x16xbf16>, vector<16x16xbf16>, vector<64x16xf32> -> vector<64x16xf32>
    %119 = vector.shape_cast %118 : vector<64x16xf32> to vector<8x8x16xf32>
    %120 = tpu.transpose %119, [0, 2, 1] : vector<8x8x16xf32> -> vector<8x16x8xf32>
    %121 = vector.shape_cast %120 : vector<8x16x8xf32> to vector<8x128xf32>
    %122 = arith.truncf %121 : vector<8x128xf32> to vector<8x128xbf16>
    %123 = arith.truncf %99 : vector<8x8xf32> to vector<8x8xbf16>
    %cst_106 = arith.constant dense<0.000000e+00> : vector<8x128xf32>
    %124 = tpu.matmul %123, %122, %cst_106 {dimension_numbers = #tpu.dot_dimension_numbers<[1], [0], [0], [1], [0, 0, 1, 1], [], []>} : vector<8x8xbf16>, vector<8x128xbf16>, vector<8x128xf32> -> vector<8x128xf32>
    %125 = vector.shape_cast %124 : vector<8x128xf32> to vector<8x16x8xf32>
    %c0_107 = arith.constant 0 : index
    %c3 = arith.constant 3 : index
    %c0_108 = arith.constant 0 : index
    %c0_109 = arith.constant 0 : index
    %126 = vector.load %arg1[%c0_107, %c3, %c0_108, %c0_109] : memref<1x4x8x24xbf16, #tpu.memory_space<vmem>>, vector<1x1x8x24xbf16>
    %127 = vector.shape_cast %126 : vector<1x1x8x24xbf16> to vector<8x24xbf16>
    %c0_110 = arith.constant 0 : index
    %c3_111 = arith.constant 3 : index
    %c0_112 = arith.constant 0 : index
    %c0_113 = arith.constant 0 : index
    %128 = vector.load %arg2[%c0_110, %c3_111, %c0_112, %c0_113] : memref<1x4x8x24xbf16, #tpu.memory_space<vmem>>, vector<1x1x8x24xbf16>
    %129 = vector.shape_cast %128 : vector<1x1x8x24xbf16> to vector<8x24xbf16>
    %cst_114 = arith.constant dense<0.000000e+00> : vector<8x8xf32>
    %130 = tpu.matmul %127, %129, %cst_114 {dimension_numbers = #tpu.dot_dimension_numbers<[1], [1], [0], [0], [0, 0, 1, 0], [], []>} : vector<8x24xbf16>, vector<8x24xbf16>, vector<8x8xf32> -> vector<8x8xf32>
    %c3_115 = arith.constant 3 : index
    %c0_116 = arith.constant 0 : index
    %c0_117 = arith.constant 0 : index
    %131 = vector.load %arg3[%c3_115, %c0_116, %c0_117] : memref<4x8x8xf32, #tpu.memory_space<vmem>>, vector<1x8x8xf32>
    %132 = vector.shape_cast %131 : vector<1x8x8xf32> to vector<8x8xf32>
    %133 = arith.mulf %130, %132 : vector<8x8xf32>
    %cst_118 = arith.constant 0.000000e+00 : f32
    %134 = vector.broadcast %cst_118 : f32 to vector<8x8xf32>
    %135 = arith.cmpf oge, %133, %134 : vector<8x8xf32>
    %cst_119 = arith.constant 2.000000e-01 : f32
    %136 = vector.broadcast %cst_119 : f32 to vector<8x8xf32>
    %137 = arith.mulf %136, %133 : vector<8x8xf32>
    %138 = arith.select %135, %133, %137 : vector<8x8xi1>, vector<8x8xf32>
    %c0_120 = arith.constant 0 : index
    %c0_121 = arith.constant 0 : index
    %139 = vector.load %arg7[%c0_120, %c0_121] : memref<1x8xf32, #tpu.memory_space<vmem>>, vector<1x8xf32>
    %140 = vector.broadcast %139 : vector<1x8xf32> to vector<8x8xf32>
    %141 = arith.mulf %138, %140 : vector<8x8xf32>
    %c0_122 = arith.constant 0 : index
    %c3_123 = arith.constant 3 : index
    %c0_124 = arith.constant 0 : index
    %c0_125 = arith.constant 0 : index
    %142 = vector.load %arg4[%c0_122, %c3_123, %c0_124, %c0_125] : memref<1x4x16x24xbf16, #tpu.memory_space<vmem>>, vector<1x1x16x24xbf16>
    %143 = vector.shape_cast %142 : vector<1x1x16x24xbf16> to vector<16x24xbf16>
    %c0_126 = arith.constant 0 : index
    %c3_127 = arith.constant 3 : index
    %c0_128 = arith.constant 0 : index
    %c0_129 = arith.constant 0 : index
    %144 = vector.load %arg5[%c0_126, %c3_127, %c0_128, %c0_129] : memref<1x4x16x24xbf16, #tpu.memory_space<vmem>>, vector<1x1x16x24xbf16>
    %145 = vector.shape_cast %144 : vector<1x1x16x24xbf16> to vector<16x24xbf16>
    %cst_130 = arith.constant dense<0.000000e+00> : vector<16x16xf32>
    %146 = tpu.matmul %143, %145, %cst_130 {dimension_numbers = #tpu.dot_dimension_numbers<[1], [1], [0], [0], [0, 0, 1, 0], [], []>} : vector<16x24xbf16>, vector<16x24xbf16>, vector<16x16xf32> -> vector<16x16xf32>
    %c3_131 = arith.constant 3 : index
    %c0_132 = arith.constant 0 : index
    %c0_133 = arith.constant 0 : index
    %147 = vector.load %arg6[%c3_131, %c0_132, %c0_133] : memref<4x16x16xf32, #tpu.memory_space<vmem>>, vector<1x16x16xf32>
    %148 = vector.shape_cast %147 : vector<1x16x16xf32> to vector<16x16xf32>
    %149 = arith.mulf %146, %148 : vector<16x16xf32>
    %cst_134 = arith.constant 0.000000e+00 : f32
    %150 = vector.broadcast %cst_134 : f32 to vector<16x16xf32>
    %151 = arith.cmpf oge, %149, %150 : vector<16x16xf32>
    %cst_135 = arith.constant 2.000000e-01 : f32
    %152 = vector.broadcast %cst_135 : f32 to vector<16x16xf32>
    %153 = arith.mulf %152, %149 : vector<16x16xf32>
    %154 = arith.select %151, %149, %153 : vector<16x16xi1>, vector<16x16xf32>
    %cst_136 = arith.constant 0.154212564 : f32
    %155 = vector.broadcast %cst_136 : f32 to vector<16x16xf32>
    %156 = arith.mulf %154, %155 : vector<16x16xf32>
    %c0_137 = arith.constant 0 : index
    %c3_138 = arith.constant 3 : index
    %c0_139 = arith.constant 0 : index
    %c0_140 = arith.constant 0 : index
    %157 = vector.load %arg8[%c0_137, %c3_138, %c0_139, %c0_140] : memref<1x4x64x16xbf16, #tpu.memory_space<vmem>>, vector<1x1x64x16xbf16>
    %158 = vector.shape_cast %157 : vector<1x1x64x16xbf16> to vector<64x16xbf16>
    %159 = arith.truncf %156 : vector<16x16xf32> to vector<16x16xbf16>
    %cst_141 = arith.constant dense<0.000000e+00> : vector<64x16xf32>
    %160 = tpu.matmul %158, %159, %cst_141 {dimension_numbers = #tpu.dot_dimension_numbers<[1], [1], [0], [0], [0, 0, 1, 0], [], []>} : vector<64x16xbf16>, vector<16x16xbf16>, vector<64x16xf32> -> vector<64x16xf32>
    %161 = vector.shape_cast %160 : vector<64x16xf32> to vector<8x8x16xf32>
    %162 = tpu.transpose %161, [0, 2, 1] : vector<8x8x16xf32> -> vector<8x16x8xf32>
    %163 = vector.shape_cast %162 : vector<8x16x8xf32> to vector<8x128xf32>
    %164 = arith.truncf %163 : vector<8x128xf32> to vector<8x128xbf16>
    %165 = arith.truncf %141 : vector<8x8xf32> to vector<8x8xbf16>
    %cst_142 = arith.constant dense<0.000000e+00> : vector<8x128xf32>
    %166 = tpu.matmul %165, %164, %cst_142 {dimension_numbers = #tpu.dot_dimension_numbers<[1], [0], [0], [1], [0, 0, 1, 1], [], []>} : vector<8x8xbf16>, vector<8x128xbf16>, vector<8x128xf32> -> vector<8x128xf32>
    %167 = vector.shape_cast %166 : vector<8x128xf32> to vector<8x16x8xf32>
    %168 = tpu.concatenate %41, %83, %125, %167 in 2 : vector<8x16x8xf32>, vector<8x16x8xf32>, vector<8x16x8xf32>, vector<8x16x8xf32> -> vector<8x16x32xf32>
    %169 = arith.truncf %168 : vector<8x16x32xf32> to vector<8x16x32xbf16>
    %c0_143 = arith.constant 0 : index
    %c0_144 = arith.constant 0 : index
    %c0_145 = arith.constant 0 : index
    %c0_146 = arith.constant 0 : index
    %170 = vector.load %arg9[%c0_143, %c0_144, %c0_145, %c0_146] : memref<1x8x16x32xbf16, #tpu.memory_space<vmem>>, vector<1x8x16x32xbf16>
    %171 = vector.shape_cast %170 : vector<1x8x16x32xbf16> to vector<8x16x32xbf16>
    %172 = vector.shape_cast %169 : vector<8x16x32xbf16> to vector<1x8x16x32xbf16>
    tpu.vector_store %arg9[%c0_143, %c0_144, %c0_145, %c0_146], %172 {strides = array<i32>} : memref<1x8x16x32xbf16, #tpu.memory_space<vmem>>, vector<1x8x16x32xbf16>,
    return
  }
  func.func @transform_0(%arg0: i32) -> (i32, i32, i32, i32) {
    %c0_i32 = arith.constant 0 : i32
    %c0_i32_0 = arith.constant 0 : i32
    %c0_i32_1 = arith.constant 0 : i32
    %c0_i32_2 = arith.constant 0 : i32
    return %arg0, %c0_i32, %c0_i32_0, %c0_i32_1 : i32, i32, i32, i32
  }
  func.func @transform_1(%arg0: i32) -> (i32, i32, i32, i32) {
    %c0_i32 = arith.constant 0 : i32
    %c0_i32_0 = arith.constant 0 : i32
    %c0_i32_1 = arith.constant 0 : i32
    %c0_i32_2 = arith.constant 0 : i32
    return %arg0, %c0_i32, %c0_i32_0, %c0_i32_1 : i32, i32, i32, i32
  }
  func.func @transform_2(%arg0: i32) -> (i32, i32, i32) {
    %c0_i32 = arith.constant 0 : i32
    %c0_i32_0 = arith.constant 0 : i32
    %c0_i32_1 = arith.constant 0 : i32
    %c0_i32_2 = arith.constant 0 : i32
    return %c0_i32, %c0_i32_0, %c0_i32_1 : i32, i32, i32
  }
  func.func @transform_3(%arg0: i32) -> (i32, i32, i32, i32) {
    %c0_i32 = arith.constant 0 : i32
    %c0_i32_0 = arith.constant 0 : i32
    %c0_i32_1 = arith.constant 0 : i32
    %c0_i32_2 = arith.constant 0 : i32
    return %arg0, %c0_i32, %c0_i32_0, %c0_i32_1 : i32, i32, i32, i32
  }
  func.func @transform_4(%arg0: i32) -> (i32, i32, i32, i32) {
    %c0_i32 = arith.constant 0 : i32
    %c0_i32_0 = arith.constant 0 : i32
    %c0_i32_1 = arith.constant 0 : i32
    %c0_i32_2 = arith.constant 0 : i32
    return %arg0, %c0_i32, %c0_i32_0, %c0_i32_1 : i32, i32, i32, i32
  }
  func.func @transform_5(%arg0: i32) -> (i32, i32, i32) {
    %c0_i32 = arith.constant 0 : i32
    %c0_i32_0 = arith.constant 0 : i32
    %c0_i32_1 = arith.constant 0 : i32
    %c0_i32_2 = arith.constant 0 : i32
    return %c0_i32, %c0_i32_0, %c0_i32_1 : i32, i32, i32
  }
  func.func @transform_6(%arg0: i32) -> (i32, i32) {
    %c0_i32 = arith.constant 0 : i32
    %c0_i32_0 = arith.constant 0 : i32
    %c0_i32_1 = arith.constant 0 : i32
    return %c0_i32, %c0_i32_0 : i32, i32
  }
  func.func @transform_7(%arg0: i32) -> (i32, i32, i32, i32) {
    %c0_i32 = arith.constant 0 : i32
    %c0_i32_0 = arith.constant 0 : i32
    %c0_i32_1 = arith.constant 0 : i32
    %c0_i32_2 = arith.constant 0 : i32
    return %arg0, %c0_i32, %c0_i32_0, %c0_i32_1 : i32, i32, i32, i32
  }
  func.func @transform_8(%arg0: i32) -> (i32, i32, i32, i32) {
    %c0_i32 = arith.constant 0 : i32
    %c0_i32_0 = arith.constant 0 : i32
    %c0_i32_1 = arith.constant 0 : i32
    %c0_i32_2 = arith.constant 0 : i32
    return %arg0, %c0_i32, %c0_i32_0, %c0_i32_1 : i32, i32, i32, i32
  }
}

module attributes {stable_mosaic.version = 11 : i64} {
  func.func @_merge_head_kernel(%arg0: i32, %arg1: i32, %arg2: memref<1x128x32xbf16, #tpu.memory_space<vmem>>, %arg3: memref<1x1x32xf32, #tpu.memory_space<vmem>>, %arg4: memref<1x1x32xf32, #tpu.memory_space<vmem>>, %arg5: memref<32x64xbf16, #tpu.memory_space<vmem>>, %arg6: memref<1x128x64xf32, #tpu.memory_space<vmem>>) attributes {dimension_semantics = [#tpu.dimension_semantics<parallel>, #tpu.dimension_semantics<parallel>], iteration_bounds = array<i64: 2, 1>, scalar_prefetch = 0 : i64, scratch_operands = 0 : i64, tpu.core_type = #tpu.core_type<tc>, window_params = [{transform_indices = @transform_0, window_bounds = array<i64: 1, 128, 32>}, {transform_indices = @transform_1, window_bounds = array<i64: 1, 1, 32>}, {transform_indices = @transform_2, window_bounds = array<i64: 1, 1, 32>}, {pipeline_mode = #tpu.pipeline_mode<synchronous>, transform_indices = @transform_3, window_bounds = array<i64: 32, 64>}, {transform_indices = @transform_4, window_bounds = array<i64: 1, 128, 64>}]} {
    %c0 = arith.constant 0 : index
    %c0_0 = arith.constant 0 : index
    %c0_1 = arith.constant 0 : index
    %0 = vector.load %arg2[%c0, %c0_0, %c0_1] : memref<1x128x32xbf16, #tpu.memory_space<vmem>>, vector<1x128x32xbf16>
    %1 = vector.shape_cast %0 : vector<1x128x32xbf16> to vector<128x32xbf16>
    %2 = arith.extf %1 : vector<128x32xbf16> to vector<128x32xf32>
    %c0_2 = arith.constant 0 : index
    %c0_3 = arith.constant 0 : index
    %c0_4 = arith.constant 0 : index
    %3 = vector.load %arg3[%c0_2, %c0_3, %c0_4] : memref<1x1x32xf32, #tpu.memory_space<vmem>>, vector<1x1x32xf32>
    %4 = vector.shape_cast %3 : vector<1x1x32xf32> to vector<1x32xf32>
    %5 = vector.broadcast %4 : vector<1x32xf32> to vector<128x32xf32>
    %6 = arith.mulf %2, %5 : vector<128x32xf32>
    %c0_5 = arith.constant 0 : index
    %c0_6 = arith.constant 0 : index
    %c0_7 = arith.constant 0 : index
    %7 = vector.load %arg4[%c0_5, %c0_6, %c0_7] : memref<1x1x32xf32, #tpu.memory_space<vmem>>, vector<1x1x32xf32>
    %8 = vector.shape_cast %7 : vector<1x1x32xf32> to vector<1x32xf32>
    %9 = vector.broadcast %8 : vector<1x32xf32> to vector<128x32xf32>
    %10 = arith.addf %6, %9 : vector<128x32xf32>
    %11 = arith.truncf %10 : vector<128x32xf32> to vector<128x32xbf16>
    %c0_8 = arith.constant 0 : index
    %c0_9 = arith.constant 0 : index
    %12 = vector.load %arg5[%c0_8, %c0_9] : memref<32x64xbf16, #tpu.memory_space<vmem>>, vector<32x64xbf16>
    %cst = arith.constant dense<0.000000e+00> : vector<128x64xf32>
    %13 = tpu.matmul %11, %12, %cst {dimension_numbers = #tpu.dot_dimension_numbers<[1], [0], [0], [1], [0, 0, 1, 1], [], []>} : vector<128x32xbf16>, vector<32x64xbf16>, vector<128x64xf32> -> vector<128x64xf32>
    %c0_10 = arith.constant 0 : index
    %c0_11 = arith.constant 0 : index
    %c0_12 = arith.constant 0 : index
    %14 = vector.load %arg6[%c0_10, %c0_11, %c0_12] : memref<1x128x64xf32, #tpu.memory_space<vmem>>, vector<1x128x64xf32>
    %15 = vector.shape_cast %14 : vector<1x128x64xf32> to vector<128x64xf32>
    %16 = vector.shape_cast %13 : vector<128x64xf32> to vector<1x128x64xf32>
    tpu.vector_store %arg6[%c0_10, %c0_11, %c0_12], %16 {strides = array<i32>} : memref<1x128x64xf32, #tpu.memory_space<vmem>>, vector<1x128x64xf32>,
    return
  }
  func.func @transform_0(%arg0: i32, %arg1: i32) -> (i32, i32, i32) {
    %c0_i32 = arith.constant 0 : i32
    %c0_i32_0 = arith.constant 0 : i32
    return %arg0, %arg1, %c0_i32 : i32, i32, i32
  }
  func.func @transform_1(%arg0: i32, %arg1: i32) -> (i32, i32, i32) {
    %c0_i32 = arith.constant 0 : i32
    %c0_i32_0 = arith.constant 0 : i32
    %c0_i32_1 = arith.constant 0 : i32
    return %arg0, %c0_i32, %c0_i32_0 : i32, i32, i32
  }
  func.func @transform_2(%arg0: i32, %arg1: i32) -> (i32, i32, i32) {
    %c0_i32 = arith.constant 0 : i32
    %c0_i32_0 = arith.constant 0 : i32
    %c0_i32_1 = arith.constant 0 : i32
    return %arg0, %c0_i32, %c0_i32_0 : i32, i32, i32
  }
  func.func @transform_3(%arg0: i32, %arg1: i32) -> (i32, i32) {
    %c0_i32 = arith.constant 0 : i32
    %c0_i32_0 = arith.constant 0 : i32
    %c0_i32_1 = arith.constant 0 : i32
    return %c0_i32, %c0_i32_0 : i32, i32
  }
  func.func @transform_4(%arg0: i32, %arg1: i32) -> (i32, i32, i32) {
    %c0_i32 = arith.constant 0 : i32
    %c0_i32_0 = arith.constant 0 : i32
    return %arg0, %arg1, %c0_i32 : i32, i32, i32
  }
}

</mosaic_0001>

<bundles_post_ra>
// kernel: cos.1
= control target key start
LH: loop header
LB: loop body
LE: loop exit
PB: predicated region body
PF: predicated region fallthrough
CT: control target
= control target key end

     0   :  { %v168_v12 = vmov 683565275   ;;  %v169_v14 = vmov 2475754826   ;;  %v170_v16 = vmov 2131351028   ;;  %s245_s0 = inlined_call_operand.vmem [shape: f32[8], index: 0, kind: input, shape index: {}]   ;;  %s246_s1 = inlined_call_operand.vmem [shape: f32[8], index: 1, kind: output, shape index: {}]  }
   0x1   :  { %v188_v0 = vld [vmem:[%s245_s0] sm:$0x1]  ;;  %v171_v18 = vmov 2102212464   ;;  %v172_v20 = vmov 920167782  }
   0x2   :  { %v6_v1 = vand.u32 2139095040, %v188_v0  ;;  %v3_v3 = vand.u32 2147483647, %v188_v0  ;;  %v173_v26 = vmov 1326507024   ;;  %vm5_vm12 = vcmp.lt.s32.totalorder %v188_v0, 0 }
   0x4   :  { %v7_v2 = vshrl.u32 %v6_v1, 23  ;;  %v10_v6 = vand.u32 8388607, %v3_v3  ;;  %v174_v1 = vmov 0   ;;  %vm232_vm13 = vcmp.le.f32.partialorder %v3_v3, 0.7853982 }
   0x6   :  { %v158_v4 = vadd.s32 4294967169, %v7_v2  ;;  %v11_v9 = vor.u32 8388608, %v10_v6 }
   0x8   :  { %v13_v5 = vadd.s32 1, %v158_v4  ;;  %v197_v28 = vshll.u32 %v11_v9, 8 }
   0xa   :  { %vm14_vm0 = vcmp.gt.s32.totalorder %v13_v5, 0  ;;  %v52_v40 = vand.u32 65535, %v197_v28  ;;  %v53_v41 = vshrl.u32 %v197_v28, 16 }
   0xb   :  { %v15_v7 = vsel %vm14_vm0, %v13_v5, 0 }
   0xc   :  { %v17_v8 = vand.u32 31, %v15_v7  ;;  %v194_v10 = vshrl.u32 %v15_v7, 5 }
   0xe   :  { %v18_v11 = vsub.s32 32, %v17_v8  ;;  %v20_v13 = vshll.u32 %v168_v12, %v17_v8  ;;  %v23_v15 = vshll.u32 %v169_v14, %v17_v8  ;;  %v26_v17 = vshll.u32 %v170_v16, %v17_v8 }
   0xf   :  { %v29_v19 = vshll.u32 %v171_v18, %v17_v8  ;;  %v32_v21 = vshll.u32 %v172_v20, %v17_v8  ;;  %vm35_vm1 = vcmp.lt.s32.totalorder %v194_v10, 1  ;;  %vm38_vm2 = vcmp.lt.s32.totalorder %v194_v10, 4 }
  0x10   :  { %v21_v22 = vshrl.u32 %v169_v14, %v18_v11  ;;  %v24_v23 = vshrl.u32 %v170_v16, %v18_v11  ;;  %v27_v24 = vshrl.u32 %v171_v18, %v18_v11  ;;  %v30_v25 = vshrl.u32 %v172_v20, %v18_v11 }
  0x11   :  { %v33_v27 = vshrl.u32 %v173_v26, %v18_v11  ;;  %vm37_vm3 = vcmp.lt.s32.totalorder %v194_v10, 3  ;;  %vm36_vm4 = vcmp.lt.s32.totalorder %v194_v10, 2  ;;  %v19_v48 = vshrl.u32 %v168_v12, %v18_v11 }
  0x12   :  { %v22_v29 = vor.u32 %v21_v22, %v20_v13  ;;  %v25_v30 = vor.u32 %v24_v23, %v23_v15  ;;  %v28_v31 = vor.u32 %v27_v24, %v26_v17  ;;  %v31_v32 = vor.u32 %v30_v25, %v29_v19 }
  0x13   :  { %v34_v33 = vor.u32 %v33_v27, %v32_v21 }
  0x14   :  { %v43_v34 = vsel %vm35_vm1, %v22_v29, %v25_v30  ;;  %v47_v35 = vsel %vm35_vm1, %v25_v30, %v28_v31  ;;  %v44_v36 = vsel %vm38_vm2, %v31_v32, 920167782  ;;  %v39_v61 = vsel %vm35_vm1, %v19_v48, %v22_v29 }
  0x15   :  { %v48_v37 = vsel %vm38_vm2, %v34_v33, 1326507024  ;;  %v45_v38 = vsel %vm37_vm3, %v28_v31, %v44_v36  ;;  %v40_v63 = vsel %vm38_vm2, %v28_v31, 2102212464  ;;  %vm146_vm1 = vweird.f32 %v188_v0 }
  0x16   :  { %v49_v39 = vsel %vm37_vm3, %v31_v32, %v48_v37  ;;  %v46_v42 = vsel %vm36_vm4, %v43_v34, %v45_v38  ;;  %v41_v12 = vsel %vm37_vm3, %v25_v30, %v40_v63 }
  0x17   :  { %v50_v43 = vsel %vm36_vm4, %v47_v35, %v49_v39  ;;  %v76_v46 = vand.u32 65535, %v46_v42  ;;  %v77_v47 = vshrl.u32 %v46_v42, 16  ;;  %v42_v10 = vsel %vm36_vm4, %v39_v61, %v41_v12 }
  0x18   :  { %v54_v44 = vand.u32 65535, %v50_v43  ;;  %v55_v45 = vshrl.u32 %v50_v43, 16  ;;  %v96_v23 = vmul.u32 %v197_v28, %v42_v10 }
  0x19   :  { %v78_v52 = vmul.u32 %v76_v46, %v52_v40  ;;  %v79_v53 = vmul.u32 %v77_v47, %v52_v40  ;;  %v80_v54 = vmul.u32 %v76_v46, %v53_v41  ;;  %v81_v58 = vmul.u32 %v77_v47, %v53_v41 }
  0x1a   :  { %v56_v49 = vmul.u32 %v54_v44, %v52_v40  ;;  %v57_v50 = vmul.u32 %v55_v45, %v52_v40  ;;  %v58_v51 = vmul.u32 %v54_v44, %v53_v41  ;;  %v59_v55 = vmul.u32 %v55_v45, %v53_v41 }
  0x1b   :  { %v82_v59 = vshll.u32 %v79_v53, 16  ;;  %v84_v60 = vshll.u32 %v80_v54, 16  ;;  %v83_v9 = vshrl.u32 %v79_v53, 16  ;;  %v85_v16 = vshrl.u32 %v80_v54, 16 }
  0x1c   :  { %v60_v56 = vshll.u32 %v57_v50, 16  ;;  %v62_v57 = vshll.u32 %v58_v51, 16  ;;  %v61_v5 = vshrl.u32 %v57_v50, 16  ;;  %v63_v13 = vshrl.u32 %v58_v51, 16 }
  0x1d   :  { %vm86_vm6 = vc.u32 %v78_v52, %v82_v59  ;;  %v88_v4 = vadd.s32 %v82_v59, %v78_v52 }
  0x1e   :  { %vm64_vm5 = vc.u32 %v56_v49, %v60_v56  ;;  %v66_v62 = vadd.s32 %v60_v56, %v56_v49  ;;  %v87_v7 = vsel %vm86_vm6, 1, %v174_v1 }
  0x1f   :  { %v65_v2 = vsel %vm64_vm5, 1, %v174_v1  ;;  %v89_v11 = vadd.s32 %v87_v7, %v81_v58  ;;  %vm90_vm8 = vc.u32 %v88_v4, %v84_v60  ;;  %v92_v19 = vadd.s32 %v88_v4, %v84_v60 }
  0x20   :  { %v67_v6 = vadd.s32 %v65_v2, %v59_v55  ;;  %vm68_vm7 = vc.u32 %v66_v62, %v62_v57  ;;  %v91_v15 = vsel %vm90_vm8, 1, %v174_v1 }
  0x21   :  { %v69_v8 = vsel %vm68_vm7, 1, %v174_v1  ;;  %v93_v17 = vadd.s32 %v91_v15, %v89_v11 }
  0x22   :  { %v71_v14 = vadd.s32 %v69_v8, %v67_v6 }
  0x23   :  { %v94_v20 = vadd.s32 %v93_v17, %v83_v9 }
  0x24   :  { %v72_v18 = vadd.s32 %v71_v14, %v61_v5 }
  0x25   :  { %v95_v22 = vadd.s32 %v94_v20, %v85_v16 }
  0x26   :  { %v73_v21 = vadd.s32 %v72_v18, %v63_v13 }
  0x27   :  { %v99_v24 = vadd.s32 1, %v95_v22 }
  0x28   :  { %vm98_vm9 = vc.u32 %v73_v21, %v92_v19  ;;  %v97_v35 = vadd.s32 %v92_v19, %v73_v21 }
  0x29   :  { %v100_v25 = vsel %vm98_vm9, %v99_v24, %v95_v22 }
  0x2a   :  { %v101_v26 = vadd.s32 %v100_v25, %v96_v23 }
  0x2c   :  { %v102_v27 = vadd.s32 536870912, %v101_v26 }
  0x2e   :  { %v103_v28 = vshrl.u32 %v102_v27, 30 }
  0x30   :  { %v104_v29 = vshll.u32 %v103_v28, 30  ;;  %v127_v50 = vsub.s32 4, %v103_v28 }
  0x32   :  { %v105_v30 = vsub.s32 %v101_v26, %v104_v29  ;;  %v128_v55 = vsel %vm5_vm12, %v127_v50, %v103_v28 }
  0x33   :  { %v130_v58 = vsel %vm232_vm13, 0, %v128_v55 }
  0x34   :  { %vm106_vm10 = vcmp.lt.s32.totalorder %v105_v30, 0  ;;  %v107_v31 = vsub.s32 0, %v105_v30  ;;  %v147_v63 = vand.u32 3, %v130_v58 }
  0x36   :  { %v108_v32 = vsel %vm106_vm10, %v107_v31, %v105_v30  ;;  %vm152_vm14 = vcmp.eq.s32.totalorder %v147_v63, 2  ;;  %vm149_vm15 = vcmp.eq.s32.totalorder %v147_v63, 0  ;;  %vm148_vm0 = vcmp.lt.s32.totalorder %v147_v63, 2 }
  0x37   :  { %v109_v33 = vclz %v108_v32 }
  0x39   :  { %v159_v34 = vadd.s32 4294967294, %v109_v33 }
  0x3b   :  { %vm160_vm11 = vcmp.lt.s32.totalorder %v159_v34, 0 }
  0x3c   :  { %v112_v36 = vsel %vm160_vm11, 0, %v159_v34 }
  0x3d   :  { %v113_v37 = vsub.s32 32, %v112_v36  ;;  %v114_v38 = vshll.u32 %v105_v30, %v112_v36  ;;  %v117_v39 = vsub.s32 4294967266, %v112_v36 }
  0x3f   :  { %v115_v40 = vshrl.u32 %v97_v35, %v113_v37  ;;  %v118_v41 = vadd.s32 127, %v117_v39 }
  0x41   :  { %v116_v42 = vor.u32 %v115_v40, %v114_v38  ;;  %v119_v43 = vshll.u32 %v118_v41, 23 }
  0x43   :  { %v120_v44 = vor.u32 4788187, %v119_v43  ;;  %v123_v45 = vcvt.s32.f32 %v116_v42 }
  0x45   :  { %v121_v46 = vand.u32 2147483647, %v120_v44 }
  0x47   :  { %v124_v47 = vmul.f32 %v123_v45, %v121_v46 }
  0x49   :  { %v125_v48 = vxor.u32 2147483648, %v124_v47 }
  0x4b   :  { %v126_v49 = vsel %vm5_vm12, %v125_v48, %v124_v47 }
  0x4c   :  { %v129_v51 = vsel %vm232_vm13, %v188_v0, %v126_v49 }
  0x4d   :  { %v131_v52 = vmul.f32 %v129_v51, %v129_v51 }
  0x4f   :  { %v132_v53 = vmul.f32 -0.001358992, %v131_v52  ;;  %v139_v54 = vmul.f32 -0.00019511016, %v131_v52 }
  0x51   :  { %v133_v56 = vadd.f32 0.041655596, %v132_v53  ;;  %v140_v57 = vadd.f32 0.008332121, %v139_v54 }
  0x53   :  { %v134_v59 = vmul.f32 %v133_v56, %v131_v52  ;;  %v141_v60 = vmul.f32 %v140_v57, %v131_v52 }
  0x55   :  { %v135_v61 = vadd.f32 -0.4999988, %v134_v59  ;;  %v142_v62 = vadd.f32 -0.16666654, %v141_v60 }
  0x57   :  { %v136_v1 = vmul.f32 %v135_v61, %v131_v52  ;;  %v143_v2 = vmul.f32 %v142_v62, %v131_v52 }
  0x59   :  { %v137_v4 = vadd.f32 1.0, %v136_v1  ;;  %v144_v5 = vadd.f32 1.0, %v143_v2 }
  0x5b   :  { %v145_v6 = vmul.f32 %v144_v5, %v129_v51  ;;  %v153_v7 = vxor.u32 2147483648, %v137_v4 }
  0x5d   :  { %v150_v8 = vxor.u32 2147483648, %v145_v6  ;;  %v154_v9 = vsel %vm152_vm14, %v153_v7, %v145_v6 }
  0x5f   :  { %v151_v0 = vsel %vm149_vm15, %v137_v4, %v150_v8 }
  0x60   :  { %v155_v11 = vsel %vm148_vm0, %v151_v0, %v154_v9 }
  0x61   :  { %v156_v12 = vsel %vm146_vm1, nan, %v155_v11 }
  0x62   :  { %157 = vst [vmem:[%s246_s1] sm:$0x1] %v156_v12 }

// kernel: _lambda_.5
= control target key start
LH: loop header
LB: loop body
LE: loop exit
PB: predicated region body
PF: predicated region fallthrough
CT: control target
= control target key end

     0   :  { %s1780_s0 = inlined_call_operand.vmem [shape: f32[2,8,64], index: 0, kind: input, shape index: {}]   ;;  %s1781_s1 = inlined_call_operand.vmem [shape: f32[2,16,64], index: 1, kind: input, shape index: {}]   ;;  %s1782_s2 = inlined_call_operand.vmem [shape: f32[8,1], index: 2, kind: input, shape index: {}]   ;;  %s1783_s3 = inlined_call_operand.vmem [shape: bf16[64,64], index: 3, kind: input, shape index: {}]   ;;  %s1784_s4 = inlined_call_operand.vmem [shape: f32[1,64], index: 4, kind: input, shape index: {}]   ;;  %s1785_s5 = inlined_call_operand.vmem [shape: f32[1,64], index: 5, kind: input, shape index: {}]   ;;  %s1786_s6 = inlined_call_operand.vmem [shape: bf16[64,128], index: 6, kind: input, shape index: {}]   ;;  %s1787_s7 = inlined_call_operand.vmem [shape: f32[1,128], index: 7, kind: input, shape index: {}]   ;;  %s1788_s8 = inlined_call_operand.vmem [shape: bf16[64,32], index: 8, kind: input, shape index: {}]   ;;  %s1789_s9 = inlined_call_operand.vmem [shape: f32[1,32], index: 9, kind: input, shape index: {}]   ;;  %s1790_s10 = inlined_call_operand.vmem [shape: bf16[32,96], index: 10, kind: input, shape index: {}]   ;;  %s1791_s11 = inlined_call_operand.vmem [shape: bf16[64,64], index: 11, kind: input, shape index: {}]   ;;  %s1792_s12 = inlined_call_operand.vmem [shape: f32[1,64], index: 12, kind: input, shape index: {}]   ;;  %s1793_s13 = inlined_call_operand.vmem [shape: f32[1,64], index: 13, kind: input, shape index: {}]   ;;  %s1794_s14 = inlined_call_operand.vmem [shape: bf16[64,128], index: 14, kind: input, shape index: {}]   ;;  %s1795_s15 = inlined_call_operand.vmem [shape: f32[1,128], index: 15, kind: input, shape index: {}]   ;;  %s1796_s16 = inlined_call_operand.vmem [shape: bf16[64,32], index: 16, kind: input, shape index: {}]   ;;  %s1797_s17 = inlined_call_operand.vmem [shape: f32[1,32], index: 17, kind: input, shape index: {}]   ;;  %s1798_s18 = inlined_call_operand.vmem [shape: bf16[32,96], index: 18, kind: input, shape index: {}]   ;;  %s1799_s19 = inlined_call_operand.vmem [shape: bf16[2,8,96], index: 19, kind: output, shape index: {0}]   ;;  %s1800_s20 = inlined_call_operand.vmem [shape: bf16[2,16,96], index: 20, kind: output, shape index: {1}]  }
   0x1   :  { %1802 = sst [smem:[#allocation2_spill]] %s1780_s0 }
   0x2   :  { %1803 = sst [smem:[#allocation3_spill]] %s1781_s1  ;;  %s1609_s1 = smov 0  }
   0x3   :  { %1804 = sst [smem:[#allocation4_spill]] %s1782_s2 }
   0x4   :  { %1805 = sst [smem:[#allocation5_spill]] %s1783_s3 }
   0x5   :  { %1806 = sst [smem:[#allocation6_spill]] %s1784_s4 }
   0x6 LB: > { %s1296_s22 = sadd.s32 4294967295, %s1499_s1   ;;  %p1300_p0 = scmp.ge.s32.totalorder %s1499_s1, 1  ;;  %s1499_s1 = sphi %s1609_s1, %s31_s1  }
   0x7   : > { %p574_p1 = scmp.lt.s32.totalorder %s1499_s1, 3 }
   0x9   : > { %p575_p2 = pnand %p1300_p0, %p574_p1 }
   0xa   : > { %s1807_s2 = sld [smem:[#allocation4_spill]] (!%p575_p2)  ;;  %p640_p3 = scmp.lt.s32.totalorder (!%p575_p2), %s1296_s22, 1 }
   0xb   : > { %578 = sbr.rel (%p575_p2) target bundleno = 1878 (0x756), region = 96  ;;  %s1808_s26 = sld [smem:[#allocation5_spill]] (!%p575_p2) }
  0x10   : > { %v661_v0 = vld [vmem:[%s1807_s2] sm:$0xff]  ;;  %v1501_v2 = vmov 0   ;;  %s1813_s22 = smov (!%p640_p3, %s1296_s22), 1  ;;  %s1809_s2 = sld [smem:[#allocation2_spill]]  ;;  %vm705_vm0 = vcmask 523264   ;;  %v1502_v14 = vmov 64.0  }
  0x11   : > { %v1434_v1 = vld [vmem:[%s1808_s26 + $0x18] sm:$0xff]  ;;  %1470 = vset.pattern.permute.xlu0 %v1501_v2  ;;  %v1433_v3 = vld [vmem:[%s1808_s26 + $0x10] sm:$0xff]  ;;  %v1432_v4 = vld [vmem:[%s1808_s26 + $0x8] sm:$0xff]  ;;  %s1301_s21 = sshll.u32 %s1813_s22, 3  ;;  %1479 = vrcp.f32 %v1502_v14  ;;  %vm898_vm5 = vcmask 261120   ;;  %s1429_s0 = sshll.u32 %s1813_s22, 4 }
  0x12   : > { %664 = vperm.xlu0 %1470, %v661_v0   ;;  %713 = vmatpush.bf16.msra.mxu0 %v1434_v1  ;;  %v1431_v5 = vld [vmem:[%s1808_s26] sm:$0xff]  ;;  %v1438_v26 = vld [vmem:[%s1786_s6 + $0x18] sm:$0xff]  ;;  %v1437_v27 = vld [vmem:[%s1786_s6 + $0x10] sm:$0xff]  ;;  %s1304_s27 = sshll.u32 %s1813_s22, 2  ;;  %vm916_vm6 = vcmask 781312  }
  0x13   : > { %805 = vmatpush.bf16.msra.mxu1 %v1438_v26  ;;  %v1436_v28 = vld [vmem:[%s1786_s6 + $0x8] sm:$0xff]  ;;  %v1435_v29 = vld [vmem:[%s1786_s6] sm:$0xff]  ;;  %v1442_v46 = vld [vmem:[%s1788_s8 + $0x18] sm:$0xff]  ;;  %s652_s29 = scalar_lea.vmem %s1799_s19, %s1304_s27 }
  0x14   : > { %v1472_v42 = vld [vmem:[%s1785_s5] ss:$0 sm:$0xff]  ;;  %872 = vmatpush.bf16.msra.mxu2 %v1442_v46  ;;  %v1441_v47 = vld [vmem:[%s1788_s8 + $0x10] sm:$0xff]  ;;  %v1440_v48 = vld [vmem:[%s1788_s8 + $0x8] sm:$0xff] }
  0x15   : > { %v1473_v49 = vld [vmem:[%s1787_s7] ss:$0 sm:$0xff]  ;;  %v1444_v56 = vld [vmem:[%s1790_s10 + $0x8] sm:$0xff] }
  0x16   : > { %714 = vmatpush.bf16.msra.mxu0 %v1433_v3  ;;  %s643_s25 = scalar_lea.vmem %s1809_s2, %s1301_s21  ;;  %v1439_v54 = vld [vmem:[%s1788_s8] sm:$0xff]  ;;  %908 = vmatpush.bf16.msra.mxu3 %v1444_v56  ;;  %s1811_s2 = sld [smem:[#allocation3_spill]] }
  0x17   : > { %v659_v6 = vld [vmem:[%s643_s25] sm:$0xff]  ;;  %v1480_v15 = vpop.eup %1479  ;;  %806 = vmatpush.bf16.msra.mxu1 %v1437_v27  ;;  %s1810_s25 = sld [smem:[#allocation6_spill]] }
  0x18   : > { %v660_v7 = vmul.f32 0.0625, %v659_v6  ;;  %v726_v16 = vmul.f32 64.0, %v1480_v15  ;;  %vm730_vm1 = vweird.f32 %v1480_v15  ;;  %873 = vmatpush.bf16.msra.mxu2 %v1441_v47  ;;  %v1443_v3 = vld [vmem:[%s1790_s10] sm:$0xff]  ;;  %v1446_v6 = vld [vmem:[%s1791_s11 + $0x8] sm:$0xff] }
  0x1a   : > { %715 = vmatpush.bf16.msra.mxu0 %v1432_v4  ;;  %v727_v17 = vsub.f32 1.0, %v726_v16  ;;  %909 = vmatpush.bf16.msra.mxu3 %v1443_v3  ;;  %v1448_v4 = vld [vmem:[%s1791_s11 + $0x18] sm:$0xff] }
  0x1b   : > { %807 = vmatpush.bf16.msra.mxu1 %v1436_v28 }
  0x1c   : > { %v728_v18 = vmul.f32 %v1480_v15, %v727_v17  ;;  %874 = vmatpush.bf16.msra.mxu2 %v1440_v48  ;;  %s648_s3 = scalar_lea.vmem %s1811_s2, %s1429_s0 }
  0x1d   : > { %v1471_v39 = vld [vmem:[%s1810_s25] ss:$0 sm:$0xff]  ;;  %s1503_s25 = smov 64   ;;  %v669_v14 = vld [vmem:[%s648_s3 + $0x8] sm:$0xff] }
  0x1e   : > { %716 = vmatpush.bf16.msra.mxu0 %v1431_v5  ;;  %v729_v19 = vadd.f32 %v1480_v15, %v728_v18  ;;  %958 = vmatpush.bf16.msrb.mxu3 %v1448_v4  ;;  %v1447_v5 = vld [vmem:[%s1791_s11 + $0x10] sm:$0xff]  ;;  %v671_v16 = vmul.f32 0.125, %v669_v14  ;;  %v1477_v4 = vld [vmem:[%s1795_s15] ss:$0 sm:$0xff] }
  0x1f   : > { %808 = vmatpush.bf16.msra.mxu1 %v1435_v29  ;;  %v1453_v14 = vld [vmem:[%s1796_s16] sm:$0xff] }
  0x20   : > { %v1642_v20 = vsel %vm730_vm1, %v1480_v15, %v729_v19  ;;  %875 = vmatpush.bf16.msra.mxu2 %v1439_v54 }
  0x22   : > { %959 = vmatpush.bf16.msrb.mxu3 %v1447_v5 }
  0x26   : > { %960 = vmatpush.bf16.msrb.mxu3 %v1446_v6 }
  0x84   : > { %v665_v8 = vpop.permute.xlu0 %664 }
  0x85   : > { %v667_v9 = vmul.f32 %v665_v8, %v660_v7  ;;  %v1445_v7 = vld [vmem:[%s1791_s11] sm:$0xff] }
  0x86   : > { %961 = vmatpush.bf16.msrb.mxu3 %v1445_v7  ;;  %v1474_v8 = vld [vmem:[%s1789_s9] ss:$0 sm:$0xff] }
  0x87   : > { %v672_v10 = vpack.c.bf16 %v667_v9, %v667_v9 }
  0x89   : > { %1323 = vmatmul.msk.bf16.vlgmr.msra.gmra.mxu0 %vm705_vm0, %v672_v10 }
 0x106   : > { %v718_v11 = vpop.f32.mrf.mxu0 }
 0x107   : > { %v722_v12 = vsel %vm705_vm0, %v718_v11, 0.0 }
 0x108   : > { %723 = vadd.xlane.f32.xlu0 %v722_v12 }
 0x10e   : > { %v720_v13 = vpop.f32.mrf.mxu0 }
 0x10f   : > { %v668_v13 = vld [vmem:[%s648_s3] sm:$0xff] }
 0x110   : > { %v670_v15 = vmul.f32 0.125, %v668_v13 }
 0x112   : > { %v918_v17 = vpack.c.bf16 %v671_v16, %v670_v15 }
 0x17b   : > { %v724_v21 = vpop.xlane.xlu0 %723 }
 0x17c   : > { %v732_v22 = vmul.f32 %v1642_v20, %v724_v21 }
 0x17e   : > { %v733_v23 = vsub.f32 %v718_v11, %v732_v22 }
 0x180   : > { %v734_v24 = vmul.f32 %v733_v23, %v733_v23 }
 0x182   : > { %v735_v25 = vsel %vm705_vm0, %v734_v24, 0.0 }
 0x183   : > { %736 = vadd.xlane.f32.xlu1 %v735_v25 }
 0x1f6   : > { %v737_v30 = vpop.xlane.xlu1 %736 }
 0x1f7   : > { %v738_v31 = vmul.f32 %v737_v30, %v1642_v20 }
 0x1f9   : > { %v739_v32 = vadd.f32 1e-05, %v738_v31 }
 0x1fb   : > { %1481 = vrsqrt.f32 %v739_v32  ;;  %vm746_vm3 = vweird.f32 %v739_v32 }
 0x201   : > { %v1482_v33 = vpop.eup %1481 }
 0x202   : > { %v741_v34 = vmul.f32 %v1482_v33, %v739_v32  ;;  %vm747_vm2 = vweird.f32 %v1482_v33 }
 0x203   : > { %vm748_vm4 = vmor %vm746_vm3, %vm747_vm2 }
 0x204   : > { %v742_v35 = vmul.f32 %v1482_v33, %v741_v34 }
 0x206   : > { %v743_v36 = vmul.f32 0.5, %v742_v35 }
 0x208   : > { %v744_v37 = vsub.f32 1.5, %v743_v36  ;;  %v1452_v36 = vld [vmem:[%s1794_s14 + $0x18] sm:$0xff] }
 0x209   : > { %1068 = vmatpush.bf16.msrb.mxu0 %v1452_v36 }
 0x20a   : > { %v745_v38 = vmul.f32 %v1482_v33, %v744_v37  ;;  %v1451_v37 = vld [vmem:[%s1794_s14 + $0x10] sm:$0xff] }
 0x20c   : > { %v749_v40 = vsel %vm748_vm4, %v1482_v33, %v745_v38  ;;  %v1450_v38 = vld [vmem:[%s1794_s14 + $0x8] sm:$0xff] }
 0x20d   : > { %v750_v41 = vmul.f32 %v749_v40, %v733_v23  ;;  %1069 = vmatpush.bf16.msrb.mxu0 %v1451_v37  ;;  %v1449_v40 = vld [vmem:[%s1794_s14] sm:$0xff] }
 0x20f   : > { %v755_v43 = vmul.f32 %v1471_v39, %v750_v41 }
 0x211   : > { %v760_v44 = vadd.f32 %v1472_v42, %v755_v43  ;;  %1070 = vmatpush.bf16.msrb.mxu0 %v1450_v38  ;;  %v1457_v38 = vld [vmem:[%s1798_s18] sm:$0xff] }
 0x213   : > { %v761_v45 = vpack.c.bf16 %v760_v44, %v760_v44 }
 0x215   : > { %1340 = vmatmul.msk.bf16.vlgmr.msra.gmra.mxu1 %vm705_vm0, %v761_v45  ;;  %1071 = vmatpush.bf16.msrb.mxu0 %v1449_v40  ;;  %v1478_v40 = vld [vmem:[%s1797_s17] ss:$0 sm:$0xff] }
 0x292   : > { %v810_v50 = vpop.f32.mrf.mxu1 }
 0x293   : > { %v811_v51 = vadd.f32 %v1473_v49, %v810_v50 }
 0x295   : > { %824 = vrot.lane.b32.xlu1 %v811_v51, %s1503_s25  ;;  %v815_v53 = vmul.f32 0.044715, %v811_v51  ;;  %v814_v62 = vmul.f32 0.5, %v811_v51 }
 0x297   : > { %v816_v55 = vmul.f32 %v815_v53, %v811_v51 }
 0x299   : > { %v817_v57 = vmul.f32 %v816_v55, %v811_v51 }
 0x29a   : > { %v812_v52 = vpop.f32.mrf.mxu1 }
 0x29b   : > { %v818_v58 = vadd.f32 %v817_v57, %v811_v51 }
 0x29d   : > { %v819_v59 = vmul.f32 0.7978846, %v818_v58 }
 0x29f   : > { %1483 = vtanh.f32 %v819_v59 }
 0x2a5   : > { %v1484_v60 = vpop.eup %1483 }
 0x2a6   : > { %v821_v61 = vadd.f32 1.0, %v1484_v60 }
 0x2a8   : > { %v822_v63 = vmul.f32 %v821_v61, %v814_v62 }
 0x307   : > { %v825_v0 = vpop.permute.xlu1 %824 }
 0x308   : > { %v827_v1 = vmul.f32 %v825_v0, %v822_v63  ;;  %v1476_v63 = vld [vmem:[%s1793_s13] ss:$0 sm:$0xff] }
 0x30a   : > { %v828_v2 = vpack.c.bf16 %v827_v1, %v827_v1 }
 0x30c   : > { %1357 = vmatmul.msk.bf16.vlgmr.msra.gmra.mxu2 %vm705_vm0, %v828_v2 }
 0x38f   : > { %v877_v9 = vpop.f32.mrf.mxu2 }
 0x390   : > { %v878_v10 = vadd.f32 %v1474_v8, %v877_v9  ;;  %v1456_v9 = vld [vmem:[%s1796_s16 + $0x18] sm:$0xff] }
 0x391   : > { %1150 = vmatpush.bf16.msrb.mxu1 %v1456_v9 }
 0x392   : > { %v881_v11 = vpack.c.bf16 %v878_v10, %v878_v10  ;;  %v1455_v10 = vld [vmem:[%s1796_s16 + $0x10] sm:$0xff] }
 0x394   : > { %1366 = vmatmul.msk.bf16.vlgmr.msra.gmra.mxu3 %vm898_vm5, %v881_v11  ;;  %v1454_v11 = vld [vmem:[%s1796_s16 + $0x8] sm:$0xff] }
 0x395   : > { %1151 = vmatpush.bf16.msrb.mxu1 %v1455_v10 }
 0x397   : > { %v879_v12 = vpop.f32.mrf.mxu2 }
 0x399   : > { %1152 = vmatpush.bf16.msrb.mxu1 %v1454_v11 }
 0x39d   : > { %1153 = vmatpush.bf16.msrb.mxu1 %v1453_v14 }
 0x3a4   : > { %1383 = vmatmul.msk.bf16.vlgmr.msrb.gmra.mxu3 %vm705_vm0, %v918_v17 }
 0x417   : > { %v911_v18 = vpop.f32.mrf.mxu3 }
 0x418   : > { %v915_v19 = vpack.c.bf16 %v911_v18, %v911_v18  ;;  %v1458_v18 = vld [vmem:[%s1798_s18 + $0x8] sm:$0xff] }
 0x419   : > { %1186 = vmatpush.bf16.msrb.mxu2 %v1458_v18 }
 0x41a   : > { %917 = vst.msk [vmem:[%s652_s29] sm:$0xf] %vm916_vm6, %v915_v19  ;;  %s657_s29 = scalar_lea.vmem %s1800_s20, %s1301_s21 }
 0x41d   : > { %1187 = vmatpush.bf16.msrb.mxu2 %v1457_v38 }
 0x41f   : > { %v913_v21 = vpop.f32.mrf.mxu3 }
 0x427   : > { %v963_v22 = vpop.f32.mrf.mxu3 }
 0x428   : > { %v968_v23 = vsel %vm705_vm0, %v963_v22, 0.0 }
 0x429   : > { %969 = vadd.xlane.f32.xlu2 %v968_v23 }
 0x42f   : > { %v965_v24 = vpop.f32.mrf.mxu3 }
 0x430   : > { %v971_v25 = vsel %vm705_vm0, %v965_v24, 0.0 }
 0x431   : > { %972 = vadd.xlane.f32.xlu2 %v971_v25 }
 0x49c   : > { %v970_v26 = vpop.xlane.xlu2 %969 }
 0x49d   : > { %v974_v27 = vmul.f32 %v970_v26, %v1642_v20 }
 0x49f   : > { %v976_v28 = vsub.f32 %v963_v22, %v974_v27 }
 0x4a1   : > { %v978_v29 = vmul.f32 %v976_v28, %v976_v28 }
 0x4a3   : > { %v980_v30 = vsel %vm705_vm0, %v978_v29, 0.0 }
 0x4a4   : > { %981 = vadd.xlane.f32.xlu2 %v980_v30  ;;  %v973_v31 = vpop.xlane.xlu2 %972 }
 0x4a5   : > { %v975_v32 = vmul.f32 %v973_v31, %v1642_v20 }
 0x4a7   : > { %v977_v33 = vsub.f32 %v965_v24, %v975_v32 }
 0x4a9   : > { %v979_v34 = vmul.f32 %v977_v33, %v977_v33 }
 0x4ab   : > { %v983_v35 = vsel %vm705_vm0, %v979_v34, 0.0 }
 0x4ac   : > { %984 = vadd.xlane.f32.xlu2 %v983_v35 }
 0x517   : > { %v982_v39 = vpop.xlane.xlu2 %981 }
 0x518   : > { %v986_v41 = vmul.f32 %v982_v39, %v1642_v20 }
 0x51a   : > { %v988_v42 = vadd.f32 1e-05, %v986_v41 }
 0x51c   : > { %1485 = vrsqrt.f32 %v988_v42  ;;  %vm996_vm8 = vweird.f32 %v988_v42 }
 0x51f   : > { %v985_v43 = vpop.xlane.xlu2 %984 }
 0x520   : > { %v987_v44 = vmul.f32 %v985_v43, %v1642_v20  ;;  %v1475_v20 = vld [vmem:[%s1792_s12] ss:$0 sm:$0xff] }
 0x522   : > { %v1486_v45 = vpop.eup %1485  ;;  %v989_v46 = vadd.f32 1e-05, %v987_v44 }
 0x523   : > { %v991_v47 = vmul.f32 %v1486_v45, %v988_v42  ;;  %vm997_vm7 = vweird.f32 %v1486_v45 }
 0x524   : > { %1487 = vrsqrt.f32 %v989_v46  ;;  %vm998_vm9 = vmor %vm996_vm8, %vm997_vm7  ;;  %vm1006_vm11 = vweird.f32 %v989_v46 }
 0x525   : > { %v992_v48 = vmul.f32 %v1486_v45, %v991_v47 }
 0x527   : > { %v993_v49 = vmul.f32 0.5, %v992_v48 }
 0x529   : > { %v994_v50 = vsub.f32 1.5, %v993_v49 }
 0x52a   : > { %v1488_v51 = vpop.eup %1487 }
 0x52b   : > { %v995_v52 = vmul.f32 %v1486_v45, %v994_v50  ;;  %v1001_v53 = vmul.f32 %v1488_v51, %v989_v46  ;;  %vm1007_vm10 = vweird.f32 %v1488_v51 }
 0x52c   : > { %vm1008_vm12 = vmor %vm1006_vm11, %vm1007_vm10 }
 0x52d   : > { %v1002_v54 = vmul.f32 %v1488_v51, %v1001_v53  ;;  %v999_v55 = vsel %vm998_vm9, %v1486_v45, %v995_v52 }
 0x52e   : > { %v1010_v58 = vmul.f32 %v999_v55, %v976_v28 }
 0x52f   : > { %v1003_v56 = vmul.f32 0.5, %v1002_v54 }
 0x530   : > { %v1016_v62 = vmul.f32 %v1475_v20, %v1010_v58 }
 0x531   : > { %v1004_v57 = vsub.f32 1.5, %v1003_v56 }
 0x532   : > { %v1022_v1 = vadd.f32 %v1476_v63, %v1016_v62 }
 0x533   : > { %v1005_v59 = vmul.f32 %v1488_v51, %v1004_v57 }
 0x535   : > { %v1009_v60 = vsel %vm1008_vm12, %v1488_v51, %v1005_v59 }
 0x536   : > { %v1011_v61 = vmul.f32 %v1009_v60, %v977_v33 }
 0x538   : > { %v1017_v0 = vmul.f32 %v1475_v20, %v1011_v61 }
 0x53a   : > { %v1023_v2 = vadd.f32 %v1476_v63, %v1017_v0 }
 0x53c   : > { %v1024_v3 = vpack.c.bf16 %v1023_v2, %v1022_v1 }
 0x53e   : > { %1400 = vmatmul.msk.bf16.vlgmr.msrb.gmra.mxu0 %vm705_vm0, %v1024_v3 }
 0x5bb   : > { %v1073_v5 = vpop.f32.mrf.mxu0 }
 0x5bc   : > { %v1074_v6 = vadd.f32 %v1477_v4, %v1073_v5 }
 0x5be   : > { %1098 = vrot.lane.b32.xlu2 %v1074_v6, %s1503_s25  ;;  %v1080_v12 = vmul.f32 0.044715, %v1074_v6  ;;  %v1078_v29 = vmul.f32 0.5, %v1074_v6 }
 0x5c0   : > { %v1082_v15 = vmul.f32 %v1080_v12, %v1074_v6 }
 0x5c2   : > { %v1084_v17 = vmul.f32 %v1082_v15, %v1074_v6 }
 0x5c3   : > { %v1075_v7 = vpop.f32.mrf.mxu0 }
 0x5c4   : > { %v1076_v8 = vadd.f32 %v1477_v4, %v1075_v7  ;;  %v1086_v21 = vadd.f32 %v1084_v17, %v1074_v6 }
 0x5c6   : > { %1100 = vrot.lane.b32.xlu1 %v1076_v8, %s1503_s25  ;;  %v1081_v13 = vmul.f32 0.044715, %v1076_v8  ;;  %v1088_v23 = vmul.f32 0.7978846, %v1086_v21  ;;  %v1079_v30 = vmul.f32 0.5, %v1076_v8 }
 0x5c8   : > { %v1083_v16 = vmul.f32 %v1081_v13, %v1076_v8  ;;  %1489 = vtanh.f32 %v1088_v23 }
 0x5ca   : > { %v1085_v19 = vmul.f32 %v1083_v16, %v1076_v8 }
 0x5cc   : > { %v1087_v22 = vadd.f32 %v1085_v19, %v1076_v8 }
 0x5ce   : > { %v1089_v24 = vmul.f32 0.7978846, %v1087_v22  ;;  %v1490_v25 = vpop.eup %1489 }
 0x5cf   : > { %v1092_v27 = vadd.f32 1.0, %v1490_v25 }
 0x5d0   : > { %1491 = vtanh.f32 %v1089_v24 }
 0x5d1   : > { %v1094_v32 = vmul.f32 %v1092_v27, %v1078_v29 }
 0x5d6   : > { %v1492_v26 = vpop.eup %1491 }
 0x5d7   : > { %v1093_v28 = vadd.f32 1.0, %v1492_v26 }
 0x5d9   : > { %v1095_v33 = vmul.f32 %v1093_v28, %v1079_v30 }
 0x618   : > { %v1099_v31 = vpop.permute.xlu2 %1098 }
 0x619   : > { %v1104_v35 = vmul.f32 %v1099_v31, %v1094_v32 }
 0x638   : > { %v1101_v34 = vpop.permute.xlu1 %1100 }
 0x639   : > { %v1105_v36 = vmul.f32 %v1101_v34, %v1095_v33 }
 0x63b   : > { %v1106_v37 = vpack.c.bf16 %v1105_v36, %v1104_v35 }
 0x63d   : > { %1417 = vmatmul.msk.bf16.vlgmr.msrb.gmra.mxu1 %vm705_vm0, %v1106_v37 }
 0x6ba   : > { %v1155_v39 = vpop.f32.mrf.mxu1 }
 0x6bb   : > { %v1156_v42 = vadd.f32 %v1478_v40, %v1155_v39 }
 0x6c2   : > { %v1157_v41 = vpop.f32.mrf.mxu1 }
 0x6c3   : > { %v1158_v43 = vadd.f32 %v1478_v40, %v1157_v41 }
 0x6c5   : > { %v1160_v44 = vpack.c.bf16 %v1158_v43, %v1156_v42 }
 0x6c7   : > { %1426 = vmatmul.msk.bf16.vlgmr.msrb.gmra.mxu2 %vm898_vm5, %v1160_v44 }
 0x74a   : > { %v1189_v45 = vpop.f32.mrf.mxu2 }
 0x74b   : > { %v1194_v46 = vpack.c.bf16 %v1189_v45, %v1189_v45 }
 0x74d   : > { %1196 = vst.msk [vmem:[%s657_s29] sm:$0xf] %vm916_vm6, %v1194_v46 }
 0x752   : > { %v1191_v47 = vpop.f32.mrf.mxu2 }
 0x753   : > { %v1195_v48 = vpack.c.bf16 %v1191_v47, %v1191_v47 }
 0x755   : > { %1197 = vst.msk [vmem:[%s657_s29 + $0x4] sm:$0xf] %vm916_vm6, %v1195_v48 }
 0x756 PF: > { %s31_s1 = sadd.s32 1, %s1499_s1  }
 0x757   : > { %p28_p4 = scmp.ge.s32.totalorder %s31_s1, 4  }
 0x759   :  { %30 = sbr.rel (!%p28_p4) target bundleno = 6 (0x6), region = 141 }

// kernel: _lambda_.4
= control target key start
LH: loop header
LB: loop body
LE: loop exit
PB: predicated region body
PF: predicated region fallthrough
CT: control target
= control target key end

     0   :  { %s1929_s30 = smov 0   ;;  %s1931_s10 = smov 0   ;;  %s2422_s0 = inlined_call_operand.vmem [shape: bf16[2,128,64], index: 0, kind: input, shape index: {}]   ;;  %s2423_s1 = inlined_call_operand.vmem [shape: f32[2,1,64], index: 1, kind: input, shape index: {}]   ;;  %s2424_s2 = inlined_call_operand.vmem [shape: f32[2,1,64], index: 2, kind: input, shape index: {}]   ;;  %s2425_s3 = inlined_call_operand.vmem [shape: bf16[64,256], index: 3, kind: input, shape index: {}]   ;;  %s2426_s4 = inlined_call_operand.vmem [shape: f32[1,256], index: 4, kind: input, shape index: {}]   ;;  %s2427_s5 = inlined_call_operand.vmem [shape: bf16[256,96], index: 5, kind: input, shape index: {}]   ;;  %s2428_s6 = inlined_call_operand.vmem [shape: f32[1,96], index: 6, kind: input, shape index: {}]   ;;  %s2429_s7 = inlined_call_operand.vmem [shape: bf16[2,128,32], index: 7, kind: output, shape index: {0}]   ;;  %s2430_s8 = inlined_call_operand.vmem [shape: f32[2,8,64], index: 8, kind: output, shape index: {1}]   ;;  %s2431_s9 = inlined_call_operand.vmem [shape: f32[2,16,64], index: 9, kind: output, shape index: {2}]  }
   0x1   :  { %s1933_s11 = smov 0  }
   0x2 LB: > { %s32_s12 = sadd.s32 1, %s1871_s10  ;;  %p1572_p0 = scmp.ge.s32.totalorder %s1875_s11, 1  ;;  %s1875_s11 = sphi %s1933_s11, %s20_s11   ;;  %s1871_s10 = sphi %s1931_s10, %s2433_s10   ;;  %s1867_s30 = sphi %s1929_s30, %s2432_s30  }
   0x3   : > { %p34_p1 = scmp.ge.s32.totalorder %s32_s12, 2  ;;  %p331_p2 = scmp.lt.s32.totalorder %s1875_s11, 3 }
   0x5   : > { %s2435_s12 = smov (%p34_p1, %s32_s12), 0  ;;  %p332_p3 = pnand %p1572_p0, %p331_p2 }
   0x6   : > { %p394_p4 = scmp.lt.s32.totalorder (!%p332_p3), %s1867_s30, 1  ;;  %s1878_s15 = smov (!%p332_p3), 96  }
   0x7   : > { %335 = sbr.rel (%p332_p3) target bundleno = 577 (0x241), region = 48 }
   0xc   : > { %v1606_v0 = vld [vmem:[%s2425_s3 + $0x30] sm:$0xf]  ;;  %v1704_v1 = vld [vmem:[%s2425_s3 + $0x34] sm:$0xf0]  ;;  %v1703_v2 = vld [vmem:[%s2425_s3 + $0x34] sm:$0xf] }
   0xd   : > { %v1607_v3 = vor.u32 %v1704_v1, %v1606_v0  ;;  %v1608_v4 = vld [vmem:[%s2425_s3 + $0x38] sm:$0xf0]  ;;  %v1598_v5 = vld [vmem:[%s2425_s3 + $0x20] sm:$0xf]  ;;  %v1702_v6 = vld [vmem:[%s2425_s3 + $0x24] sm:$0xf0] }
   0xe   : > { %v1611_v7 = vor.u32 %v1703_v2, %v1608_v4  ;;  %v1701_v8 = vld [vmem:[%s2425_s3 + $0x24] sm:$0xf]  ;;  %v1600_v9 = vld [vmem:[%s2425_s3 + $0x28] sm:$0xf0]  ;;  %v1599_v10 = vor.u32 %v1702_v6, %v1598_v5  ;;  %v1590_v12 = vld [vmem:[%s2425_s3 + $0x10] sm:$0xf] }
   0xf   : > { %595 = vmatpush.bf16.msra.mxu0 %v1607_v3  ;;  %v1603_v11 = vor.u32 %v1701_v8, %v1600_v9  ;;  %v1700_v13 = vld [vmem:[%s2425_s3 + $0x14] sm:$0xf0]  ;;  %v1699_v14 = vld [vmem:[%s2425_s3 + $0x14] sm:$0xf]  ;;  %v1592_v15 = vld [vmem:[%s2425_s3 + $0x18] sm:$0xf0] }
  0x10   : > { %644 = vmatpush.bf16.msra.mxu1 %v1611_v7  ;;  %v1591_v16 = vor.u32 %v1700_v13, %v1590_v12  ;;  %s2437_s30 = smov (!%p394_p4, %s1867_s30), 1  ;;  %v1595_v17 = vor.u32 %v1699_v14, %v1592_v15  ;;  %v1582_v18 = vld [vmem:[%s2425_s3] sm:$0xf]  ;;  %v1698_v19 = vld [vmem:[%s2425_s3 + $0x4] sm:$0xf0]  ;;  %vm566_vm0 = vcmask 523264  }
  0x11   : > { %v1697_v20 = vld [vmem:[%s2425_s3 + $0x4] sm:$0xf]  ;;  %v1584_v21 = vld [vmem:[%s2425_s3 + $0x8] sm:$0xf0]  ;;  %s1694_s28 = sshll.u32 %s2437_s30, 6  ;;  %s405_s14 = scalar_lea.vmem %s2423_s1, %s2437_s30  ;;  %v1583_v23 = vor.u32 %v1698_v19, %v1582_v18  ;;  %v1712_v19 = vld [vmem:[%s2427_s5 + $0x38] sm:$0xff] }
  0x12   : > { %s2011_s17 = scalar_lea.vmem %s2422_s0, %s1694_s28  ;;  %s408_s20 = scalar_lea.vmem %s2424_s2, %s2437_s30  ;;  %v2017_v22 = vld [vmem:[%s405_s14] ss:$0 sm:$0xff]  ;;  %v1587_v25 = vor.u32 %v1697_v20, %v1584_v21  ;;  %v1720_v20 = vld [vmem:[%s2427_s5 + $0x78] sm:$0xff]  ;;  %1125 = vmatpush.bf16.msra.mxu2 %v1712_v19  ;;  %vm1239_vm1 = vcmask 257024   ;;  %vm1256_vm2 = vcmask 785664   ;;  %vm1337_vm3 = vcmask 1041409  }
  0x13   : > { %596 = vmatpush.bf16.msra.mxu0 %v1599_v10  ;;  %v1722_v24 = vld [vmem:[%s2011_s17] sm:$0xff]   ;;  %v1753_v33 = vld [vmem:[%s2011_s17 + $0x8] sm:$0xff]   ;;  %v1754_v42 = vld [vmem:[%s2011_s17 + $0x10] sm:$0xff]   ;;  %1174 = vmatpush.bf16.msra.mxu3 %v1720_v20  ;;  %s2315_s27 = scalar_lea.vmem %s2429_s7, %s1694_s28  ;;  %vm1339_vm4 = vcmask 1042434   ;;  %s1696_s28 = sshll.u32 %s2437_s30, 4  ;;  %vm1341_vm5 = vcmask 1043459  }
  0x14   : > { %645 = vmatpush.bf16.msra.mxu1 %v1603_v11  ;;  %v1723_v26 = vunpack.c.l.bf16 %v1722_v24  ;;  %v1724_v27 = vunpack.c.h.bf16 %v1722_v24  ;;  %v2020_v28 = vld [vmem:[%s408_s20] ss:$0 sm:$0xff]  ;;  %v1727_v35 = vunpack.c.l.bf16 %v1753_v33  ;;  %v1728_v36 = vunpack.c.h.bf16 %v1753_v33  ;;  %v1755_v50 = vld [vmem:[%s2011_s17 + $0x18] sm:$0xff]   ;;  %v1757_v2 = vld [vmem:[%s2011_s17 + $0x28] sm:$0xff]   ;;  %s2377_s14 = scalar_lea.vmem %s2431_s9, %s1696_s28  ;;  %s1577_s16 = sshll.u32 %s2437_s30, 3 }
  0x15   : > { %v1731_v43 = vunpack.c.l.bf16 %v1754_v42  ;;  %v1732_v44 = vunpack.c.h.bf16 %v1754_v42  ;;  %v1735_v51 = vunpack.c.l.bf16 %v1755_v50  ;;  %v1736_v52 = vunpack.c.h.bf16 %v1755_v50  ;;  %v1756_v58 = vld [vmem:[%s2011_s17 + $0x20] sm:$0xff]   ;;  %v1758_v10 = vld [vmem:[%s2011_s17 + $0x30] sm:$0xff]   ;;  %v1759_v18 = vld [vmem:[%s2011_s17 + $0x38] sm:$0xff]   ;;  %s425_s19 = scalar_lea.vmem %s2430_s8, %s1577_s16 }
  0x16   : > { %v468_v29 = vmul.f32 %v2017_v22, %v1723_v26  ;;  %v469_v30 = vmul.f32 %v2017_v22, %v1724_v27  ;;  %v470_v37 = vmul.f32 %v2017_v22, %v1727_v35  ;;  %v471_v38 = vmul.f32 %v2017_v22, %v1728_v36  ;;  %v1711_v24 = vld [vmem:[%s2427_s5 + $0x30] sm:$0xff]  ;;  %v1717_v33 = vld [vmem:[%s2427_s5 + $0x60] sm:$0xff]  ;;  %v1708_v35 = vld [vmem:[%s2427_s5 + $0x18] sm:$0xff] }
  0x17   : > { %597 = vmatpush.bf16.msra.mxu0 %v1591_v16  ;;  %v472_v45 = vmul.f32 %v2017_v22, %v1731_v43  ;;  %v473_v46 = vmul.f32 %v2017_v22, %v1732_v44  ;;  %v474_v53 = vmul.f32 %v2017_v22, %v1735_v51  ;;  %v475_v54 = vmul.f32 %v2017_v22, %v1736_v52  ;;  %v1707_v36 = vld [vmem:[%s2427_s5 + $0x10] sm:$0xff]  ;;  %v1713_v42 = vld [vmem:[%s2427_s5 + $0x40] sm:$0xff] }
  0x18   : > { %646 = vmatpush.bf16.msra.mxu1 %v1595_v17  ;;  %v488_v31 = vadd.f32 %v2020_v28, %v468_v29  ;;  %v489_v32 = vadd.f32 %v2020_v28, %v469_v30  ;;  %v490_v39 = vadd.f32 %v2020_v28, %v470_v37  ;;  %v491_v40 = vadd.f32 %v2020_v28, %v471_v38  ;;  %v1710_v29 = vld [vmem:[%s2427_s5 + $0x28] sm:$0xff]  ;;  %v1715_v37 = vld [vmem:[%s2427_s5 + $0x50] sm:$0xff] }
  0x19   : > { %v492_v47 = vadd.f32 %v2020_v28, %v472_v45  ;;  %v493_v48 = vadd.f32 %v2020_v28, %v473_v46  ;;  %v494_v55 = vadd.f32 %v2020_v28, %v474_v53  ;;  %v495_v56 = vadd.f32 %v2020_v28, %v475_v54  ;;  %1126 = vmatpush.bf16.msra.mxu2 %v1711_v24  ;;  %v1718_v30 = vld [vmem:[%s2427_s5 + $0x68] sm:$0xff] }
  0x1a   : > { %v504_v34 = vpack.c.bf16 %v489_v32, %v488_v31  ;;  %v505_v41 = vpack.c.bf16 %v491_v40, %v490_v39  ;;  %v1739_v59 = vunpack.c.l.bf16 %v1756_v58  ;;  %v1740_v60 = vunpack.c.h.bf16 %v1756_v58  ;;  %v1706_v38 = vld [vmem:[%s2427_s5 + $0x8] sm:$0xff]  ;;  %v520_v40 = vld [vmem:[%s2426_s4] sm:$0x3] }
  0x1b   : > { %598 = vmatpush.bf16.msra.mxu0 %v1583_v23  ;;  %v506_v49 = vpack.c.bf16 %v493_v48, %v492_v47  ;;  %v507_v57 = vpack.c.bf16 %v495_v56, %v494_v55  ;;  %v1743_v3 = vunpack.c.l.bf16 %v1757_v2  ;;  %v1744_v4 = vunpack.c.h.bf16 %v1757_v2  ;;  %v1714_v39 = vld [vmem:[%s2427_s5 + $0x48] sm:$0xff] }
  0x1c   : > { %647 = vmatpush.bf16.msra.mxu1 %v1587_v25  ;;  %v476_v61 = vmul.f32 %v2017_v22, %v1739_v59  ;;  %v477_v62 = vmul.f32 %v2017_v22, %v1740_v60  ;;  %v1747_v11 = vunpack.c.l.bf16 %v1758_v10  ;;  %v1748_v12 = vunpack.c.h.bf16 %v1758_v10  ;;  %v1719_v25 = vld [vmem:[%s2427_s5 + $0x70] sm:$0xff] }
  0x1d   : > { %v478_v5 = vmul.f32 %v2017_v22, %v1743_v3  ;;  %v479_v6 = vmul.f32 %v2017_v22, %v1744_v4  ;;  %v1751_v21 = vunpack.c.l.bf16 %v1759_v18  ;;  %v1752_v23 = vunpack.c.h.bf16 %v1759_v18  ;;  %1175 = vmatpush.bf16.msra.mxu3 %v1719_v25  ;;  %1127 = vmatpush.bf16.msra.mxu2 %v1710_v29 }
  0x1e   : > { %1612 = vmatmul.msk.bf16.vlgmr.msra.gmra.mxu0 %vm566_vm0, %v504_v34  ;;  %v496_v63 = vadd.f32 %v2020_v28, %v476_v61  ;;  %v497_v0 = vadd.f32 %v2020_v28, %v477_v62  ;;  %v480_v13 = vmul.f32 %v2017_v22, %v1747_v11  ;;  %v481_v14 = vmul.f32 %v2017_v22, %v1748_v12 }
  0x1f   : > { %1620 = vmatmul.msk.bf16.vlgmr.msra.gmra.mxu1 %vm566_vm0, %v504_v34  ;;  %v498_v7 = vadd.f32 %v2020_v28, %v478_v5  ;;  %v499_v8 = vadd.f32 %v2020_v28, %v479_v6  ;;  %v482_v26 = vmul.f32 %v2017_v22, %v1751_v21  ;;  %v483_v27 = vmul.f32 %v2017_v22, %v1752_v23  ;;  %v1709_v22 = vld [vmem:[%s2427_s5 + $0x20] sm:$0xff] }
  0x20   : > { %v508_v1 = vpack.c.bf16 %v497_v0, %v496_v63  ;;  %v500_v15 = vadd.f32 %v2020_v28, %v480_v13  ;;  %v501_v16 = vadd.f32 %v2020_v28, %v481_v14  ;;  %v2128_v43 = vperm.slane %v520_v40, 0 }
  0x21   : > { %v509_v9 = vpack.c.bf16 %v499_v8, %v498_v7  ;;  %v502_v31 = vadd.f32 %v2020_v28, %v482_v26  ;;  %v503_v32 = vadd.f32 %v2020_v28, %v483_v27  ;;  %1176 = vmatpush.bf16.msra.mxu3 %v1718_v30  ;;  %1128 = vmatpush.bf16.msra.mxu2 %v1709_v22  ;;  %v1716_v28 = vld [vmem:[%s2427_s5 + $0x58] sm:$0xff]  ;;  %v2130_v44 = vperm.slane %v520_v40, 1 }
  0x22   : > { %v510_v17 = vpack.c.bf16 %v501_v16, %v500_v15  ;;  %vm1343_vm6 = vcmask 1044484   ;;  %vm1345_vm7 = vcmask 1045509   ;;  %vm1347_vm8 = vcmask 1046534  }
  0x23   : > { %v511_v34 = vpack.c.bf16 %v503_v32, %v502_v31  ;;  %vm1349_vm9 = vcmask 1047559  }
  0x25   : > { %1177 = vmatpush.bf16.msra.mxu3 %v1717_v33  ;;  %1129 = vmatpush.bf16.msra.mxu2 %v1708_v35 }
  0x29   : > { %1178 = vmatpush.bf16.msra.mxu3 %v1716_v28  ;;  %1130 = vmatpush.bf16.msra.mxu2 %v1707_v36 }
  0x2d   : > { %1179 = vmatpush.bf16.msra.mxu3 %v1715_v37  ;;  %1131 = vmatpush.bf16.msra.mxu2 %v1706_v38 }
  0x2e   : > { %1613 = vmatmul.msk.bf16.gmra.mxu0 %vm566_vm0, %v505_v41 }
  0x2f   : > { %1621 = vmatmul.msk.bf16.gmra.mxu1 %vm566_vm0, %v505_v41  ;;  %v1705_v41 = vld [vmem:[%s2427_s5] sm:$0xff] }
  0x31   : > { %1180 = vmatpush.bf16.msra.mxu3 %v1714_v39  ;;  %1132 = vmatpush.bf16.msra.mxu2 %v1705_v41 }
  0x35   : > { %1181 = vmatpush.bf16.msra.mxu3 %v1713_v42 }
  0x3e   : > { %1614 = vmatmul.msk.bf16.gmra.mxu0 %vm566_vm0, %v506_v49 }
  0x3f   : > { %1622 = vmatmul.msk.bf16.gmra.mxu1 %vm566_vm0, %v506_v49 }
  0x4e   : > { %1615 = vmatmul.msk.bf16.gmra.mxu0 %vm566_vm0, %v507_v57 }
  0x4f   : > { %1623 = vmatmul.msk.bf16.gmra.mxu1 %vm566_vm0, %v507_v57 }
  0x5e   : > { %1616 = vmatmul.msk.bf16.gmra.mxu0 %vm566_vm0, %v508_v1 }
  0x5f   : > { %1624 = vmatmul.msk.bf16.gmra.mxu1 %vm566_vm0, %v508_v1 }
  0x6e   : > { %1617 = vmatmul.msk.bf16.gmra.mxu0 %vm566_vm0, %v509_v9 }
  0x6f   : > { %1625 = vmatmul.msk.bf16.gmra.mxu1 %vm566_vm0, %v509_v9 }
  0x7e   : > { %1618 = vmatmul.msk.bf16.gmra.mxu0 %vm566_vm0, %v510_v17 }
  0x7f   : > { %1626 = vmatmul.msk.bf16.gmra.mxu1 %vm566_vm0, %v510_v17 }
  0x8e   : > { %1619 = vmatmul.msk.bf16.gmra.mxu0 %vm566_vm0, %v511_v34 }
  0x8f   : > { %1627 = vmatmul.msk.bf16.gmra.mxu1 %vm566_vm0, %v511_v34 }
  0x9b   : > { %v600_v45 = vpop.f32.mrf.mxu0 }
  0x9c   : > { %v649_v46 = vpop.f32.mrf.mxu1  ;;  %v601_v47 = vadd.f32 %v600_v45, %v2128_v43 }
  0x9d   : > { %v650_v48 = vadd.f32 %v649_v46, %v2130_v44 }
  0x9e   : > { %v721_v49 = vmul.f32 0.044715, %v601_v47  ;;  %v689_v22 = vmul.f32 0.5, %v601_v47 }
  0x9f   : > { %v722_v50 = vmul.f32 0.044715, %v650_v48  ;;  %v690_v36 = vmul.f32 0.5, %v650_v48 }
  0xa0   : > { %v753_v51 = vmul.f32 %v721_v49, %v601_v47 }
  0xa1   : > { %v754_v52 = vmul.f32 %v722_v50, %v650_v48 }
  0xa2   : > { %v785_v53 = vmul.f32 %v753_v51, %v601_v47 }
  0xa3   : > { %v786_v54 = vmul.f32 %v754_v52, %v650_v48  ;;  %v602_v55 = vpop.f32.mrf.mxu0 }
  0xa4   : > { %v651_v56 = vpop.f32.mrf.mxu1  ;;  %v603_v57 = vadd.f32 %v602_v55, %v2128_v43  ;;  %v817_v59 = vadd.f32 %v785_v53, %v601_v47 }
  0xa5   : > { %v652_v58 = vadd.f32 %v651_v56, %v2130_v44  ;;  %v818_v60 = vadd.f32 %v786_v54, %v650_v48 }
  0xa6   : > { %v723_v61 = vmul.f32 0.044715, %v603_v57  ;;  %v849_v63 = vmul.f32 0.7978846, %v817_v59  ;;  %v691_v35 = vmul.f32 0.5, %v603_v57 }
  0xa7   : > { %v724_v62 = vmul.f32 0.044715, %v652_v58  ;;  %v850_v2 = vmul.f32 0.7978846, %v818_v60  ;;  %v692_v38 = vmul.f32 0.5, %v652_v58 }
  0xa8   : > { %v755_v0 = vmul.f32 %v723_v61, %v603_v57  ;;  %1789 = vtanh.f32 %v849_v63 }
  0xa9   : > { %v756_v1 = vmul.f32 %v724_v62, %v652_v58  ;;  %1791 = vtanh.f32 %v850_v2 }
  0xaa   : > { %v787_v3 = vmul.f32 %v755_v0, %v603_v57 }
  0xab   : > { %v788_v4 = vmul.f32 %v756_v1, %v652_v58  ;;  %v605_v5 = vpop.f32.mrf.mxu0 }
  0xac   : > { %v654_v6 = vpop.f32.mrf.mxu1  ;;  %v2137_v7 = vadd.f32 %v605_v5, %v2128_v43  ;;  %v819_v9 = vadd.f32 %v787_v3, %v603_v57 }
  0xad   : > { %v2140_v8 = vadd.f32 %v654_v6, %v2130_v44  ;;  %v820_v10 = vadd.f32 %v788_v4, %v652_v58 }
  0xae   : > { %v725_v11 = vmul.f32 0.044715, %v2137_v7  ;;  %v851_v13 = vmul.f32 0.7978846, %v819_v9  ;;  %v1790_v17 = vpop.eup %1789 }
  0xaf   : > { %v726_v12 = vmul.f32 0.044715, %v2140_v8  ;;  %v852_v14 = vmul.f32 0.7978846, %v820_v10  ;;  %v1792_v20 = vpop.eup %1791  ;;  %v913_v27 = vadd.f32 1.0, %v1790_v17  ;;  %v693_v17 = vmul.f32 0.5, %v2137_v7 }
  0xb0   : > { %1793 = vtanh.f32 %v851_v13  ;;  %v757_v15 = vmul.f32 %v725_v11, %v2137_v7  ;;  %v914_v33 = vadd.f32 1.0, %v1792_v20 }
  0xb1   : > { %v758_v16 = vmul.f32 %v726_v12, %v2140_v8  ;;  %1795 = vtanh.f32 %v852_v14  ;;  %v945_v42 = vmul.f32 %v913_v27, %v689_v22 }
  0xb2   : > { %v789_v18 = vmul.f32 %v757_v15, %v2137_v7  ;;  %v946_v49 = vmul.f32 %v914_v33, %v690_v36 }
  0xb3   : > { %v790_v19 = vmul.f32 %v758_v16, %v2140_v8  ;;  %v607_v21 = vpop.f32.mrf.mxu0 }
  0xb4   : > { %v656_v23 = vpop.f32.mrf.mxu1  ;;  %v608_v24 = vadd.f32 %v607_v21, %v2128_v43  ;;  %v821_v26 = vadd.f32 %v789_v18, %v2137_v7 }
  0xb5   : > { %v2150_v25 = vadd.f32 %v656_v23, %v2130_v44  ;;  %v822_v29 = vadd.f32 %v790_v19, %v2140_v8  ;;  %v694_v23 = vmul.f32 0.5, %v2140_v8 }
  0xb6   : > { %v1794_v30 = vpop.eup %1793  ;;  %v727_v31 = vmul.f32 0.044715, %v608_v24  ;;  %v853_v37 = vmul.f32 0.7978846, %v821_v26  ;;  %v695_v20 = vmul.f32 0.5, %v608_v24 }
  0xb7   : > { %v728_v32 = vmul.f32 0.044715, %v2150_v25  ;;  %v1796_v34 = vpop.eup %1795  ;;  %v915_v28 = vadd.f32 1.0, %v1794_v30  ;;  %v854_v46 = vmul.f32 0.7978846, %v822_v29  ;;  %v696_v27 = vmul.f32 0.5, %v2150_v25 }
  0xb8   : > { %v916_v39 = vadd.f32 1.0, %v1796_v34  ;;  %v759_v40 = vmul.f32 %v727_v31, %v608_v24  ;;  %1797 = vtanh.f32 %v853_v37 }
  0xb9   : > { %v760_v41 = vmul.f32 %v728_v32, %v2150_v25  ;;  %v947_v45 = vmul.f32 %v915_v28, %v691_v35  ;;  %1799 = vtanh.f32 %v854_v46 }
  0xba   : > { %v948_v50 = vmul.f32 %v916_v39, %v692_v38  ;;  %v791_v51 = vmul.f32 %v759_v40, %v608_v24 }
  0xbb   : > { %v792_v52 = vmul.f32 %v760_v41, %v2150_v25  ;;  %v610_v47 = vpop.f32.mrf.mxu0  ;;  %v977_v54 = vpack.c.bf16 %v947_v45, %v945_v42 }
  0xbc   : > { %v659_v53 = vpop.f32.mrf.mxu1  ;;  %v2158_v48 = vadd.f32 %v610_v47, %v2128_v43  ;;  %v978_v56 = vpack.c.bf16 %v948_v50, %v946_v49  ;;  %v823_v57 = vadd.f32 %v791_v51, %v608_v24 }
  0xbd   : > { %v2161_v55 = vadd.f32 %v659_v53, %v2130_v44  ;;  %1133 = vmatmul.bf16.vlgmr.msra.gmra.mxu2 %v977_v54  ;;  %v824_v58 = vadd.f32 %v792_v52, %v2150_v25 }
  0xbe   : > { %v729_v59 = vmul.f32 0.044715, %v2158_v48  ;;  %1182 = vmatmul.bf16.vlgmr.msra.gmra.mxu3 %v978_v56  ;;  %v855_v61 = vmul.f32 0.7978846, %v823_v57  ;;  %v1798_v1 = vpop.eup %1797 }
  0xbf   : > { %v730_v60 = vmul.f32 0.044715, %v2161_v55  ;;  %v856_v62 = vmul.f32 0.7978846, %v824_v58  ;;  %v1800_v4 = vpop.eup %1799  ;;  %v917_v12 = vadd.f32 1.0, %v1798_v1  ;;  %v697_v1 = vmul.f32 0.5, %v2158_v48 }
  0xc0   : > { %1801 = vtanh.f32 %v855_v61  ;;  %v761_v63 = vmul.f32 %v729_v59, %v2158_v48  ;;  %v918_v18 = vadd.f32 1.0, %v1800_v4 }
  0xc1   : > { %v762_v0 = vmul.f32 %v730_v60, %v2161_v55  ;;  %1803 = vtanh.f32 %v856_v62  ;;  %v949_v32 = vmul.f32 %v917_v12, %v693_v17 }
  0xc2   : > { %v793_v2 = vmul.f32 %v761_v63, %v2158_v48  ;;  %v950_v34 = vmul.f32 %v918_v18, %v694_v23 }
  0xc3   : > { %v794_v3 = vmul.f32 %v762_v0, %v2161_v55  ;;  %v612_v5 = vpop.f32.mrf.mxu0 }
  0xc4   : > { %v661_v6 = vpop.f32.mrf.mxu1  ;;  %v613_v9 = vadd.f32 %v612_v5, %v2128_v43  ;;  %v825_v11 = vadd.f32 %v793_v2, %v2158_v48 }
  0xc5   : > { %v2172_v10 = vadd.f32 %v661_v6, %v2130_v44  ;;  %v826_v13 = vadd.f32 %v794_v3, %v2161_v55  ;;  %v698_v6 = vmul.f32 0.5, %v2161_v55 }
  0xc6   : > { %v1802_v14 = vpop.eup %1801  ;;  %v731_v15 = vmul.f32 0.044715, %v613_v9  ;;  %v857_v26 = vmul.f32 0.7978846, %v825_v11  ;;  %v699_v4 = vmul.f32 0.5, %v613_v9 }
  0xc7   : > { %v732_v16 = vmul.f32 0.044715, %v2172_v10  ;;  %v1804_v19 = vpop.eup %1803  ;;  %v919_v21 = vadd.f32 1.0, %v1802_v14  ;;  %v858_v33 = vmul.f32 0.7978846, %v826_v13  ;;  %v700_v12 = vmul.f32 0.5, %v2172_v10 }
  0xc8   : > { %v920_v29 = vadd.f32 1.0, %v1804_v19  ;;  %v763_v30 = vmul.f32 %v731_v15, %v613_v9  ;;  %1805 = vtanh.f32 %v857_v26 }
  0xc9   : > { %v764_v31 = vmul.f32 %v732_v16, %v2172_v10  ;;  %v951_v22 = vmul.f32 %v919_v21, %v695_v20  ;;  %1807 = vtanh.f32 %v858_v33 }
  0xca   : > { %v952_v35 = vmul.f32 %v920_v29, %v696_v27  ;;  %v795_v28 = vmul.f32 %v763_v30, %v613_v9 }
  0xcb   : > { %v796_v7 = vmul.f32 %v764_v31, %v2172_v10  ;;  %v615_v36 = vpop.f32.mrf.mxu0  ;;  %v979_v37 = vpack.c.bf16 %v951_v22, %v949_v32 }
  0xcc   : > { %v664_v24 = vpop.f32.mrf.mxu1  ;;  %v2183_v8 = vadd.f32 %v615_v36, %v2128_v43  ;;  %v980_v38 = vpack.c.bf16 %v952_v35, %v950_v34  ;;  %v827_v39 = vadd.f32 %v795_v28, %v613_v9 }
  0xcd   : > { %v2186_v25 = vadd.f32 %v664_v24, %v2130_v44  ;;  %1138 = vmatmul.bf16.gmra.mxu2 %v979_v37  ;;  %v828_v40 = vadd.f32 %v796_v7, %v2172_v10 }
  0xce   : > { %v733_v41 = vmul.f32 0.044715, %v2183_v8  ;;  %1187 = vmatmul.bf16.gmra.mxu3 %v980_v38  ;;  %v859_v45 = vmul.f32 0.7978846, %v827_v39  ;;  %v1806_v51 = vpop.eup %1805 }
  0xcf   : > { %v734_v42 = vmul.f32 0.044715, %v2186_v25  ;;  %v860_v46 = vmul.f32 0.7978846, %v828_v40  ;;  %v1808_v53 = vpop.eup %1807  ;;  %v921_v60 = vadd.f32 1.0, %v1806_v51  ;;  %v701_v51 = vmul.f32 0.5, %v2183_v8 }
  0xd0   : > { %1809 = vtanh.f32 %v859_v45  ;;  %v765_v49 = vmul.f32 %v733_v41, %v2183_v8  ;;  %v922_v2 = vadd.f32 1.0, %v1808_v53 }
  0xd1   : > { %v766_v50 = vmul.f32 %v734_v42, %v2186_v25  ;;  %1811 = vtanh.f32 %v860_v46  ;;  %v953_v16 = vmul.f32 %v921_v60, %v697_v1 }
  0xd2   : > { %v797_v52 = vmul.f32 %v765_v49, %v2183_v8  ;;  %v954_v19 = vmul.f32 %v922_v2, %v698_v6 }
  0xd3   : > { %v798_v47 = vmul.f32 %v766_v50, %v2186_v25  ;;  %v617_v54 = vpop.f32.mrf.mxu0 }
  0xd4   : > { %v666_v56 = vpop.f32.mrf.mxu1  ;;  %v618_v57 = vadd.f32 %v617_v54, %v2128_v43  ;;  %v829_v59 = vadd.f32 %v797_v52, %v2183_v8 }
  0xd5   : > { %v2197_v58 = vadd.f32 %v666_v56, %v2130_v44  ;;  %v830_v61 = vadd.f32 %v798_v47, %v2186_v25  ;;  %v702_v56 = vmul.f32 0.5, %v2186_v25 }
  0xd6   : > { %v1810_v62 = vpop.eup %1809  ;;  %v735_v63 = vmul.f32 0.044715, %v618_v57  ;;  %v861_v11 = vmul.f32 0.7978846, %v829_v59  ;;  %v703_v53 = vmul.f32 0.5, %v618_v57 }
  0xd7   : > { %v736_v0 = vmul.f32 0.044715, %v2197_v58  ;;  %v1812_v3 = vpop.eup %1811  ;;  %v923_v5 = vadd.f32 1.0, %v1810_v62  ;;  %v862_v18 = vmul.f32 0.7978846, %v830_v61  ;;  %v704_v60 = vmul.f32 0.5, %v2197_v58 }
  0xd8   : > { %v924_v13 = vadd.f32 1.0, %v1812_v3  ;;  %v767_v14 = vmul.f32 %v735_v63, %v618_v57  ;;  %1813 = vtanh.f32 %v861_v11 }
  0xd9   : > { %v768_v15 = vmul.f32 %v736_v0, %v2197_v58  ;;  %v955_v17 = vmul.f32 %v923_v5, %v699_v4  ;;  %1815 = vtanh.f32 %v862_v18 }
  0xda   : > { %v956_v20 = vmul.f32 %v924_v13, %v700_v12  ;;  %v799_v21 = vmul.f32 %v767_v14, %v618_v57 }
  0xdb   : > { %v800_v48 = vmul.f32 %v768_v15, %v2197_v58  ;;  %v620_v23 = vpop.f32.mrf.mxu0  ;;  %v981_v26 = vpack.c.bf16 %v955_v17, %v953_v16 }
  0xdc   : > { %v669_v9 = vpop.f32.mrf.mxu1  ;;  %v2208_v55 = vadd.f32 %v620_v23, %v2128_v43  ;;  %v982_v27 = vpack.c.bf16 %v956_v20, %v954_v19  ;;  %v831_v29 = vadd.f32 %v799_v21, %v618_v57 }
  0xdd   : > { %v2211_v10 = vadd.f32 %v669_v9, %v2130_v44  ;;  %1143 = vmatmul.bf16.gmra.mxu2 %v981_v26  ;;  %v832_v30 = vadd.f32 %v800_v48, %v2197_v58 }
  0xde   : > { %v737_v31 = vmul.f32 0.044715, %v2208_v55  ;;  %1192 = vmatmul.bf16.gmra.mxu3 %v982_v27  ;;  %v863_v22 = vmul.f32 0.7978846, %v831_v29  ;;  %v1814_v28 = vpop.eup %1813 }
  0xdf   : > { %v738_v32 = vmul.f32 0.044715, %v2211_v10  ;;  %v864_v33 = vmul.f32 0.7978846, %v832_v30  ;;  %v1816_v24 = vpop.eup %1815  ;;  %v925_v42 = vadd.f32 1.0, %v1814_v28  ;;  %v705_v28 = vmul.f32 0.5, %v2208_v55 }
  0xe0   : > { %1817 = vtanh.f32 %v863_v22  ;;  %v769_v34 = vmul.f32 %v737_v31, %v2208_v55  ;;  %v926_v52 = vadd.f32 1.0, %v1816_v24 }
  0xe1   : > { %v770_v35 = vmul.f32 %v738_v32, %v2211_v10  ;;  %1819 = vtanh.f32 %v864_v33  ;;  %v957_v0 = vmul.f32 %v925_v42, %v701_v51 }
  0xe2   : > { %v801_v7 = vmul.f32 %v769_v34, %v2208_v55  ;;  %v958_v3 = vmul.f32 %v926_v52, %v702_v56 }
  0xe3   : > { %v802_v36 = vmul.f32 %v770_v35, %v2211_v10  ;;  %v622_v37 = vpop.f32.mrf.mxu0 }
  0xe4   : > { %v671_v38 = vpop.f32.mrf.mxu1  ;;  %v623_v39 = vadd.f32 %v622_v37, %v2128_v43  ;;  %v833_v41 = vadd.f32 %v801_v7, %v2208_v55 }
  0xe5   : > { %v2222_v40 = vadd.f32 %v671_v38, %v2130_v44  ;;  %v834_v45 = vadd.f32 %v802_v36, %v2211_v10  ;;  %v706_v38 = vmul.f32 0.5, %v2211_v10 }
  0xe6   : > { %v1818_v46 = vpop.eup %1817  ;;  %v739_v49 = vmul.f32 0.044715, %v623_v39  ;;  %v865_v59 = vmul.f32 0.7978846, %v833_v41  ;;  %v707_v24 = vmul.f32 0.5, %v623_v39 }
  0xe7   : > { %v740_v50 = vmul.f32 0.044715, %v2222_v40  ;;  %v1820_v47 = vpop.eup %1819  ;;  %v927_v54 = vadd.f32 1.0, %v1818_v46  ;;  %v866_v2 = vmul.f32 0.7978846, %v834_v45  ;;  %v708_v42 = vmul.f32 0.5, %v2222_v40 }
  0xe8   : > { %v928_v61 = vadd.f32 1.0, %v1820_v47  ;;  %v771_v62 = vmul.f32 %v739_v49, %v623_v39  ;;  %1821 = vtanh.f32 %v865_v59 }
  0xe9   : > { %v772_v63 = vmul.f32 %v740_v50, %v2222_v40  ;;  %v959_v1 = vmul.f32 %v927_v54, %v703_v53  ;;  %1823 = vtanh.f32 %v866_v2 }
  0xea   : > { %v960_v4 = vmul.f32 %v928_v61, %v704_v60  ;;  %v803_v5 = vmul.f32 %v771_v62, %v623_v39 }
  0xeb   : > { %v804_v8 = vmul.f32 %v772_v63, %v2222_v40  ;;  %v625_v6 = vpop.f32.mrf.mxu0  ;;  %v983_v11 = vpack.c.bf16 %v959_v1, %v957_v0 }
  0xec   : > { %v674_v57 = vpop.f32.mrf.mxu1  ;;  %v2233_v25 = vadd.f32 %v625_v6, %v2128_v43  ;;  %v984_v12 = vpack.c.bf16 %v960_v4, %v958_v3  ;;  %v835_v13 = vadd.f32 %v803_v5, %v623_v39 }
  0xed   : > { %v2236_v58 = vadd.f32 %v674_v57, %v2130_v44  ;;  %1148 = vmatmul.bf16.gmra.mxu2 %v983_v11  ;;  %v836_v14 = vadd.f32 %v804_v8, %v2222_v40 }
  0xee   : > { %v741_v15 = vmul.f32 0.044715, %v2233_v25  ;;  %1197 = vmatmul.bf16.gmra.mxu3 %v984_v12  ;;  %v867_v17 = vmul.f32 0.7978846, %v835_v13  ;;  %v1822_v21 = vpop.eup %1821 }
  0xef   : > { %v742_v16 = vmul.f32 0.044715, %v2236_v58  ;;  %v868_v18 = vmul.f32 0.7978846, %v836_v14  ;;  %v1824_v9 = vpop.eup %1823  ;;  %v929_v32 = vadd.f32 1.0, %v1822_v21  ;;  %v709_v21 = vmul.f32 0.5, %v2233_v25 }
  0xf0   : > { %1825 = vtanh.f32 %v867_v17  ;;  %v773_v19 = vmul.f32 %v741_v15, %v2233_v25  ;;  %v930_v7 = vadd.f32 1.0, %v1824_v9 }
  0xf1   : > { %v774_v20 = vmul.f32 %v742_v16, %v2236_v58  ;;  %1827 = vtanh.f32 %v868_v18  ;;  %v961_v50 = vmul.f32 %v929_v32, %v705_v28 }
  0xf2   : > { %v805_v48 = vmul.f32 %v773_v19, %v2233_v25  ;;  %v962_v47 = vmul.f32 %v930_v7, %v706_v38 }
  0xf3   : > { %v806_v23 = vmul.f32 %v774_v20, %v2236_v58  ;;  %v627_v26 = vpop.f32.mrf.mxu0 }
  0xf4   : > { %v676_v27 = vpop.f32.mrf.mxu1  ;;  %v628_v29 = vadd.f32 %v627_v26, %v2128_v43  ;;  %v837_v31 = vadd.f32 %v805_v48, %v2233_v25 }
  0xf5   : > { %v2247_v30 = vadd.f32 %v676_v27, %v2130_v44  ;;  %v838_v22 = vadd.f32 %v806_v23, %v2236_v58  ;;  %v710_v27 = vmul.f32 0.5, %v2236_v58 }
  0xf6   : > { %v1826_v33 = vpop.eup %1825  ;;  %v743_v34 = vmul.f32 0.044715, %v628_v29  ;;  %v869_v41 = vmul.f32 0.7978846, %v837_v31  ;;  %v711_v9 = vmul.f32 0.5, %v628_v29 }
  0xf7   : > { %v744_v35 = vmul.f32 0.044715, %v2247_v30  ;;  %v1828_v36 = vpop.eup %1827  ;;  %v931_v37 = vadd.f32 1.0, %v1826_v33  ;;  %v870_v52 = vmul.f32 0.7978846, %v838_v22  ;;  %v712_v32 = vmul.f32 0.5, %v2247_v30 }
  0xf8   : > { %v932_v45 = vadd.f32 1.0, %v1828_v36  ;;  %v775_v46 = vmul.f32 %v743_v34, %v628_v29  ;;  %1829 = vtanh.f32 %v869_v41 }
  0xf9   : > { %v776_v49 = vmul.f32 %v744_v35, %v2247_v30  ;;  %v963_v51 = vmul.f32 %v931_v37, %v707_v24  ;;  %1831 = vtanh.f32 %v870_v52 }
  0xfa   : > { %v964_v53 = vmul.f32 %v932_v45, %v708_v42  ;;  %v807_v54 = vmul.f32 %v775_v46, %v628_v29 }
  0xfb   : > { %v808_v55 = vmul.f32 %v776_v49, %v2247_v30  ;;  %v630_v56 = vpop.f32.mrf.mxu0  ;;  %v985_v59 = vpack.c.bf16 %v963_v51, %v961_v50 }
  0xfc   : > { %v679_v39 = vpop.f32.mrf.mxu1  ;;  %v2258_v10 = vadd.f32 %v630_v56, %v2128_v43  ;;  %v986_v60 = vpack.c.bf16 %v964_v53, %v962_v47  ;;  %v839_v61 = vadd.f32 %v807_v54, %v628_v29 }
  0xfd   : > { %v2261_v40 = vadd.f32 %v679_v39, %v2130_v44  ;;  %1153 = vmatmul.bf16.gmra.mxu2 %v985_v59  ;;  %v840_v62 = vadd.f32 %v808_v55, %v2247_v30 }
  0xfe   : > { %v745_v63 = vmul.f32 0.044715, %v2258_v10  ;;  %1202 = vmatmul.bf16.gmra.mxu3 %v986_v60  ;;  %v871_v1 = vmul.f32 0.7978846, %v839_v61  ;;  %v1830_v5 = vpop.eup %1829 }
  0xff   : > { %v746_v0 = vmul.f32 0.044715, %v2261_v40  ;;  %v872_v2 = vmul.f32 0.7978846, %v840_v62  ;;  %v1832_v57 = vpop.eup %1831  ;;  %v933_v16 = vadd.f32 1.0, %v1830_v5  ;;  %v713_v5 = vmul.f32 0.5, %v2258_v10 }
 0x100   : > { %1833 = vtanh.f32 %v871_v1  ;;  %v777_v3 = vmul.f32 %v745_v63, %v2258_v10  ;;  %v934_v48 = vadd.f32 1.0, %v1832_v57 }
 0x101   : > { %v778_v4 = vmul.f32 %v746_v0, %v2261_v40  ;;  %1835 = vtanh.f32 %v872_v2  ;;  %v965_v35 = vmul.f32 %v933_v16, %v709_v21 }
 0x102   : > { %v809_v8 = vmul.f32 %v777_v3, %v2258_v10  ;;  %v966_v36 = vmul.f32 %v934_v48, %v710_v27 }
 0x103   : > { %v810_v6 = vmul.f32 %v778_v4, %v2261_v40  ;;  %v632_v11 = vpop.f32.mrf.mxu0 }
 0x104   : > { %v681_v12 = vpop.f32.mrf.mxu1  ;;  %v633_v13 = vadd.f32 %v632_v11, %v2128_v43  ;;  %v841_v15 = vadd.f32 %v809_v8, %v2258_v10 }
 0x105   : > { %v2272_v14 = vadd.f32 %v681_v12, %v2130_v44  ;;  %v842_v17 = vadd.f32 %v810_v6, %v2261_v40  ;;  %v714_v12 = vmul.f32 0.5, %v2261_v40 }
 0x106   : > { %v1834_v18 = vpop.eup %1833  ;;  %v747_v19 = vmul.f32 0.044715, %v633_v13  ;;  %v873_v31 = vmul.f32 0.7978846, %v841_v15  ;;  %v715_v57 = vmul.f32 0.5, %v633_v13 }
 0x107   : > { %v748_v20 = vmul.f32 0.044715, %v2272_v14  ;;  %v1836_v23 = vpop.eup %1835  ;;  %v935_v26 = vadd.f32 1.0, %v1834_v18  ;;  %v874_v7 = vmul.f32 0.7978846, %v842_v17 }
 0x108   : > { %v936_v22 = vadd.f32 1.0, %v1836_v23  ;;  %v779_v33 = vmul.f32 %v747_v19, %v633_v13  ;;  %1837 = vtanh.f32 %v873_v31 }
 0x109   : > { %v780_v34 = vmul.f32 %v748_v20, %v2272_v14  ;;  %v967_v28 = vmul.f32 %v935_v26, %v711_v9  ;;  %1839 = vtanh.f32 %v874_v7 }
 0x10a   : > { %v968_v24 = vmul.f32 %v936_v22, %v712_v32  ;;  %v811_v37 = vmul.f32 %v779_v33, %v633_v13 }
 0x10b   : > { %v812_v25 = vmul.f32 %v780_v34, %v2272_v14  ;;  %v635_v38 = vpop.f32.mrf.mxu0  ;;  %v987_v41 = vpack.c.bf16 %v967_v28, %v965_v35 }
 0x10c   : > { %v684_v29 = vpop.f32.mrf.mxu1  ;;  %v2283_v58 = vadd.f32 %v635_v38, %v2128_v43  ;;  %v988_v42 = vpack.c.bf16 %v968_v24, %v966_v36  ;;  %v843_v45 = vadd.f32 %v811_v37, %v633_v13 }
 0x10d   : > { %v2286_v30 = vadd.f32 %v684_v29, %v2130_v44  ;;  %1158 = vmatmul.bf16.gmra.mxu2 %v987_v41  ;;  %v844_v46 = vadd.f32 %v812_v25, %v2272_v14 }
 0x10e   : > { %v749_v49 = vmul.f32 0.044715, %v2283_v58  ;;  %1207 = vmatmul.bf16.gmra.mxu3 %v988_v42  ;;  %v875_v51 = vmul.f32 0.7978846, %v843_v45  ;;  %v1838_v54 = vpop.eup %1837  ;;  %v717_v28 = vmul.f32 0.5, %v2283_v58 }
 0x10f   : > { %v750_v50 = vmul.f32 0.044715, %v2286_v30  ;;  %v876_v52 = vmul.f32 0.7978846, %v844_v46  ;;  %v1840_v39 = vpop.eup %1839  ;;  %v937_v0 = vadd.f32 1.0, %v1838_v54  ;;  %v718_v24 = vmul.f32 0.5, %v2286_v30 }
 0x110   : > { %1841 = vtanh.f32 %v875_v51  ;;  %v781_v47 = vmul.f32 %v749_v49, %v2283_v58  ;;  %v938_v8 = vadd.f32 1.0, %v1840_v39  ;;  %v2307_v49 = vld [vmem:[%s2428_s6] ss:$0 sm:$0xff] }
 0x111   : > { %v782_v53 = vmul.f32 %v750_v50, %v2286_v30  ;;  %1843 = vtanh.f32 %v876_v52  ;;  %v969_v18 = vmul.f32 %v937_v0, %v713_v5 }
 0x112   : > { %v813_v55 = vmul.f32 %v781_v47, %v2283_v58  ;;  %v970_v21 = vmul.f32 %v938_v8, %v714_v12 }
 0x113   : > { %v814_v56 = vmul.f32 %v782_v53, %v2286_v30  ;;  %v637_v59 = vpop.f32.mrf.mxu0 }
 0x114   : > { %v686_v60 = vpop.f32.mrf.mxu1  ;;  %v638_v61 = vadd.f32 %v637_v59, %v2128_v43  ;;  %v845_v63 = vadd.f32 %v813_v55, %v2283_v58  ;;  %v716_v43 = vmul.f32 0.5, %v2272_v14 }
 0x115   : > { %v687_v62 = vadd.f32 %v686_v60, %v2130_v44  ;;  %v846_v1 = vadd.f32 %v814_v56, %v2286_v30 }
 0x116   : > { %v1842_v2 = vpop.eup %1841  ;;  %v751_v3 = vmul.f32 0.044715, %v638_v61  ;;  %v877_v16 = vmul.f32 0.7978846, %v845_v63  ;;  %v719_v7 = vmul.f32 0.5, %v638_v61 }
 0x117   : > { %v752_v4 = vmul.f32 0.044715, %v687_v62  ;;  %v1844_v6 = vpop.eup %1843  ;;  %v939_v11 = vadd.f32 1.0, %v1842_v2  ;;  %v878_v20 = vmul.f32 0.7978846, %v846_v1  ;;  %v720_v37 = vmul.f32 0.5, %v687_v62 }
 0x118   : > { %v940_v15 = vadd.f32 1.0, %v1844_v6  ;;  %v783_v44 = vmul.f32 %v751_v3, %v638_v61  ;;  %1845 = vtanh.f32 %v877_v16 }
 0x119   : > { %v784_v17 = vmul.f32 %v752_v4, %v687_v62  ;;  %v971_v19 = vmul.f32 %v939_v11, %v715_v57  ;;  %1847 = vtanh.f32 %v878_v20 }
 0x11a   : > { %v972_v48 = vmul.f32 %v940_v15, %v716_v43  ;;  %v815_v23 = vmul.f32 %v783_v44, %v638_v61 }
 0x11b   : > { %v816_v9 = vmul.f32 %v784_v17, %v687_v62  ;;  %v989_v10 = vpack.c.bf16 %v971_v19, %v969_v18 }
 0x11c   : > { %v990_v26 = vpack.c.bf16 %v972_v48, %v970_v21  ;;  %v847_v27 = vadd.f32 %v815_v23, %v638_v61 }
 0x11d   : > { %v848_v13 = vadd.f32 %v816_v9, %v687_v62  ;;  %1163 = vmatmul.bf16.gmra.mxu2 %v989_v10 }
 0x11e   : > { %1212 = vmatmul.bf16.gmra.mxu3 %v990_v26  ;;  %v879_v40 = vmul.f32 0.7978846, %v847_v27  ;;  %v1846_v31 = vpop.eup %1845 }
 0x11f   : > { %v880_v14 = vmul.f32 0.7978846, %v848_v13  ;;  %v1848_v32 = vpop.eup %1847  ;;  %v941_v22 = vadd.f32 1.0, %v1846_v31 }
 0x120   : > { %1849 = vtanh.f32 %v879_v40  ;;  %v942_v34 = vadd.f32 1.0, %v1848_v32 }
 0x121   : > { %1851 = vtanh.f32 %v880_v14  ;;  %v973_v38 = vmul.f32 %v941_v22, %v717_v28 }
 0x122   : > { %v974_v41 = vmul.f32 %v942_v34, %v718_v24 }
 0x126   : > { %v1850_v33 = vpop.eup %1849 }
 0x127   : > { %v1852_v35 = vpop.eup %1851  ;;  %v943_v36 = vadd.f32 1.0, %v1850_v33 }
 0x128   : > { %v944_v25 = vadd.f32 1.0, %v1852_v35 }
 0x129   : > { %v975_v29 = vmul.f32 %v943_v36, %v719_v7 }
 0x12a   : > { %v976_v42 = vmul.f32 %v944_v25, %v720_v37 }
 0x12b   : > { %v991_v45 = vpack.c.bf16 %v975_v29, %v973_v38 }
 0x12c   : > { %v992_v46 = vpack.c.bf16 %v976_v42, %v974_v41 }
 0x12d   : > { %1168 = vmatmul.bf16.gmra.mxu2 %v991_v45 }
 0x12e   : > { %1217 = vmatmul.bf16.gmra.mxu3 %v992_v46 }
 0x140   : > { %v1134_v58 = vpop.f32.mrf.mxu2 }
 0x141   : > { %v1135_v50 = vadd.f32 %v2307_v49, %v1134_v58  ;;  %v1183_v30 = vpop.f32.mrf.mxu3 }
 0x143   : > { %v1184_v51 = vadd.f32 %v1183_v30, %v1135_v50 }
 0x145   : > { %v1223_v52 = vpack.c.bf16 %v1184_v51, %v1184_v51  ;;  %v1257_v56 = vsel %vm1256_vm2, %v1184_v51, 0.0 }
 0x147   : > { %1240 = vst.msk [vmem:[%s2315_s27] sm:$0xf] %vm1239_vm1, %v1223_v52 }
 0x148   : > { %v1136_v47 = vpop.f32.mrf.mxu2 }
 0x149   : > { %v1137_v53 = vadd.f32 %v2307_v49, %v1136_v47  ;;  %v1185_v54 = vpop.f32.mrf.mxu3 }
 0x14b   : > { %v1186_v55 = vadd.f32 %v1185_v54, %v1137_v53 }
 0x14d   : > { %v1224_v39 = vpack.c.bf16 %v1186_v55, %v1186_v55  ;;  %v1258_v59 = vsel %vm1256_vm2, %v1186_v55, 0.0 }
 0x14e   : > { %v1259_v60 = vadd.f32 %v1258_v59, %v1257_v56 }
 0x14f   : > { %1241 = vst.msk [vmem:[%s2315_s27 + $0x4] sm:$0xf] %vm1239_vm1, %v1224_v39 }
 0x150   : > { %v1139_v61 = vpop.f32.mrf.mxu2  ;;  %v1260_v3 = vrot.slane %v1259_v60, 4 }
 0x151   : > { %v1140_v62 = vadd.f32 %v2307_v49, %v1139_v61  ;;  %v1188_v63 = vpop.f32.mrf.mxu3 }
 0x152   : > { %v1261_v57 = vadd.f32 %v1260_v3, %v1259_v60 }
 0x153   : > { %v1189_v0 = vadd.f32 %v1188_v63, %v1140_v62 }
 0x154   : > { %v1262_v15 = vrot.slane %v1261_v57, 2 }
 0x155   : > { %v1225_v1 = vpack.c.bf16 %v1189_v0, %v1189_v0  ;;  %v1266_v2 = vsel %vm1256_vm2, %v1189_v0, 0.0 }
 0x156   : > { %v1363_v4 = vadd.f32 %v1266_v2, %v1257_v56  ;;  %v1263_v21 = vadd.f32 %v1262_v15, %v1261_v57 }
 0x157   : > { %1242 = vst.msk [vmem:[%s2315_s27 + $0x8] sm:$0xf] %vm1239_vm1, %v1225_v1 }
 0x158   : > { %v1141_v5 = vpop.f32.mrf.mxu2  ;;  %v1264_v27 = vrot.slane %v1263_v21, 1 }
 0x159   : > { %v1142_v8 = vadd.f32 %v2307_v49, %v1141_v5  ;;  %v1190_v6 = vpop.f32.mrf.mxu3 }
 0x15a   : > { %v1265_v33 = vadd.f32 %v1264_v27, %v1263_v21 }
 0x15b   : > { %v1191_v11 = vadd.f32 %v1190_v6, %v1142_v8 }
 0x15d   : > { %v1226_v12 = vpack.c.bf16 %v1191_v11, %v1191_v11  ;;  %v1267_v43 = vsel %vm1256_vm2, %v1191_v11, 0.0 }
 0x15e   : > { %v1268_v44 = vadd.f32 %v1267_v43, %v1266_v2  ;;  %v1370_v16 = vadd.f32 %v1267_v43, %v1258_v59 }
 0x15f   : > { %1243 = vst.msk [vmem:[%s2315_s27 + $0xc] sm:$0xf] %vm1239_vm1, %v1226_v12 }
 0x160   : > { %v1269_v17 = vrot.slane %v1268_v44, 4  ;;  %v1144_v18 = vpop.f32.mrf.mxu2 }
 0x161   : > { %v1145_v19 = vadd.f32 %v2307_v49, %v1144_v18  ;;  %v1193_v20 = vpop.f32.mrf.mxu3 }
 0x162   : > { %v1270_v48 = vadd.f32 %v1269_v17, %v1268_v44 }
 0x163   : > { %v1194_v23 = vadd.f32 %v1193_v20, %v1145_v19 }
 0x164   : > { %v1271_v9 = vrot.slane %v1270_v48, 2 }
 0x165   : > { %v1227_v10 = vpack.c.bf16 %v1194_v23, %v1194_v23  ;;  %v1275_v26 = vsel %vm1256_vm2, %v1194_v23, 0.0 }
 0x166   : > { %v1272_v13 = vadd.f32 %v1271_v9, %v1270_v48  ;;  %v2334_v40 = vadd.f32 %v1363_v4, %v1275_v26 }
 0x167   : > { %1244 = vst.msk [vmem:[%s2315_s27 + $0x10] sm:$0xf] %vm1239_vm1, %v1227_v10 }
 0x168   : > { %v1273_v14 = vrot.slane %v1272_v13, 1  ;;  %v1146_v31 = vpop.f32.mrf.mxu2 }
 0x169   : > { %v1147_v32 = vadd.f32 %v2307_v49, %v1146_v31  ;;  %v1195_v22 = vpop.f32.mrf.mxu3 }
 0x16a   : > { %v1274_v34 = vadd.f32 %v1273_v14, %v1272_v13 }
 0x16b   : > { %v1196_v35 = vadd.f32 %v1195_v22, %v1147_v32 }
 0x16c   : > { %v1338_v28 = vsel %vm1337_vm3, %v1274_v34, %v1265_v33 }
 0x16d   : > { %v1228_v7 = vpack.c.bf16 %v1196_v35, %v1196_v35  ;;  %v1276_v36 = vsel %vm1256_vm2, %v1196_v35, 0.0 }
 0x16e   : > { %v1277_v24 = vadd.f32 %v1276_v36, %v1275_v26  ;;  %v2340_v37 = vadd.f32 %v1370_v16, %v1276_v36  ;;  %v1877_v36 = vmov 0.0  }
 0x16f   : > { %1245 = vst.msk [vmem:[%s2315_s27 + $0x14] sm:$0xf] %vm1239_vm1, %v1228_v7 }
 0x170   : > { %v1278_v25 = vrot.slane %v1277_v24, 4  ;;  %v1149_v38 = vpop.f32.mrf.mxu2  ;;  %1359 = vst.msk [vmem:[%s2377_s14] sm:$0xff] %vm566_vm0, %v1877_v36 }
 0x171   : > { %v1150_v29 = vadd.f32 %v2307_v49, %v1149_v38  ;;  %v1198_v41 = vpop.f32.mrf.mxu3  ;;  %1360 = vst.msk [vmem:[%s2377_s14 + $0x8] sm:$0xff] %vm566_vm0, %v1877_v36 }
 0x172   : > { %v1279_v42 = vadd.f32 %v1278_v25, %v1277_v24 }
 0x173   : > { %v1199_v45 = vadd.f32 %v1198_v41, %v1150_v29 }
 0x174   : > { %v1280_v46 = vrot.slane %v1279_v42, 2 }
 0x175   : > { %v1229_v58 = vpack.c.bf16 %v1199_v45, %v1199_v45  ;;  %v1284_v26 = vsel %vm1256_vm2, %v1199_v45, 0.0 }
 0x176   : > { %v1281_v50 = vadd.f32 %v1280_v46, %v1279_v42  ;;  %v1365_v35 = vadd.f32 %v2334_v40, %v1284_v26 }
 0x177   : > { %1246 = vst.msk [vmem:[%s2315_s27 + $0x18] sm:$0xf] %vm1239_vm1, %v1229_v58 }
 0x178   : > { %v1282_v30 = vrot.slane %v1281_v50, 1  ;;  %v1151_v51 = vpop.f32.mrf.mxu2 }
 0x179   : > { %v1152_v52 = vadd.f32 %v2307_v49, %v1151_v51  ;;  %v1200_v47 = vpop.f32.mrf.mxu3 }
 0x17a   : > { %v1283_v53 = vadd.f32 %v1282_v30, %v1281_v50 }
 0x17b   : > { %v1201_v54 = vadd.f32 %v1200_v47, %v1152_v52 }
 0x17c   : > { %v2348_v55 = vsel %vm1339_vm4, %v1283_v53, %v1338_v28 }
 0x17d   : > { %v1230_v56 = vpack.c.bf16 %v1201_v54, %v1201_v54  ;;  %v1285_v48 = vsel %vm1256_vm2, %v1201_v54, 0.0 }
 0x17e   : > { %v1286_v31 = vadd.f32 %v1285_v48, %v1284_v26  ;;  %v1372_v54 = vadd.f32 %v2340_v37, %v1285_v48 }
 0x17f   : > { %1247 = vst.msk [vmem:[%s2315_s27 + $0x1c] sm:$0xf] %vm1239_vm1, %v1230_v56 }
 0x180   : > { %v1154_v39 = vpop.f32.mrf.mxu2  ;;  %v1287_v25 = vrot.slane %v1286_v31, 4 }
 0x181   : > { %v1155_v59 = vadd.f32 %v2307_v49, %v1154_v39  ;;  %v1203_v60 = vpop.f32.mrf.mxu3 }
 0x182   : > { %v1288_v30 = vadd.f32 %v1287_v25, %v1286_v31 }
 0x183   : > { %v1204_v61 = vadd.f32 %v1203_v60, %v1155_v59 }
 0x184   : > { %v1289_v60 = vrot.slane %v1288_v30, 2 }
 0x185   : > { %v1231_v62 = vpack.c.bf16 %v1204_v61, %v1204_v61  ;;  %v1293_v27 = vsel %vm1256_vm2, %v1204_v61, 0.0 }
 0x186   : > { %v1366_v38 = vadd.f32 %v1365_v35, %v1293_v27 }
 0x187   : > { %1248 = vst.msk [vmem:[%s2315_s27 + $0x20] sm:$0xf] %vm1239_vm1, %v1231_v62 }
 0x188   : > { %v1156_v63 = vpop.f32.mrf.mxu2 }
 0x189   : > { %v1157_v0 = vadd.f32 %v2307_v49, %v1156_v63  ;;  %v1205_v1 = vpop.f32.mrf.mxu3 }
 0x18b   : > { %v1206_v2 = vadd.f32 %v1205_v1, %v1157_v0 }
 0x18d   : > { %v1232_v3 = vpack.c.bf16 %v1206_v2, %v1206_v2  ;;  %v1294_v23 = vsel %vm1256_vm2, %v1206_v2, 0.0 }
 0x18e   : > { %v1295_v32 = vadd.f32 %v1294_v23, %v1293_v27  ;;  %v1373_v61 = vadd.f32 %v1372_v54, %v1294_v23 }
 0x18f   : > { %1249 = vst.msk [vmem:[%s2315_s27 + $0x24] sm:$0xf] %vm1239_vm1, %v1232_v3 }
 0x190   : > { %v1159_v4 = vpop.f32.mrf.mxu2  ;;  %v1296_v41 = vrot.slane %v1295_v32, 4 }
 0x191   : > { %v1160_v5 = vadd.f32 %v2307_v49, %v1159_v4  ;;  %v1208_v8 = vpop.f32.mrf.mxu3 }
 0x192   : > { %v1297_v52 = vadd.f32 %v1296_v41, %v1295_v32 }
 0x193   : > { %v1209_v6 = vadd.f32 %v1208_v8, %v1160_v5  ;;  %v1290_v5 = vadd.f32 %v1289_v60, %v1288_v30 }
 0x194   : > { %v1298_v63 = vrot.slane %v1297_v52, 2 }
 0x195   : > { %v1233_v57 = vpack.c.bf16 %v1209_v6, %v1209_v6  ;;  %v1302_v22 = vsel %vm1256_vm2, %v1209_v6, 0.0 }
 0x196   : > { %v1367_v40 = vadd.f32 %v1366_v38, %v1302_v22  ;;  %v1299_v6 = vadd.f32 %v1298_v63, %v1297_v52 }
 0x197   : > { %1250 = vst.msk [vmem:[%s2315_s27 + $0x28] sm:$0xf] %vm1239_vm1, %v1233_v57 }
 0x198   : > { %v1161_v11 = vpop.f32.mrf.mxu2 }
 0x199   : > { %v1162_v12 = vadd.f32 %v2307_v49, %v1161_v11  ;;  %v1210_v43 = vpop.f32.mrf.mxu3 }
 0x19b   : > { %v1211_v15 = vadd.f32 %v1210_v43, %v1162_v12 }
 0x19d   : > { %v1234_v44 = vpack.c.bf16 %v1211_v15, %v1211_v15  ;;  %v1303_v13 = vsel %vm1256_vm2, %v1211_v15, 0.0 }
 0x19e   : > { %v1304_v28 = vadd.f32 %v1303_v13, %v1302_v22  ;;  %v1374_v2 = vadd.f32 %v1373_v61, %v1303_v13 }
 0x19f   : > { %1251 = vst.msk [vmem:[%s2315_s27 + $0x2c] sm:$0xf] %vm1239_vm1, %v1234_v44 }
 0x1a0   : > { %v1164_v16 = vpop.f32.mrf.mxu2  ;;  %v1305_v46 = vrot.slane %v1304_v28, 4 }
 0x1a1   : > { %v1165_v17 = vadd.f32 %v2307_v49, %v1164_v16  ;;  %v1213_v18 = vpop.f32.mrf.mxu3  ;;  %v1291_v16 = vrot.slane %v1290_v5, 1 }
 0x1a2   : > { %v1306_v56 = vadd.f32 %v1305_v46, %v1304_v28 }
 0x1a3   : > { %v1214_v19 = vadd.f32 %v1213_v18, %v1165_v17 }
 0x1a4   : > { %v1307_v1 = vrot.slane %v1306_v56, 2 }
 0x1a5   : > { %v1235_v20 = vpack.c.bf16 %v1214_v19, %v1214_v19  ;;  %v1311_v7 = vsel %vm1256_vm2, %v1214_v19, 0.0 }
 0x1a6   : > { %v1368_v51 = vadd.f32 %v1367_v40, %v1311_v7  ;;  %v1308_v12 = vadd.f32 %v1307_v1, %v1306_v56 }
 0x1a7   : > { %1252 = vst.msk [vmem:[%s2315_s27 + $0x30] sm:$0xf] %vm1239_vm1, %v1235_v20 }
 0x1a8   : > { %v1166_v21 = vpop.f32.mrf.mxu2  ;;  %v1309_v18 = vrot.slane %v1308_v12, 1 }
 0x1a9   : > { %v1167_v9 = vadd.f32 %v2307_v49, %v1166_v21  ;;  %v1215_v10 = vpop.f32.mrf.mxu3  ;;  %v1292_v21 = vadd.f32 %v1291_v16, %v1290_v5 }
 0x1ab   : > { %v1216_v14 = vadd.f32 %v1215_v10, %v1167_v9  ;;  %v1310_v9 = vadd.f32 %v1309_v18, %v1308_v12  ;;  %v1342_v13 = vsel %vm1341_vm5, %v1292_v21, %v2348_v55 }
 0x1ad   : > { %v1236_v33 = vpack.c.bf16 %v1216_v14, %v1216_v14  ;;  %v1312_v34 = vsel %vm1256_vm2, %v1216_v14, 0.0 }
 0x1ae   : > { %v1313_v24 = vadd.f32 %v1312_v34, %v1311_v7  ;;  %v1375_v8 = vadd.f32 %v1374_v2, %v1312_v34  ;;  %v1361_v34 = vld [vmem:[%s2377_s14] sm:$0xff]  ;;  %v1362_v7 = vld [vmem:[%s2377_s14 + $0x8] sm:$0xff] }
 0x1af   : > { %1253 = vst.msk [vmem:[%s2315_s27 + $0x34] sm:$0xf] %vm1239_vm1, %v1236_v33 }
 0x1b0   : > { %v1169_v29 = vpop.f32.mrf.mxu2  ;;  %v1314_v58 = vrot.slane %v1313_v24, 4 }
 0x1b1   : > { %v1170_v42 = vadd.f32 %v2307_v49, %v1169_v29  ;;  %v1218_v45 = vpop.f32.mrf.mxu3 }
 0x1b2   : > { %v1315_v59 = vadd.f32 %v1314_v58, %v1313_v24 }
 0x1b3   : > { %v1219_v50 = vadd.f32 %v1218_v45, %v1170_v42 }
 0x1b4   : > { %v1316_v4 = vrot.slane %v1315_v59, 2 }
 0x1b5   : > { %v1237_v47 = vpack.c.bf16 %v1219_v50, %v1219_v50  ;;  %v1320_v53 = vsel %vm1256_vm2, %v1219_v50, 0.0 }
 0x1b6   : > { %v1369_v39 = vadd.f32 %v1368_v51, %v1320_v53  ;;  %v1317_v44 = vadd.f32 %v1316_v4, %v1315_v59 }
 0x1b7   : > { %1254 = vst.msk [vmem:[%s2315_s27 + $0x38] sm:$0xf] %vm1239_vm1, %v1237_v47 }
 0x1b8   : > { %v1171_v62 = vpop.f32.mrf.mxu2  ;;  %1379 = vrot.lane.b32.xlu0 %v1369_v39, %s1878_s15  ;;  %v1318_v20 = vrot.slane %v1317_v44, 1 }
 0x1b9   : > { %v1172_v0 = vadd.f32 %v2307_v49, %v1171_v62  ;;  %v1220_v3 = vpop.f32.mrf.mxu3  ;;  %v1300_v49 = vrot.slane %v1299_v6, 1 }
 0x1ba   : > { %v1319_v26 = vadd.f32 %v1318_v20, %v1317_v44 }
 0x1bb   : > { %v1221_v37 = vadd.f32 %v1220_v3, %v1172_v0  ;;  %v1301_v23 = vadd.f32 %v1300_v49, %v1299_v6 }
 0x1bd   : > { %v1238_v57 = vpack.c.bf16 %v1221_v37, %v1221_v37  ;;  %v1321_v11 = vsel %vm1256_vm2, %v1221_v37, 0.0  ;;  %v1344_v14 = vsel %vm1343_vm6, %v1301_v23, %v1342_v13 }
 0x1be   : > { %v1376_v43 = vadd.f32 %v1375_v8, %v1321_v11  ;;  %v1322_v15 = vadd.f32 %v1321_v11, %v1320_v53  ;;  %v1346_v32 = vsel %vm1345_vm7, %v1310_v9, %v1344_v14 }
 0x1bf   : > { %1255 = vst.msk [vmem:[%s2315_s27 + $0x3c] sm:$0xf] %vm1239_vm1, %v1238_v57  ;;  %v1348_v22 = vsel %vm1347_vm8, %v1319_v26, %v1346_v32 }
 0x1c0   : > { %v1323_v17 = vrot.slane %v1322_v15, 4  ;;  %1381 = vrot.lane.b32.xlu0 %v1376_v43, %s1878_s15 }
 0x1c2   : > { %v1324_v19 = vadd.f32 %v1323_v17, %v1322_v15 }
 0x1c4   : > { %v1325_v48 = vrot.slane %v1324_v19, 2 }
 0x1c6   : > { %v1326_v10 = vadd.f32 %v1325_v48, %v1324_v19 }
 0x1c8   : > { %v1327_v27 = vrot.slane %v1326_v10, 1 }
 0x1ca   : > { %v1328_v31 = vadd.f32 %v1327_v27, %v1326_v10 }
 0x1cc   : > { %v1350_v33 = vsel %vm1349_vm9, %v1328_v31, %v1348_v22 }
 0x1cd   : > { %1351 = vrot.lane.b32.xlu1 %v1350_v33, %s1878_s15 }
 0x22a   : > { %v1380_v35 = vpop.permute.xlu0 %1379 }
 0x22b   : > { %v1385_v28 = vadd.f32 %v1380_v35, %v1361_v34 }
 0x22d   : > { %1387 = vst.msk [vmem:[%s2377_s14] sm:$0xff] %vm566_vm0, %v1385_v28 }
 0x232   : > { %v1382_v36 = vpop.permute.xlu0 %1381 }
 0x233   : > { %v1386_v24 = vadd.f32 %v1382_v36, %v1362_v7 }
 0x235   : > { %1388 = vst.msk [vmem:[%s2377_s14 + $0x8] sm:$0xff] %vm566_vm0, %v1386_v24 }
 0x23f   : > { %v1352_v55 = vpop.permute.xlu1 %1351 }
 0x240   : > { %1354 = vst.msk [vmem:[%s425_s19] sm:$0xff] %vm566_vm0, %v1352_v55 }
 0x241 PF: > { %s20_s11 = sadd.s32 1, %s1875_s11   ;;  %s2432_s30 = smov %s1871_s10 }
 0x242   : > { %p17_p5 = scmp.ge.s32.totalorder %s20_s11, 4   ;;  %s2433_s10 = smov %s2435_s12 }
 0x244   :  { %19 = sbr.rel (!%p17_p5) target bundleno = 2 (0x2), region = 112 }

// kernel: _lambda_.7
= control target key start
LH: loop header
LB: loop body
LE: loop exit
PB: predicated region body
PF: predicated region fallthrough
CT: control target
= control target key end

     0   :  { %9 = vsyncpa [#allocation3], 0  ;;  %s986_s0 = inlined_call_operand.vmem [shape: bf16[2,128,32], index: 0, kind: input, shape index: {}]   ;;  %s987_s1 = inlined_call_operand.vmem [shape: f32[2,1,32], index: 1, kind: input, shape index: {}]   ;;  %s988_s2 = inlined_call_operand.vmem [shape: f32[2,1,32], index: 2, kind: input, shape index: {}]   ;;  %s989_s3 = inlined_call_operand.vmem [shape: bf16[32,64], index: 3, kind: input, shape index: {}]   ;;  %s990_s4 = inlined_call_operand.hbm [shape: f32[2,128,64], index: 4, kind: output, shape index: {}]  }
   0x1   :  { %11 = vsyncpa [#allocation3 + $0x1], 0  ;;  %s802_s15 = smov 0   ;;  %s804_s16 = smov 0  }
   0x2   :  { %s806_s17 = smov 0   ;;  %s808_s18 = smov 0  }
   0x3   :  { %s810_s19 = smov 0   ;;  %s812_s20 = smov 0  }
   0x4 LB: > { %s558_s21 = sadd.s32 4294967295, %s773_s20   ;;  %s559_s22 = sadd.s32 4294967294, %s773_s20   ;;  %s773_s20 = sphi %s812_s20, %s17_s20   ;;  %s769_s19 = sphi %s810_s19, %s997_s19   ;;  %s765_s18 = sphi %s808_s18, %s996_s18   ;;  %s761_s17 = sphi %s806_s17, %s995_s17   ;;  %s757_s16 = sphi %s804_s16, %s994_s16   ;;  %s753_s15 = sphi %s802_s15, %s993_s15  }
   0x5   : > { %s29_s23 = sadd.s32 1, %s769_s19  ;;  %s139_s24 = sadd.s32 1, %s761_s17 }
   0x6   : > { %p31_p0 = scmp.ge.s32.totalorder %s29_s23, 2  ;;  %p149_p1 = scmp.ne.s32.totalorder %s761_s17, %s757_s16 }
   0x7   : > { %p150_p2 = scmp.eq.s32.totalorder %s558_s21, 1  ;;  %p155_p3 = scmp.ne.s32.totalorder %s757_s16, %s753_s15 }
   0x8   : > { %s999_s23 = smov (%p31_p0, %s29_s23), 0  ;;  %p156_p5 = scmp.eq.s32.totalorder %s559_s22, 1 }
   0x9   : > { %p842_p4 = por %p150_p2, %p149_p1  ;;  %s134_s26 = ssub.s32 %s769_s19, %s999_s23 }
   0xa   : > { %p562_p6 = scmp.ge.s32.totalorder %s773_s20, 1  ;;  %p137_p7 = scmp.eq.s32.totalorder %s134_s26, 0 }
   0xb   : > { %p849_p8 = por %p156_p5, %p155_p3  ;;  %p202_p9 = scmp.lt.s32.totalorder %s773_s20, 3 }
   0xc   : > { %s855_s28 = scalar_select %p137_p7, %s761_s17, %s139_s24  }
   0xd   : > { %p203_p10 = pnand %p562_p6, %p202_p9 }
   0xe   : > { %p239_p11 = scmp.lt.s32.totalorder (!%p203_p10), %s765_s18, 1  ;;  %s235_s26 = sand.u32 (!%p203_p10), 1, %s757_s16  }
   0xf   : > { %206 = sbr.rel (%p203_p10) target bundleno = 195 (0xc3), region = 36  ;;  %s563_s29 = sshll.u32 (!%p203_p10), %s235_s26, 7 }
  0x10   : > { %s913_s30 = scalar_lea.vmem (!%p203_p10), [#allocation2], %s563_s29  ;;  %s590_s5 = sshll.u32 (!%p203_p10), %s765_s18, 7 }
  0x11   : > { %s444_s10 = scalar_lea.sflag (!%p203_p10), [#allocation3], %s235_s26  ;;  %s715_s21 = scalar_lea.hbm (!%p203_p10), %s990_s4, 256 }
  0x14   : > { %v589_v0 = vld [vmem:[%s989_s3 + $0x8] sm:$0xff]  ;;  %v588_v1 = vld [vmem:[%s989_s3] sm:$0xff]  ;;  %s240_s7 = scalar_select %p239_p11, %s765_s18, 1  ;;  %vm352_vm0 = vcmask 261120   ;;  %vm426_vm1 = vcmask 523264  }
  0x15   : > { %383 = vmatpush.bf16.msra.mxu0 %v589_v0  ;;  %630 = vmatpush.bf16.msra.mxu1 %v589_v0  ;;  %s458_s18 = sshll.u32 %s913_s30, 4  ;;  %s459_s18 = int_to_ptr.vmem [resolvable:$true] %s458_s18 }
  0x16   : > { %631 = vmatpush.bf16.msra.mxu2 %v589_v0  ;;  %632 = vmatpush.bf16.msra.mxu3 %v589_v0  ;;  %s587_s8 = sshll.u32 %s240_s7, 6  ;;  %s250_s11 = scalar_lea.vmem %s987_s1, %s240_s7 }
  0x17   : > { %s871_s14 = scalar_lea.vmem %s986_s0, %s587_s8  ;;  %s253_s24 = scalar_lea.vmem %s988_s2, %s240_s7  ;;  %v693_v2 = vld [vmem:[%s250_s11] ss:$0 sm:$0xff] }
  0x18   : > { %v592_v3 = vld [vmem:[%s871_s14] sm:$0xff]   ;;  %v624_v7 = vld [vmem:[%s871_s14 + $0x10] sm:$0xff]   ;;  %v623_v30 = vld [vmem:[%s871_s14 + $0x8] sm:$0xff]   ;;  %s457_s8 = scalar_lea.hbm %s990_s4, %s590_s5 }
  0x19   : > { %384 = vmatpush.bf16.msra.mxu0 %v588_v1  ;;  %633 = vmatpush.bf16.msra.mxu1 %v588_v1  ;;  %v877_v4 = vld [vmem:[%s253_s24] ss:$0 sm:$0xff]  ;;  %v593_v5 = vunpack.c.l.bf16 %v592_v3  ;;  %v594_v6 = vunpack.c.h.bf16 %v592_v3  ;;  %v628_v9 = vld [vmem:[%s871_s14 + $0x30] sm:$0xff]   ;;  %v601_v10 = vunpack.c.l.bf16 %v624_v7  ;;  %v602_v11 = vunpack.c.h.bf16 %v624_v7  ;;  %v625_v34 = vld [vmem:[%s871_s14 + $0x18] sm:$0xff]   ;;  %s460_s9 = sshll.u32 %s457_s8, 4  ;;  %s461_s9 = int_to_ptr.hbm [resolvable:$true] %s460_s9 }
  0x1a   : > { %634 = vmatpush.bf16.msra.mxu2 %v588_v1  ;;  %635 = vmatpush.bf16.msra.mxu3 %v588_v1  ;;  %v626_v8 = vld [vmem:[%s871_s14 + $0x20] sm:$0xff]   ;;  %v617_v16 = vunpack.c.l.bf16 %v628_v9  ;;  %v618_v17 = vunpack.c.h.bf16 %v628_v9  ;;  %v627_v35 = vld [vmem:[%s871_s14 + $0x28] sm:$0xff]   ;;  %v629_v38 = vld [vmem:[%s871_s14 + $0x38] sm:$0xff]   ;;  %v597_v40 = vunpack.c.l.bf16 %v623_v30  ;;  %v598_v41 = vunpack.c.h.bf16 %v623_v30  ;;  %s709_s11 = sshra.s32 %s461_s9, 4  ;;  %s710_s11 = int_to_ptr.hbm [resolvable:$true] %s709_s11 }
  0x1b   : > { %v609_v12 = vunpack.c.l.bf16 %v626_v8  ;;  %v610_v13 = vunpack.c.h.bf16 %v626_v8  ;;  %v292_v14 = vmul.f32 %v693_v2, %v593_v5  ;;  %v293_v15 = vmul.f32 %v693_v2, %v594_v6  ;;  %s711_s12 = scalar_lea.hbm %s710_s11, 128  ;;  %p716_p1 = scmp.lt.s32.totalorder %s710_s11, %s990_s4 }
  0x1c   : > { %v296_v18 = vmul.f32 %v693_v2, %v601_v10  ;;  %v297_v19 = vmul.f32 %v693_v2, %v602_v11  ;;  %v304_v24 = vmul.f32 %v693_v2, %v617_v16  ;;  %v305_v25 = vmul.f32 %v693_v2, %v618_v17  ;;  %p712_p12 = scmp.ne.s32.totalorder %s710_s11, %s711_s12  ;;  %p717_p2 = scmp.lt.s32.totalorder %s715_s21, %s711_s12 }
  0x1d   : > { %v300_v20 = vmul.f32 %v693_v2, %v609_v12  ;;  %v301_v21 = vmul.f32 %v693_v2, %v610_v13  ;;  %v312_v22 = vadd.f32 %v877_v4, %v292_v14  ;;  %v313_v23 = vadd.f32 %v877_v4, %v293_v15 }
  0x1e   : > { %v316_v26 = vadd.f32 %v877_v4, %v296_v18  ;;  %v317_v27 = vadd.f32 %v877_v4, %v297_v19  ;;  %v324_v32 = vadd.f32 %v877_v4, %v304_v24  ;;  %v325_v33 = vadd.f32 %v877_v4, %v305_v25  ;;  %p713_p13 = pnand %p712_p12, %p842_p4  ;;  %p718_p3 = por %p717_p2, %p716_p1 }
  0x1f   : > { %v320_v28 = vadd.f32 %v877_v4, %v300_v20  ;;  %v321_v29 = vadd.f32 %v877_v4, %v301_v21  ;;  %v328_v31 = vpack.c.bf16 %v313_v23, %v312_v22  ;;  %v605_v42 = vunpack.c.l.bf16 %v625_v34 }
  0x20   : > { %v330_v36 = vpack.c.bf16 %v317_v27, %v316_v26  ;;  %v334_v39 = vpack.c.bf16 %v325_v33, %v324_v32  ;;  %v606_v43 = vunpack.c.h.bf16 %v625_v34  ;;  %v613_v44 = vunpack.c.l.bf16 %v627_v35  ;;  %p714_p0 = pneg %p713_p13 }
  0x21   : > { %v332_v37 = vpack.c.bf16 %v321_v29, %v320_v28  ;;  %574 = vmatmul.msk.bf16.vlgmr.msra.gmra.mxu0 %vm352_vm0, %v328_v31  ;;  %v614_v45 = vunpack.c.h.bf16 %v627_v35  ;;  %v621_v46 = vunpack.c.l.bf16 %v629_v38  ;;  %v622_v47 = vunpack.c.h.bf16 %v629_v38 }
  0x22   : > { %576 = vmatmul.msk.bf16.vlgmr.msra.gmra.mxu1 %vm352_vm0, %v330_v36  ;;  %580 = vmatmul.msk.bf16.vlgmr.msra.gmra.mxu3 %vm352_vm0, %v334_v39  ;;  %v294_v48 = vmul.f32 %v693_v2, %v597_v40  ;;  %v295_v49 = vmul.f32 %v693_v2, %v598_v41  ;;  %v298_v50 = vmul.f32 %v693_v2, %v605_v42  ;;  %p719_p5 = pnand %p718_p3, %p714_p0 }
  0x23   : > { %578 = vmatmul.msk.bf16.vlgmr.msra.gmra.mxu2 %vm352_vm0, %v332_v37  ;;  %v299_v51 = vmul.f32 %v693_v2, %v606_v43  ;;  %v302_v52 = vmul.f32 %v693_v2, %v613_v44  ;;  %v303_v53 = vmul.f32 %v693_v2, %v614_v45  ;;  %v306_v54 = vmul.f32 %v693_v2, %v621_v46 }
  0x24   : > { %v307_v55 = vmul.f32 %v693_v2, %v622_v47  ;;  %v314_v56 = vadd.f32 %v877_v4, %v294_v48  ;;  %v315_v57 = vadd.f32 %v877_v4, %v295_v49  ;;  %v318_v58 = vadd.f32 %v877_v4, %v298_v50 }
  0x25   : > { %v319_v59 = vadd.f32 %v877_v4, %v299_v51  ;;  %v322_v60 = vadd.f32 %v877_v4, %v302_v52  ;;  %v323_v61 = vadd.f32 %v877_v4, %v303_v53  ;;  %v326_v62 = vadd.f32 %v877_v4, %v306_v54 }
  0x26   : > { %v327_v63 = vadd.f32 %v877_v4, %v307_v55  ;;  %v329_v0 = vpack.c.bf16 %v315_v57, %v314_v56 }
  0x27   : > { %v331_v1 = vpack.c.bf16 %v319_v59, %v318_v58  ;;  %v333_v2 = vpack.c.bf16 %v323_v61, %v322_v60 }
  0x28   : > { %v335_v3 = vpack.c.bf16 %v327_v63, %v326_v62 }
  0x31   : > { %575 = vmatmul.msk.bf16.gmra.mxu0 %vm352_vm0, %v329_v0 }
  0x32   : > { %577 = vmatmul.msk.bf16.gmra.mxu1 %vm352_vm0, %v331_v1  ;;  %581 = vmatmul.msk.bf16.gmra.mxu3 %vm352_vm0, %v335_v3 }
  0x33   : > { %579 = vmatmul.msk.bf16.gmra.mxu2 %vm352_vm0, %v333_v2 }
  0x9e   : > { %v386_v5 = vpop.f32.mrf.mxu0 }
  0x9f   : > { %427 = vst.msk [vmem:[%s913_s30] sm:$0xff] %vm426_vm1, %v386_v5  ;;  %v396_v4 = vpop.f32.mrf.mxu1 }
  0xa0   : > { %431 = vst.msk [vmem:[%s913_s30 + $0x20] sm:$0xff] %vm426_vm1, %v396_v4 }
  0xa5   : > { %v416_v7 = vpop.f32.mrf.mxu3 }
  0xa6   : > { %v406_v6 = vpop.f32.mrf.mxu2  ;;  %v388_v8 = vpop.f32.mrf.mxu0  ;;  %439 = vst.msk [vmem:[%s913_s30 + $0x60] sm:$0xff] %vm426_vm1, %v416_v7 }
  0xa7   : > { %435 = vst.msk [vmem:[%s913_s30 + $0x40] sm:$0xff] %vm426_vm1, %v406_v6  ;;  %v398_v9 = vpop.f32.mrf.mxu1 }
  0xa8   : > { %428 = vst.msk [vmem:[%s913_s30 + $0x8] sm:$0xff] %vm426_vm1, %v388_v8 }
  0xa9   : > { %432 = vst.msk [vmem:[%s913_s30 + $0x28] sm:$0xff] %vm426_vm1, %v398_v9 }
  0xad   : > { %v418_v11 = vpop.f32.mrf.mxu3 }
  0xae   : > { %v408_v10 = vpop.f32.mrf.mxu2  ;;  %v391_v12 = vpop.f32.mrf.mxu0  ;;  %440 = vst.msk [vmem:[%s913_s30 + $0x68] sm:$0xff] %vm426_vm1, %v418_v11 }
  0xaf   : > { %436 = vst.msk [vmem:[%s913_s30 + $0x48] sm:$0xff] %vm426_vm1, %v408_v10  ;;  %v401_v13 = vpop.f32.mrf.mxu1 }
  0xb0   : > { %429 = vst.msk [vmem:[%s913_s30 + $0x10] sm:$0xff] %vm426_vm1, %v391_v12 }
  0xb1   : > { %433 = vst.msk [vmem:[%s913_s30 + $0x30] sm:$0xff] %vm426_vm1, %v401_v13 }
  0xb5   : > { %v421_v15 = vpop.f32.mrf.mxu3 }
  0xb6   : > { %v411_v14 = vpop.f32.mrf.mxu2  ;;  %v393_v16 = vpop.f32.mrf.mxu0  ;;  %441 = vst.msk [vmem:[%s913_s30 + $0x70] sm:$0xff] %vm426_vm1, %v421_v15 }
  0xb7   : > { %437 = vst.msk [vmem:[%s913_s30 + $0x50] sm:$0xff] %vm426_vm1, %v411_v14  ;;  %v403_v17 = vpop.f32.mrf.mxu1 }
  0xb8   : > { %430 = vst.msk [vmem:[%s913_s30 + $0x18] sm:$0xff] %vm426_vm1, %v393_v16 }
  0xb9   : > { %434 = vst.msk [vmem:[%s913_s30 + $0x38] sm:$0xff] %vm426_vm1, %v403_v17 }
  0xbd   : > { %v423_v19 = vpop.f32.mrf.mxu3 }
  0xbe   : > { %v413_v18 = vpop.f32.mrf.mxu2  ;;  %442 = vst.msk [vmem:[%s913_s30 + $0x78] sm:$0xff] %vm426_vm1, %v423_v19 }
  0xbf   : > { %438 = vst.msk [vmem:[%s913_s30 + $0x58] sm:$0xff] %vm426_vm1, %v413_v18 }
  0xc0   : > { %722 = shalt.err (!%p719_p5)
}
  0xc1   : > { %s775_s26 = smov 128   ;;  %s776_s29 = smov 8  }
  0xc2   : > { %636 = dma.vmem_to_hbm [thread:$0]  (%p842_p4), %s459_s18, 2048, %s461_s9, %s444_s10, %s775_s26, %s775_s26, %s776_s29  }
  0xc3 PF: > { %p642_p6 = scmp.ge.s32.totalorder %s773_s20, 2  ;;  %s475_s30 = sand.u32 1, %s753_s15  }
  0xc4   : > { %s476_s5 = scalar_lea.sflag [#allocation3], %s475_s30 }
  0xc5   : > { %p639_p7 = pnand %p642_p6, %p849_p8 }
  0xc7   : > { %p640_p9 = pneg %p639_p7 }
  0xc9   : > { %748 = dma.done.wait (%p640_p9), %s476_s5, 2048  }
  0xca   : > { %750 = vsyncadd (%p640_p9), %s476_s5, 4294965248  ;;  %s17_s20 = sadd.s32 1, %s773_s20   ;;  %s993_s15 = smov %s757_s16 }
  0xcb   : > { %p14_p10 = scmp.ge.s32.totalorder %s17_s20, 4   ;;  %s994_s16 = smov %s761_s17 }
  0xcc   : > { %s995_s17 = smov %s855_s28  ;;  %s996_s18 = smov %s769_s19 }
  0xcd   : > { %s997_s19 = smov %s999_s23  ;;  %16 = sbr.rel (!%p14_p10) target bundleno = 4 (0x4), region = 77 }
  0xd2   :  { %482 = vsyncpa [#allocation3], 1 }
  0xd3   :  { %484 = vsyncpa [#allocation3 + $0x1], 1 }

// kernel: _lambda_.6
= control target key start
LH: loop header
LB: loop body
LE: loop exit
PB: predicated region body
PF: predicated region fallthrough
CT: control target
= control target key end

     0   :  { %s5484_s27 = smov 0   ;;  %s7396_s0 = inlined_call_operand.vmem [shape: bf16[2,4,8,24], index: 0, kind: input, shape index: {}]   ;;  %s7397_s1 = inlined_call_operand.vmem [shape: bf16[2,4,8,24], index: 1, kind: input, shape index: {}]   ;;  %s7398_s2 = inlined_call_operand.vmem [shape: f32[4,8,8], index: 2, kind: input, shape index: {}]   ;;  %s7399_s3 = inlined_call_operand.vmem [shape: bf16[2,4,16,24], index: 3, kind: input, shape index: {}]   ;;  %s7400_s4 = inlined_call_operand.vmem [shape: bf16[2,4,16,24], index: 4, kind: input, shape index: {}]   ;;  %s7401_s5 = inlined_call_operand.vmem [shape: f32[4,16,16], index: 5, kind: input, shape index: {}]   ;;  %s7402_s6 = inlined_call_operand.vmem [shape: f32[1,8], index: 6, kind: input, shape index: {}]   ;;  %s7403_s7 = inlined_call_operand.vmem [shape: bf16[2,4,64,16], index: 7, kind: input, shape index: {}]   ;;  %s7404_s8 = inlined_call_operand.vmem [shape: bf16[2,8,16,32], index: 8, kind: output, shape index: {}]  }
   0x1 LB: > { %s4773_s28 = sadd.s32 4294967295, %s5420_s27   ;;  %p4777_p0 = scmp.ge.s32.totalorder %s5420_s27, 1  ;;  %s5420_s27 = sphi %s5484_s27, %s18_s27  }
   0x2   : > { %p302_p1 = scmp.lt.s32.totalorder %s5420_s27, 3 }
   0x4   : > { %p303_p2 = pnand %p4777_p0, %p302_p1 }
   0x6   : > { %306 = sbr.rel (%p303_p2) target bundleno = 2719 (0xa9f), region = 52 }
   0xb   : > { %p356_p3 = scmp.lt.s32.totalorder %s4773_s28, 1  ;;  %vm389_vm0 = vcmask 195584   ;;  %v4838_v15 = vld [vmem:[%s7401_s5 + $0x10] sm:$0xff]  ;;  %v4839_v17 = vld [vmem:[%s7401_s5 + $0x18] sm:$0xff]  ;;  %vm494_vm3 = vcmask 130048   ;;  %v453_v32 = vld [vmem:[%s7401_s5] sm:$0xff] }
   0xc   : > { %v454_v36 = vld [vmem:[%s7401_s5 + $0x8] sm:$0xff]  ;;  %vm796_vm6 = vcmask 1047556   ;;  %s5424_s15 = smov 32   ;;  %s5425_s16 = smov 40   ;;  %vm1080_vm7 = vcmask 64512   ;;  %vm1084_vm8 = vcmask 261120  }
   0xd   : > { %s7521_s28 = smov (!%p356_p3, %s4773_s28), 1  ;;  %s7421_s18 = smov 24   ;;  %vm1086_vm9 = vcmask 326656   ;;  %vm7420_vm10 = vcmask 392192   ;;  %vm7409_vm11 = vcmask 457728   ;;  %vm1092_vm12 = vcmask 523264  }
   0xe   : > { %s4967_s29 = sshll.u32 %s7521_s28, 4  ;;  %s4969_s11 = sshll.u32 %s7521_s28, 5  ;;  %vm1094_vm13 = vcmask 588800   ;;  %vm1096_vm14 = vcmask 654336   ;;  %vm7410_vm15 = vcmask 719872  }
   0xf   : > { %s5498_s10 = scalar_lea.vmem %s7397_s1, %s4967_s29  ;;  %s5506_s14 = scalar_lea.vmem %s7400_s4, %s4969_s11 }
  0x10   : > { %v388_v0 = vld [vmem:[%s5498_s10] sm:$0xf]  ;;  %s5511_s17 = scalar_lea.vmem %s7396_s0, %s4967_s29  ;;  %v4980_v2 = vld [vmem:[%s5506_s14 + $0x8] sm:$0xff]  ;;  %s5520_s20 = scalar_lea.vmem %s7399_s3, %s4969_s11  ;;  %v4822_v8 = vld [vmem:[%s5498_s10 + $0x4] sm:$0xf] }
  0x11   : > { %v394_v1 = vsel %vm389_vm0, %v388_v0, 0  ;;  %v1450_v3 = vsel %vm389_vm0, %v4980_v2, 0  ;;  %v387_v4 = vld [vmem:[%s5511_s17] sm:$0xf]  ;;  %v4979_v5 = vld [vmem:[%s5520_s20 + $0x8] sm:$0xff]  ;;  %v1408_v9 = vsel %vm389_vm0, %v4822_v8, 0 }
  0x12   : > { %403 = vmatpush.bf16.xpose.msra.mxu0 %v394_v1  ;;  %v4974_v6 = vld [vmem:[%s5506_s14] sm:$0xff]  ;;  %1417 = vmatpush.bf16.xpose.msra.mxu3 %v1408_v9  ;;  %s4971_s25 = sshll.u32 %s7521_s28, 7  ;;  %s5427_s19 = smov 8  }
  0x13   : > { %v437_v7 = vsel %vm389_vm0, %v4974_v6, 0  ;;  %v4973_v10 = vld [vmem:[%s5520_s20] sm:$0xff]  ;;  %s5545_s30 = scalar_lea.vmem %s7403_s7, %s4971_s25  ;;  %s7423_s21 = smov 16  }
  0x14   : > { %446 = vmatpush.bf16.xpose.msra.mxu1 %v437_v7  ;;  %v4821_v11 = vld [vmem:[%s5511_s17 + $0x4] sm:$0xf]  ;;  %v4983_v29 = vld [vmem:[%s5545_s30 + $0x30] sm:$0xff]  ;;  %v4982_v30 = vld [vmem:[%s5545_s30 + $0x28] sm:$0xff]  ;;  %s5429_s22 = smov 48   ;;  %s5430_s23 = smov 56  }
  0x15   : > { %v4981_v28 = vld [vmem:[%s5545_s30 + $0x20] sm:$0xff]  ;;  %v4984_v31 = vld [vmem:[%s5545_s30 + $0x38] sm:$0xff]  ;;  %s5431_s24 = smov 88   ;;  %s7418_s25 = smov 104  }
  0x16   : > { %s7411_s26 = smov 112   ;;  %s7413_s29 = smov 72  }
  0x17   : > { %s5435_s9 = smov 80   ;;  %s7407_s11 = smov 96  }
  0x18   : > { %s7405_s12 = smov 64   ;;  %s7416_s13 = smov 120  }
  0x19   : > { %4790 = vmatmul.msk.bf16.vlgmr.msra.gmra.mxu0 %vm389_vm0, %v387_v4  ;;  %4823 = vmatmul.msk.bf16.vlgmr.msra.gmra.mxu3 %vm389_vm0, %v4821_v11 }
  0x1a   : > { %1459 = vmatpush.bf16.xpose.msrb.mxu0 %v1450_v3  ;;  %v5422_v3 = vmov 1983009808  }
  0x1b   : > { %4799 = vmatmul.msk.bf16.vlgmr.msra.gmra.mxu1 %vm389_vm0, %v4973_v10  ;;  %v801_v4 = vunpack.c.l.s4 %v5422_v3 }
  0x29   : > { %4837 = vmatmul.msk.bf16.vlgmr.msrb.gmra.mxu0 %vm389_vm0, %v4979_v5 }
  0x96   : > { %v5532_v12 = vpop.f32.mrf.mxu0 }
  0x98   : > { %v448_v33 = vpop.f32.mrf.mxu1 }
  0x99   : > { %v455_v34 = vmul.f32 %v453_v32, %v448_v33 }
  0x9b   : > { %v459_v35 = vmul.f32 0.2, %v455_v34  ;;  %vm457_vm4 = vcmp.ge.f32.partialorder %v455_v34, 0.0 }
  0x9c   : > { %v5561_v40 = vpop.f32.mrf.mxu3 }
  0x9d   : > { %v461_v39 = vsel %vm457_vm4, %v455_v34, %v459_v35 }
  0x9e   : > { %v407_v13 = vpop.f32.mrf.mxu0  ;;  %v463_v42 = vmul.f32 0.15421256, %v461_v39 }
  0x9f   : > { %v5568_v13 = vunpack.c.0.s8 %v801_v4 }
  0xa0   : > { %v450_v37 = vpop.f32.mrf.mxu1 }
  0xa1   : > { %v456_v38 = vmul.f32 %v454_v36, %v450_v37 }
  0xa3   : > { %vm458_vm5 = vcmp.ge.f32.partialorder %v456_v38, 0.0  ;;  %v460_v41 = vmul.f32 0.2, %v456_v38 }
  0xa4   : > { %v1421_v47 = vpop.f32.mrf.mxu3 }
  0xa5   : > { %v462_v43 = vsel %vm458_vm5, %v456_v38, %v460_v41  ;;  %vm1104_vm5 = vcmask 916480  }
  0xa6   : > { %v1461_v14 = vpop.f32.mrf.mxu0  ;;  %v464_v44 = vmul.f32 0.15421256, %v462_v43 }
  0xa7   : > { %v1469_v16 = vmul.f32 %v4838_v15, %v1461_v14  ;;  %v5423_v15 = vmov 1934713408  }
  0xa8   : > { %v473_v45 = vpack.c.bf16 %v464_v44, %v463_v42 }
  0xa9   : > { %v1473_v18 = vmul.f32 0.2, %v1469_v16  ;;  %vm1471_vm1 = vcmp.ge.f32.partialorder %v1469_v16, 0.0 }
  0xaa   : > { %v508_v46 = vsel %vm494_vm3, %v473_v45, 0 }
  0xab   : > { %v1475_v22 = vsel %vm1471_vm1, %v1469_v16, %v1473_v18  ;;  %517 = vmatpush.bf16.xpose.msra.mxu2 %v508_v46  ;;  %v849_v16 = vunpack.c.l.s4 %v5423_v15  ;;  %vm1100_vm1 = vcmask 785408  }
  0xac   : > { %v1477_v24 = vmul.f32 0.15421256, %v1475_v22 }
  0xad   : > { %v5580_v33 = vunpack.c.0.s8 %v849_v16 }
  0xae   : > { %v1463_v19 = vpop.f32.mrf.mxu0 }
  0xaf   : > { %v1470_v20 = vmul.f32 %v4839_v17, %v1463_v19 }
  0xb1   : > { %vm1472_vm2 = vcmp.ge.f32.partialorder %v1470_v20, 0.0  ;;  %v1474_v21 = vmul.f32 0.2, %v1470_v20 }
  0xb3   : > { %v1476_v23 = vsel %vm1472_vm2, %v1470_v20, %v1474_v21  ;;  %vm1102_vm2 = vcmask 850944  }
  0xb4   : > { %v1478_v25 = vmul.f32 0.15421256, %v1476_v23 }
  0xb6   : > { %v1488_v26 = vpack.c.bf16 %v1478_v25, %v1477_v24 }
  0xb8   : > { %v1522_v27 = vsel %vm494_vm3, %v1488_v26, 0 }
  0xb9   : > { %1531 = vmatpush.bf16.xpose.msrb.mxu1 %v1522_v27  ;;  %4997 = vmatpush.bf16.xpose.msrb.mxu3 %v1522_v27 }
  0xc0   : > { %4864 = vmatmul.msk.bf16.vlgmr.msrb.gmra.mxu1 %vm494_vm3, %v4981_v28  ;;  %4866 = vmatmul.msk.bf16.vlgmr.msrb.gmra.mxu3 %vm494_vm3, %v4983_v29 }
  0xd0   : > { %4865 = vmatmul.msk.bf16.gmra.mxu1 %vm494_vm3, %v4982_v30  ;;  %4867 = vmatmul.msk.bf16.gmra.mxu3 %vm494_vm3, %v4984_v31 }
 0x13d   : > { %v1533_v48 = vpop.f32.mrf.mxu1 }
 0x143   : > { %v1543_v49 = vpop.f32.mrf.mxu3 }
 0x145   : > { %v1535_v50 = vpop.f32.mrf.mxu1 }
 0x14b   : > { %v1545_v51 = vpop.f32.mrf.mxu3 }
 0x14c   : > { %v5024_v52 = vpack.i.bf16 %v1533_v48, %v1545_v51 }
 0x14d   : > { %v1538_v53 = vpop.f32.mrf.mxu1 }
 0x14e   : > { %5025 = vxpose.xlu1.b32.start.end [1/1] (short) (narrow) %v5024_v52, 16  ;;  %v5036_v54 = vpack.i.bf16 %v1538_v53, %v1535_v50 }
 0x150   : > { %5037 = vxpose.xlu0.b32.start.end [1/1] (short) (narrow) %v5036_v54, 16 }
 0x153   : > { %v1548_v55 = vpop.f32.mrf.mxu3 }
 0x155   : > { %v1540_v56 = vpop.f32.mrf.mxu1 }
 0x156   : > { %v5048_v59 = vpack.i.bf16 %v1548_v55, %v1540_v56 }
 0x15b   : > { %v1550_v57 = vpop.f32.mrf.mxu3 }
 0x15c   : > { %v5060_v58 = vpack.i.bf16 %v1543_v49, %v1550_v57 }
 0x15e   : > { %5061 = vxpose.xlu1.b32.start.end [1/1] (short) (narrow) %v5060_v58, 16 }
 0x160   : > { %5049 = vxpose.xlu0.b32.start.end [1/1] (short) (narrow) %v5048_v59, 16 }
 0x1f2   : > { %v5026_v60 = vpop.trf.xlu1 }
 0x1f3   : > { %v5027_v0 = vunpack.i.l.bf16 %v5026_v60  ;;  %v5030_v2 = vunpack.i.h.bf16 %v5026_v60 }
 0x1f4   : > { %v5038_v61 = vpop.trf.xlu0 }
 0x1f5   : > { %v5042_v1 = vunpack.i.h.bf16 %v5038_v61  ;;  %v5039_v5 = vunpack.i.l.bf16 %v5038_v61  ;;  %v1847_v6 = vrot.slane %v5027_v0, 4  ;;  %v1811_v11 = vrot.slane %v5030_v2, 4 }
 0x1f7   : > { %v1809_v7 = vrot.slane %v5042_v1, 4  ;;  %v1823_v17 = vrot.slane %v5039_v5, 4  ;;  %v1812_v34 = vsel %vm796_vm6, %v5042_v1, %v1811_v11 }
 0x1f8   : > { %v1820_v42 = vperm.slane %v1812_v34, %v5568_v13 }
 0x1f9   : > { %v1810_v23 = vsel %vm796_vm6, %v1809_v7, %v5030_v2 }
 0x1fa   : > { %v5564_v62 = vpop.trf.xlu1  ;;  %v1816_v38 = vperm.slane %v1810_v23, %v5568_v13 }
 0x1fb   : > { %v5035_v23 = vunpack.i.h.bf16 %v5564_v62 }
 0x1fc   : > { %v5566_v63 = vpop.trf.xlu0  ;;  %v1859_v48 = vrot.slane %v1816_v38, 4 }
 0x1fd   : > { %v5047_v11 = vunpack.i.h.bf16 %v5566_v63 }
 0x202   : > { %v5062_v8 = vpop.trf.xlu1 }
 0x203   : > { %v5066_v9 = vunpack.i.h.bf16 %v5062_v8  ;;  %v5063_v10 = vunpack.i.l.bf16 %v5062_v8 }
 0x204   : > { %v5050_v14 = vpop.trf.xlu0 }
 0x205   : > { %v1835_v18 = vrot.slane %v5066_v9, 4  ;;  %v1848_v19 = vsel %vm796_vm6, %v5063_v10, %v1847_v6  ;;  %v5054_v20 = vunpack.i.h.bf16 %v5050_v14  ;;  %v5051_v22 = vunpack.i.l.bf16 %v5050_v14 }
 0x206   : > { %v1856_v21 = vperm.slane %v1848_v19, %v5568_v13  ;;  %v1845_v30 = vrot.slane %v5063_v10, 4 }
 0x207   : > { %v1833_v24 = vrot.slane %v5054_v20, 4  ;;  %v1836_v25 = vsel %vm796_vm6, %v5054_v20, %v1835_v18  ;;  %v1821_v28 = vrot.slane %v5051_v22, 4  ;;  %v1824_v29 = vsel %vm796_vm6, %v5051_v22, %v1823_v17 }
 0x208   : > { %v1893_v26 = vrot.slane %v1856_v21, 4  ;;  %v1844_v27 = vperm.slane %v1836_v25, %v5568_v13  ;;  %v5578_v32 = vperm.slane %v1824_v29, %v5568_v13  ;;  %v1846_v46 = vsel %vm796_vm6, %v1845_v30, %v5027_v0 }
 0x209   : > { %v1834_v31 = vsel %vm796_vm6, %v1833_v24, %v5066_v9  ;;  %v1822_v35 = vsel %vm796_vm6, %v1821_v28, %v5039_v5  ;;  %v1852_v50 = vperm.slane %v1846_v46, %v5568_v13  ;;  %v1921_v18 = vrot.slane %v5047_v11, 4 }
 0x20a   : > { %v5584_v36 = vpop.trf.xlu1  ;;  %v1894_v37 = vsel %vm796_vm6, %v1893_v26, %v1844_v27  ;;  %v1869_v39 = vrot.slane %v5578_v32, 4  ;;  %v1840_v41 = vperm.slane %v1834_v31, %v5568_v13  ;;  %v1828_v45 = vperm.slane %v1822_v35, %v5568_v13 }
 0x20b   : > { %v1900_v44 = vperm.slane %v1894_v37, %v5580_v33  ;;  %v1881_v60 = vrot.slane %v1852_v50, 4  ;;  %v1895_v9 = vrot.slane %v1844_v27, 4  ;;  %v1871_v22 = vrot.slane %v1820_v42, 4 }
 0x20c   : > { %v5591_v43 = vpop.trf.xlu0  ;;  %v1870_v47 = vsel %vm796_vm6, %v1869_v39, %v1820_v42  ;;  %v1883_v51 = vrot.slane %v1840_v41, 4  ;;  %v1860_v53 = vsel %vm796_vm6, %v1828_v45, %v1859_v48  ;;  %v1857_v59 = vrot.slane %v1828_v45, 4 }
 0x20d   : > { %v1876_v49 = vperm.slane %v1870_v47, %v5580_v33  ;;  %v1913_v52 = vrot.slane %v1900_v44, 4  ;;  %v1868_v56 = vperm.slane %v1860_v53, %v5580_v33  ;;  %v1882_v4 = vsel %vm796_vm6, %v1881_v60, %v1840_v41 }
 0x20e   : > { %v1884_v58 = vsel %vm796_vm6, %v1852_v50, %v1883_v51  ;;  %v1858_v1 = vsel %vm796_vm6, %v1857_v59, %v1816_v38  ;;  %v1888_v5 = vperm.slane %v1882_v4, %v5580_v33  ;;  %v1896_v15 = vsel %vm796_vm6, %v1856_v21, %v1895_v9 }
 0x20f   : > { %v1915_v54 = vrot.slane %v1876_v49, 4  ;;  %v1914_v55 = vsel %vm796_vm6, %v1913_v52, %v1876_v49  ;;  %v1892_v61 = vperm.slane %v1884_v58, %v5580_v33  ;;  %v1911_v0 = vrot.slane %v1868_v56, 4 }
 0x210   : > { %2046 = vrot.lane.b32.xlu0 %v1914_v55, %s5424_s15  ;;  %v1864_v3 = vperm.slane %v1858_v1, %v5580_v33  ;;  %v1905_v7 = vrot.slane %v1888_v5, 4  ;;  %v5059_v16 = vunpack.i.h.bf16 %v5591_v43  ;;  %v5056_v17 = vunpack.i.l.bf16 %v5591_v43 }
 0x211   : > { %v1916_v57 = vsel %vm796_vm6, %v1900_v44, %v1915_v54  ;;  %v1912_v2 = vsel %vm796_vm6, %v1892_v61, %v1911_v0  ;;  %v1909_v14 = vrot.slane %v1892_v61, 4  ;;  %v1904_v20 = vperm.slane %v1896_v15, %v5580_v33 }
 0x212   : > { %2050 = vrot.lane.b32.xlu1 %v1916_v57, %s5425_s16  ;;  %2042 = vrot.lane.b32.xlu2 %v1912_v2, %s7421_s18  ;;  %v1907_v6 = vrot.slane %v1864_v3, 4  ;;  %v5616_v10 = vsel %vm796_vm6, %v1905_v7, %v1864_v3  ;;  %v1945_v24 = vrot.slane %v5059_v16, 4  ;;  %v1933_v25 = vrot.slane %v5056_v17, 4 }
 0x213   : > { %v1910_v19 = vsel %vm796_vm6, %v1909_v14, %v1868_v56  ;;  %v5044_v26 = vunpack.i.l.bf16 %v5566_v63  ;;  %v1872_v21 = vsel %vm796_vm6, %v5578_v32, %v1871_v22  ;;  %v1922_v27 = vsel %vm796_vm6, %v1921_v18, %v5035_v23 }
 0x214   : > { %v1908_v8 = vsel %vm796_vm6, %v1888_v5, %v1907_v6  ;;  %v5071_v28 = vunpack.i.h.bf16 %v5584_v36  ;;  %v5068_v29 = vunpack.i.l.bf16 %v5584_v36  ;;  %v1917_v30 = vrot.slane %v1904_v20, 4 }
 0x215   : > { %v1934_v34 = vsel %vm796_vm6, %v1933_v25, %v5044_v26  ;;  %v1880_v35 = vperm.slane %v1872_v21, %v5580_v33  ;;  %v1928_v37 = vperm.slane %v1922_v27, %v5568_v13  ;;  %v1935_v38 = vrot.slane %v5044_v26, 4 }
 0x216   : > { %v1946_v31 = vsel %vm796_vm6, %v1945_v24, %v5071_v28  ;;  %v1957_v63 = vrot.slane %v5068_v29, 4  ;;  %v1940_v41 = vperm.slane %v1934_v34, %v5568_v13  ;;  %v5032_v36 = vunpack.i.l.bf16 %v5564_v62 }
 0x217   : > { %v1918_v39 = vsel %vm796_vm6, %v1917_v30, %v1880_v35  ;;  %v1952_v32 = vperm.slane %v1946_v31, %v5568_v13  ;;  %v1936_v42 = vsel %vm796_vm6, %v5056_v17, %v1935_v38  ;;  %v1971_v43 = vrot.slane %v1928_v37, 4 }
 0x218   : > { %v1923_v44 = vrot.slane %v5035_v23, 4  ;;  %v1958_v45 = vsel %vm796_vm6, %v1957_v63, %v5032_v36  ;;  %v1919_v46 = vrot.slane %v1880_v35, 4  ;;  %v1944_v47 = vperm.slane %v1936_v42, %v5568_v13 }
 0x219   : > { %v1972_v48 = vsel %vm796_vm6, %v1940_v41, %v1971_v43  ;;  %v1995_v49 = vrot.slane %v1952_v32, 4  ;;  %v1959_v50 = vrot.slane %v5032_v36, 4  ;;  %v1947_v51 = vrot.slane %v5071_v28, 4 }
 0x21a   : > { %2034 = vrot.lane.b32.xlu2 %v1908_v8, %s5427_s19  ;;  %v1964_v52 = vperm.slane %v1958_v45, %v5568_v13  ;;  %v1924_v53 = vsel %vm796_vm6, %v5047_v11, %v1923_v44  ;;  %v1920_v54 = vsel %vm796_vm6, %v1904_v20, %v1919_v46  ;;  %v1980_v55 = vperm.slane %v1972_v48, %v5580_v33 }
 0x21b   : > { %v1960_v62 = vsel %vm796_vm6, %v5068_v29, %v1959_v50  ;;  %v1981_v56 = vrot.slane %v1944_v47, 4  ;;  %v1948_v58 = vsel %vm796_vm6, %v5059_v16, %v1947_v51  ;;  %v1932_v59 = vperm.slane %v1924_v53, %v5568_v13 }
 0x21c   : > { %v1996_v57 = vsel %vm796_vm6, %v1964_v52, %v1995_v49  ;;  %v1968_v60 = vperm.slane %v1960_v62, %v5568_v13  ;;  %v2023_v0 = vrot.slane %v1980_v55, 4  ;;  %v1956_v1 = vperm.slane %v1948_v58, %v5568_v13 }
 0x21d   : > { %v2004_v61 = vperm.slane %v1996_v57, %v5580_v33  ;;  %v1982_v2 = vsel %vm796_vm6, %v1981_v56, %v1932_v59  ;;  %v1983_v16 = vrot.slane %v1932_v59, 4  ;;  %v1969_v17 = vrot.slane %v1940_v41, 4 }
 0x21e   : > { %v2005_v3 = vrot.slane %v1968_v60, 4  ;;  %v1988_v5 = vperm.slane %v1982_v2, %v5580_v33  ;;  %v2007_v6 = vrot.slane %v1956_v1, 4  ;;  %v1993_v23 = vrot.slane %v1964_v52, 4 }
 0x21f   : > { %v2024_v4 = vsel %vm796_vm6, %v2004_v61, %v2023_v0  ;;  %v1984_v18 = vsel %vm796_vm6, %v1944_v47, %v1983_v16  ;;  %v1970_v20 = vsel %vm796_vm6, %v1969_v17, %v1928_v37  ;;  %v2021_v29 = vrot.slane %v2004_v61, 4  ;;  %v4985_v17 = vld [vmem:[%s5520_s20 + $0x10] sm:$0xff] }
 0x220   : > { %v2006_v7 = vsel %vm796_vm6, %v2005_v3, %v1956_v1  ;;  %v2027_v8 = vrot.slane %v1988_v5, 4  ;;  %v2008_v9 = vsel %vm796_vm6, %v1968_v60, %v2007_v6  ;;  %v1992_v22 = vperm.slane %v1984_v18, %v5580_v33  ;;  %v5708_v6 = vld [vmem:[%s7402_s6] ss:$0 sm:$0xff]  ;;  %v4870_v18 = vld [vmem:[%s5498_s10 + $0x8] sm:$0xf] }
 0x221   : > { %v2012_v11 = vperm.slane %v2006_v7, %v5580_v33  ;;  %v2016_v15 = vperm.slane %v2008_v9, %v5580_v33  ;;  %v1976_v25 = vperm.slane %v1970_v20, %v5580_v33  ;;  %v1994_v26 = vsel %vm796_vm6, %v1993_v23, %v1952_v32  ;;  %v4869_v20 = vld [vmem:[%s5511_s17 + $0x8] sm:$0xf] }
 0x222   : > { %2038 = vrot.lane.b32.xlu2 %v1910_v19, %s7423_s21  ;;  %v2000_v27 = vperm.slane %v1994_v26, %v5580_v33  ;;  %v2022_v30 = vsel %vm796_vm6, %v2021_v29, %v1980_v55  ;;  %v2031_v63 = vrot.slane %v1992_v22, 4 }
 0x223   : > { %v2028_v14 = vsel %vm796_vm6, %v2012_v11, %v2027_v8  ;;  %v2029_v19 = vrot.slane %v2016_v15, 4  ;;  %v2019_v21 = vrot.slane %v1976_v25, 4  ;;  %v2025_v31 = vrot.slane %v2012_v11, 4 }
 0x224   : > { %v2017_v35 = vrot.slane %v2000_v27, 4 }
 0x225   : > { %v2030_v24 = vsel %vm796_vm6, %v2029_v19, %v1992_v22  ;;  %v2020_v28 = vsel %vm796_vm6, %v2000_v27, %v2019_v21  ;;  %v2026_v34 = vsel %vm796_vm6, %v2025_v31, %v1988_v5  ;;  %v4986_v5 = vld [vmem:[%s5506_s14 + $0x10] sm:$0xff]  ;;  %v2407_v19 = vsel %vm389_vm0, %v4870_v18, 0  ;;  %v4887_v21 = vld [vmem:[%s7401_s5 + $0x28] sm:$0xff] }
 0x226   : > { %v2018_v37 = vsel %vm796_vm6, %v2017_v35, %v1976_v25  ;;  %2416 = vmatpush.bf16.xpose.msra.mxu0 %v2407_v19  ;;  %v4886_v25 = vld [vmem:[%s7401_s5 + $0x20] sm:$0xff] }
 0x22a   : > { %2054 = vrot.lane.b32.xlu2 %v1918_v39, %s5429_s22  ;;  %v2032_v39 = vsel %vm796_vm6, %v2016_v15, %v2031_v63 }
 0x22d   : > { %4871 = vmatmul.msk.bf16.vlgmr.msra.gmra.mxu0 %vm389_vm0, %v4869_v20 }
 0x232   : > { %2058 = vrot.lane.b32.xlu2 %v1920_v54, %s5430_s23  ;;  %v4824_v54 = vld [vmem:[%s7398_s2 + $0x8] sm:$0xff] }
 0x23a   : > { %2074 = vrot.lane.b32.xlu2 %v2024_v4, %s5431_s24 }
 0x242   : > { %2082 = vrot.lane.b32.xlu2 %v2028_v14, %s7418_s25  ;;  %v2449_v14 = vsel %vm389_vm0, %v4986_v5, 0 }
 0x24a   : > { %2086 = vrot.lane.b32.xlu2 %v2030_v24, %s7411_s26  ;;  %s7431_s26 = smov 72  }
 0x252   : > { %2066 = vrot.lane.b32.xlu2 %v2020_v28, %s7413_s29  ;;  %s7432_s29 = smov 112  }
 0x25a   : > { %2070 = vrot.lane.b32.xlu2 %v2022_v30, %s5435_s9 }
 0x262   : > { %2078 = vrot.lane.b32.xlu2 %v2026_v34, %s7407_s11  ;;  %s7433_s11 = smov 96  }
 0x26a   : > { %2062 = vrot.lane.b32.xlu2 %v2018_v37, %s7405_s12  ;;  %s7434_s12 = smov 64  }
 0x26c   : > { %v2043_v38 = vpop.permute.xlu2 %2042 }
 0x272   : > { %2090 = vrot.lane.b32.xlu2 %v2032_v39, %s7416_s13  ;;  %v4987_v39 = vld [vmem:[%s5545_s30 + $0x40] sm:$0xff] }
 0x274   : > { %v2035_v32 = vpop.permute.xlu2 %2034 }
 0x275   : > { %v2093_v48 = vsel %vm1080_vm7, %v5616_v10, %v2035_v32  ;;  %v1425_v10 = vmul.f32 %v4824_v54, %v5561_v40  ;;  %v4988_v32 = vld [vmem:[%s5545_s30 + $0x48] sm:$0xff] }
 0x277   : > { %v1427_v61 = vmul.f32 0.2, %v1425_v10  ;;  %vm1426_vm4 = vcmp.ge.f32.partialorder %v1425_v10, 0.0 }
 0x279   : > { %v1428_v3 = vsel %vm1426_vm4, %v1425_v10, %v1427_v61 }
 0x27a   : > { %v1429_v9 = vmul.f32 %v5708_v6, %v1428_v3 }
 0x27c   : > { %v2039_v41 = vpop.permute.xlu2 %2038  ;;  %v2109_v16 = vpack.c.bf16 %v1429_v9, %v1429_v9 }
 0x27d   : > { %v2094_v49 = vsel %vm494_vm3, %v2093_v48, %v2039_v41  ;;  %v4989_v41 = vld [vmem:[%s5545_s30 + $0x50] sm:$0xff] }
 0x27e   : > { %v2095_v51 = vsel %vm389_vm0, %v2094_v49, %v2043_v38  ;;  %v4975_v49 = vld [vmem:[%s5545_s30] sm:$0xff] }
 0x27f   : > { %4816 = vmatmul.msk.bf16.vlgmr.msra.gmra.mxu2 %vm494_vm3, %v4975_v49 }
 0x282   : > { %v2047_v50 = vpop.permute.xlu0 %2046 }
 0x283   : > { %v2096_v53 = vsel %vm1084_vm8, %v2095_v51, %v2047_v50 }
 0x284   : > { %v2055_v36 = vpop.permute.xlu2 %2054  ;;  %v2051_v62 = vpop.permute.xlu1 %2050 }
 0x285   : > { %v2097_v55 = vsel %vm1086_vm9, %v2096_v53, %v2051_v62  ;;  %v4976_v53 = vld [vmem:[%s5545_s30 + $0x8] sm:$0xff] }
 0x286   : > { %v2098_v56 = vsel %vm7420_vm10, %v2097_v55, %v2055_v36  ;;  %v4990_v36 = vld [vmem:[%s5545_s30 + $0x58] sm:$0xff] }
 0x28c   : > { %v2059_v42 = vpop.permute.xlu2 %2058 }
 0x28d   : > { %v2099_v57 = vsel %vm7409_vm11, %v2098_v56, %v2059_v42  ;;  %vm1106_vm11 = vcmask 982016   ;;  %v4977_v56 = vld [vmem:[%s5545_s30 + $0x10] sm:$0xff] }
 0x28f   : > { %4817 = vmatmul.msk.bf16.gmra.mxu2 %vm494_vm3, %v4976_v53 }
 0x294   : > { %v2075_v43 = vpop.permute.xlu2 %2074 }
 0x29c   : > { %v2083_v44 = vpop.permute.xlu2 %2082 }
 0x29f   : > { %4818 = vmatmul.msk.bf16.gmra.mxu2 %vm494_vm3, %v4977_v56 }
 0x2a4   : > { %v2087_v45 = vpop.permute.xlu2 %2086 }
 0x2aa   : > { %v5738_v42 = vpop.f32.mrf.mxu0 }
 0x2ac   : > { %v2067_v46 = vpop.permute.xlu2 %2066 }
 0x2b4   : > { %v2071_v47 = vpop.permute.xlu2 %2070 }
 0x2bc   : > { %v2079_v52 = vpop.permute.xlu2 %2078 }
 0x2c4   : > { %v2063_v58 = vpop.permute.xlu2 %2062 }
 0x2c5   : > { %v2100_v59 = vsel %vm1092_vm12, %v2099_v57, %v2063_v58  ;;  %v4978_v57 = vld [vmem:[%s5545_s30 + $0x18] sm:$0xff] }
 0x2c6   : > { %v2101_v60 = vsel %vm1094_vm13, %v2100_v59, %v2067_v46  ;;  %4819 = vmatmul.msk.bf16.gmra.mxu2 %vm494_vm3, %v4978_v57 }
 0x2c7   : > { %v2102_v0 = vsel %vm1096_vm14, %v2101_v60, %v2071_v47 }
 0x2c8   : > { %v2103_v40 = vsel %vm7410_vm15, %v2102_v0, %v2075_v43  ;;  %vm7415_vm15 = vcmask 1043456   ;;  %v2420_v43 = vpop.f32.mrf.mxu0 }
 0x2c9   : > { %v2104_v1 = vsel %vm1100_vm1, %v2103_v40, %v2079_v52 }
 0x2ca   : > { %v2105_v2 = vsel %vm1102_vm2, %v2104_v1, %v2083_v44 }
 0x2cb   : > { %v2106_v4 = vsel %vm1104_vm5, %v2105_v2, %v2087_v45 }
 0x2cc   : > { %v2091_v7 = vpop.permute.xlu2 %2090 }
 0x2cd   : > { %v2107_v8 = vsel %vm1106_vm11, %v2106_v4, %v2091_v7 }
 0x2ce   : > { %v2108_v11 = vpack.c.bf16 %v2107_v8, %v2107_v8 }
 0x2d0   : > { %v2114_v15 = vsel %vm7415_vm15, %v2108_v11, 0 }
 0x2d1   : > { %2123 = vmatpush.bf16.msra.mxu3 %v2114_v15 }
 0x2d4   : > { %4868 = vmatmul.msk.bf16.vlgmr.msra.gmra.mxu3 %vm1080_vm7, %v2109_v16 }
 0x2d5   : > { %2458 = vmatpush.bf16.xpose.msrb.mxu3 %v2449_v14 }
 0x2e4   : > { %4885 = vmatmul.msk.bf16.vlgmr.msrb.gmra.mxu3 %vm389_vm0, %v4985_v17 }
 0x357   : > { %v5721_v22 = vpop.f32.mrf.mxu3 }
 0x35f   : > { %v2127_v23 = vpop.f32.mrf.mxu3 }
 0x367   : > { %v2460_v24 = vpop.f32.mrf.mxu3 }
 0x368   : > { %v2468_v26 = vmul.f32 %v4886_v25, %v2460_v24 }
 0x36a   : > { %v2472_v27 = vmul.f32 0.2, %v2468_v26  ;;  %vm2470_vm4 = vcmp.ge.f32.partialorder %v2468_v26, 0.0 }
 0x36c   : > { %v2474_v30 = vsel %vm2470_vm4, %v2468_v26, %v2472_v27 }
 0x36d   : > { %v2476_v35 = vmul.f32 0.15421256, %v2474_v30 }
 0x36f   : > { %v2462_v28 = vpop.f32.mrf.mxu3 }
 0x370   : > { %v2469_v29 = vmul.f32 %v4887_v21, %v2462_v28 }
 0x372   : > { %vm2471_vm15 = vcmp.ge.f32.partialorder %v2469_v29, 0.0  ;;  %v2473_v31 = vmul.f32 0.2, %v2469_v29 }
 0x374   : > { %v2475_v34 = vsel %vm2471_vm15, %v2469_v29, %v2473_v31  ;;  %vm7435_vm15 = vcmask 457728  }
 0x375   : > { %v2477_v37 = vmul.f32 0.15421256, %v2475_v34 }
 0x377   : > { %v2487_v38 = vpack.c.bf16 %v2477_v37, %v2476_v35 }
 0x379   : > { %v2521_v63 = vsel %vm494_vm3, %v2487_v38, 0 }
 0x37a   : > { %2530 = vmatpush.bf16.xpose.msrb.mxu0 %v2521_v63 }
 0x381   : > { %4912 = vmatmul.msk.bf16.vlgmr.msrb.gmra.mxu0 %vm494_vm3, %v4987_v39 }
 0x391   : > { %4913 = vmatmul.msk.bf16.gmra.mxu0 %vm494_vm3, %v4988_v32 }
 0x3a1   : > { %4914 = vmatmul.msk.bf16.gmra.mxu0 %vm494_vm3, %v4989_v41 }
 0x3b1   : > { %4915 = vmatmul.msk.bf16.gmra.mxu0 %vm494_vm3, %v4990_v36 }
 0x3fe   : > { %v2532_v44 = vpop.f32.mrf.mxu0 }
 0x406   : > { %v2534_v45 = vpop.f32.mrf.mxu0 }
 0x40e   : > { %v2537_v46 = vpop.f32.mrf.mxu0 }
 0x40f   : > { %v5072_v47 = vpack.i.bf16 %v2537_v46, %v2534_v45 }
 0x411   : > { %5073 = vxpose.xlu1.b32.start.end [1/1] (short) (narrow) %v5072_v47, 16 }
 0x416   : > { %v2539_v48 = vpop.f32.mrf.mxu0 }
 0x41e   : > { %v2542_v50 = vpop.f32.mrf.mxu0 }
 0x426   : > { %v2544_v51 = vpop.f32.mrf.mxu0 }
 0x427   : > { %v5084_v52 = vpack.i.bf16 %v2532_v44, %v2544_v51 }
 0x429   : > { %5085 = vxpose.xlu2.b32.start.end [1/1] (short) (narrow) %v5084_v52, 16 }
 0x42e   : > { %v2547_v62 = vpop.f32.mrf.mxu0 }
 0x42f   : > { %v5096_v55 = vpack.i.bf16 %v2547_v62, %v2539_v48 }
 0x436   : > { %v2549_v54 = vpop.f32.mrf.mxu0 }
 0x437   : > { %v5108_v10 = vpack.i.bf16 %v2542_v50, %v2549_v54 }
 0x439   : > { %5097 = vxpose.xlu2.b32.start.end [1/1] (short) (narrow) %v5096_v55, 16  ;;  %5109 = vxpose.xlu0.b32.start.end [1/1] (short) (narrow) %v5108_v10, 16  ;;  %v5791_v55 = vpop.f32.mrf.mxu2 }
 0x4b5   : > { %v5074_v58 = vpop.trf.xlu1 }
 0x4b6   : > { %v5078_v40 = vunpack.i.h.bf16 %v5074_v58  ;;  %v5075_v2 = vunpack.i.l.bf16 %v5074_v58 }
 0x4b8   : > { %v2808_v3 = vrot.slane %v5078_v40, 4  ;;  %v2822_v5 = vrot.slane %v5075_v2, 4 }
 0x4bd   : > { %v5748_v59 = vpop.trf.xlu1 }
 0x4be   : > { %v5080_v16 = vunpack.i.l.bf16 %v5748_v59  ;;  %v5083_v25 = vunpack.i.h.bf16 %v5748_v59 }
 0x4c0   : > { %v2934_v21 = vrot.slane %v5080_v16, 4  ;;  %v5772_v35 = vrot.slane %v5083_v25, 4 }
 0x4c2   : > { %v5086_v60 = vpop.trf.xlu2 }
 0x4c3   : > { %v5090_v61 = vunpack.i.h.bf16 %v5086_v60  ;;  %v5087_v27 = vunpack.i.l.bf16 %v5086_v60 }
 0x4c5   : > { %v2810_v1 = vrot.slane %v5090_v61, 4  ;;  %v2809_v8 = vsel %vm796_vm6, %v2808_v3, %v5090_v61  ;;  %v2846_v44 = vrot.slane %v5087_v27, 4 }
 0x4c6   : > { %v5758_v17 = vperm.slane %v2809_v8, %v5568_v13 }
 0x4c7   : > { %v2811_v4 = vsel %vm796_vm6, %v5078_v40, %v2810_v1 }
 0x4c8   : > { %v2819_v11 = vperm.slane %v2811_v4, %v5568_v13  ;;  %v2858_v29 = vrot.slane %v5758_v17, 4 }
 0x4ca   : > { %v5750_v0 = vpop.trf.xlu2  ;;  %v2870_v20 = vrot.slane %v2819_v11, 4 }
 0x4cb   : > { %v5095_v18 = vunpack.i.h.bf16 %v5750_v0  ;;  %v5092_v38 = vunpack.i.l.bf16 %v5750_v0 }
 0x4cd   : > { %v2922_v30 = vrot.slane %v5095_v18, 4  ;;  %v2958_v10 = vrot.slane %v5092_v38, 4 }
 0x4cf   : > { %v2923_v45 = vsel %vm796_vm6, %v5083_v25, %v2922_v30 }
 0x4d0   : > { %v5794_v56 = vperm.slane %v2923_v45, %v5568_v13 }
 0x4d2   : > { %v5098_v7 = vpop.trf.xlu2 }
 0x4d3   : > { %v5099_v9 = vunpack.i.l.bf16 %v5098_v7  ;;  %v5102_v23 = vunpack.i.h.bf16 %v5098_v7 }
 0x4d5   : > { %v2820_v14 = vrot.slane %v5099_v9, 4  ;;  %v2823_v15 = vsel %vm796_vm6, %v5099_v9, %v2822_v5  ;;  %v2832_v34 = vrot.slane %v5102_v23, 4 }
 0x4d6   : > { %v2831_v24 = vperm.slane %v2823_v15, %v5568_v13 }
 0x4d7   : > { %v2821_v19 = vsel %vm796_vm6, %v2820_v14, %v5075_v2 }
 0x4d8   : > { %v5765_v26 = vperm.slane %v2821_v19, %v5568_v13  ;;  %v2871_v37 = vsel %vm796_vm6, %v2831_v24, %v2870_v20  ;;  %v2868_v63 = vrot.slane %v2831_v24, 4 }
 0x4d9   : > { %v2879_v47 = vperm.slane %v2871_v37, %v5580_v33 }
 0x4da   : > { %v5103_v28 = vpop.trf.xlu2  ;;  %v2859_v41 = vsel %vm796_vm6, %v5765_v26, %v2858_v29  ;;  %v2869_v58 = vsel %vm796_vm6, %v2868_v63, %v2819_v11  ;;  %v2856_v5 = vrot.slane %v5765_v26, 4 }
 0x4db   : > { %v5104_v31 = vunpack.i.l.bf16 %v5103_v28  ;;  %v5107_v48 = vunpack.i.h.bf16 %v5103_v28  ;;  %v5786_v51 = vperm.slane %v2859_v41, %v5580_v33  ;;  %v2918_v4 = vrot.slane %v2879_v47, 4 }
 0x4dd   : > { %v2935_v39 = vsel %vm796_vm6, %v5104_v31, %v2934_v21  ;;  %v5110_v32 = vpop.trf.xlu0  ;;  %v2944_v2 = vrot.slane %v5107_v48, 4  ;;  %v2932_v7 = vrot.slane %v5104_v31, 4  ;;  %v2910_v9 = vrot.slane %v5786_v51, 4 }
 0x4de   : > { %v5780_v36 = vperm.slane %v2935_v39, %v5568_v13  ;;  %v5114_v43 = vunpack.i.h.bf16 %v5110_v32  ;;  %v5111_v46 = vunpack.i.l.bf16 %v5110_v32 }
 0x4e0   : > { %v2833_v49 = vsel %vm796_vm6, %v2832_v34, %v5114_v43  ;;  %v2834_v50 = vrot.slane %v5114_v43, 4  ;;  %v2980_v52 = vrot.slane %v5780_v36, 4  ;;  %v2844_v62 = vrot.slane %v5111_v46, 4 }
 0x4e1   : > { %v2839_v53 = vperm.slane %v2833_v49, %v5568_v13  ;;  %v2847_v54 = vsel %vm796_vm6, %v5111_v46, %v2846_v44  ;;  %v5826_v46 = vpop.f32.mrf.mxu2 }
 0x4e2   : > { %v2835_v57 = vsel %vm796_vm6, %v5102_v23, %v2834_v50  ;;  %v2845_v61 = vsel %vm796_vm6, %v2844_v62, %v5087_v27  ;;  %v2855_v40 = vperm.slane %v2847_v54, %v5568_v13  ;;  %v2981_v11 = vsel %vm796_vm6, %v2980_v52, %v5794_v56 }
 0x4e3   : > { %v2843_v60 = vperm.slane %v2835_v57, %v5568_v13  ;;  %v2882_v1 = vrot.slane %v2839_v53, 4  ;;  %v2851_v3 = vperm.slane %v2845_v61, %v5568_v13  ;;  %v5819_v39 = vperm.slane %v2981_v11, %v5580_v33 }
 0x4e4   : > { %v2892_v24 = vrot.slane %v2855_v40, 4  ;;  %v2921_v52 = vsel %vm796_vm6, %v5772_v35, %v5095_v18  ;;  %v2857_v62 = vsel %vm796_vm6, %v2856_v5, %v5758_v17 }
 0x4e5   : > { %v5115_v8 = vpop.trf.xlu0  ;;  %v2894_v14 = vrot.slane %v2843_v60, 4  ;;  %v2883_v20 = vsel %vm796_vm6, %v2851_v3, %v2882_v1  ;;  %v2880_v25 = vrot.slane %v2851_v3, 4  ;;  %v3026_v18 = vrot.slane %v5819_v39, 4 }
 0x4e6   : > { %v5119_v15 = vunpack.i.h.bf16 %v5115_v8  ;;  %v5116_v19 = vunpack.i.l.bf16 %v5115_v8  ;;  %v2891_v31 = vperm.slane %v2883_v20, %v5580_v33  ;;  %v2893_v45 = vsel %vm796_vm6, %v2892_v24, %v2843_v60 }
 0x4e7   : > { %v2895_v23 = vsel %vm796_vm6, %v2855_v40, %v2894_v14  ;;  %v2881_v32 = vsel %vm796_vm6, %v2880_v25, %v2839_v53  ;;  %v2875_v53 = vperm.slane %v2869_v58, %v5580_v33  ;;  %v2933_v60 = vsel %vm796_vm6, %v2932_v7, %v5080_v16 }
 0x4e8   : > { %v2945_v21 = vsel %vm796_vm6, %v2944_v2, %v5119_v15  ;;  %v2946_v27 = vrot.slane %v5119_v15, 4  ;;  %v2956_v26 = vrot.slane %v5116_v19, 4  ;;  %v2959_v28 = vsel %vm796_vm6, %v5116_v19, %v2958_v10 }
 0x4e9   : > { %v5811_v29 = vperm.slane %v2945_v21, %v5568_v13  ;;  %v2967_v30 = vperm.slane %v2959_v28, %v5568_v13  ;;  %v2903_v34 = vperm.slane %v2895_v23, %v5580_v33  ;;  %v2911_v43 = vsel %vm796_vm6, %v2891_v31, %v2910_v9  ;;  %v524_v7 = vpop.f32.mrf.mxu2 }
 0x4ea   : > { %v2947_v37 = vsel %vm796_vm6, %v5107_v48, %v2946_v27  ;;  %v2957_v63 = vsel %vm796_vm6, %v2956_v26, %v5092_v38  ;;  %3041 = vrot.lane.b32.xlu0 %v2911_v43, %s7421_s18  ;;  %v2887_v54 = vperm.slane %v2881_v32, %v5580_v33  ;;  %v2899_v35 = vperm.slane %v2893_v45, %v5580_v33 }
 0x4eb   : > { %v2994_v41 = vrot.slane %v5811_v29, 4  ;;  %v2919_v44 = vsel %vm796_vm6, %v2903_v34, %v2918_v4  ;;  %v2963_v49 = vperm.slane %v2957_v63, %v5568_v13  ;;  %v2916_v38 = vrot.slane %v2903_v34, 4 }
 0x4ec   : > { %3057 = vrot.lane.b32.xlu1 %v2919_v44, %s5430_s23  ;;  %v2955_v48 = vperm.slane %v2947_v37, %v5568_v13  ;;  %v3004_v50 = vrot.slane %v2967_v30, 4  ;;  %v2927_v17 = vperm.slane %v2921_v52, %v5568_v13  ;;  %v2863_v58 = vperm.slane %v2857_v62, %v5580_v33 }
 0x4ed   : > { %v2917_v10 = vsel %vm796_vm6, %v2916_v38, %v2879_v47  ;;  %v2904_v61 = vrot.slane %v2887_v54, 4  ;;  %v2995_v47 = vsel %vm796_vm6, %v2963_v49, %v2994_v41  ;;  %v2914_v59 = vrot.slane %v2875_v53, 4 }
 0x4ee   : > { %v3005_v57 = vsel %vm796_vm6, %v3004_v50, %v2955_v48  ;;  %3053 = vrot.lane.b32.xlu2 %v2917_v10, %s5429_s22  ;;  %v2939_v16 = vperm.slane %v2933_v60, %v5568_v13  ;;  %v3003_v2 = vperm.slane %v2995_v47, %v5580_v33  ;;  %v2906_v3 = vrot.slane %v2863_v58, 4 }
 0x4ef   : > { %v3011_v0 = vperm.slane %v3005_v57, %v5580_v33  ;;  %v2915_v1 = vsel %vm796_vm6, %v2899_v35, %v2914_v59  ;;  %v2970_v4 = vrot.slane %v2927_v17, 4  ;;  %v5859_v5 = vsel %vm796_vm6, %v2904_v61, %v2863_v58 }
 0x4f0   : > { %v2982_v8 = vrot.slane %v5794_v56, 4  ;;  %v2907_v9 = vsel %vm796_vm6, %v2887_v54, %v2906_v3  ;;  %v3020_v11 = vrot.slane %v3003_v2, 4  ;;  %v2908_v15 = vrot.slane %v2891_v31, 4 }
 0x4f1   : > { %v3027_v40 = vsel %vm796_vm6, %v3011_v0, %v3026_v18  ;;  %v2971_v14 = vsel %vm796_vm6, %v2939_v16, %v2970_v4  ;;  %v3006_v19 = vrot.slane %v2955_v48, 4  ;;  %v2912_v23 = vrot.slane %v2899_v35, 4  ;;  %v526_v31 = vpop.f32.mrf.mxu2 }
 0x4f2   : > { %3081 = vrot.lane.b32.xlu0 %v3027_v40, %s7418_s25  ;;  %v2979_v20 = vperm.slane %v2971_v14, %v5580_v33  ;;  %v2983_v24 = vsel %vm796_vm6, %v5780_v36, %v2982_v8  ;;  %v2909_v56 = vsel %vm796_vm6, %v2908_v15, %v5786_v51  ;;  %v2968_v28 = vrot.slane %v2939_v16, 4  ;;  %s7445_s25 = smov 24  }
 0x4f3   : > { %v3007_v21 = vsel %vm796_vm6, %v2967_v30, %v3006_v19  ;;  %v2991_v27 = vperm.slane %v2983_v24, %v5580_v33  ;;  %v2913_v26 = vsel %vm796_vm6, %v2912_v23, %v2875_v53  ;;  %v2992_v34 = vrot.slane %v2963_v49, 4 }
 0x4f4   : > { %3049 = vrot.lane.b32.xlu1 %v2915_v1, %s5425_s16  ;;  %v3021_v25 = vsel %vm796_vm6, %v3020_v11, %v2979_v20  ;;  %v3015_v36 = vperm.slane %v3007_v21, %v5580_v33  ;;  %v2969_v51 = vsel %vm796_vm6, %v2968_v28, %v2927_v17  ;;  %v3022_v32 = vrot.slane %v2979_v20, 4 }
 0x4f5   : > { %v3030_v37 = vrot.slane %v2991_v27, 4  ;;  %v2993_v30 = vsel %vm796_vm6, %v2992_v34, %v5811_v29  ;;  %v2975_v41 = vperm.slane %v2969_v51, %v5580_v33  ;;  %v3024_v29 = vrot.slane %v3011_v0, 4 }
 0x4f6   : > { %3033 = vrot.lane.b32.xlu2 %v2907_v9, %s5427_s19  ;;  %v3023_v43 = vsel %vm796_vm6, %v3003_v2, %v3022_v32  ;;  %v2999_v44 = vperm.slane %v2993_v30, %v5580_v33  ;;  %v3028_v38 = vrot.slane %v3015_v36, 4  ;;  %v5120_v10 = vpack.i.bf16 %v5826_v46, %v5791_v55 }
 0x4f7   : > { %v3031_v63 = vsel %vm796_vm6, %v3015_v36, %v3030_v37  ;;  %v3018_v45 = vrot.slane %v2975_v41, 4  ;;  %v3025_v53 = vsel %vm796_vm6, %v3024_v29, %v5819_v39  ;;  %v5132_v0 = vpack.i.bf16 %v526_v31, %v524_v7 }
 0x4f8   : > { %v3029_v50 = vsel %vm796_vm6, %v3028_v38, %v2991_v27  ;;  %v3016_v52 = vrot.slane %v2999_v44, 4 }
 0x4f9   : > { %v529_v49 = vpop.f32.mrf.mxu2  ;;  %v3019_v48 = vsel %vm796_vm6, %v2999_v44, %v3018_v45 }
 0x4fa   : > { %3069 = vrot.lane.b32.xlu0 %v3021_v25, %s5435_s9  ;;  %v3017_v54 = vsel %vm796_vm6, %v3016_v52, %v2975_v41 }
 0x4fc   : > { %3037 = vrot.lane.b32.xlu1 %v2909_v56, %s7423_s21 }
 0x4fe   : > { %3045 = vrot.lane.b32.xlu2 %v2913_v26, %s5424_s15 }
 0x501   : > { %v531_v62 = vpop.f32.mrf.mxu2 }
 0x502   : > { %v5144_v35 = vpack.i.bf16 %v531_v62, %v529_v49 }
 0x504   : > { %3089 = vrot.lane.b32.xlu1 %v3031_v63, %s7416_s13 }
 0x506   : > { %3073 = vrot.lane.b32.xlu2 %v3023_v43, %s5431_s24 }
 0x509   : > { %v534_v57 = vpop.f32.mrf.mxu2 }
 0x50c   : > { %3065 = vrot.lane.b32.xlu1 %v3019_v48, %s7431_s26 }
 0x50e   : > { %3085 = vrot.lane.b32.xlu2 %v3029_v50, %s7432_s29 }
 0x511   : > { %v536_v60 = vpop.f32.mrf.mxu2 }
 0x512   : > { %v5156_v18 = vpack.i.bf16 %v536_v60, %v534_v57 }
 0x514   : > { %3077 = vrot.lane.b32.xlu1 %v3025_v53, %s7433_s11 }
 0x516   : > { %3061 = vrot.lane.b32.xlu2 %v3017_v54, %s7434_s12 }
 0x51c   : > { %5121 = vxpose.xlu0.b32.start.end [1/1] (short) (narrow) %v5120_v10, 16 }
 0x52c   : > { %5157 = vxpose.xlu0.b32.start.end [1/1] (short) (narrow) %v5156_v18, 16 }
 0x53c   : > { %5133 = vxpose.xlu2.b32.start.end [1/1] (short) (narrow) %v5132_v0, 16 }
 0x548   : > { %v3054_v39 = vpop.permute.xlu2 %3053 }
 0x549   : > { %5145 = vxpose.xlu1.b32.start.end [1/1] (short) (narrow) %v5144_v35, 16 }
 0x550   : > { %v3034_v17 = vpop.permute.xlu2 %3033 }
 0x551   : > { %v3092_v59 = vsel %vm1080_vm7, %v5859_v5, %v3034_v17  ;;  %v4872_v5 = vld [vmem:[%s7398_s2 + $0x10] sm:$0xff] }
 0x552   : > { %v2424_v20 = vmul.f32 %v4872_v5, %v5738_v42 }
 0x554   : > { %v2426_v56 = vmul.f32 0.2, %v2424_v20  ;;  %vm2425_vm4 = vcmp.ge.f32.partialorder %v2424_v20, 0.0 }
 0x556   : > { %v2427_v28 = vsel %vm2425_vm4, %v2424_v20, %v2426_v56  ;;  %vm7441_vm4 = vcmask 457728  }
 0x557   : > { %v2428_v42 = vmul.f32 %v5708_v6, %v2427_v28 }
 0x558   : > { %v3046_v61 = vpop.permute.xlu2 %3045 }
 0x559   : > { %v3108_v63 = vpack.c.bf16 %v2428_v42, %v2428_v42 }
 0x55c   : > { %v3042_v16 = vpop.permute.xlu0 %3041 }
 0x55e   : > { %v3058_v58 = vpop.permute.xlu1 %3057 }
 0x560   : > { %v3074_v40 = vpop.permute.xlu2 %3073 }
 0x564   : > { %v3082_v8 = vpop.permute.xlu0 %3081 }
 0x566   : > { %v3050_v47 = vpop.permute.xlu1 %3049 }
 0x568   : > { %v3086_v3 = vpop.permute.xlu2 %3085 }
 0x56c   : > { %v3070_v24 = vpop.permute.xlu0 %3069 }
 0x56e   : > { %v3038_v55 = vpop.permute.xlu1 %3037 }
 0x56f   : > { %v3093_v46 = vsel %vm494_vm3, %v3092_v59, %v3038_v55 }
 0x570   : > { %v3094_v1 = vsel %vm389_vm0, %v3093_v46, %v3042_v16  ;;  %v3062_v11 = vpop.permute.xlu2 %3061 }
 0x571   : > { %v3095_v2 = vsel %vm1084_vm8, %v3094_v1, %v3046_v61 }
 0x572   : > { %v3096_v4 = vsel %vm1086_vm9, %v3095_v2, %v3050_v47 }
 0x573   : > { %v3097_v9 = vsel %vm7420_vm10, %v3096_v4, %v3054_v39  ;;  %vm7436_vm10 = vcmask 719872  }
 0x574   : > { %v3098_v14 = vsel %vm7435_vm15, %v3097_v9, %v3058_v58  ;;  %vm7437_vm15 = vcmask 1043456  }
 0x575   : > { %v3099_v19 = vsel %vm1092_vm12, %v3098_v14, %v3062_v11 }
 0x576   : > { %v3090_v7 = vpop.permute.xlu1 %3089 }
 0x57e   : > { %v3066_v15 = vpop.permute.xlu1 %3065 }
 0x57f   : > { %v3100_v23 = vsel %vm1094_vm13, %v3099_v19, %v3066_v15 }
 0x580   : > { %v3101_v25 = vsel %vm1096_vm14, %v3100_v23, %v3070_v24 }
 0x581   : > { %v3102_v27 = vsel %vm7436_vm10, %v3101_v25, %v3074_v40  ;;  %vm7440_vm10 = vcmask 392192  }
 0x586   : > { %v3078_v21 = vpop.permute.xlu1 %3077 }
 0x587   : > { %v3103_v26 = vsel %vm1100_vm1, %v3102_v27, %v3078_v21 }
 0x588   : > { %v3104_v36 = vsel %vm1102_vm2, %v3103_v26, %v3082_v8 }
 0x589   : > { %v3105_v31 = vsel %vm1104_vm5, %v3104_v36, %v3086_v3 }
 0x58a   : > { %v3106_v34 = vsel %vm1106_vm11, %v3105_v31, %v3090_v7 }
 0x58b   : > { %v3107_v37 = vpack.c.bf16 %v3106_v34, %v3106_v34 }
 0x58d   : > { %v3113_v51 = vsel %vm7437_vm15, %v3107_v37, 0  ;;  %vm7442_vm15 = vcmask 719872  }
 0x58e   : > { %3122 = vmatpush.bf16.msra.mxu3 %v3113_v51 }
 0x591   : > { %4916 = vmatmul.msk.bf16.vlgmr.msra.gmra.mxu3 %vm1080_vm7, %v3108_v63 }
 0x5c0   : > { %v5122_v32 = vpop.trf.xlu0 }
 0x5c1   : > { %v5126_v6 = vunpack.i.h.bf16 %v5122_v32  ;;  %v5123_v50 = vunpack.i.l.bf16 %v5122_v32 }
 0x5c3   : > { %v810_v52 = vrot.slane %v5126_v6, 4  ;;  %v798_v10 = vrot.slane %v5123_v50, 4 }
 0x5c8   : > { %v5921_v30 = vpop.trf.xlu0 }
 0x5c9   : > { %v5131_v58 = vunpack.i.h.bf16 %v5921_v30  ;;  %v5128_v47 = vunpack.i.l.bf16 %v5921_v30 }
 0x5d0   : > { %v5158_v41 = vpop.trf.xlu0 }
 0x5d1   : > { %v5162_v60 = vunpack.i.h.bf16 %v5158_v41  ;;  %v5159_v18 = vunpack.i.l.bf16 %v5158_v41 }
 0x5d3   : > { %v832_v40 = vrot.slane %v5162_v60, 4  ;;  %v820_v59 = vrot.slane %v5159_v18, 4 }
 0x5d5   : > { %v5134_v43 = vpop.trf.xlu2 }
 0x5d6   : > { %v5135_v45 = vunpack.i.l.bf16 %v5134_v43  ;;  %v5138_v49 = vunpack.i.h.bf16 %v5134_v43 }
 0x5d8   : > { %v5923_v44 = vpop.trf.xlu0  ;;  %v795_v48 = vrot.slane %v5135_v45, 4  ;;  %v808_v29 = vrot.slane %v5138_v49, 4  ;;  %v811_v57 = vsel %vm796_vm6, %v5138_v49, %v810_v52  ;;  %v799_v61 = vsel %vm796_vm6, %v5135_v45, %v798_v10 }
 0x5d9   : > { %v5934_v39 = vperm.slane %v811_v57, %v5568_v13  ;;  %v5167_v2 = vunpack.i.h.bf16 %v5923_v44  ;;  %v5944_v7 = vperm.slane %v799_v61, %v5568_v13  ;;  %v5164_v8 = vunpack.i.l.bf16 %v5923_v44 }
 0x5da   : > { %v797_v53 = vsel %vm796_vm6, %v795_v48, %v5123_v50  ;;  %v809_v62 = vsel %vm796_vm6, %v808_v29, %v5126_v6 }
 0x5db   : > { %v803_v54 = vperm.slane %v797_v53, %v5568_v13  ;;  %v815_v0 = vperm.slane %v809_v62, %v5568_v13  ;;  %v856_v14 = vrot.slane %v5934_v39, 4  ;;  %v944_v26 = vrot.slane %v5167_v2, 4 }
 0x5dc   : > { %v932_v37 = vrot.slane %v5164_v8, 4 }
 0x5dd   : > { %v5925_v38 = vpop.trf.xlu2  ;;  %v846_v17 = vrot.slane %v803_v54, 4  ;;  %v844_v16 = vrot.slane %v815_v0, 4  ;;  %v857_v63 = vsel %vm796_vm6, %v856_v14, %v5944_v7 }
 0x5de   : > { %v5143_v35 = vunpack.i.h.bf16 %v5925_v38  ;;  %v5140_v46 = vunpack.i.l.bf16 %v5925_v38 }
 0x5df   : > { %v847_v9 = vsel %vm796_vm6, %v815_v0, %v846_v17  ;;  %v845_v25 = vsel %vm796_vm6, %v844_v16, %v803_v54  ;;  %v863_v17 = vperm.slane %v857_v63, %v5580_v33 }
 0x5e0   : > { %v920_v55 = vrot.slane %v5143_v35, 4  ;;  %v908_v56 = vrot.slane %v5140_v46, 4  ;;  %v855_v36 = vperm.slane %v847_v9, %v5580_v33  ;;  %v851_v51 = vperm.slane %v845_v25, %v5580_v33 }
 0x5e2   : > { %v921_v20 = vsel %vm796_vm6, %v920_v55, %v5131_v58  ;;  %v909_v50 = vsel %vm796_vm6, %v908_v56, %v5128_v47  ;;  %v898_v52 = vrot.slane %v855_v36, 4  ;;  %v894_v10 = vrot.slane %v851_v51, 4 }
 0x5e3   : > { %v5966_v42 = vperm.slane %v921_v20, %v5568_v13  ;;  %v910_v56 = vrot.slane %v5128_v47, 4 }
 0x5e5   : > { %v956_v61 = vrot.slane %v5966_v42, 4 }
 0x5ed   : > { %v5146_v1 = vpop.trf.xlu1 }
 0x5ee   : > { %v5150_v3 = vunpack.i.h.bf16 %v5146_v1  ;;  %v5147_v4 = vunpack.i.l.bf16 %v5146_v1 }
 0x5f0   : > { %v833_v5 = vsel %vm796_vm6, %v832_v40, %v5150_v3  ;;  %v834_v11 = vrot.slane %v5150_v3, 4  ;;  %v821_v15 = vsel %vm796_vm6, %v820_v59, %v5147_v4  ;;  %v822_v19 = vrot.slane %v5147_v4, 4 }
 0x5f1   : > { %v839_v23 = vperm.slane %v833_v5, %v5568_v13  ;;  %v827_v24 = vperm.slane %v821_v15, %v5568_v13  ;;  %v915_v40 = vperm.slane %v909_v50, %v5568_v13  ;;  %v858_v5 = vrot.slane %v5944_v7, 4 }
 0x5f2   : > { %v835_v21 = vsel %vm796_vm6, %v5162_v60, %v834_v11  ;;  %v823_v27 = vsel %vm796_vm6, %v5159_v18, %v822_v19  ;;  %v4992_v60 = vld [vmem:[%s5506_s14 + $0x18] sm:$0xff]  ;;  %s7438_s14 = smov 104  }
 0x5f3   : > { %v843_v28 = vperm.slane %v835_v21, %v5568_v13  ;;  %v870_v31 = vrot.slane %v827_v24, 4  ;;  %v868_v34 = vrot.slane %v839_v23, 4  ;;  %v831_v45 = vperm.slane %v823_v27, %v5568_v13 }
 0x5f4   : > { %v3448_v11 = vsel %vm389_vm0, %v4992_v60, 0  ;;  %v957_v19 = vsel %vm796_vm6, %v956_v61, %v915_v40  ;;  %v958_v21 = vrot.slane %v915_v40, 4  ;;  %v902_v27 = vrot.slane %v863_v17, 4 }
 0x5f5   : > { %v5151_v32 = vpop.trf.xlu1  ;;  %v871_v41 = vsel %vm796_vm6, %v839_v23, %v870_v31  ;;  %v869_v43 = vsel %vm796_vm6, %v868_v34, %v827_v24  ;;  %v880_v49 = vrot.slane %v843_v28, 4  ;;  %v882_v9 = vrot.slane %v831_v45, 4  ;;  %3457 = vmatpush.bf16.xpose.msrb.mxu3 %v3448_v11 }
 0x5f6   : > { %v5155_v48 = vunpack.i.h.bf16 %v5151_v32  ;;  %v5152_v6 = vunpack.i.l.bf16 %v5151_v32  ;;  %v879_v29 = vperm.slane %v871_v41, %v5580_v33  ;;  %v875_v53 = vperm.slane %v869_v43, %v5580_v33 }
 0x5f7   : > { %v881_v57 = vsel %vm796_vm6, %v880_v49, %v831_v45  ;;  %v922_v23 = vrot.slane %v5131_v58, 4  ;;  %v963_v31 = vperm.slane %v957_v19, %v5580_v33  ;;  %v859_v58 = vsel %vm796_vm6, %v5934_v39, %v858_v5 }
 0x5f8   : > { %v945_v62 = vsel %vm796_vm6, %v944_v26, %v5155_v48  ;;  %v933_v54 = vsel %vm796_vm6, %v932_v37, %v5152_v6  ;;  %v899_v0 = vsel %vm796_vm6, %v879_v29, %v898_v52  ;;  %v934_v59 = vrot.slane %v5152_v6, 4  ;;  %v4991_v37 = vld [vmem:[%s5520_s20 + $0x18] sm:$0xff]  ;;  %s7439_s20 = smov 120  }
 0x5f9   : > { %v951_v18 = vperm.slane %v945_v62, %v5568_v13  ;;  %1029 = vrot.lane.b32.xlu1 %v899_v0, %s7421_s18  ;;  %v895_v16 = vsel %vm796_vm6, %v875_v53, %v894_v10  ;;  %v896_v55 = vrot.slane %v879_v29, 4  ;;  %v939_v3 = vperm.slane %v933_v54, %v5568_v13 }
 0x5fa   : > { %1021 = vrot.lane.b32.xlu2 %v895_v16, %s5427_s19  ;;  %v887_v4 = vperm.slane %v881_v57, %v5580_v33  ;;  %v892_v15 = vrot.slane %v875_v53, 4  ;;  %v935_v24 = vsel %vm796_vm6, %v5164_v8, %v934_v59  ;;  %v883_v26 = vsel %vm796_vm6, %v843_v28, %v882_v9 }
 0x5fb   : > { %v980_v1 = vrot.slane %v951_v18, 4  ;;  %v897_v14 = vsel %vm796_vm6, %v896_v55, %v855_v36  ;;  %v946_v36 = vrot.slane %v5155_v48, 4  ;;  %v943_v8 = vperm.slane %v935_v24, %v5568_v13 }
 0x5fc   : > { %1025 = vrot.lane.b32.xlu0 %v897_v14, %s7423_s21  ;;  %v900_v25 = vrot.slane %v887_v4, 4  ;;  %v903_v63 = vsel %vm796_vm6, %v887_v4, %v902_v27  ;;  %v982_v32 = vrot.slane %v939_v3, 4  ;;  %v6017_v30 = vsel %vm796_vm6, %v892_v15, %v851_v51  ;;  %4933 = vmatmul.msk.bf16.vlgmr.msrb.gmra.mxu3 %vm389_vm0, %v4991_v37 }
 0x5fd   : > { %v981_v20 = vsel %vm796_vm6, %v980_v1, %v939_v3  ;;  %v891_v41 = vperm.slane %v883_v26, %v5580_v33  ;;  %v867_v39 = vperm.slane %v859_v58, %v5580_v33  ;;  %v959_v43 = vsel %vm796_vm6, %v5966_v42, %v958_v21 }
 0x5fe   : > { %v987_v7 = vperm.slane %v981_v20, %v5580_v33  ;;  %v901_v47 = vsel %vm796_vm6, %v900_v25, %v863_v17  ;;  %v911_v51 = vsel %vm796_vm6, %v5140_v46, %v910_v56  ;;  %v947_v45 = vsel %vm796_vm6, %v5167_v2, %v946_v36 }
 0x5ff   : > { %v923_v49 = vsel %vm796_vm6, %v5143_v35, %v922_v23  ;;  %v983_v48 = vsel %vm796_vm6, %v951_v18, %v982_v32  ;;  %v994_v6 = vrot.slane %v943_v8, 4  ;;  %v904_v42 = vrot.slane %v891_v41, 4 }
 0x600   : > { %v1004_v34 = vrot.slane %v987_v7, 4  ;;  %v967_v50 = vperm.slane %v959_v43, %v5580_v33  ;;  %v919_v46 = vperm.slane %v911_v51, %v5568_v13  ;;  %v955_v44 = vperm.slane %v947_v45, %v5568_v13 }
 0x601   : > { %1037 = vrot.lane.b32.xlu1 %v903_v63, %s5425_s16  ;;  %v906_v29 = vrot.slane %v867_v39, 4  ;;  %v991_v2 = vperm.slane %v983_v48, %v5580_v33  ;;  %v931_v52 = vperm.slane %v923_v49, %v5568_v13  ;;  %v905_v53 = vsel %vm796_vm6, %v904_v42, %v867_v39 }
 0x602   : > { %v1005_v28 = vsel %vm796_vm6, %v1004_v34, %v963_v31  ;;  %1033 = vrot.lane.b32.xlu2 %v901_v47, %s5424_s15  ;;  %v995_v35 = vsel %vm796_vm6, %v955_v44, %v994_v6  ;;  %v1010_v62 = vrot.slane %v967_v50, 4  ;;  %v970_v54 = vrot.slane %v919_v46, 4  ;;  %v4934_v6 = vld [vmem:[%s7401_s5 + $0x30] sm:$0xff] }
 0x603   : > { %v907_v38 = vsel %vm796_vm6, %v891_v41, %v906_v29  ;;  %v992_v10 = vrot.slane %v955_v44, 4  ;;  %v1003_v60 = vperm.slane %v995_v35, %v5580_v33  ;;  %v968_v18 = vrot.slane %v931_v52, 4 }
 0x604   : > { %1049 = vrot.lane.b32.xlu0 %v1005_v28, %s7434_s12  ;;  %v1011_v57 = vsel %vm796_vm6, %v991_v2, %v1010_v62  ;;  %v1008_v0 = vrot.slane %v991_v2, 4  ;;  %v971_v17 = vsel %vm796_vm6, %v931_v52, %v970_v54  ;;  %v1006_v40 = vrot.slane %v963_v31, 4  ;;  %v4935_v62 = vld [vmem:[%s7401_s5 + $0x38] sm:$0xff] }
 0x605   : > { %v993_v61 = vsel %vm796_vm6, %v992_v10, %v943_v8  ;;  %v1016_v59 = vrot.slane %v1003_v60, 4  ;;  %v969_v16 = vsel %vm796_vm6, %v968_v18, %v919_v46  ;;  %v979_v3 = vperm.slane %v971_v17, %v5580_v33  ;;  %v5412_v18 = vld [vmem:[%s7402_s6] ss:$0 sm:$0xff] }
 0x606   : > { %v1009_v55 = vsel %vm796_vm6, %v1008_v0, %v967_v50  ;;  %v1007_v1 = vsel %vm796_vm6, %v987_v7, %v1006_v40  ;;  %v999_v4 = vperm.slane %v993_v61, %v5580_v33  ;;  %v975_v9 = vperm.slane %v969_v16, %v5580_v33 }
 0x607   : > { %v1017_v14 = vsel %vm796_vm6, %v1016_v59, %v979_v3  ;;  %v1018_v24 = vrot.slane %v979_v3, 4 }
 0x608   : > { %v1012_v11 = vrot.slane %v999_v4, 4  ;;  %v1014_v15 = vrot.slane %v975_v9, 4 }
 0x609   : > { %1045 = vrot.lane.b32.xlu1 %v907_v38, %s5430_s23  ;;  %v1019_v25 = vsel %vm796_vm6, %v1003_v60, %v1018_v24 }
 0x60a   : > { %1041 = vrot.lane.b32.xlu2 %v905_v53, %s5429_s22  ;;  %v1015_v19 = vsel %vm796_vm6, %v999_v4, %v1014_v15  ;;  %v1013_v20 = vsel %vm796_vm6, %v1012_v11, %v975_v9  ;;  %v4993_v11 = vld [vmem:[%s5545_s30 + $0x60] sm:$0xff]  ;;  %v4994_v15 = vld [vmem:[%s5545_s30 + $0x68] sm:$0xff] }
 0x60c   : > { %1061 = vrot.lane.b32.xlu0 %v1011_v57, %s5431_s24 }
 0x611   : > { %1057 = vrot.lane.b32.xlu1 %v1009_v55, %s5435_s9 }
 0x612   : > { %1053 = vrot.lane.b32.xlu2 %v1007_v1, %s7431_s26 }
 0x614   : > { %v6063_v5 = vpop.f32.mrf.mxu3  ;;  %1073 = vrot.lane.b32.xlu0 %v1017_v14, %s7432_s29 }
 0x619   : > { %1069 = vrot.lane.b32.xlu1 %v1015_v19, %s7438_s14  ;;  %v4995_v19 = vld [vmem:[%s5545_s30 + $0x70] sm:$0xff] }
 0x61a   : > { %1065 = vrot.lane.b32.xlu2 %v1013_v20, %s7433_s11  ;;  %v4996_v20 = vld [vmem:[%s5545_s30 + $0x78] sm:$0xff]  ;;  %s7444_s30 = smov 16  }
 0x61c   : > { %v3126_v23 = vpop.f32.mrf.mxu3 }
 0x622   : > { %1077 = vrot.lane.b32.xlu2 %v1019_v25, %s7439_s20 }
 0x654   : > { %v1022_v7 = vpop.permute.xlu2 %1021 }
 0x655   : > { %v1081_v36 = vsel %vm1080_vm7, %v6017_v30, %v1022_v7  ;;  %v409_v30 = vld [vmem:[%s7398_s2] sm:$0xff] }
 0x656   : > { %v410_v49 = vmul.f32 %v409_v30, %v5532_v12  ;;  %v2177_v30 = vrot.slane %v5721_v22, 4 }
 0x658   : > { %v412_v44 = vmul.f32 0.2, %v410_v49 }
 0x65c   : > { %v1034_v56 = vpop.permute.xlu2 %1033 }
 0x664   : > { %v1042_v26 = vpop.permute.xlu2 %1041 }
 0x66b   : > { %v1030_v21 = vpop.permute.xlu1 %1029 }
 0x66c   : > { %v1054_v8 = vpop.permute.xlu2 %1053 }
 0x66e   : > { %v1026_v27 = vpop.permute.xlu0 %1025 }
 0x66f   : > { %v1082_v31 = vsel %vm494_vm3, %v1081_v36, %v1026_v27 }
 0x670   : > { %v1083_v58 = vsel %vm389_vm0, %v1082_v31, %v1030_v21 }
 0x671   : > { %v1085_v63 = vsel %vm1084_vm8, %v1083_v58, %v1034_v56 }
 0x673   : > { %v1038_v34 = vpop.permute.xlu1 %1037 }
 0x674   : > { %v1087_v32 = vsel %vm1086_vm9, %v1085_v63, %v1038_v34  ;;  %v1066_v51 = vpop.permute.xlu2 %1065 }
 0x675   : > { %v1089_v28 = vsel %vm7440_vm10, %v1087_v32, %v1042_v26  ;;  %vm411_vm10 = vcmp.ge.f32.partialorder %v410_v49, 0.0 }
 0x676   : > { %v1050_v37 = vpop.permute.xlu0 %1049  ;;  %v413_v35 = vsel %vm411_vm10, %v410_v49, %v412_v44 }
 0x677   : > { %v418_v0 = vmul.f32 %v5412_v18, %v413_v35 }
 0x679   : > { %v1109_v1 = vpack.c.bf16 %v418_v0, %v418_v0 }
 0x67b   : > { %v1046_v47 = vpop.permute.xlu1 %1045 }
 0x67c   : > { %v1091_v41 = vsel %vm7441_vm4, %v1089_v28, %v1046_v47  ;;  %v1078_v54 = vpop.permute.xlu2 %1077 }
 0x67d   : > { %v1093_v39 = vsel %vm1092_vm12, %v1091_v41, %v1050_v37 }
 0x67e   : > { %v1062_v43 = vpop.permute.xlu0 %1061  ;;  %v1095_v48 = vsel %vm1094_vm13, %v1093_v39, %v1054_v8 }
 0x67f   : > { %v3459_v50 = vpop.f32.mrf.mxu3 }
 0x680   : > { %v3467_v46 = vmul.f32 %v4934_v6, %v3459_v50 }
 0x682   : > { %v3471_v38 = vmul.f32 0.2, %v3467_v46  ;;  %vm3469_vm4 = vcmp.ge.f32.partialorder %v3467_v46, 0.0 }
 0x683   : > { %v1058_v45 = vpop.permute.xlu1 %1057 }
 0x684   : > { %v1097_v42 = vsel %vm1096_vm14, %v1095_v48, %v1058_v45  ;;  %v3473_v61 = vsel %vm3469_vm4, %v3467_v46, %v3471_v38  ;;  %vm7486_vm4 = vcmask 392192  }
 0x685   : > { %v1099_v29 = vsel %vm7442_vm15, %v1097_v42, %v1062_v43  ;;  %vm7443_vm15 = vcmask 1043456   ;;  %v3475_v55 = vmul.f32 0.15421256, %v3473_v61 }
 0x686   : > { %v1101_v52 = vsel %vm1100_vm1, %v1099_v29, %v1066_v51  ;;  %v1074_v12 = vpop.permute.xlu0 %1073 }
 0x687   : > { %v3461_v60 = vpop.f32.mrf.mxu3 }
 0x688   : > { %v3468_v40 = vmul.f32 %v4935_v62, %v3461_v60 }
 0x68a   : > { %vm3470_vm10 = vcmp.ge.f32.partialorder %v3468_v40, 0.0  ;;  %v3472_v16 = vmul.f32 0.2, %v3468_v40 }
 0x68b   : > { %v1070_v2 = vpop.permute.xlu1 %1069 }
 0x68c   : > { %v1103_v53 = vsel %vm1102_vm2, %v1101_v52, %v1070_v2  ;;  %v3474_v3 = vsel %vm3470_vm10, %v3468_v40, %v3472_v16 }
 0x68d   : > { %v1105_v10 = vsel %vm1104_vm5, %v1103_v53, %v1074_v12  ;;  %v3476_v4 = vmul.f32 0.15421256, %v3474_v3 }
 0x68e   : > { %v1107_v57 = vsel %vm1106_vm11, %v1105_v10, %v1078_v54 }
 0x68f   : > { %v1108_v17 = vpack.c.bf16 %v1107_v57, %v1107_v57  ;;  %v3486_v9 = vpack.c.bf16 %v3476_v4, %v3475_v55 }
 0x691   : > { %v1115_v59 = vsel %vm7443_vm15, %v1108_v17, 0  ;;  %v3520_v14 = vsel %vm494_vm3, %v3486_v9, 0  ;;  %vm7487_vm15 = vcmask 457728  }
 0x692   : > { %1124 = vmatpush.bf16.msrb.mxu2 %v1115_v59  ;;  %3529 = vmatpush.bf16.xpose.msra.mxu1 %v3520_v14 }
 0x695   : > { %4820 = vmatmul.msk.bf16.vlgmr.msrb.gmra.mxu2 %vm1080_vm7, %v1109_v1 }
 0x699   : > { %4960 = vmatmul.msk.bf16.vlgmr.msra.gmra.mxu1 %vm494_vm3, %v4993_v11 }
 0x6a9   : > { %4961 = vmatmul.msk.bf16.gmra.mxu1 %vm494_vm3, %v4994_v15 }
 0x6b9   : > { %4962 = vmatmul.msk.bf16.gmra.mxu1 %vm494_vm3, %v4995_v19 }
 0x6c9   : > { %4963 = vmatmul.msk.bf16.gmra.mxu1 %vm494_vm3, %v4996_v20 }
 0x716   : > { %v6131_v7 = vpop.f32.mrf.mxu1 }
 0x718   : > { %v6112_v23 = vpop.f32.mrf.mxu2 }
 0x719   : > { %v5178_v24 = vpack.i.bf16 %v5721_v22, %v6112_v23  ;;  %v1178_v49 = vrot.slane %v6112_v23, 4 }
 0x71b   : > { %5179 = vrot.lane.b32.xlu2 %v5178_v24, %s7438_s14  ;;  %5174 = vrot.lane.b32.xlu0 %v5178_v24, %s7432_s29 }
 0x71c   : > { %5169 = vrot.lane.b32.xlu1 %v5178_v24, %s7439_s20 }
 0x71e   : > { %v3533_v56 = vpop.f32.mrf.mxu1 }
 0x720   : > { %v1128_v25 = vpop.f32.mrf.mxu2 }
 0x723   : > { %5194 = vrot.lane.b32.xlu2 %v5178_v24, %s5435_s9  ;;  %5189 = vrot.lane.b32.xlu0 %v5178_v24, %s5431_s24 }
 0x724   : > { %5184 = vrot.lane.b32.xlu1 %v5178_v24, %s7433_s11 }
 0x726   : > { %v3536_v21 = vpop.f32.mrf.mxu1 }
 0x72b   : > { %5209 = vrot.lane.b32.xlu2 %v5178_v24, %s5430_s23  ;;  %5204 = vrot.lane.b32.xlu0 %v5178_v24, %s7434_s12 }
 0x72c   : > { %5199 = vrot.lane.b32.xlu1 %v5178_v24, %s7431_s26 }
 0x72e   : > { %v6157_v27 = vpop.f32.mrf.mxu1 }
 0x72f   : > { %v5243_v18 = vpack.i.bf16 %v6157_v27, %v6131_v7 }
 0x733   : > { %5224 = vrot.lane.b32.xlu2 %v5178_v24, %s5424_s15  ;;  %5219 = vrot.lane.b32.xlu0 %v5178_v24, %s5425_s16 }
 0x734   : > { %5214 = vrot.lane.b32.xlu1 %v5178_v24, %s5429_s22 }
 0x736   : > { %v3541_v26 = vpop.f32.mrf.mxu1 }
 0x73b   : > { %5239 = vrot.lane.b32.xlu2 %v5178_v24, %s5427_s19  ;;  %5234 = vrot.lane.b32.xlu0 %v5178_v24, %s7444_s30 }
 0x73c   : > { %5229 = vrot.lane.b32.xlu1 %v5178_v24, %s7445_s25 }
 0x73e   : > { %v3543_v36 = vpop.f32.mrf.mxu1 }
 0x73f   : > { %v5255_v37 = vpack.i.bf16 %v3543_v36, %v3541_v26 }
 0x743   : > { %3135 = vrot.lane.b32.xlu2 %v6063_v5, %s7438_s14  ;;  %3132 = vrot.lane.b32.xlu0 %v6063_v5, %s7432_s29 }
 0x744   : > { %3129 = vrot.lane.b32.xlu1 %v6063_v5, %s7439_s20 }
 0x746   : > { %v3546_v34 = vpop.f32.mrf.mxu1 }
 0x747   : > { %v5267_v44 = vpack.i.bf16 %v3533_v56, %v3546_v34 }
 0x74b   : > { %3144 = vrot.lane.b32.xlu2 %v6063_v5, %s5435_s9  ;;  %3141 = vrot.lane.b32.xlu0 %v6063_v5, %s5431_s24 }
 0x74c   : > { %3138 = vrot.lane.b32.xlu1 %v6063_v5, %s7433_s11 }
 0x74e   : > { %v3548_v8 = vpop.f32.mrf.mxu1 }
 0x74f   : > { %v5279_v63 = vpack.i.bf16 %v3548_v8, %v3536_v21 }
 0x753   : > { %3153 = vrot.lane.b32.xlu2 %v6063_v5, %s5430_s23  ;;  %3150 = vrot.lane.b32.xlu0 %v6063_v5, %s7434_s12 }
 0x754   : > { %3147 = vrot.lane.b32.xlu1 %v6063_v5, %s7431_s26 }
 0x75b   : > { %3162 = vrot.lane.b32.xlu2 %v6063_v5, %s5424_s15  ;;  %3159 = vrot.lane.b32.xlu0 %v6063_v5, %s5425_s16 }
 0x75c   : > { %3156 = vrot.lane.b32.xlu1 %v6063_v5, %s5429_s22 }
 0x763   : > { %3171 = vrot.lane.b32.xlu2 %v6063_v5, %s5427_s19  ;;  %3168 = vrot.lane.b32.xlu0 %v6063_v5, %s7444_s30 }
 0x764   : > { %3165 = vrot.lane.b32.xlu1 %v6063_v5, %s7445_s25 }
 0x775   : > { %v5180_v31 = vpop.permute.xlu2 %5179 }
 0x776   : > { %v5182_v32 = vunpack.i.h.bf16 %v5180_v31  ;;  %v5181_v47 = vunpack.i.l.bf16 %v5180_v31 }
 0x778   : > { %v2187_v45 = vrot.slane %v5182_v32, 4  ;;  %v1188_v42 = vrot.slane %v5181_v47, 4 }
 0x77d   : > { %v6165_v58 = vpop.permute.xlu2 %5194 }
 0x77e   : > { %v5197_v17 = vunpack.i.h.bf16 %v6165_v58  ;;  %v5196_v55 = vunpack.i.l.bf16 %v6165_v58 }
 0x780   : > { %v2199_v25 = vrot.slane %v5197_v17, 4  ;;  %v1200_v56 = vrot.slane %v5196_v55, 4 }
 0x785   : > { %5256 = vxpose.xlu0.b32.start.end [1/1] (short) (narrow) %v5255_v37, 16  ;;  %v6167_v28 = vpop.permute.xlu2 %5209 }
 0x786   : > { %v5212_v37 = vunpack.i.h.bf16 %v6167_v28 }
 0x789   : > { %5280 = vxpose.xlu2.b32.start.end [1/1] (short) (narrow) %v5279_v63, 16 }
 0x78d   : > { %v5175_v41 = vpop.permute.xlu0 %5174  ;;  %v6198_v14 = vpop.permute.xlu2 %5224 }
 0x78e   : > { %v5177_v39 = vunpack.i.h.bf16 %v5175_v41  ;;  %v5176_v43 = vunpack.i.l.bf16 %v5175_v41  ;;  %v5170_v51 = vpop.permute.xlu1 %5169 }
 0x78f   : > { %v5172_v48 = vunpack.i.h.bf16 %v5170_v51  ;;  %v5171_v6 = vunpack.i.l.bf16 %v5170_v51 }
 0x790   : > { %v2175_v50 = vrot.slane %v5177_v39, 4  ;;  %v2178_v46 = vsel %vm796_vm6, %v5177_v39, %v2177_v30  ;;  %v1176_v2 = vrot.slane %v5176_v43, 4  ;;  %v1179_v52 = vsel %vm796_vm6, %v5176_v43, %v1178_v49 }
 0x791   : > { %v6173_v29 = vperm.slane %v2178_v46, %v5568_v13  ;;  %v2188_v38 = vsel %vm796_vm6, %v2187_v45, %v5172_v48  ;;  %v1187_v12 = vperm.slane %v1179_v52, %v5568_v13  ;;  %v2189_v53 = vrot.slane %v5172_v48, 4 }
 0x792   : > { %v2176_v35 = vsel %vm796_vm6, %v2175_v50, %v5721_v22  ;;  %v2194_v62 = vperm.slane %v2188_v38, %v5568_v13  ;;  %v1177_v57 = vsel %vm796_vm6, %v1176_v2, %v6112_v23  ;;  %v1189_v60 = vsel %vm796_vm6, %v1188_v42, %v5171_v6 }
 0x793   : > { %v2182_v54 = vperm.slane %v2176_v35, %v5568_v13  ;;  %v2237_v10 = vrot.slane %v6173_v29, 4  ;;  %v1183_v0 = vperm.slane %v1177_v57, %v5568_v13  ;;  %v2190_v22 = vsel %vm796_vm6, %v5182_v32, %v2189_v53 }
 0x794   : > { %v6192_v61 = vperm.slane %v2190_v22, %v5568_v13  ;;  %v1190_v40 = vrot.slane %v5171_v6, 4  ;;  %v1195_v59 = vperm.slane %v1189_v60, %v5568_v13  ;;  %v1238_v3 = vrot.slane %v1187_v12, 4 }
 0x795   : > { %v6195_v16 = vpop.permute.xlu0 %5189  ;;  %5268 = vxpose.xlu0.b32.start.end [1/1] (short) (narrow) %v5267_v44, 16  ;;  %v1226_v1 = vrot.slane %v1183_v0, 4  ;;  %v2223_v4 = vrot.slane %v2194_v62, 4  ;;  %v2225_v11 = vrot.slane %v2182_v54, 4  ;;  %v5211_v43 = vunpack.i.l.bf16 %v6167_v28  ;;  %v6242_v44 = vpop.permute.xlu2 %5239 }
 0x796   : > { %v5185_v9 = vpop.permute.xlu1 %5184  ;;  %v6202_v15 = vsel %vm796_vm6, %v6192_v61, %v2237_v10  ;;  %v1191_v19 = vsel %vm796_vm6, %v5181_v47, %v1190_v40  ;;  %v1224_v20 = vrot.slane %v1195_v59, 4  ;;  %v5192_v36 = vunpack.i.h.bf16 %v6195_v16 }
 0x797   : > { %v1199_v23 = vperm.slane %v1191_v19, %v5568_v13  ;;  %v6207_v24 = vsel %vm796_vm6, %v1195_v59, %v1226_v1  ;;  %v5187_v26 = vunpack.i.h.bf16 %v5185_v9  ;;  %v5186_v31 = vunpack.i.l.bf16 %v5185_v9 }
 0x798   : > { %v6210_v7 = vsel %vm796_vm6, %v1224_v20, %v1183_v0  ;;  %v6217_v34 = vsel %vm796_vm6, %v2223_v4, %v2182_v54  ;;  %v6220_v58 = vsel %vm796_vm6, %v2194_v62, %v2225_v11  ;;  %v5191_v47 = vunpack.i.l.bf16 %v6195_v16 }
 0x799   : > { %5244 = vxpose.xlu1.b32.start.end [1/1] (short) (narrow) %v5243_v18, 16  ;;  %v1236_v21 = vrot.slane %v1199_v23, 4  ;;  %v6213_v27 = vsel %vm796_vm6, %v1199_v23, %v1238_v3  ;;  %v6227_v63 = vsel %vm796_vm6, %v2199_v25, %v5187_v26  ;;  %v2201_v32 = vrot.slane %v5187_v26, 4 }
 0x79a   : > { %v1201_v41 = vsel %vm796_vm6, %v1200_v56, %v5186_v31  ;;  %v1202_v30 = vrot.slane %v5186_v31, 4  ;;  %v2213_v49 = vrot.slane %v5192_v36, 4  ;;  %v2301_v50 = vrot.slane %v5212_v37, 4 }
 0x79b   : > { %v6224_v8 = vsel %vm796_vm6, %v1236_v21, %v1187_v12  ;;  %v2202_v51 = vsel %vm796_vm6, %v5197_v17, %v2201_v32  ;;  %v1214_v2 = vrot.slane %v5191_v47, 4  ;;  %v1302_v12 = vrot.slane %v5211_v43, 4 }
 0x79c   : > { %v6236_v48 = vperm.slane %v2202_v51, %v5568_v13  ;;  %v1203_v6 = vsel %vm796_vm6, %v5196_v55, %v1202_v30  ;;  %v6247_v62 = vperm.slane %v1201_v41, %v5568_v13  ;;  %v5227_v10 = vunpack.i.h.bf16 %v6198_v14 }
 0x79d   : > { %v6231_v39 = vpop.permute.xlu0 %5204  ;;  %v1211_v46 = vperm.slane %v1203_v6, %v5568_v13  ;;  %v5226_v59 = vunpack.i.l.bf16 %v6198_v14  ;;  %v5242_v16 = vunpack.i.h.bf16 %v6242_v44  ;;  %v5241_v55 = vunpack.i.l.bf16 %v6242_v44 }
 0x79e   : > { %v5200_v45 = vpop.permute.xlu1 %5199  ;;  %v2261_v53 = vrot.slane %v6236_v48, 4  ;;  %v5207_v22 = vunpack.i.h.bf16 %v6231_v39  ;;  %v1250_v4 = vrot.slane %v6247_v62, 4  ;;  %v5206_v23 = vunpack.i.l.bf16 %v6231_v39 }
 0x79f   : > { %v5202_v42 = vunpack.i.h.bf16 %v5200_v45  ;;  %v5201_v35 = vunpack.i.l.bf16 %v5200_v45  ;;  %v1262_v0 = vrot.slane %v1211_v46, 4 }
 0x7a0   : > { %v2289_v26 = vrot.slane %v5207_v22, 4 }
 0x7a1   : > { %v2211_v52 = vrot.slane %v5202_v42, 4  ;;  %v2214_v38 = vsel %vm796_vm6, %v5202_v42, %v2213_v49  ;;  %v1212_v60 = vrot.slane %v5201_v35, 4  ;;  %v1215_v18 = vsel %vm796_vm6, %v5201_v35, %v1214_v2  ;;  %v6291_v2 = vpop.permute.xlu2 %3135 }
 0x7a2   : > { %v6250_v54 = vperm.slane %v2214_v38, %v5568_v13  ;;  %v1223_v17 = vperm.slane %v1215_v18, %v5568_v13  ;;  %v1290_v42 = vrot.slane %v5206_v23, 4 }
 0x7a3   : > { %v6254_v57 = vsel %vm796_vm6, %v2211_v52, %v5192_v36  ;;  %v1213_v1 = vsel %vm796_vm6, %v1212_v60, %v5191_v47 }
 0x7a4   : > { %v6261_v40 = vsel %vm796_vm6, %v6250_v54, %v2261_v53  ;;  %v6269_v9 = vperm.slane %v1213_v1, %v5568_v13  ;;  %v1260_v11 = vrot.slane %v1223_v17, 4  ;;  %v6272_v19 = vsel %vm796_vm6, %v1223_v17, %v1262_v0 }
 0x7a5   : > { %v5220_v3 = vpop.permute.xlu0 %5219  ;;  %v3176_v53 = vrot.slane %v6063_v5, 4  ;;  %v2313_v0 = vrot.slane %v5227_v10, 4  ;;  %v1314_v17 = vrot.slane %v5226_v59, 4 }
 0x7a6   : > { %v5215_v20 = vpop.permute.xlu1 %5214  ;;  %v5222_v25 = vunpack.i.h.bf16 %v5220_v3  ;;  %v5221_v56 = vunpack.i.l.bf16 %v5220_v3  ;;  %v6277_v36 = vsel %vm796_vm6, %v6269_v9, %v1250_v4  ;;  %v6280_v31 = vsel %vm796_vm6, %v1260_v11, %v1211_v46 }
 0x7a7   : > { %v5217_v21 = vunpack.i.h.bf16 %v5215_v20  ;;  %7446 = vst [vmem:[#allocation2_spill] sm:$0xff] %v6280_v31  ;;  %v5216_v32 = vunpack.i.l.bf16 %v5215_v20  ;;  %v1324_v11 = vrot.slane %v5241_v55, 4 }
 0x7a8   : > { %v2299_v47 = vrot.slane %v5222_v25, 4  ;;  %v2302_v41 = vsel %vm796_vm6, %v5222_v25, %v2301_v50  ;;  %v1300_v30 = vrot.slane %v5221_v56, 4  ;;  %v1303_v51 = vsel %vm796_vm6, %v5221_v56, %v1302_v12 }
 0x7a9   : > { %v6285_v39 = vperm.slane %v2302_v41, %v5568_v13  ;;  %v6288_v45 = vperm.slane %v1303_v51, %v5568_v13  ;;  %v2287_v49 = vrot.slane %v5217_v21, 4  ;;  %v2290_v6 = vsel %vm796_vm6, %v5217_v21, %v2289_v26 }
 0x7aa   : > { %v2300_v46 = vsel %vm796_vm6, %v2299_v47, %v5212_v37  ;;  %v1301_v50 = vsel %vm796_vm6, %v1300_v30, %v5211_v43  ;;  %v1288_v52 = vrot.slane %v5216_v32, 4  ;;  %v6302_v12 = vperm.slane %v2290_v6, %v5568_v13 }
 0x7ab   : > { %7447 = vst [vmem:[#allocation3_spill] sm:$0xff] %v6288_v45  ;;  %v2347_v38 = vrot.slane %v6285_v39, 4  ;;  %v6299_v35 = vperm.slane %v1301_v50, %v5568_v13  ;;  %v1348_v60 = vrot.slane %v6288_v45, 4  ;;  %v2288_v18 = vsel %vm796_vm6, %v2287_v49, %v5207_v22 }
 0x7ac   : > { %v1289_v28 = vsel %vm796_vm6, %v1288_v52, %v5206_v23  ;;  %v1291_v37 = vsel %vm796_vm6, %v5216_v32, %v1290_v42  ;;  %v2323_v22 = vrot.slane %v5242_v16, 4  ;;  %v6330_v25 = vperm.slane %v6227_v63, %v5568_v13 }
 0x7ad   : > { %v5235_v43 = vpop.permute.xlu0 %5234  ;;  %v1336_v1 = vrot.slane %v6299_v35, 4  ;;  %v6316_v3 = vsel %vm796_vm6, %v2347_v38, %v6302_v12  ;;  %v6323_v20 = vperm.slane %v1289_v28, %v5568_v13  ;;  %v6326_v23 = vperm.slane %v1291_v37, %v5568_v13  ;;  %v3145_v28 = vpop.permute.xlu2 %3144 }
 0x7ae   : > { %v5230_v4 = vpop.permute.xlu1 %5229  ;;  %v5237_v56 = vunpack.i.h.bf16 %v5235_v43  ;;  %v5236_v21 = vunpack.i.l.bf16 %v5235_v43  ;;  %v6334_v32 = vperm.slane %v6210_v7, %v5580_v33  ;;  %v6346_v30 = vperm.slane %v6217_v34, %v5580_v33 }
 0x7af   : > { %v5232_v26 = vunpack.i.h.bf16 %v5230_v4  ;;  %v6338_v47 = vsel %vm796_vm6, %v1336_v1, %v6323_v20  ;;  %v6342_v41 = vsel %vm796_vm6, %v1348_v60, %v6326_v23  ;;  %v6353_v7 = vperm.slane %v6220_v58, %v5580_v33 }
 0x7b0   : > { %v2311_v63 = vrot.slane %v5237_v56, 4  ;;  %v6349_v51 = vsel %vm796_vm6, %v5237_v56, %v2313_v0  ;;  %v1312_v49 = vrot.slane %v5236_v21, 4  ;;  %v6357_v6 = vperm.slane %v6254_v57, %v5568_v13 }
 0x7b1   : > { %v6360_v42 = vsel %vm796_vm6, %v5236_v21, %v1314_v17  ;;  %v2324_v50 = vsel %vm796_vm6, %v2323_v22, %v5232_v26  ;;  %v2325_v34 = vrot.slane %v5232_v26, 4  ;;  %v6365_v52 = vperm.slane %v6207_v24, %v5580_v33 }
 0x7b2   : > { %v2312_v58 = vsel %vm796_vm6, %v2311_v63, %v5227_v10  ;;  %v1313_v57 = vsel %vm796_vm6, %v1312_v49, %v5226_v59  ;;  %v3186_v60 = vrot.slane %v6291_v2, 4  ;;  %v5231_v17 = vunpack.i.l.bf16 %v5230_v4 }
 0x7b3   : > { %v6376_v37 = vperm.slane %v2312_v58, %v5568_v13  ;;  %v1319_v43 = vperm.slane %v1313_v57, %v5568_v13  ;;  %v2326_v24 = vsel %vm796_vm6, %v5242_v16, %v2325_v34  ;;  %v2273_v10 = vrot.slane %v6346_v30, 4 }
 0x7b4   : > { %v2247_v22 = vrot.slane %v6357_v6, 4  ;;  %v2330_v26 = vperm.slane %v2324_v50, %v5568_v13  ;;  %v2306_v63 = vperm.slane %v2300_v46, %v5568_v13  ;;  %v1325_v16 = vsel %vm796_vm6, %v1324_v11, %v5231_v17 }
 0x7b5   : > { %v3133_v0 = vpop.permute.xlu0 %3132  ;;  %v2361_v56 = vrot.slane %v6376_v37, 4  ;;  %v1362_v21 = vrot.slane %v1319_v43, 4  ;;  %v1326_v49 = vrot.slane %v5231_v17, 4  ;;  %v1331_v58 = vperm.slane %v1325_v16, %v5568_v13 }
 0x7b6   : > { %v3130_v1 = vpop.permute.xlu1 %3129  ;;  %v3174_v4 = vrot.slane %v3133_v0, 4  ;;  %v3177_v57 = vsel %vm796_vm6, %v3133_v0, %v3176_v53  ;;  %v2294_v14 = vperm.slane %v2288_v18, %v5568_v13  ;;  %v3198_v0 = vrot.slane %v3145_v28, 4  ;;  %v6414_v53 = vpop.permute.xlu2 %3153 }
 0x7b7   : > { %v2362_v34 = vsel %vm796_vm6, %v2330_v26, %v2361_v56  ;;  %v3187_v59 = vsel %vm796_vm6, %v3186_v60, %v3130_v1  ;;  %v6398_v50 = vsel %vm796_vm6, %v5241_v55, %v1326_v49  ;;  %v3185_v11 = vperm.slane %v3177_v57, %v5568_v13 }
 0x7b8   : > { %v3175_v46 = vsel %vm796_vm6, %v3174_v4, %v6063_v5  ;;  %v1360_v17 = vrot.slane %v1331_v58, 4  ;;  %v1363_v56 = vsel %vm796_vm6, %v1331_v58, %v1362_v21  ;;  %v2335_v60 = vrot.slane %v2306_v63, 4 }
 0x7b9   : > { %v3181_v16 = vperm.slane %v3175_v46, %v5568_v13  ;;  %v3188_v18 = vrot.slane %v3130_v1, 4  ;;  %v3193_v44 = vperm.slane %v3187_v59, %v5568_v13  ;;  %v3236_v38 = vrot.slane %v3185_v11, 4 }
 0x7ba   : > { %v1361_v55 = vsel %vm796_vm6, %v1360_v17, %v1319_v43  ;;  %v2248_v5 = vsel %vm796_vm6, %v2247_v22, %v6330_v25  ;;  %v1248_v4 = vrot.slane %v6269_v9, 4  ;;  %v2337_v21 = vrot.slane %v2294_v14, 4 }
 0x7bb   : > { %v3224_v49 = vrot.slane %v3181_v16, 4  ;;  %v3189_v58 = vsel %vm796_vm6, %v6291_v2, %v3188_v18  ;;  %v3222_v57 = vrot.slane %v3193_v44, 4  ;;  %v1338_v1 = vrot.slane %v6323_v20, 4 }
 0x7bc   : > { %v3197_v43 = vperm.slane %v3189_v58, %v5568_v13  ;;  %v6424_v9 = vperm.slane %v2326_v24, %v5568_v13  ;;  %v2359_v22 = vrot.slane %v2330_v26, 4  ;;  %v6433_v58 = vperm.slane %v2248_v5, %v5580_v33 }
 0x7bd   : > { %v3142_v45 = vpop.permute.xlu0 %3141  ;;  %v6418_v59 = vsel %vm796_vm6, %v3193_v44, %v3224_v49  ;;  %v6427_v2 = vsel %vm796_vm6, %v3222_v57, %v3181_v16  ;;  %v2336_v44 = vsel %vm796_vm6, %v2335_v60, %v2294_v14  ;;  %v3300_v24 = vrot.slane %v6414_v53, 4 }
 0x7be   : > { %v3139_v46 = vpop.permute.xlu1 %3138  ;;  %v3234_v31 = vrot.slane %v3197_v43, 4  ;;  %v6430_v20 = vsel %vm796_vm6, %v3197_v43, %v3236_v38  ;;  %v2342_v16 = vperm.slane %v2336_v44, %v5580_v33  ;;  %v6443_v49 = vperm.slane %v1363_v56, %v5580_v33 }
 0x7bf   : > { %v6421_v17 = vsel %vm796_vm6, %v3198_v0, %v3139_v46  ;;  %v3200_v18 = vrot.slane %v3139_v46, 4  ;;  %v6437_v0 = vperm.slane %v2362_v34, %v5580_v33  ;;  %v6451_v14 = vsel %vm796_vm6, %v6433_v58, %v2273_v10 }
 0x7c0   : > { %v6446_v38 = vsel %vm796_vm6, %v3234_v31, %v3185_v11  ;;  %v6454_v34 = vperm.slane %v1361_v55, %v5580_v33  ;;  %v7448_v60 = vrot.slane %v6330_v25, 4  ;;  %v2338_v31 = vsel %vm796_vm6, %v2306_v63, %v2337_v21 }
 0x7c1   : > { %v3201_v26 = vsel %vm796_vm6, %v3145_v28, %v3200_v18  ;;  %v2360_v28 = vsel %vm796_vm6, %v2359_v22, %v6376_v37  ;;  %v3212_v11 = vrot.slane %v3142_v45, 4  ;;  %v2385_v43 = vrot.slane %v2342_v16, 4 }
 0x7c2   : > { %v3209_v5 = vperm.slane %v3201_v26, %v5568_v13  ;;  %v2250_v56 = vsel %vm796_vm6, %v6357_v6, %v7448_v60  ;;  %v2366_v46 = vperm.slane %v2360_v28, %v5580_v33  ;;  %v6466_v44 = vperm.slane %v2338_v31, %v5580_v33 }
 0x7c3   : > { %v2258_v10 = vperm.slane %v2250_v56, %v5580_v33  ;;  %v2387_v37 = vrot.slane %v6437_v0, 4  ;;  %v1249_v25 = vsel %vm796_vm6, %v1248_v4, %v6247_v62  ;;  %v7449_v60 = vrot.slane %v6353_v7, 4 }
 0x7c4   : > { %v3260_v18 = vrot.slane %v3209_v5, 4  ;;  %v2383_v21 = vrot.slane %v2366_v46, 4  ;;  %v6474_v28 = vsel %vm796_vm6, %v2366_v46, %v2385_v43  ;;  %v1388_v46 = vrot.slane %v6443_v49, 4 }
 0x7c5   : > { %v3151_v57 = vpop.permute.xlu0 %3150  ;;  %v2275_v22 = vrot.slane %v2258_v10, 4  ;;  %v6479_v56 = vsel %vm796_vm6, %v2258_v10, %v7449_v60  ;;  %v6483_v31 = vsel %vm796_vm6, %v2387_v37, %v6466_v44  ;;  %v6508_v37 = vperm.slane %v1249_v25, %v5580_v33 }
 0x7c6   : > { %v3148_v55 = vpop.permute.xlu1 %3147  ;;  %7450 = vst [vmem:[#allocation4_spill] sm:$0xff] %v6479_v56  ;;  %v6487_v4 = vsel %vm796_vm6, %v2383_v21, %v2342_v16  ;;  %v1259_v21 = vperm.slane %v6277_v36, %v5580_v33  ;;  %v7452_v60 = vrot.slane %v6334_v32, 4 }
 0x7c7   : > { %v3210_v6 = vrot.slane %v3148_v55, 4  ;;  %v3213_v63 = vsel %vm796_vm6, %v3148_v55, %v3212_v11  ;;  %7451 = vst [vmem:[#allocation5_spill] sm:$0xff] %v6483_v31  ;;  %v6491_v11 = vsel %vm796_vm6, %v2275_v22, %v6353_v7  ;;  %v3288_v22 = vrot.slane %v3151_v57, 4 }
 0x7c8   : > { %v3221_v26 = vperm.slane %v3213_v63, %v5568_v13  ;;  %v2271_v63 = vrot.slane %v6433_v58, 4  ;;  %v6523_v25 = vsel %vm796_vm6, %v6508_v37, %v7452_v60 }
 0x7c9   : > { %v3211_v62 = vsel %vm796_vm6, %v3210_v6, %v3142_v45  ;;  %v1343_v45 = vperm.slane %v6338_v47, %v5580_v33  ;;  %v1384_v6 = vrot.slane %v6454_v34, 4  ;;  %v1339_v47 = vsel %vm796_vm6, %v6299_v35, %v1338_v1  ;;  %7453 = vst [vmem:[#allocation6_spill] sm:$0xff] %v6523_v25 }
 0x7ca   : > { %v3258_v43 = vrot.slane %v3221_v26, 4  ;;  %v6496_v10 = vsel %vm796_vm6, %v3221_v26, %v3260_v18  ;;  %v6503_v16 = vperm.slane %v3211_v62, %v5568_v13  ;;  %v7455_v35 = vrot.slane %v6365_v52, 4 }
 0x7cb   : > { %v6526_v62 = vsel %vm796_vm6, %v1384_v6, %v1343_v45  ;;  %v1386_v31 = vrot.slane %v1343_v45, 4 }
 0x7cc   : > { %v6512_v18 = vsel %vm796_vm6, %v3258_v43, %v3209_v5  ;;  %7454 = vst [vmem:[#allocation7_spill] sm:$0xff] %v6526_v62  ;;  %v6529_v5 = vperm.slane %v1339_v47, %v5580_v33  ;;  %v6535_v1 = vsel %vm796_vm6, %v1259_v21, %v7455_v35  ;;  %v3246_v60 = vrot.slane %v6503_v16, 4 }
 0x7cd   : > { %v3160_v26 = vpop.permute.xlu0 %3159  ;;  %7456 = vst [vmem:[#allocation8_spill] sm:$0xff] %v6535_v1  ;;  %v1276_v35 = vrot.slane %v1259_v21, 4 }
 0x7ce   : > { %v3298_v58 = vrot.slane %v3160_v26, 4  ;;  %v3301_v36 = vsel %vm796_vm6, %v3160_v26, %v3300_v24  ;;  %v3157_v43 = vpop.permute.xlu1 %3156  ;;  %v6546_v26 = vsel %vm796_vm6, %v1388_v46, %v6529_v5  ;;  %v6561_v46 = vperm.slane %v6421_v17, %v5568_v13 }
 0x7cf   : > { %v3309_v7 = vperm.slane %v3301_v36, %v5568_v13  ;;  %v3286_v6 = vrot.slane %v3157_v43, 4  ;;  %v3289_v55 = vsel %vm796_vm6, %v3157_v43, %v3288_v22  ;;  %7457 = vst [vmem:[#allocation9_spill] sm:$0xff] %v6546_v26  ;;  %v6553_v22 = vsel %vm796_vm6, %v1276_v35, %v6365_v52 }
 0x7d0   : > { %v3299_v47 = vsel %vm796_vm6, %v3298_v58, %v6414_v53  ;;  %v3297_v24 = vperm.slane %v3289_v55, %v5568_v13  ;;  %7458 = vst [vmem:[#allocation10_spill] sm:$0xff] %v6553_v22  ;;  %v6557_v53 = vsel %vm796_vm6, %v2271_v63, %v6346_v30  ;;  %v2270_v52 = vperm.slane %v6261_v40, %v5580_v33 }
 0x7d1   : > { %v3305_v1 = vperm.slane %v3299_v47, %v5568_v13  ;;  %v3346_v62 = vrot.slane %v3309_v7, 4  ;;  %v3287_v25 = vsel %vm796_vm6, %v3286_v6, %v3151_v57  ;;  %v6568_v57 = vsel %vm796_vm6, %v6454_v34, %v1386_v31 }
 0x7d2   : > { %v3293_v36 = vperm.slane %v3287_v25, %v5568_v13  ;;  %v3348_v56 = vrot.slane %v3297_v24, 4  ;;  %7459 = vst [vmem:[#allocation11_spill] sm:$0xff] %v6568_v57  ;;  %v2371_v30 = vrot.slane %v6424_v9, 4  ;;  %v3247_v63 = vsel %vm796_vm6, %v3246_v60, %v6561_v46 }
 0x7d3   : > { %v3334_v55 = vrot.slane %v3305_v1, 4  ;;  %v6564_v21 = vsel %vm796_vm6, %v3346_v62, %v3297_v24  ;;  %v2235_v34 = vrot.slane %v6192_v61, 4  ;;  %v2354_v40 = vperm.slane %v6316_v3, %v5580_v33 }
 0x7d4   : > { %v3336_v45 = vrot.slane %v3293_v36, 4  ;;  %v6573_v25 = vsel %vm796_vm6, %v3309_v7, %v3348_v56  ;;  %v2322_v56 = vperm.slane %v6349_v51, %v5568_v13  ;;  %v6590_v31 = vperm.slane %v3247_v63, %v5580_v33 }
 0x7d5   : > { %v6577_v17 = vsel %vm796_vm6, %v3334_v55, %v3293_v36  ;;  %v2246_v7 = vperm.slane %v6202_v15, %v5580_v33  ;;  %v2283_v58 = vrot.slane %v2270_v52, 4  ;;  %v2259_v43 = vrot.slane %v6250_v54, 4 }
 0x7d6   : > { %v6582_v62 = vsel %vm796_vm6, %v3305_v1, %v3336_v45  ;;  %v2372_v1 = vsel %vm796_vm6, %v2371_v30, %v2322_v56  ;;  %v2349_v60 = vrot.slane %v6302_v12, 4  ;;  %v6599_v61 = vperm.slane %v6427_v2, %v5580_v33 }
 0x7d7   : > { %v3270_v3 = vrot.slane %v6590_v31, 4  ;;  %v6603_v51 = vsel %vm796_vm6, %v2283_v58, %v2246_v7  ;;  %v1335_v6 = vperm.slane %v6398_v50, %v5568_v13  ;;  %v2378_v15 = vperm.slane %v2372_v1, %v5580_v33 }
 0x7d8   : > { %v2393_v47 = vrot.slane %v2354_v40, 4  ;;  %v2236_v54 = vsel %vm796_vm6, %v2235_v34, %v6173_v29  ;;  %v2373_v24 = vrot.slane %v2322_v56, 4  ;;  %v6616_v2 = vperm.slane %v6272_v19, %v5580_v33  ;;  %v6635_v34 = vpop.permute.xlu2 %3162 }
 0x7d9   : > { %v6612_v12 = vsel %vm796_vm6, %v3270_v3, %v6599_v61  ;;  %v1350_v35 = vrot.slane %v6326_v23, 4  ;;  %v1355_v50 = vperm.slane %v6342_v41, %v5580_v33  ;;  %v1323_v29 = vperm.slane %v6360_v42, %v5568_v13 }
 0x7da   : > { %v6622_v36 = vsel %vm796_vm6, %v2378_v15, %v2393_v47  ;;  %v2242_v45 = vperm.slane %v2236_v54, %v5580_v33  ;;  %v2260_v19 = vsel %vm796_vm6, %v2259_v43, %v6236_v48  ;;  %v1372_v30 = vrot.slane %v1335_v6, 4 }
 0x7db   : > { %v2266_v23 = vperm.slane %v2260_v19, %v5580_v33  ;;  %v2389_v63 = vrot.slane %v6466_v44, 4  ;;  %v2350_v41 = vsel %vm796_vm6, %v6285_v39, %v2349_v60  ;;  %v2391_v42 = vrot.slane %v2378_v15, 4 }
 0x7dc   : > { %v2281_v56 = vrot.slane %v2242_v45, 4  ;;  %v2358_v58 = vperm.slane %v2350_v41, %v5580_v33  ;;  %v2374_v1 = vsel %vm796_vm6, %v6424_v9, %v2373_v24  ;;  %v2285_v44 = vrot.slane %v2246_v7, 4 }
 0x7dd   : > { %v2279_v3 = vrot.slane %v2266_v23, 4  ;;  %v6642_v48 = vsel %vm796_vm6, %v6437_v0, %v2389_v63  ;;  %v2382_v43 = vperm.slane %v2374_v1, %v5580_v33  ;;  %v6649_v39 = vsel %vm796_vm6, %v2391_v42, %v2354_v40  ;;  %v7461_v42 = vld [vmem:[#allocation2_spill] sm:$0xff] }
 0x7de   : > { %v6646_v47 = vsel %vm796_vm6, %v2266_v23, %v2281_v56  ;;  %v2397_v60 = vrot.slane %v2358_v58, 4  ;;  %v1272_v15 = vrot.slane %v6508_v37, 4  ;;  %v6658_v24 = vsel %vm796_vm6, %v2270_v52, %v2285_v44 }
 0x7df   : > { %v6655_v54 = vsel %vm796_vm6, %v2279_v3, %v2242_v45  ;;  %v2395_v0 = vrot.slane %v2382_v43, 4  ;;  %v1247_v37 = vperm.slane %v6213_v27, %v5580_v33  ;;  %v1284_v23 = vrot.slane %v6616_v2, 4 }
 0x7e0   : > { %v6663_v19 = vsel %vm796_vm6, %v2382_v43, %v2397_v60  ;;  %v6667_v40 = vsel %vm796_vm6, %v1272_v15, %v6334_v32  ;;  %v1373_v52 = vsel %vm796_vm6, %v1372_v30, %v1323_v29  ;;  %v1394_v63 = vrot.slane %v1355_v50, 4 }
 0x7e1   : > { %7460 = vst [vmem:[#allocation12_spill] sm:$0xff] %v6667_v40  ;;  %v6672_v45 = vsel %vm796_vm6, %v2395_v0, %v2358_v58  ;;  %v1379_v56 = vperm.slane %v1373_v52, %v5580_v33  ;;  %v1243_v32 = vperm.slane %v6224_v8, %v5580_v33  ;;  %v1267_v1 = vperm.slane %v7461_v42, %v5580_v33  ;;  %v7465_v8 = vld [vmem:[#allocation3_spill] sm:$0xff]  ;;  %v3172_v52 = vpop.permute.xlu2 %3171 }
 0x7e2   : > { %v1374_v27 = vrot.slane %v1323_v29, 4  ;;  %v6684_v58 = vsel %vm796_vm6, %v1284_v23, %v1247_v37  ;;  %v1390_v3 = vrot.slane %v6529_v5, 4  ;;  %v1351_v0 = vsel %vm796_vm6, %v7465_v8, %v1350_v35 }
 0x7e3   : > { %7462 = vst [vmem:[#allocation2_spill] sm:$0xff] %v6684_v58  ;;  %v6688_v30 = vsel %vm796_vm6, %v1379_v56, %v1394_v63  ;;  %v1282_v43 = vrot.slane %v1243_v32, 4  ;;  %v1392_v44 = vrot.slane %v1379_v56, 4  ;;  %v1280_v60 = vrot.slane %v1267_v1, 4 }
 0x7e4   : > { %7463 = vst [vmem:[#allocation13_spill] sm:$0xff] %v6688_v30  ;;  %v6692_v15 = vsel %vm796_vm6, %v6443_v49, %v1390_v3  ;;  %v1359_v63 = vperm.slane %v1351_v0, %v5580_v33  ;;  %v1375_v56 = vsel %vm796_vm6, %v1335_v6, %v1374_v27  ;;  %v1286_v42 = vrot.slane %v1247_v37, 4  ;;  %v3169_v49 = vpop.permute.xlu0 %3168  ;;  %v3166_v3 = vpop.permute.xlu1 %3165 }
 0x7e5   : > { %7464 = vst [vmem:[#allocation14_spill] sm:$0xff] %v6692_v15  ;;  %v6697_v29 = vsel %vm796_vm6, %v1267_v1, %v1282_v43  ;;  %v6700_v23 = vsel %vm796_vm6, %v1392_v44, %v1355_v50  ;;  %v6703_v5 = vsel %vm796_vm6, %v1280_v60, %v1243_v32  ;;  %v1383_v41 = vperm.slane %v1375_v56, %v5580_v33 }
 0x7e6   : > { %7466 = vst [vmem:[#allocation3_spill] sm:$0xff] %v6697_v29  ;;  %v1398_v35 = vrot.slane %v1359_v63, 4  ;;  %v3322_v8 = vrot.slane %v3172_v52, 4  ;;  %v6710_v1 = vsel %vm796_vm6, %v6616_v2, %v1286_v42  ;;  %v3245_v32 = vperm.slane %v6430_v20, %v5580_v33 }
 0x7e7   : > { %7467 = vst [vmem:[#allocation15_spill] sm:$0xff] %v6700_v23  ;;  %v1396_v50 = vrot.slane %v1383_v41, 4  ;;  %v3265_v6 = vperm.slane %v6512_v18, %v5580_v33  ;;  %v3310_v37 = vrot.slane %v3169_v49, 4  ;;  %v3233_v44 = vperm.slane %v6418_v59, %v5580_v33  ;;  %v4917_v23 = vld [vmem:[%s5511_s17 + $0xc] sm:$0xf] }
 0x7e8   : > { %7468 = vst [vmem:[#allocation16_spill] sm:$0xff] %v6703_v5  ;;  %v6713_v43 = vsel %vm796_vm6, %v1383_v41, %v1398_v35  ;;  %v3323_v27 = vsel %vm796_vm6, %v3322_v8, %v3166_v3  ;;  %v3269_v2 = vperm.slane %v6496_v10, %v5580_v33  ;;  %v3241_v41 = vperm.slane %v6446_v38, %v5580_v33 }
 0x7e9   : > { %7469 = vst [vmem:[#allocation17_spill] sm:$0xff] %v6710_v1  ;;  %v6723_v60 = vsel %vm796_vm6, %v1396_v50, %v1359_v63  ;;  %v3312_v20 = vrot.slane %v6635_v34, 4  ;;  %v3248_v0 = vrot.slane %v6561_v46, 4  ;;  %v3329_v18 = vperm.slane %v3323_v27, %v5568_v13 }
 0x7ea   : > { %7470 = vst [vmem:[#allocation18_spill] sm:$0xff] %v6713_v43  ;;  %v3278_v56 = vrot.slane %v3265_v6, 4  ;;  %v3311_v42 = vsel %vm796_vm6, %v3310_v37, %v6635_v34  ;;  %v3272_v59 = vrot.slane %v6599_v61, 4  ;;  %v3284_v63 = vrot.slane %v3245_v32, 4 }
 0x7eb   : > { %7471 = vst [vmem:[#allocation19_spill] sm:$0xff] %v6723_v60  ;;  %v3313_v35 = vsel %vm796_vm6, %v3169_v49, %v3312_v20  ;;  %v3324_v8 = vrot.slane %v3166_v3, 4  ;;  %v3249_v10 = vsel %vm796_vm6, %v6503_v16, %v3248_v0  ;;  %v3276_v38 = vrot.slane %v3233_v44, 4 }
 0x7ec   : > { %v3257_v50 = vperm.slane %v3249_v10, %v5580_v33  ;;  %v6740_v46 = vsel %vm796_vm6, %v3269_v2, %v3284_v63  ;;  %v3282_v27 = vrot.slane %v3269_v2, 4  ;;  %v3280_v7 = vrot.slane %v3241_v41, 4 }
 0x7ed   : > { %v3317_v9 = vperm.slane %v3311_v42, %v5568_v13  ;;  %v3358_v34 = vrot.slane %v3329_v18, 4  ;;  %v6745_v61 = vsel %vm796_vm6, %v6590_v31, %v3272_v59  ;;  %v3321_v2 = vperm.slane %v3313_v35, %v5568_v13 }
 0x7ee   : > { %v6748_v49 = vsel %vm796_vm6, %v3257_v50, %v3276_v38  ;;  %v3274_v3 = vrot.slane %v3257_v50, 4  ;;  %v6751_v16 = vsel %vm796_vm6, %v3282_v27, %v3245_v32  ;;  %v6754_v37 = vsel %vm796_vm6, %v3265_v6, %v3280_v7 }
 0x7ef   : > { %7472 = vst [vmem:[#allocation20_spill] sm:$0xff] %v6754_v37  ;;  %v3325_v20 = vsel %vm796_vm6, %v3172_v52, %v3324_v8  ;;  %v6759_v0 = vsel %vm796_vm6, %v3278_v56, %v3241_v41  ;;  %v3359_v42 = vsel %vm796_vm6, %v3358_v34, %v3317_v9  ;;  %v3372_v59 = vrot.slane %v3321_v2, 4 }
 0x7f0   : > { %v6762_v31 = vsel %vm796_vm6, %v3274_v3, %v3233_v44  ;;  %v3333_v63 = vperm.slane %v3325_v20, %v5568_v13  ;;  %v3360_v32 = vrot.slane %v3317_v9, 4  ;;  %v3365_v10 = vperm.slane %v3359_v42, %v5580_v33 }
 0x7f1   : > { %v3341_v6 = vperm.slane %v6577_v17, %v5580_v33  ;;  %v3353_v52 = vperm.slane %v6564_v21, %v5580_v33  ;;  %v3357_v44 = vperm.slane %v6573_v25, %v5580_v33  ;;  %v3345_v41 = vperm.slane %v6582_v62, %v5580_v33 }
 0x7f2   : > { %v3373_v7 = vsel %vm796_vm6, %v3333_v63, %v3372_v59  ;;  %v3361_v56 = vsel %vm796_vm6, %v3329_v18, %v3360_v32  ;;  %v3370_v35 = vrot.slane %v3333_v63, 4  ;;  %v3382_v9 = vrot.slane %v3365_v10, 4 }
 0x7f3   : > { %v3381_v8 = vperm.slane %v3373_v7, %v5580_v33  ;;  %v3369_v38 = vperm.slane %v3361_v56, %v5580_v33  ;;  %v3384_v50 = vrot.slane %v3341_v6, 4  ;;  %v3392_v27 = vrot.slane %v3353_v52, 4 }
 0x7f4   : > { %v6780_v17 = vsel %vm796_vm6, %v3382_v9, %v3341_v6  ;;  %v3388_v21 = vrot.slane %v3345_v41, 4  ;;  %v3371_v34 = vsel %vm796_vm6, %v3370_v35, %v3321_v2  ;;  %v3396_v25 = vrot.slane %v3357_v44, 4 }
 0x7f5   : > { %v6786_v18 = vsel %vm796_vm6, %v3365_v10, %v3384_v50  ;;  %v3394_v3 = vrot.slane %v3381_v8, 4  ;;  %v3377_v20 = vperm.slane %v3371_v34, %v5580_v33  ;;  %v3386_v2 = vrot.slane %v3369_v38, 4 }
 0x7f6   : > { %v6792_v59 = vsel %vm796_vm6, %v3381_v8, %v3396_v25  ;;  %v6795_v63 = vsel %vm796_vm6, %v3369_v38, %v3388_v21 }
 0x7f7   : > { %7473 = vst [vmem:[#allocation21_spill] sm:$0xff] %v6792_v59  ;;  %v6798_v32 = vsel %vm796_vm6, %v3394_v3, %v3357_v44  ;;  %v6801_v7 = vsel %vm796_vm6, %v3377_v20, %v3392_v27  ;;  %v3390_v35 = vrot.slane %v3377_v20, 4  ;;  %v6810_v9 = vsel %vm796_vm6, %v3386_v2, %v3345_v41 }
 0x7f9   : > { %v6815_v8 = vsel %vm796_vm6, %v3390_v35, %v3353_v52  ;;  %v4918_v35 = vld [vmem:[%s5498_s10 + $0xc] sm:$0xf] }
 0x7fa   : > { %7474 = vst [vmem:[#allocation22_spill] sm:$0xff] %v6815_v8  ;;  %v3406_v55 = vsel %vm389_vm0, %v4918_v35, 0 }
 0x7fb   : > { %3415 = vmatpush.bf16.xpose.msra.mxu2 %v3406_v55 }
 0x802   : > { %4919 = vmatmul.msk.bf16.vlgmr.msra.gmra.mxu2 %vm389_vm0, %v4917_v23 }
 0x822   : > { %v5281_v50 = vpop.trf.xlu2 }
 0x823   : > { %v5285_v25 = vunpack.i.h.bf16 %v5281_v50  ;;  %v5282_v2 = vunpack.i.l.bf16 %v5281_v50 }
 0x825   : > { %v3843_v20 = vrot.slane %v5285_v25, 4 }
 0x829   : > { %v5257_v27 = vpop.trf.xlu0 }
 0x82a   : > { %v6819_v21 = vpop.trf.xlu2  ;;  %v5261_v3 = vunpack.i.h.bf16 %v5257_v27  ;;  %v5258_v41 = vunpack.i.l.bf16 %v5257_v27  ;;  %v3807_v27 = vrot.slane %v5282_v2, 4 }
 0x82b   : > { %v7475_v22 = vunpack.i.h.bf16 %v6819_v21  ;;  %v7476_v55 = vunpack.i.l.bf16 %v6819_v21 }
 0x82c   : > { %v3845_v56 = vrot.slane %v5261_v3, 4  ;;  %v3833_v6 = vrot.slane %v5258_v41, 4  ;;  %v3844_v52 = vsel %vm796_vm6, %v3843_v20, %v5261_v3 }
 0x82e   : > { %v3846_v3 = vsel %vm796_vm6, %v5285_v25, %v3845_v56 }
 0x82f   : > { %v6844_v56 = vperm.slane %v3846_v3, %v5568_v13 }
 0x831   : > { %v6821_v34 = vpop.trf.xlu0 }
 0x839   : > { %v5269_v42 = vpop.trf.xlu0 }
 0x83a   : > { %v5273_v44 = vunpack.i.h.bf16 %v5269_v42  ;;  %v5270_v10 = vunpack.i.l.bf16 %v5269_v42  ;;  %v6834_v42 = vperm.slane %v3844_v52, %v5568_v13 }
 0x83c   : > { %v3831_v60 = vrot.slane %v5270_v10, 4  ;;  %v3834_v29 = vsel %vm796_vm6, %v5270_v10, %v3833_v6  ;;  %v3821_v50 = vrot.slane %v5273_v44, 4  ;;  %v3955_v10 = vrot.slane %v7475_v22, 4 }
 0x83d   : > { %v6830_v15 = vperm.slane %v3834_v29, %v5568_v13  ;;  %v5245_v20 = vpop.trf.xlu1  ;;  %v3919_v6 = vrot.slane %v7476_v55, 4  ;;  %v5266_v29 = vunpack.i.h.bf16 %v6821_v34 }
 0x83e   : > { %v5249_v38 = vunpack.i.h.bf16 %v5245_v20  ;;  %v5246_v35 = vunpack.i.l.bf16 %v5245_v20  ;;  %v3832_v26 = vsel %vm796_vm6, %v3831_v60, %v5258_v41 }
 0x83f   : > { %v3893_v62 = vrot.slane %v6830_v15, 4  ;;  %v6858_v41 = vperm.slane %v3832_v26, %v5568_v13  ;;  %v3957_v30 = vrot.slane %v5266_v29, 4 }
 0x840   : > { %v3819_v25 = vrot.slane %v5249_v38, 4  ;;  %v3808_v52 = vsel %vm796_vm6, %v3807_v27, %v5246_v35  ;;  %v3809_v43 = vrot.slane %v5246_v35, 4  ;;  %v3822_v1 = vsel %vm796_vm6, %v5249_v38, %v3821_v50 }
 0x841   : > { %v6848_v20 = vpop.trf.xlu0  ;;  %v6853_v55 = vperm.slane %v3808_v52, %v5568_v13  ;;  %v3894_v38 = vsel %vm796_vm6, %v6844_v56, %v3893_v62  ;;  %v5263_v50 = vunpack.i.l.bf16 %v6821_v34  ;;  %v3830_v26 = vperm.slane %v3822_v1, %v5568_v13 }
 0x842   : > { %v3820_v5 = vsel %vm796_vm6, %v3819_v25, %v5273_v44  ;;  %v5278_v60 = vunpack.i.h.bf16 %v6848_v20  ;;  %v3810_v27 = vsel %vm796_vm6, %v5282_v2, %v3809_v43  ;;  %v7428_v35 = vunpack.i.l.bf16 %v6848_v20 }
 0x843   : > { %v3818_v3 = vperm.slane %v3810_v27, %v5568_v13  ;;  %v3956_v44 = vsel %vm796_vm6, %v3955_v10, %v5266_v29  ;;  %v3826_v25 = vperm.slane %v3820_v5, %v5568_v13  ;;  %v3857_v52 = vrot.slane %v6853_v55, 4 }
 0x844   : > { %v3933_v43 = vrot.slane %v5278_v60, 4  ;;  %v3943_v62 = vrot.slane %v7428_v35, 4  ;;  %v3902_v34 = vperm.slane %v3894_v38, %v5580_v33  ;;  %v3881_v57 = vrot.slane %v6858_v41, 4 }
 0x845   : > { %v5250_v2 = vpop.trf.xlu1  ;;  %v3869_v27 = vrot.slane %v3818_v3, 4  ;;  %v6877_v5 = vperm.slane %v3956_v44, %v5568_v13  ;;  %v3867_v58 = vrot.slane %v3830_v26, 4  ;;  %v3858_v37 = vsel %vm796_vm6, %v3826_v25, %v3857_v52 }
 0x846   : > { %v5254_v23 = vunpack.i.h.bf16 %v5250_v2  ;;  %v5251_v22 = vunpack.i.l.bf16 %v5250_v2  ;;  %v3944_v10 = vsel %vm796_vm6, %v3943_v62, %v5263_v50  ;;  %v3915_v8 = vrot.slane %v3902_v34, 4 }
 0x847   : > { %v6880_v40 = vperm.slane %v3944_v10, %v5568_v13  ;;  %v3870_v62 = vsel %vm796_vm6, %v3830_v26, %v3869_v27  ;;  %v3882_v10 = vsel %vm796_vm6, %v6834_v42, %v3881_v57  ;;  %v7477_v52 = vunpack.i.l.bf16 %v6819_v21 }
 0x848   : > { %v3931_v1 = vrot.slane %v5254_v23, 4  ;;  %v3920_v35 = vsel %vm796_vm6, %v3919_v6, %v5251_v22  ;;  %v3934_v59 = vsel %vm796_vm6, %v5254_v23, %v3933_v43  ;;  %v3921_v38 = vrot.slane %v5251_v22, 4 }
 0x849   : > { %v6885_v2 = vperm.slane %v3920_v35, %v5568_v13  ;;  %v3878_v44 = vperm.slane %v3870_v62, %v5580_v33  ;;  %v6894_v6 = vperm.slane %v3934_v59, %v5568_v13  ;;  %v3866_v22 = vperm.slane %v3858_v37, %v5580_v33 }
 0x84a   : > { %v3932_v29 = vsel %vm796_vm6, %v3931_v1, %v5278_v60  ;;  %v3890_v35 = vperm.slane %v3882_v10, %v5580_v33  ;;  %v3855_v43 = vrot.slane %v3826_v25, 4  ;;  %v3922_v1 = vsel %vm796_vm6, %v7477_v52, %v3921_v38 }
 0x84b   : > { %v3916_v60 = vsel %vm796_vm6, %v3915_v8, %v3878_v44  ;;  %v3917_v23 = vrot.slane %v3878_v44, 4  ;;  %v3938_v26 = vperm.slane %v3932_v29, %v5568_v13  ;;  %v3969_v27 = vrot.slane %v6885_v2, 4 }
 0x84c   : > { %4052 = vrot.lane.b32.xlu1 %v3916_v60, %s5429_s22  ;;  %v3909_v57 = vrot.slane %v3866_v22, 4  ;;  %v3993_v59 = vrot.slane %v6880_v40, 4  ;;  %v3868_v37 = vsel %vm796_vm6, %v3867_v58, %v3818_v3  ;;  %v3891_v29 = vrot.slane %v6844_v56, 4 }
 0x84d   : > { %v3918_v25 = vsel %vm796_vm6, %v3902_v34, %v3917_v23  ;;  %v3970_v8 = vsel %vm796_vm6, %v3938_v26, %v3969_v27  ;;  %v3874_v62 = vperm.slane %v3868_v37, %v5580_v33  ;;  %v3945_v44 = vrot.slane %v5263_v50, 4 }
 0x84e   : > { %v7478_v10 = vunpack.i.h.bf16 %v6819_v21  ;;  %v3910_v60 = vsel %vm796_vm6, %v3890_v35, %v3909_v57  ;;  %4056 = vrot.lane.b32.xlu2 %v3918_v25, %s5430_s23  ;;  %v3994_v58 = vsel %vm796_vm6, %v6877_v5, %v3993_v59  ;;  %v3930_v3 = vperm.slane %v3922_v1, %v5568_v13 }
 0x84f   : > { %v3979_v34 = vrot.slane %v6894_v6, 4  ;;  %4040 = vrot.lane.b32.xlu0 %v3910_v60, %s7445_s25  ;;  %v4002_v56 = vperm.slane %v3994_v58, %v5580_v33  ;;  %v3907_v50 = vrot.slane %v3890_v35, 4  ;;  %v3978_v21 = vperm.slane %v3970_v8, %v5580_v33 }
 0x850   : > { %v3958_v38 = vsel %vm796_vm6, %v7478_v10, %v3957_v30  ;;  %v3892_v30 = vsel %vm796_vm6, %v3891_v29, %v6830_v15  ;;  %v3856_v23 = vsel %vm796_vm6, %v3855_v43, %v6853_v55  ;;  %v7479_v27 = vrot.slane %v6834_v42, 4 }
 0x851   : > { %v4019_v1 = vrot.slane %v4002_v56, 4  ;;  %v3913_v57 = vrot.slane %v3874_v62, 4  ;;  %v7480_v59 = vunpack.i.l.bf16 %v6848_v20  ;;  %v3862_v35 = vperm.slane %v3856_v23, %v5580_v33 }
 0x852   : > { %v3880_v52 = vsel %vm796_vm6, %v7479_v27, %v6858_v41  ;;  %v3966_v15 = vperm.slane %v3958_v38, %v5568_v13  ;;  %v3908_v8 = vsel %vm796_vm6, %v3907_v50, %v3866_v22  ;;  %v3898_v55 = vperm.slane %v3892_v30, %v5580_v33 }
 0x853   : > { %v3946_v37 = vsel %vm796_vm6, %v7480_v59, %v3945_v44  ;;  %v3886_v25 = vperm.slane %v3880_v52, %v5580_v33  ;;  %v3980_v42 = vsel %vm796_vm6, %v3979_v34, %v3930_v3  ;;  %v4020_v41 = vsel %vm796_vm6, %v4019_v1, %v3978_v21 }
 0x854   : > { %4036 = vrot.lane.b32.xlu1 %v3908_v8, %s7444_s30  ;;  %v3954_v20 = vperm.slane %v3946_v37, %v5568_v13  ;;  %v3914_v29 = vsel %vm796_vm6, %v3898_v55, %v3913_v57  ;;  %v3986_v44 = vperm.slane %v3980_v42, %v5580_v33  ;;  %v3967_v10 = vrot.slane %v3938_v26, 4 }
 0x855   : > { %v3903_v43 = vrot.slane %v3886_v25, 4  ;;  %v4003_v38 = vrot.slane %v3966_v15, 4  ;;  %v3911_v58 = vrot.slane %v3898_v55, 4  ;;  %v3905_v34 = vrot.slane %v3862_v35, 4 }
 0x856   : > { %4048 = vrot.lane.b32.xlu2 %v3914_v29, %s5425_s16  ;;  %v4025_v50 = vrot.slane %v3986_v44, 4  ;;  %v3968_v30 = vsel %vm796_vm6, %v3967_v10, %v6885_v2  ;;  %v3991_v57 = vrot.slane %v6877_v5, 4  ;;  %v4021_v59 = vrot.slane %v3978_v21, 4  ;;  %v7484_v10 = vld [vmem:[#allocation5_spill] sm:$0xff] }
 0x857   : > { %v3904_v22 = vsel %vm796_vm6, %v3903_v43, %v3862_v35  ;;  %4068 = vrot.lane.b32.xlu0 %v4020_v41, %s5435_s9  ;;  %v4004_v60 = vsel %vm796_vm6, %v4003_v38, %v3954_v20  ;;  %v3912_v23 = vsel %vm796_vm6, %v3911_v58, %v3874_v62  ;;  %v3906_v26 = vsel %vm796_vm6, %v3886_v25, %v3905_v34 }
 0x858   : > { %v4010_v27 = vperm.slane %v4004_v60, %v5580_v33  ;;  %v3974_v52 = vperm.slane %v3968_v30, %v5580_v33  ;;  %v3992_v2 = vsel %vm796_vm6, %v3991_v57, %v6880_v40  ;;  %v4022_v37 = vsel %vm796_vm6, %v4002_v56, %v4021_v59 }
 0x859   : > { %v3998_v35 = vperm.slane %v3992_v2, %v5580_v33  ;;  %v4005_v8 = vrot.slane %v3954_v20, 4  ;;  %v3981_v55 = vrot.slane %v3930_v3, 4  ;;  %v7481_v5 = vpack.i.bf16 %v6451_v14, %v6487_v4 }
 0x85a   : > { %v4026_v1 = vsel %vm796_vm6, %v4010_v27, %v4025_v50  ;;  %v4017_v62 = vrot.slane %v3974_v52, 4  ;;  %v4023_v41 = vrot.slane %v4010_v27, 4 }
 0x85b   : > { %v4015_v21 = vrot.slane %v3998_v35, 4  ;;  %v3982_v40 = vsel %vm796_vm6, %v6894_v6, %v3981_v55  ;;  %v4006_v56 = vsel %vm796_vm6, %v3966_v15, %v4005_v8  ;;  %v7482_v15 = vpack.i.bf16 %v6491_v11, %v6474_v28 }
 0x85c   : > { %4044 = vrot.lane.b32.xlu1 %v3912_v23, %s5424_s15  ;;  %v4018_v25 = vsel %vm796_vm6, %v3998_v35, %v4017_v62  ;;  %v4024_v43 = vsel %vm796_vm6, %v4023_v41, %v3986_v44  ;;  %v3990_v3 = vperm.slane %v3982_v40, %v5580_v33  ;;  %v4014_v20 = vperm.slane %v4006_v56, %v5580_v33  ;;  %v7483_v44 = vld [vmem:[#allocation4_spill] sm:$0xff] }
 0x85d   : > { %v4016_v42 = vsel %vm796_vm6, %v4015_v21, %v3974_v52  ;;  %v7485_v38 = vpack.i.bf16 %v7483_v44, %v7484_v10  ;;  %v5413_v44 = vld [vmem:[%s7402_s6] ss:$0 sm:$0xff] }
 0x85e   : > { %4032 = vrot.lane.b32.xlu2 %v3906_v26, %s5427_s19  ;;  %v4027_v14 = vrot.slane %v4014_v20, 4  ;;  %v4029_v4 = vrot.slane %v3990_v3, 4 }
 0x85f   : > { %4080 = vrot.lane.b32.xlu0 %v4026_v1, %s7438_s14 }
 0x860   : > { %v4028_v29 = vsel %vm796_vm6, %v4027_v14, %v3990_v3  ;;  %v4030_v6 = vsel %vm796_vm6, %v4014_v20, %v4029_v4 }
 0x864   : > { %4072 = vrot.lane.b32.xlu1 %v4022_v37, %s5431_s24 }
 0x866   : > { %4064 = vrot.lane.b32.xlu2 %v4018_v25, %s7431_s26  ;;  %v4920_v25 = vld [vmem:[%s7398_s2 + $0x18] sm:$0xff] }
 0x867   : > { %5292 = vrot.lane.b32.xlu0 %v7481_v5, %s5427_s19 }
 0x86c   : > { %4060 = vrot.lane.b32.xlu1 %v4016_v42, %s7434_s12 }
 0x86e   : > { %4076 = vrot.lane.b32.xlu2 %v4024_v43, %s7433_s11 }
 0x874   : > { %4084 = vrot.lane.b32.xlu1 %v4028_v29, %s7432_s29 }
 0x876   : > { %4088 = vrot.lane.b32.xlu2 %v4030_v6, %s7439_s20 }
 0x87c   : > { %5297 = vrot.lane.b32.xlu1 %v7482_v15, %s5427_s19 }
 0x87e   : > { %5302 = vrot.lane.b32.xlu2 %v7485_v38, %s5427_s19 }
 0x885   : > { %v3417_v50 = vpop.f32.mrf.mxu2 }
 0x886   : > { %v3423_v5 = vmul.f32 %v4920_v25, %v3417_v50 }
 0x888   : > { %v3425_v42 = vmul.f32 0.2, %v3423_v5 }
 0x88d   : > { %v3419_v27 = vpop.f32.mrf.mxu2 }
 0x88e   : > { %v7490_v27 = vpack.i.bf16 %v6603_v51, %v6622_v36  ;;  %v7494_v51 = vpack.i.bf16 %v6658_v24, %v6672_v45  ;;  %v7495_v36 = vpack.i.bf16 %v6759_v0, %v6795_v63  ;;  %v7500_v24 = vld [vmem:[#allocation20_spill] sm:$0xff] }
 0x8a8   : > { %v4057_v60 = vpop.permute.xlu2 %4056 }
 0x8b0   : > { %v4049_v34 = vpop.permute.xlu2 %4048 }
 0x8b8   : > { %v4033_v23 = vpop.permute.xlu2 %4032 }
 0x8b9   : > { %v4091_v52 = vsel %vm1080_vm7, %v3904_v22, %v4033_v23 }
 0x8be   : > { %v4053_v58 = vpop.permute.xlu1 %4052 }
 0x8c0   : > { %v4065_v28 = vpop.permute.xlu2 %4064 }
 0x8c1   : > { %v4041_v1 = vpop.permute.xlu0 %4040 }
 0x8c6   : > { %v4037_v30 = vpop.permute.xlu1 %4036 }
 0x8c7   : > { %v4092_v57 = vsel %vm494_vm3, %v4091_v52, %v4037_v30 }
 0x8c8   : > { %v4093_v11 = vsel %vm389_vm0, %v4092_v57, %v4041_v1  ;;  %v4077_v8 = vpop.permute.xlu2 %4076  ;;  %v7504_v57 = vld [vmem:[#allocation12_spill] sm:$0xff] }
 0x8c9   : > { %v4069_v37 = vpop.permute.xlu0 %4068 }
 0x8ce   : > { %v4045_v26 = vpop.permute.xlu1 %4044 }
 0x8cf   : > { %v4094_v59 = vsel %vm1084_vm8, %v4093_v11, %v4045_v26  ;;  %vm7488_vm8 = vcmask 719872   ;;  %v7491_v26 = vpack.i.bf16 %v6646_v47, %v6649_v39  ;;  %v7497_v47 = vpack.i.bf16 %v6762_v31, %v6786_v18 }
 0x8d0   : > { %v4095_v62 = vsel %vm1086_vm9, %v4094_v59, %v4049_v34  ;;  %vm3424_vm9 = vcmp.ge.f32.partialorder %v3423_v5, 0.0  ;;  %v4089_v29 = vpop.permute.xlu2 %4088  ;;  %v7498_v39 = vpack.i.bf16 %v6740_v46, %v6798_v32 }
 0x8d1   : > { %v4096_v35 = vsel %vm7486_vm4, %v4095_v62, %v4053_v58  ;;  %v4081_v3 = vpop.permute.xlu0 %4080  ;;  %v3426_v20 = vsel %vm3424_vm9, %v3423_v5, %v3425_v42  ;;  %v7506_v5 = vld [vmem:[#allocation13_spill] sm:$0xff] }
 0x8d2   : > { %v4097_v55 = vsel %vm7487_vm15, %v4096_v35, %v4057_v60  ;;  %v3427_v10 = vmul.f32 %v5413_v44, %v3426_v20 }
 0x8d4   : > { %v4107_v58 = vpack.c.bf16 %v3427_v10, %v3427_v10 }
 0x8d6   : > { %v4073_v2 = vpop.permute.xlu1 %4072 }
 0x8d9   : > { %v7103_v18 = vpop.permute.xlu0 %5292 }
 0x8de   : > { %v4061_v22 = vpop.permute.xlu1 %4060 }
 0x8df   : > { %v4098_v21 = vsel %vm1092_vm12, %v4097_v55, %v4061_v22  ;;  %vm7489_vm12 = vcmask 1043456   ;;  %v7505_v22 = vld [vmem:[#allocation2_spill] sm:$0xff] }
 0x8e0   : > { %v4099_v40 = vsel %vm1094_vm13, %v4098_v21, %v4065_v28 }
 0x8e1   : > { %v4100_v56 = vsel %vm1096_vm14, %v4099_v40, %v4069_v37 }
 0x8e2   : > { %v4101_v41 = vsel %vm7488_vm8, %v4100_v56, %v4073_v2 }
 0x8e3   : > { %v4102_v43 = vsel %vm1100_vm1, %v4101_v41, %v4077_v8 }
 0x8e4   : > { %v4103_v4 = vsel %vm1102_vm2, %v4102_v43, %v4081_v3 }
 0x8e6   : > { %v4085_v14 = vpop.permute.xlu1 %4084 }
 0x8e7   : > { %v4104_v6 = vsel %vm1104_vm5, %v4103_v4, %v4085_v14 }
 0x8e8   : > { %v4105_v15 = vsel %vm1106_vm11, %v4104_v6, %v4089_v29 }
 0x8e9   : > { %v4106_v38 = vpack.c.bf16 %v4105_v15, %v4105_v15 }
 0x8eb   : > { %v4112_v60 = vsel %vm7489_vm12, %v4106_v38, 0 }
 0x8ec   : > { %4121 = vmatpush.bf16.msrb.mxu2 %v4112_v60 }
 0x8ef   : > { %4964 = vmatmul.msk.bf16.vlgmr.msrb.gmra.mxu2 %vm1080_vm7, %v4107_v58 }
 0x972   : > { %v7015_v34 = vpop.f32.mrf.mxu2 }
 0x973   : > { %4134 = vrot.lane.b32.xlu2 %v7015_v34, %s7438_s14  ;;  %4131 = vrot.lane.b32.xlu1 %v7015_v34, %s7432_s29  ;;  %v5321_v30 = vpack.i.bf16 %v6557_v53, %v7015_v34  ;;  %v5311_v23 = vpack.i.bf16 %v6612_v12, %v7015_v34  ;;  %v7492_v53 = vpack.i.bf16 %v6655_v54, %v6642_v48  ;;  %v4175_v41 = vrot.slane %v7015_v34, 4 }
 0x974   : > { %4128 = vrot.lane.b32.xlu0 %v7015_v34, %s7439_s20  ;;  %v7493_v12 = vpack.i.bf16 %v6745_v61, %v6780_v17  ;;  %v7496_v48 = vpack.i.bf16 %v6748_v49, %v6810_v9  ;;  %v7499_v54 = vpack.i.bf16 %v6751_v16, %v6801_v7  ;;  %v7503_v61 = vld [vmem:[#allocation21_spill] sm:$0xff]  ;;  %v7097_v49 = vpop.permute.xlu2 %5302  ;;  %v7099_v17 = vpop.permute.xlu1 %5297 }
 0x97a   : > { %v4125_v50 = vpop.f32.mrf.mxu2 }
 0x97b   : > { %4143 = vrot.lane.b32.xlu2 %v7015_v34, %s5435_s9  ;;  %4140 = vrot.lane.b32.xlu1 %v7015_v34, %s5431_s24 }
 0x97c   : > { %4137 = vrot.lane.b32.xlu0 %v7015_v34, %s7433_s11 }
 0x983   : > { %4152 = vrot.lane.b32.xlu2 %v7015_v34, %s5430_s23  ;;  %4149 = vrot.lane.b32.xlu1 %v7015_v34, %s7434_s12 }
 0x984   : > { %4146 = vrot.lane.b32.xlu0 %v7015_v34, %s7431_s26 }
 0x98b   : > { %4161 = vrot.lane.b32.xlu2 %v7015_v34, %s5424_s15  ;;  %4158 = vrot.lane.b32.xlu1 %v7015_v34, %s5425_s16  ;;  %s4972_s15 = sshll.u32 %s7521_s28, 6 }
 0x98c   : > { %4155 = vrot.lane.b32.xlu0 %v7015_v34, %s5429_s22  ;;  %s7277_s22 = scalar_lea.vmem %s7404_s8, %s4972_s15 }
 0x993   : > { %5322 = vrot.lane.b32.xlu2 %v5321_v30, %s5427_s19  ;;  %5312 = vrot.lane.b32.xlu1 %v5311_v23, %s7444_s30 }
 0x994   : > { %4164 = vrot.lane.b32.xlu0 %v7015_v34, %s7445_s25 }
 0x99b   : > { %5327 = vrot.lane.b32.xlu2 %v7490_v27, %s5427_s19  ;;  %5317 = vrot.lane.b32.xlu1 %v7491_v26, %s5427_s19 }
 0x99c   : > { %5307 = vrot.lane.b32.xlu0 %v7492_v53, %s5427_s19 }
 0x9a3   : > { %5337 = vrot.lane.b32.xlu2 %v7493_v12, %s7444_s30  ;;  %4443 = vrot.lane.b32.xlu1 %v6663_v19, %s5427_s19  ;;  %v7501_v19 = vld [vmem:[#allocation22_spill] sm:$0xff] }
 0x9a4   : > { %5332 = vrot.lane.b32.xlu0 %v7494_v51, %s5427_s19  ;;  %v7502_v45 = vpack.i.bf16 %v7500_v24, %v7501_v19 }
 0x9ab   : > { %5352 = vrot.lane.b32.xlu2 %v7495_v36, %s7444_s30  ;;  %5347 = vrot.lane.b32.xlu1 %v7496_v48, %s7444_s30 }
 0x9ac   : > { %5342 = vrot.lane.b32.xlu0 %v7497_v47, %s7444_s30 }
 0x9b3   : > { %5367 = vrot.lane.b32.xlu2 %v7498_v39, %s7444_s30  ;;  %5362 = vrot.lane.b32.xlu1 %v7499_v54, %s7444_s30 }
 0x9b4   : > { %5357 = vrot.lane.b32.xlu0 %v7502_v45, %s7444_s30 }
 0x9bc   : > { %4507 = vrot.lane.b32.xlu0 %v7503_v61, %s7444_s30 }
 0x9cd   : > { %v4135_v0 = vpop.permute.xlu2 %4134 }
 0x9ce   : > { %v4185_v11 = vrot.slane %v4135_v0, 4 }
 0x9d5   : > { %v4144_v31 = vpop.permute.xlu2 %4143 }
 0x9d6   : > { %v4197_v20 = vrot.slane %v4144_v31, 4 }
 0x9dd   : > { %v7101_v46 = vpop.permute.xlu2 %4152 }
 0x9de   : > { %v4299_v39 = vrot.slane %v7101_v46, 4 }
 0x9e5   : > { %v7105_v16 = vpop.permute.xlu2 %4161  ;;  %v4132_v63 = vpop.permute.xlu1 %4131 }
 0x9e6   : > { %v4129_v32 = vpop.permute.xlu0 %4128  ;;  %v4173_v62 = vrot.slane %v4132_v63, 4  ;;  %v4176_v3 = vsel %vm796_vm6, %v4132_v63, %v4175_v41  ;;  %v4311_v54 = vrot.slane %v7105_v16, 4 }
 0x9e7   : > { %v4186_v8 = vsel %vm796_vm6, %v4185_v11, %v4129_v32  ;;  %v4187_v40 = vrot.slane %v4129_v32, 4  ;;  %v7134_v60 = vperm.slane %v4176_v3, %v5568_v13 }
 0x9e8   : > { %v4174_v42 = vsel %vm796_vm6, %v4173_v62, %v7015_v34  ;;  %v4192_v43 = vperm.slane %v4186_v8, %v5568_v13 }
 0x9e9   : > { %v4180_v14 = vperm.slane %v4174_v42, %v5568_v13  ;;  %v4188_v4 = vsel %vm796_vm6, %v4135_v0, %v4187_v40  ;;  %v4235_v24 = vrot.slane %v7134_v60, 4 }
 0x9ea   : > { %v4221_v15 = vrot.slane %v4192_v43, 4  ;;  %v7138_v30 = vperm.slane %v4188_v4, %v5568_v13 }
 0x9eb   : > { %v4223_v26 = vrot.slane %v4180_v14, 4 }
 0x9ec   : > { %v4222_v36 = vsel %vm796_vm6, %v4221_v15, %v4180_v14  ;;  %v4233_v45 = vrot.slane %v7138_v30, 4 }
 0x9ed   : > { %v7107_v7 = vpop.permute.xlu2 %5322  ;;  %v4141_v9 = vpop.permute.xlu1 %4140  ;;  %v7160_v32 = vperm.slane %v4222_v36, %v5580_v33 }
 0x9ee   : > { %v5325_v52 = vunpack.i.h.bf16 %v7107_v7  ;;  %v4138_v1 = vpop.permute.xlu0 %4137  ;;  %v4211_v58 = vrot.slane %v4141_v9, 4  ;;  %v5324_v53 = vunpack.i.l.bf16 %v7107_v7 }
 0x9ef   : > { %v4199_v44 = vrot.slane %v4138_v1, 4  ;;  %v4198_v34 = vsel %vm796_vm6, %v4197_v20, %v4138_v1 }
 0x9f0   : > { %v7112_v28 = vsel %vm1080_vm7, %v7504_v57, %v5325_v52  ;;  %v4204_v47 = vperm.slane %v4198_v34, %v5568_v13 }
 0x9f1   : > { %v4200_v48 = vsel %vm796_vm6, %v4144_v31, %v4199_v44  ;;  %v4224_v31 = vsel %vm796_vm6, %v4192_v43, %v4223_v26 }
 0x9f2   : > { %v7163_v7 = vperm.slane %v4200_v48, %v5568_v13  ;;  %v4247_v52 = vrot.slane %v4204_v47, 4  ;;  %v4232_v34 = vperm.slane %v4224_v31, %v5580_v33 }
 0x9f5   : > { %v5328_v59 = vpop.permute.xlu2 %5327  ;;  %v7114_v2 = vpop.permute.xlu1 %4149 }
 0x9f6   : > { %v5330_v37 = vunpack.i.h.bf16 %v5328_v59  ;;  %v5329_v35 = vunpack.i.l.bf16 %v5328_v59  ;;  %v4147_v25 = vpop.permute.xlu0 %4146  ;;  %v4287_v1 = vrot.slane %v7114_v2, 4 }
 0x9f7   : > { %v4209_v56 = vrot.slane %v4147_v25, 4  ;;  %v4212_v12 = vsel %vm796_vm6, %v4147_v25, %v4211_v58 }
 0x9f8   : > { %v7119_v55 = vsel %vm1080_vm7, %v7505_v22, %v5330_v37  ;;  %v7123_v21 = vsel %vm1080_vm7, %v7506_v5, %v5329_v35  ;;  %v7156_v61 = vperm.slane %v4212_v12, %v5568_v13  ;;  %v4271_v12 = vrot.slane %v7160_v32, 4 }
 0x9f9   : > { %v4210_v29 = vsel %vm796_vm6, %v4209_v56, %v4141_v9 }
 0x9fa   : > { %v4216_v23 = vperm.slane %v4210_v29, %v5568_v13  ;;  %v4257_v22 = vrot.slane %v7156_v61, 4 }
 0x9fc   : > { %v4245_v0 = vrot.slane %v4216_v23, 4  ;;  %v4248_v43 = vsel %vm796_vm6, %v4216_v23, %v4247_v52 }
 0x9fd   : > { %v4159_v6 = vpop.permute.xlu1 %4158  ;;  %v4256_v23 = vperm.slane %v4248_v43, %v5580_v33 }
 0x9fe   : > { %v4297_v10 = vrot.slane %v4159_v6, 4  ;;  %v4156_v38 = vpop.permute.xlu0 %4155  ;;  %v4300_v57 = vsel %vm796_vm6, %v4159_v6, %v4299_v39  ;;  %v4246_v8 = vsel %vm796_vm6, %v4245_v0, %v4204_v47 }
 0x9ff   : > { %v4285_v50 = vrot.slane %v4156_v38, 4  ;;  %v4308_v3 = vperm.slane %v4300_v57, %v5568_v13  ;;  %v4288_v20 = vsel %vm796_vm6, %v4156_v38, %v4287_v1  ;;  %v4252_v6 = vperm.slane %v4246_v8, %v5580_v33 }
 0xa00   : > { %v4298_v27 = vsel %vm796_vm6, %v4297_v10, %v7101_v46  ;;  %v4321_v46 = vrot.slane %v5324_v53, 4  ;;  %v4258_v38 = vsel %vm796_vm6, %v4257_v22, %v7163_v7 }
 0xa01   : > { %v4304_v51 = vperm.slane %v4298_v27, %v5568_v13  ;;  %v4286_v19 = vsel %vm796_vm6, %v4285_v50, %v7114_v2  ;;  %v4296_v50 = vperm.slane %v4288_v20, %v5568_v13  ;;  %v4345_v27 = vrot.slane %v4308_v3, 4 }
 0xa02   : > { %v4292_v11 = vperm.slane %v4286_v19, %v5568_v13  ;;  %v4264_v39 = vperm.slane %v4258_v38, %v5580_v33 }
 0xa03   : > { %v4333_v63 = vrot.slane %v4304_v51, 4  ;;  %v4347_v52 = vrot.slane %v4296_v50, 4 }
 0xa04   : > { %v4335_v4 = vrot.slane %v4292_v11, 4 }
 0xa05   : > { %v5313_v9 = vpop.permute.xlu1 %5312  ;;  %v4334_v5 = vsel %vm796_vm6, %v4333_v63, %v4292_v11  ;;  %v4272_v63 = vsel %vm796_vm6, %v4252_v6, %v4271_v12 }
 0xa06   : > { %v4165_v59 = vpop.permute.xlu0 %4164  ;;  %v5315_v62 = vunpack.i.h.bf16 %v5313_v9  ;;  %v5314_v37 = vunpack.i.l.bf16 %v5313_v9  ;;  %v4340_v29 = vperm.slane %v4334_v5, %v5580_v33  ;;  %v4336_v19 = vsel %vm796_vm6, %v4304_v51, %v4335_v4 }
 0xa07   : > { %v4322_v35 = vsel %vm796_vm6, %v4321_v46, %v4165_v59  ;;  %v4323_v25 = vrot.slane %v4165_v59, 4  ;;  %v4273_v46 = vrot.slane %v4256_v23, 4  ;;  %v4346_v9 = vsel %vm796_vm6, %v4345_v27, %v4296_v50 }
 0xa08   : > { %v4328_v40 = vperm.slane %v4322_v35, %v5568_v13  ;;  %v7175_v2 = vsel %vm494_vm3, %v7112_v28, %v5315_v62  ;;  %v4309_v56 = vrot.slane %v5314_v37, 4  ;;  %v4312_v42 = vsel %vm796_vm6, %v5314_v37, %v4311_v54 }
 0xa09   : > { %v4324_v41 = vsel %vm796_vm6, %v5324_v53, %v4323_v25  ;;  %v4320_v44 = vperm.slane %v4312_v42, %v5568_v13  ;;  %v4383_v47 = vrot.slane %v4340_v29, 4  ;;  %v4344_v59 = vperm.slane %v4336_v19, %v5580_v33 }
 0xa0a   : > { %v4332_v14 = vperm.slane %v4324_v41, %v5568_v13  ;;  %v4310_v28 = vsel %vm796_vm6, %v4309_v56, %v7105_v16  ;;  %v4357_v10 = vrot.slane %v4328_v40, 4  ;;  %v4234_v51 = vsel %vm796_vm6, %v4233_v45, %v7134_v60 }
 0xa0b   : > { %v4316_v15 = vperm.slane %v4310_v28, %v5568_v13  ;;  %v4269_v13 = vrot.slane %v4252_v6, 4  ;;  %v4371_v11 = vrot.slane %v4320_v44, 4  ;;  %v4277_v35 = vrot.slane %v4264_v39, 4 }
 0xa0c   : > { %v4369_v58 = vrot.slane %v4332_v14, 4  ;;  %v4352_v22 = vperm.slane %v4346_v9, %v5580_v33  ;;  %v4348_v42 = vsel %vm796_vm6, %v4308_v3, %v4347_v52  ;;  %v4259_v45 = vrot.slane %v7163_v7, 4 }
 0xa0d   : > { %v4359_v26 = vrot.slane %v4316_v15, 4  ;;  %v4358_v16 = vsel %vm796_vm6, %v4357_v10, %v4316_v15  ;;  %v4270_v25 = vsel %vm796_vm6, %v4269_v13, %v7160_v32  ;;  %v4372_v43 = vsel %vm796_vm6, %v4332_v14, %v4371_v11 }
 0xa0e   : > { %v4370_v53 = vsel %vm796_vm6, %v4369_v58, %v4320_v44  ;;  %v4364_v36 = vperm.slane %v4358_v16, %v5580_v33  ;;  %v4240_v32 = vperm.slane %v4234_v51, %v5580_v33  ;;  %v4236_v4 = vsel %vm796_vm6, %v7138_v30, %v4235_v24 }
 0xa0f   : > { %v4376_v48 = vperm.slane %v4370_v53, %v5580_v33  ;;  %v4360_v54 = vsel %vm796_vm6, %v4328_v40, %v4359_v26  ;;  %v4274_v40 = vsel %vm796_vm6, %v4273_v46, %v4232_v34  ;;  %v4260_v3 = vsel %vm796_vm6, %v7156_v61, %v4259_v45 }
 0xa10   : > { %v4368_v0 = vperm.slane %v4360_v54, %v5580_v33  ;;  %v4384_v31 = vsel %vm796_vm6, %v4364_v36, %v4383_v47  ;;  %v4381_v57 = vrot.slane %v4364_v36, 4  ;;  %v4356_v7 = vperm.slane %v4348_v42, %v5580_v33  ;;  %v7251_v54 = vpop.permute.xlu0 %5307 }
 0xa11   : > { %v5376_v1 = vpack.i.bf16 %v4384_v31, %v4272_v63  ;;  %v4389_v37 = vrot.slane %v4376_v48, 4  ;;  %v4278_v14 = vsel %vm796_vm6, %v4277_v35, %v4240_v32  ;;  %v4391_v28 = vrot.slane %v4352_v22, 4 }
 0xa12   : > { %v4385_v62 = vrot.slane %v4368_v0, 4  ;;  %v4382_v8 = vsel %vm796_vm6, %v4381_v57, %v4340_v29  ;;  %v4387_v29 = vrot.slane %v4344_v59, 4  ;;  %v4275_v6 = vrot.slane %v4232_v34, 4 }
 0xa13   : > { %5377 = vrot.lane.b32.xlu2 %v5376_v1, %s7445_s25  ;;  %v5371_v5 = vpack.i.bf16 %v4382_v8, %v4270_v25  ;;  %v4390_v20 = vsel %vm796_vm6, %v4389_v37, %v4352_v22  ;;  %v4380_v15 = vperm.slane %v4372_v43, %v5580_v33  ;;  %v4244_v10 = vperm.slane %v4236_v4, %v5580_v33  ;;  %v7508_v37 = vld [vmem:[#allocation11_spill] sm:$0xff] }
 0xa14   : > { %v4386_v56 = vsel %vm796_vm6, %v4385_v62, %v4344_v59  ;;  %v5391_v44 = vpack.i.bf16 %v4390_v20, %v4278_v14  ;;  %v4388_v60 = vsel %vm796_vm6, %v4368_v0, %v4387_v29  ;;  %v4279_v30 = vrot.slane %v4240_v32, 4  ;;  %v7257_v0 = vpop.permute.xlu1 %5317  ;;  %v7507_v59 = vld [vmem:[#allocation6_spill] sm:$0xff]  ;;  %v7509_v20 = vld [vmem:[#allocation16_spill] sm:$0xff] }
 0xa15   : > { %v5381_v41 = vpack.i.bf16 %v4386_v56, %v4274_v40  ;;  %5372 = vrot.lane.b32.xlu1 %v5371_v5, %s7445_s25  ;;  %v4392_v24 = vsel %vm796_vm6, %v4376_v48, %v4391_v28  ;;  %v4268_v58 = vperm.slane %v4260_v3, %v5580_v33  ;;  %v4276_v61 = vsel %vm796_vm6, %v4256_v23, %v4275_v6 }
 0xa16   : > { %v4395_v38 = vrot.slane %v4356_v7, 4  ;;  %v5386_v50 = vpack.i.bf16 %v4388_v60, %v4276_v61  ;;  %v4280_v34 = vsel %vm796_vm6, %v4264_v39, %v4279_v30  ;;  %v4393_v26 = vrot.slane %v4380_v15, 4  ;;  %v7249_v39 = vpop.permute.xlu2 %5337 }
 0xa17   : > { %5382 = vrot.lane.b32.xlu0 %v5381_v41, %s7445_s25  ;;  %v5396_v27 = vpack.i.bf16 %v4392_v24, %v4280_v34  ;;  %v4283_v16 = vrot.slane %v4244_v10, 4  ;;  %v4281_v12 = vrot.slane %v4268_v58, 4  ;;  %v5295_v46 = vunpack.i.h.bf16 %v7103_v18 }
 0xa18   : > { %v4396_v53 = vsel %vm796_vm6, %v4380_v15, %v4395_v38  ;;  %v4394_v48 = vsel %vm796_vm6, %v4393_v26, %v4356_v7  ;;  %v7255_v19 = vpop.permute.xlu0 %5332  ;;  %v5299_v9 = vunpack.i.l.bf16 %v7099_v17  ;;  %v5340_v52 = vunpack.i.h.bf16 %v7249_v39  ;;  %v7510_v7 = vld [vmem:[#allocation15_spill] sm:$0xff]  ;;  %v7511_v38 = vld [vmem:[#allocation17_spill] sm:$0xff] }
 0xa19   : > { %v4284_v33 = vsel %vm796_vm6, %v4268_v58, %v4283_v16  ;;  %v4282_v23 = vsel %vm796_vm6, %v4281_v12, %v4244_v10  ;;  %v4591_v62 = vsel %vm1080_vm7, %v7507_v59, %v5295_v46  ;;  %v5310_v5 = vunpack.i.h.bf16 %v7251_v54  ;;  %v7512_v16 = vld [vmem:[#allocation18_spill] sm:$0xff] }
 0xa1a   : > { %v5406_v36 = vpack.i.bf16 %v4396_v53, %v4284_v33  ;;  %v5401_v47 = vpack.i.bf16 %v4394_v48, %v4282_v23  ;;  %v4592_v51 = vsel %vm1080_vm7, %v7508_v37, %v5299_v9  ;;  %v4607_v8 = vsel %vm494_vm3, %v4591_v62, %v5340_v52 }
 0xa1b   : > { %5392 = vrot.lane.b32.xlu2 %v5391_v44, %s7445_s25  ;;  %vm4653_vm6 = vcmask 257024   ;;  %v5319_v43 = vunpack.i.l.bf16 %v7257_v0  ;;  %v4597_v4 = vsel %vm1080_vm7, %v7509_v20, %v5310_v5  ;;  %v5335_v10 = vunpack.i.h.bf16 %v7255_v19 }
 0xa1c   : > { %v4444_v57 = vpop.permute.xlu1 %4443  ;;  %v5339_v59 = vunpack.i.l.bf16 %v7249_v39 }
 0xa1d   : > { %5387 = vrot.lane.b32.xlu1 %v5386_v50, %s7445_s25  ;;  %v4598_v14 = vsel %vm1080_vm7, %v7510_v7, %v5319_v43  ;;  %v4603_v50 = vsel %vm1080_vm7, %v7511_v38, %v5335_v10  ;;  %v4604_v53 = vsel %vm1080_vm7, %v7512_v16, %v4444_v57  ;;  %v5294_v57 = vunpack.i.l.bf16 %v7103_v18 }
 0xa1e   : > { %v7253_v13 = vpop.permute.xlu2 %5352 }
 0xa1f   : > { %5397 = vrot.lane.b32.xlu0 %v5396_v27, %s7445_s25  ;;  %v5355_v29 = vunpack.i.h.bf16 %v7253_v13 }
 0xa20   : > { %v7261_v31 = vpop.permute.xlu0 %5342 }
 0xa21   : > { %v5344_v1 = vunpack.i.l.bf16 %v7261_v31  ;;  %v4613_v60 = vsel %vm494_vm3, %v4597_v4, %v5355_v29  ;;  %v5345_v37 = vunpack.i.h.bf16 %v7261_v31  ;;  %v5309_v31 = vunpack.i.l.bf16 %v7251_v54 }
 0xa22   : > { %v5320_v54 = vunpack.i.h.bf16 %v7257_v0  ;;  %v5354_v0 = vunpack.i.l.bf16 %v7253_v13 }
 0xa23   : > { %5407 = vrot.lane.b32.xlu2 %v5406_v36, %s7445_s25  ;;  %v4608_v22 = vsel %vm494_vm3, %v4592_v51, %v5344_v1  ;;  %v5304_v1 = vunpack.i.l.bf16 %v7097_v49  ;;  %v5305_v51 = vunpack.i.h.bf16 %v7097_v49 }
 0xa24   : > { %v7295_v28 = vpop.permute.xlu1 %5347 }
 0xa25   : > { %5402 = vrot.lane.b32.xlu1 %v5401_v47, %s7445_s25  ;;  %v5349_v62 = vunpack.i.l.bf16 %v7295_v28 }
 0xa26   : > { %v7259_v63 = vpop.permute.xlu2 %5367 }
 0xa27   : > { %v5370_v27 = vunpack.i.h.bf16 %v7259_v63 }
 0xa28   : > { %v7280_v40 = vpop.permute.xlu0 %5357 }
 0xa29   : > { %v5359_v32 = vunpack.i.l.bf16 %v7280_v40  ;;  %v4619_v48 = vsel %vm494_vm3, %v4603_v50, %v5370_v27  ;;  %v5334_v50 = vunpack.i.l.bf16 %v7255_v19 }
 0xa2b   : > { %v4614_v44 = vsel %vm494_vm3, %v4598_v14, %v5359_v32 }
 0xa2c   : > { %v7313_v23 = vpop.permute.xlu1 %5362 }
 0xa30   : > { %v4508_v34 = vpop.permute.xlu0 %4507 }
 0xa31   : > { %v4620_v36 = vsel %vm494_vm3, %v4604_v53, %v4508_v34 }
 0xa6d   : > { %v5378_v11 = vpop.permute.xlu2 %5377 }
 0xa6e   : > { %v5380_v35 = vunpack.i.h.bf16 %v5378_v11  ;;  %v5379_v25 = vunpack.i.l.bf16 %v5378_v11  ;;  %v5300_v11 = vunpack.i.h.bf16 %v7099_v17 }
 0xa70   : > { %v4623_v56 = vsel %vm389_vm0, %v4607_v8, %v5379_v25  ;;  %v4624_v42 = vsel %vm389_vm0, %v4608_v22, %v5380_v35  ;;  %v7513_v35 = vld [vmem:[#allocation9_spill] sm:$0xff]  ;;  %v7514_v22 = vld [vmem:[#allocation7_spill] sm:$0xff] }
 0xa71   : > { %v4639_v41 = vpack.c.bf16 %v4623_v56, %v4623_v56  ;;  %v4640_v45 = vpack.c.bf16 %v4624_v42, %v4624_v42  ;;  %v4594_v25 = vsel %vm1080_vm7, %v7513_v35, %v5304_v1  ;;  %v4590_v5 = vsel %vm1080_vm7, %v7514_v22, %v5294_v57  ;;  %v7515_v56 = vld [vmem:[#allocation10_spill] sm:$0xff] }
 0xa72   : > { %v4593_v18 = vsel %vm1080_vm7, %v7515_v56, %v5300_v11  ;;  %v4606_v39 = vsel %vm494_vm3, %v4590_v5, %v5339_v59  ;;  %v4610_v43 = vsel %vm494_vm3, %v4594_v25, %v5349_v62  ;;  %v5365_v57 = vunpack.i.h.bf16 %v7313_v23 }
 0xa73   : > { %4656 = vst.msk [vmem:[%s7277_s22 + $0x8] sm:$0xf] %vm4653_vm6, %v4639_v41  ;;  %v4609_v32 = vsel %vm494_vm3, %v4593_v18, %v5345_v37  ;;  %v5369_v59 = vunpack.i.l.bf16 %v7259_v63 }
 0xa74   : > { %4657 = vst.msk [vmem:[%s7277_s22 + $0xc] sm:$0xf] %vm4653_vm6, %v4640_v45 }
 0xa75   : > { %v5393_v3 = vpop.permute.xlu2 %5392 }
 0xa76   : > { %v5395_v6 = vunpack.i.h.bf16 %v5393_v3  ;;  %v5394_v15 = vunpack.i.l.bf16 %v5393_v3 }
 0xa78   : > { %v4630_v30 = vsel %vm389_vm0, %v4614_v44, %v5395_v6  ;;  %v4629_v24 = vsel %vm389_vm0, %v4613_v60, %v5394_v15  ;;  %v5350_v44 = vunpack.i.h.bf16 %v7295_v28  ;;  %v7516_v60 = vld [vmem:[#allocation14_spill] sm:$0xff]  ;;  %v7518_v28 = vld [vmem:[#allocation3_spill] sm:$0xff] }
 0xa79   : > { %v4646_v58 = vpack.c.bf16 %v4630_v30, %v4630_v30  ;;  %v4645_v61 = vpack.c.bf16 %v4629_v24, %v4629_v24  ;;  %v4596_v10 = vsel %vm1080_vm7, %v7516_v60, %v5309_v31  ;;  %v5360_v30 = vunpack.i.h.bf16 %v7280_v40  ;;  %v7517_v24 = vld [vmem:[#allocation8_spill] sm:$0xff] }
 0xa7a   : > { %v4599_v38 = vsel %vm1080_vm7, %v7518_v28, %v5320_v54  ;;  %v4612_v16 = vsel %vm494_vm3, %v4596_v10, %v5354_v0 }
 0xa7b   : > { %4663 = vst.msk [vmem:[%s7277_s22 + $0x24] sm:$0xf] %vm4653_vm6, %v4646_v58  ;;  %v4595_v58 = vsel %vm1080_vm7, %v7517_v24, %v5305_v51 }
 0xa7c   : > { %4662 = vst.msk [vmem:[%s7277_s22 + $0x20] sm:$0xf] %vm4653_vm6, %v4645_v61 }
 0xa7d   : > { %v5408_v26 = vpop.permute.xlu2 %5407 }
 0xa7e   : > { %v5410_v12 = vunpack.i.h.bf16 %v5408_v26  ;;  %v5409_v33 = vunpack.i.l.bf16 %v5408_v26  ;;  %v4611_v26 = vsel %vm494_vm3, %v4595_v58, %v5350_v44 }
 0xa80   : > { %v4636_v47 = vsel %vm389_vm0, %v4620_v36, %v5410_v12  ;;  %v4635_v46 = vsel %vm389_vm0, %v4619_v48, %v5409_v33  ;;  %v4615_v33 = vsel %vm494_vm3, %v4599_v38, %v5360_v30 }
 0xa81   : > { %v4652_v9 = vpack.c.bf16 %v4636_v47, %v4636_v47  ;;  %v4651_v52 = vpack.c.bf16 %v4635_v46, %v4635_v46 }
 0xa83   : > { %4669 = vst.msk [vmem:[%s7277_s22 + $0x3c] sm:$0xf] %vm4653_vm6, %v4652_v9 }
 0xa84   : > { %4668 = vst.msk [vmem:[%s7277_s22 + $0x38] sm:$0xf] %vm4653_vm6, %v4651_v52 }
 0xa87   : > { %v5373_v8 = vpop.permute.xlu1 %5372 }
 0xa88   : > { %v5375_v42 = vunpack.i.h.bf16 %v5373_v8  ;;  %v5374_v17 = vunpack.i.l.bf16 %v5373_v8 }
 0xa89   : > { %v5383_v41 = vpop.permute.xlu0 %5382 }
 0xa8a   : > { %v5385_v45 = vunpack.i.h.bf16 %v5383_v41  ;;  %v5384_v49 = vunpack.i.l.bf16 %v5383_v41  ;;  %v4622_v20 = vsel %vm389_vm0, %v4606_v39, %v5375_v42  ;;  %v4621_v4 = vsel %vm389_vm0, %v7175_v2, %v5374_v17 }
 0xa8b   : > { %v4638_v29 = vpack.c.bf16 %v4622_v20, %v4622_v20  ;;  %v4637_v3 = vpack.c.bf16 %v4621_v4, %v4621_v4  ;;  %v5364_v2 = vunpack.i.l.bf16 %v7313_v23  ;;  %v4617_v23 = vsel %vm494_vm3, %v7119_v55, %v5365_v57 }
 0xa8c   : > { %v4626_v7 = vsel %vm389_vm0, %v4610_v43, %v5385_v45  ;;  %v4625_v14 = vsel %vm389_vm0, %v4609_v32, %v5384_v49 }
 0xa8d   : > { %v4642_v6 = vpack.c.bf16 %v4626_v7, %v4626_v7  ;;  %v4641_v15 = vpack.c.bf16 %v4625_v14, %v4625_v14  ;;  %4655 = vst.msk [vmem:[%s7277_s22 + $0x4] sm:$0xf] %vm4653_vm6, %v4638_v29  ;;  %v4616_v12 = vsel %vm494_vm3, %v7123_v21, %v5364_v2  ;;  %v7519_v21 = vld [vmem:[#allocation19_spill] sm:$0xff] }
 0xa8e   : > { %4654 = vst.msk [vmem:[%s7277_s22] sm:$0xf] %vm4653_vm6, %v4637_v3  ;;  %v4602_v11 = vsel %vm1080_vm7, %v7519_v21, %v5334_v50 }
 0xa8f   : > { %4659 = vst.msk [vmem:[%s7277_s22 + $0x14] sm:$0xf] %vm4653_vm6, %v4642_v6  ;;  %v5388_v61 = vpop.permute.xlu1 %5387  ;;  %v4618_v35 = vsel %vm494_vm3, %v4602_v11, %v5369_v59 }
 0xa90   : > { %4658 = vst.msk [vmem:[%s7277_s22 + $0x10] sm:$0xf] %vm4653_vm6, %v4641_v15  ;;  %v5390_v34 = vunpack.i.h.bf16 %v5388_v61  ;;  %v5389_v27 = vunpack.i.l.bf16 %v5388_v61 }
 0xa91   : > { %v5398_v40 = vpop.permute.xlu0 %5397 }
 0xa92   : > { %v5400_v13 = vunpack.i.h.bf16 %v5398_v40  ;;  %v5399_v53 = vunpack.i.l.bf16 %v5398_v40  ;;  %v4627_v19 = vsel %vm389_vm0, %v4611_v26, %v5389_v27  ;;  %v4628_v36 = vsel %vm389_vm0, %v4612_v16, %v5390_v34 }
 0xa93   : > { %v4643_v48 = vpack.c.bf16 %v4627_v19, %v4627_v19  ;;  %v4644_v47 = vpack.c.bf16 %v4628_v36, %v4628_v36 }
 0xa94   : > { %v4632_v46 = vsel %vm389_vm0, %v4616_v12, %v5400_v13  ;;  %v4631_v9 = vsel %vm389_vm0, %v4615_v33, %v5399_v53 }
 0xa95   : > { %v4648_v52 = vpack.c.bf16 %v4632_v46, %v4632_v46  ;;  %v4647_v1 = vpack.c.bf16 %v4631_v9, %v4631_v9  ;;  %4660 = vst.msk [vmem:[%s7277_s22 + $0x18] sm:$0xf] %vm4653_vm6, %v4643_v48 }
 0xa96   : > { %4661 = vst.msk [vmem:[%s7277_s22 + $0x1c] sm:$0xf] %vm4653_vm6, %v4644_v47 }
 0xa97   : > { %4665 = vst.msk [vmem:[%s7277_s22 + $0x2c] sm:$0xf] %vm4653_vm6, %v4648_v52  ;;  %v5403_v62 = vpop.permute.xlu1 %5402 }
 0xa98   : > { %4664 = vst.msk [vmem:[%s7277_s22 + $0x28] sm:$0xf] %vm4653_vm6, %v4647_v1  ;;  %v5405_v37 = vunpack.i.h.bf16 %v5403_v62  ;;  %v5404_v51 = vunpack.i.l.bf16 %v5403_v62 }
 0xa9a   : > { %v4634_v25 = vsel %vm389_vm0, %v4618_v35, %v5405_v37  ;;  %v4633_v8 = vsel %vm389_vm0, %v4617_v23, %v5404_v51 }
 0xa9b   : > { %v4650_v22 = vpack.c.bf16 %v4634_v25, %v4634_v25  ;;  %v4649_v5 = vpack.c.bf16 %v4633_v8, %v4633_v8 }
 0xa9d   : > { %4667 = vst.msk [vmem:[%s7277_s22 + $0x34] sm:$0xf] %vm4653_vm6, %v4650_v22 }
 0xa9e   : > { %4666 = vst.msk [vmem:[%s7277_s22 + $0x30] sm:$0xf] %vm4653_vm6, %v4649_v5 }
 0xa9f PF: > { %s18_s27 = sadd.s32 1, %s5420_s27  }
 0xaa0   : > { %p15_p4 = scmp.ge.s32.totalorder %s18_s27, 4  }
 0xaa2   :  { %17 = sbr.rel (!%p15_p4) target bundleno = 1 (0x1), region = 115 }

</bundles_post_ra>
